<compile_context>
chip_gen: v7x
topology: tpu7x:2x2x1
jax: 0.10.0
libtpu: 0.0.40
codegen_flags: <defaults>
</compile_context>

<pallas_src>
import functools

import jax
import jax.numpy as jnp
from jax.experimental import pallas as pl
from jax.experimental.pallas import tpu as pltpu

BN_EPS = 1e-5


# -----------------------------------------------------------------------------
# Tiling helpers
# -----------------------------------------------------------------------------
def _round_up(x, m):
    return (x + m - 1) // m * m


def _pick_tile(size, max_tile, align, min_tiles=1):
    """Pick (tile, padded): tile is a multiple of `align` and <= max(align, max_tile);
    padded is a multiple of tile; if possible there are >= min_tiles tiles
    (so the "parallel" M axis can shard across v7x's two TensorCores)."""
    padded = _round_up(size, align)
    tile = min(_round_up(max_tile, align), padded)
    if min_tiles > 1:
        tile = min(tile, _round_up((padded + min_tiles - 1) // min_tiles, align))
    tile = max(align, tile)
    padded = _round_up(padded, tile)
    return tile, padded


# -----------------------------------------------------------------------------
# Pallas kernels
# -----------------------------------------------------------------------------
def _conv_gemm_kernel(x_ref, w_ref, scale_ref, shift_ref, o_ref, *, relu):
    """o = act((x @ w) * scale + shift).  bf16 inputs, f32 MXU accumulation.
    Single K step (full K block), so no accumulator scratch / pl.when needed."""
    y = jnp.dot(x_ref[...], w_ref[...], preferred_element_type=jnp.float32)
    y = y * scale_ref[...] + shift_ref[...]
    if relu:
        y = jnp.maximum(y, 0.0)
    o_ref[...] = y.astype(o_ref.dtype)


def _dueling_head_kernel(x_ref, w1_ref, b1_ref, w2_ref, b2_ref, o_ref,
                         *, num_actions):
    """Fused dueling head, single full-K step:
       h = relu(flat @ W1 + b1)          (W1 = [fc1_adv | fc1_val], f32 acc)
       y = h @ W2 + b2                   (W2 block-diagonal, padded to 128 lanes)
       q = val + adv - mean(adv)         (stored lane-dense; first A cols valid)"""
    h = jnp.dot(x_ref[...], w1_ref[...], preferred_element_type=jnp.float32)
    h = jnp.maximum(h + b1_ref[...], 0.0)
    y = jnp.dot(h.astype(w2_ref.dtype), w2_ref[...],
                preferred_element_type=jnp.float32) + b2_ref[...]
    adv = y[:, :num_actions]                              # (tm, A)
    val = y[:, num_actions:num_actions + 1]               # (tm, 1)
    o_ref[...] = val + y - jnp.mean(adv, axis=1, keepdims=True)   # (tm, 128)


# -----------------------------------------------------------------------------
# Pallas wrappers
# -----------------------------------------------------------------------------
def pallas_conv_gemm(x, w, scale, shift, *, relu=True, out_dtype=jnp.bfloat16,
                     block_m=1024, min_m_tiles=2):
    """(M,K) @ (K,N) * scale + shift (+ReLU). bf16 in, f32 MXU accumulation.
    K is one full block (K <= ~600 here); M is tiled "parallel"."""
    M, K = x.shape
    Kw, N = w.shape
    assert Kw == K
    tm, Mp = _pick_tile(M, block_m, 16, min_tiles=min_m_tiles)

    x = x.astype(jnp.bfloat16)
    w = w.astype(jnp.bfloat16)
    if Mp != M:
        x = jnp.pad(x, ((0, Mp - M), (0, 0)))
    scale = scale.reshape(1, N).astype(jnp.float32)
    shift = shift.reshape(1, N).astype(jnp.float32)

    out = pl.pallas_call(
        functools.partial(_conv_gemm_kernel, relu=relu),
        out_shape=jax.ShapeDtypeStruct((Mp, N), out_dtype),
        grid_spec=pltpu.PrefetchScalarGridSpec(
            num_scalar_prefetch=0,
            grid=(Mp // tm,),
            in_specs=[
                pl.BlockSpec((tm, K), lambda i: (i, 0)),   # patches (full K)
                pl.BlockSpec((K, N), lambda i: (0, 0)),    # conv weight
                pl.BlockSpec((1, N), lambda i: (0, 0)),    # folded BN scale
                pl.BlockSpec((1, N), lambda i: (0, 0)),    # folded BN shift
            ],
            out_specs=pl.BlockSpec((tm, N), lambda i: (i, 0)),
        ),
        compiler_params=pltpu.CompilerParams(
            dimension_semantics=("parallel",)),
    )(x, w, scale, shift)
    return out[:M] if Mp != M else out


def pallas_dueling_head(flat, w1, b1, w2, b2, num_actions, *,
                        block_m=256, min_m_tiles=2):
    """Whole dueling head in one pallas_call: fc1 (adv+val fused, full K=3136) ->
    ReLU -> fc2 block-diag (padded to 128 lanes) -> val + adv - mean(adv)."""
    M, K = flat.shape
    N1 = w1.shape[1]                 # 1024 (512 adv hidden | 512 val hidden)
    N2 = w2.shape[1]                 # 128  (num_actions+1 real cols, rest zero)
    assert w1.shape[0] == K and w2.shape[0] == N1 and num_actions + 1 <= N2
    tm, Mp = _pick_tile(M, block_m, 16, min_tiles=min_m_tiles)

    flat = flat.astype(jnp.bfloat16)
    w1 = w1.astype(jnp.bfloat16)
    w2 = w2.astype(jnp.bfloat16)
    if Mp != M:
        flat = jnp.pad(flat, ((0, Mp - M), (0, 0)))
    b1 = b1.reshape(1, N1).astype(jnp.float32)
    b2 = b2.reshape(1, N2).astype(jnp.float32)

    out = pl.pallas_call(
        functools.partial(_dueling_head_kernel, num_actions=num_actions),
        out_shape=jax.ShapeDtypeStruct((Mp, N2), jnp.float32),
        grid_spec=pltpu.PrefetchScalarGridSpec(
            num_scalar_prefetch=0,
            grid=(Mp // tm,),
            in_specs=[
                pl.BlockSpec((tm, K), lambda i: (i, 0)),   # flat (full K = 3136)
                pl.BlockSpec((K, N1), lambda i: (0, 0)),   # fc1 fused weight (6.4 MB bf16)
                pl.BlockSpec((1, N1), lambda i: (0, 0)),   # fc1 bias
                pl.BlockSpec((N1, N2), lambda i: (0, 0)),  # fc2 block-diag weight
                pl.BlockSpec((1, N2), lambda i: (0, 0)),   # fc2 bias
            ],
            out_specs=pl.BlockSpec((tm, N2), lambda i: (i, 0)),
        ),
        compiler_params=pltpu.CompilerParams(
            dimension_semantics=("parallel",),
            # Single full-K block keeps ~20 MB live (w1 double-buffered) at
            # tm=256; raise the scoped-VMEM limit so v5e's 16 MB default also
            # compiles (well under v7x's 64 MiB physical VMEM).
            vmem_limit_bytes=40 * 1024 * 1024),
    )(flat, w1, b1, w2, b2)
    return out[:M, :num_actions]


# -----------------------------------------------------------------------------
# Glue: im2col (pure data movement — all GEMM compute lives in Pallas)
# -----------------------------------------------------------------------------
def _im2col_nhwc(x, kh, kw, stride):
    """x: (B,H,W,C) -> patches (B*OH*OW, kh*kw*C), K ordered (i, j, c)."""
    B, H, W, C = x.shape
    OH = (H - kh) // stride + 1
    OW = (W - kw) // stride + 1
    cols = []
    for i in range(kh):
        for j in range(kw):
            cols.append(x[:, i:i + stride * OH:stride, j:j + stride * OW:stride, :])
    p = jnp.stack(cols, axis=3)                     # (B, OH, OW, kh*kw, C)
    p = p.reshape(B * OH * OW, kh * kw * C)
    return p, OH, OW


# -----------------------------------------------------------------------------
# Parameter construction (deterministic, synthetic — no checkpoint load)
# -----------------------------------------------------------------------------
def make_bn_params(key, c):
    k1, k2, k3, k4 = jax.random.split(key, 4)
    gamma = jax.random.uniform(k1, (c,), jnp.float32, 0.5, 1.5)
    beta = 0.1 * jax.random.normal(k2, (c,), jnp.float32)
    mean = 0.1 * jax.random.normal(k3, (c,), jnp.float32)
    var = jax.random.uniform(k4, (c,), jnp.float32, 0.5, 1.5)
    scale = gamma / jnp.sqrt(var + BN_EPS)
    shift = beta - mean * scale
    return scale, shift


def make_params(num_actions, key):
    ks = jax.random.split(key, 16)

    # BN layers (eval mode) folded to per-channel affine.
    bn_in_s, bn_in_t = make_bn_params(ks[0], 4)
    bn1_s, bn1_t = make_bn_params(ks[1], 32)
    bn2_s, bn2_t = make_bn_params(ks[2], 64)
    bn3_s, bn3_t = make_bn_params(ks[3], 64)

    def he(k, shape, fan_in):
        return jax.random.normal(k, shape, jnp.float32) * jnp.sqrt(2.0 / fan_in)

    # Conv weights in PyTorch layout (C_out, C_in, kh, kw).
    w1 = he(ks[4], (32, 4, 8, 8), 4 * 8 * 8)
    w2 = he(ks[5], (64, 32, 4, 4), 32 * 4 * 4)
    w3 = he(ks[6], (64, 64, 3, 3), 64 * 3 * 3)

    p = {}
    # Fold the input BatchNorm2d(4) into conv1 (eval-mode BN = per-channel affine):
    #   conv(BN(x)) = patches(x) @ (W * s_in[c]) + sum_{c,i,j} W * t_in[c]
    w1_folded = w1 * bn_in_s[None, :, None, None]
    bias_extra = jnp.sum(w1 * bn_in_t[None, :, None, None], axis=(1, 2, 3))      # (32,)
    # NHWC patch K-order is (i, j, c): weight rows (kh, kw, cin) -> cols cout.
    p["conv1_w"] = w1_folded.transpose(2, 3, 1, 0).reshape(-1, 32).astype(jnp.bfloat16)  # (256,32)
    p["bn1_scale"] = bn1_s
    p["bn1_shift"] = bn1_t + bn1_s * bias_extra

    p["conv2_w"] = w2.transpose(2, 3, 1, 0).reshape(-1, 64).astype(jnp.bfloat16)  # (512, 64)
    p["bn2_scale"], p["bn2_shift"] = bn2_s, bn2_t
    p["conv3_w"] = w3.transpose(2, 3, 1, 0).reshape(-1, 64).astype(jnp.bfloat16)  # (576, 64)
    p["bn3_scale"], p["bn3_shift"] = bn3_s, bn3_t

    # fc1_adv / fc1_val (torch layout (512, 3136), input index c*49 + h*7 + w).
    fa = he(ks[7], (512, 7 * 7 * 64), 7 * 7 * 64)
    fv = he(ks[8], (512, 7 * 7 * 64), 7 * 7 * 64)

    def to_nhwc_rows(w):
        # torch row order (c,h,w) -> our NHWC flatten order (h,w,c); transpose to (K, 512).
        return w.reshape(512, 64, 7, 7).transpose(2, 3, 1, 0).reshape(7 * 7 * 64, 512)

    p["fc1_w"] = jnp.concatenate([to_nhwc_rows(fa), to_nhwc_rows(fv)],
                                 axis=1).astype(jnp.bfloat16)                     # (3136, 1024)
    p["fc1_b"] = jnp.zeros((1024,), jnp.float32)                                  # init_weights: 0

    # fc2_adv (A,512) / fc2_val (1,512) as one block-diagonal weight, zero-padded
    # to 128 output lanes so the head epilogue matmul + store are lane-dense.
    n2 = 128
    assert num_actions + 1 <= n2
    w2a = he(ks[9], (num_actions, 512), 512)
    w2v = he(ks[10], (1, 512), 512)
    blk = jnp.zeros((1024, n2), jnp.float32)
    blk = blk.at[:512, :num_actions].set(w2a.T)
    blk = blk.at[512:, num_actions:num_actions + 1].set(w2v.T)
    p["fc2_w"] = blk.astype(jnp.bfloat16)                                         # (1024, 128)
    p["fc2_b"] = jnp.zeros((n2,), jnp.float32)                                    # init_weights: 0
    return p


# -----------------------------------------------------------------------------
# Forward pass (Pallas) and a pure-f32 reference for a sanity check
# -----------------------------------------------------------------------------
def dqn_forward(params, x, num_actions):
    p = params
    B = x.shape[0]

    # Cast to bf16 and go NHWC BEFORE any patch extraction (halves im2col HBM traffic).
    h = jnp.transpose(x.astype(jnp.bfloat16), (0, 2, 3, 1))                       # (B,84,84,4)

    # conv1: Conv(4->32, 8x8, s4) with input-BN folded in, + BN(32) + ReLU.
    pat, oh, ow = _im2col_nhwc(h, 8, 8, 4)                                        # (B*400, 256)
    h = pallas_conv_gemm(pat, p["conv1_w"], p["bn1_scale"], p["bn1_shift"])
    h = h.reshape(B, oh, ow, 32)

    # conv2: Conv(32->64, 4x4, s2) + BN(64) + ReLU.
    pat, oh, ow = _im2col_nhwc(h, 4, 4, 2)                                        # (B*81, 512)
    h = pallas_conv_gemm(pat, p["conv2_w"], p["bn2_scale"], p["bn2_shift"])
    h = h.reshape(B, oh, ow, 64)

    # conv3: Conv(64->64, 3x3, s1) + BN(64) + ReLU.
    pat, oh, ow = _im2col_nhwc(h, 3, 3, 1)                                        # (B*49, 576)
    h = pallas_conv_gemm(pat, p["conv3_w"], p["bn3_scale"], p["bn3_shift"])
    h = h.reshape(B, oh, ow, 64)

    # NHWC flatten; fc1 rows were pre-permuted so this matches torch's NCHW view(B,-1).
    flat = h.reshape(B, -1)                                                       # (B, 3136)

    # Fused dueling head: fc1_adv+fc1_val -> ReLU -> fc2 block-diag -> combine.
    return pallas_dueling_head(flat, p["fc1_w"], p["fc1_b"],
                               p["fc2_w"], p["fc2_b"], num_actions)               # (B, A)


def ref_forward(params, x, num_actions):
    """Pure-jnp f32 reference with the same (bf16-stored) folded parameters."""
    p = {k: jnp.asarray(v, jnp.float32) for k, v in params.items()}
    B = x.shape[0]
    h = jnp.transpose(x.astype(jnp.float32), (0, 2, 3, 1))
    pat, oh, ow = _im2col_nhwc(h, 8, 8, 4)
    h = jnp.maximum(pat @ p["conv1_w"] * p["bn1_scale"] + p["bn1_shift"], 0.0).reshape(B, oh, ow, 32)
    pat, oh, ow = _im2col_nhwc(h, 4, 4, 2)
    h = jnp.maximum(pat @ p["conv2_w"] * p["bn2_scale"] + p["bn2_shift"], 0.0).reshape(B, oh, ow, 64)
    pat, oh, ow = _im2col_nhwc(h, 3, 3, 1)
    h = jnp.maximum(pat @ p["conv3_w"] * p["bn3_scale"] + p["bn3_shift"], 0.0).reshape(B, oh, ow, 64)
    flat = h.reshape(B, -1)
    hid = jnp.maximum(flat @ p["fc1_w"] + p["fc1_b"], 0.0)
    y = hid @ p["fc2_w"] + p["fc2_b"]
    adv = y[:, :num_actions]
    val = y[:, num_actions:num_actions + 1]
    return val + adv - jnp.mean(adv, axis=1, keepdims=True)


if __name__ == "__main__":
    num_actions = 4
    batch = 2
    key = jax.random.PRNGKey(0)
    kx, kp = jax.random.split(key)

    # Spatial size must be 84x84 so the flatten hits fc1's 7*7*64 input.
    x = jax.random.normal(kx, (batch, 4, 84, 84), jnp.float32)
    params = make_params(num_actions, kp)

    fwd = jax.jit(functools.partial(dqn_forward, num_actions=num_actions))
    q = fwd(params, x)
    jax.block_until_ready(q)
    assert q.shape == (batch, num_actions)
    assert bool(jnp.all(jnp.isfinite(q)))

    # Loose tolerance vs the f32 reference (same folded weights; only activation
    # bf16 rounding differs) — catches layout / permutation / padding bugs.
    q_ref = ref_forward(params, x, num_actions)
    err = float(jnp.max(jnp.abs(q - q_ref)))
    tol = 0.05 * float(jnp.max(jnp.abs(q_ref))) + 0.1
    assert err < tol, f"max abs err {err} vs tol {tol}"
    print("KERNEL_OK")
</pallas_src>

<mosaic_0001>
module attributes {stable_mosaic.version = 11 : i64} {
  func.func @_conv_gemm_kernel(%arg0: i32, %arg1: memref<400x256xbf16, #tpu.memory_space<vmem>>, %arg2: memref<256x32xbf16, #tpu.memory_space<vmem>>, %arg3: memref<1x32xf32, #tpu.memory_space<vmem>>, %arg4: memref<1x32xf32, #tpu.memory_space<vmem>>, %arg5: memref<400x32xbf16, #tpu.memory_space<vmem>>) attributes {dimension_semantics = [#tpu.dimension_semantics<parallel>], iteration_bounds = array<i64: 2>, scalar_prefetch = 0 : i64, scratch_operands = 0 : i64, tpu.core_type = #tpu.core_type<tc>, window_params = [{transform_indices = @transform_0, window_bounds = array<i64: 400, 256>}, {pipeline_mode = #tpu.pipeline_mode<synchronous>, transform_indices = @transform_1, window_bounds = array<i64: 256, 32>}, {pipeline_mode = #tpu.pipeline_mode<synchronous>, transform_indices = @transform_2, window_bounds = array<i64: 1, 32>}, {pipeline_mode = #tpu.pipeline_mode<synchronous>, transform_indices = @transform_3, window_bounds = array<i64: 1, 32>}, {transform_indices = @transform_4, window_bounds = array<i64: 400, 32>}]} {
    %c0 = arith.constant 0 : index
    %c0_0 = arith.constant 0 : index
    %0 = vector.load %arg1[%c0, %c0_0] : memref<400x256xbf16, #tpu.memory_space<vmem>>, vector<400x256xbf16>
    %c0_1 = arith.constant 0 : index
    %c0_2 = arith.constant 0 : index
    %1 = vector.load %arg2[%c0_1, %c0_2] : memref<256x32xbf16, #tpu.memory_space<vmem>>, vector<256x32xbf16>
    %cst = arith.constant dense<0.000000e+00> : vector<400x32xf32>
    %2 = tpu.matmul %0, %1, %cst {dimension_numbers = #tpu.dot_dimension_numbers<[1], [0], [0], [1], [0, 0, 1, 1], [], []>} : vector<400x256xbf16>, vector<256x32xbf16>, vector<400x32xf32> -> vector<400x32xf32>
    %c0_3 = arith.constant 0 : index
    %c0_4 = arith.constant 0 : index
    %3 = vector.load %arg3[%c0_3, %c0_4] : memref<1x32xf32, #tpu.memory_space<vmem>>, vector<1x32xf32>
    %4 = vector.broadcast %3 : vector<1x32xf32> to vector<400x32xf32>
    %5 = arith.mulf %2, %4 : vector<400x32xf32>
    %c0_5 = arith.constant 0 : index
    %c0_6 = arith.constant 0 : index
    %6 = vector.load %arg4[%c0_5, %c0_6] : memref<1x32xf32, #tpu.memory_space<vmem>>, vector<1x32xf32>
    %7 = vector.broadcast %6 : vector<1x32xf32> to vector<400x32xf32>
    %8 = arith.addf %5, %7 : vector<400x32xf32>
    %cst_7 = arith.constant 0.000000e+00 : f32
    %9 = vector.broadcast %cst_7 : f32 to vector<400x32xf32>
    %10 = arith.maximumf %8, %9 : vector<400x32xf32>
    %11 = arith.truncf %10 : vector<400x32xf32> to vector<400x32xbf16>
    %c0_8 = arith.constant 0 : index
    %c0_9 = arith.constant 0 : index
    %12 = vector.load %arg5[%c0_8, %c0_9] : memref<400x32xbf16, #tpu.memory_space<vmem>>, vector<400x32xbf16>
    tpu.vector_store %arg5[%c0_8, %c0_9], %11 {strides = array<i32>} : memref<400x32xbf16, #tpu.memory_space<vmem>>, vector<400x32xbf16>,
    return
  }
  func.func @transform_0(%arg0: i32) -> (i32, i32) {
    %c0_i32 = arith.constant 0 : i32
    %c0_i32_0 = arith.constant 0 : i32
    return %arg0, %c0_i32 : i32, i32
  }
  func.func @transform_1(%arg0: i32) -> (i32, i32) {
    %c0_i32 = arith.constant 0 : i32
    %c0_i32_0 = arith.constant 0 : i32
    %c0_i32_1 = arith.constant 0 : i32
    return %c0_i32, %c0_i32_0 : i32, i32
  }
  func.func @transform_2(%arg0: i32) -> (i32, i32) {
    %c0_i32 = arith.constant 0 : i32
    %c0_i32_0 = arith.constant 0 : i32
    %c0_i32_1 = arith.constant 0 : i32
    return %c0_i32, %c0_i32_0 : i32, i32
  }
  func.func @transform_3(%arg0: i32) -> (i32, i32) {
    %c0_i32 = arith.constant 0 : i32
    %c0_i32_0 = arith.constant 0 : i32
    %c0_i32_1 = arith.constant 0 : i32
    return %c0_i32, %c0_i32_0 : i32, i32
  }
  func.func @transform_4(%arg0: i32) -> (i32, i32) {
    %c0_i32 = arith.constant 0 : i32
    %c0_i32_0 = arith.constant 0 : i32
    return %arg0, %c0_i32 : i32, i32
  }
}

module attributes {stable_mosaic.version = 11 : i64} {
  func.func @_conv_gemm_kernel(%arg0: i32, %arg1: memref<96x512xbf16, #tpu.memory_space<vmem>>, %arg2: memref<512x64xbf16, #tpu.memory_space<vmem>>, %arg3: memref<1x64xf32, #tpu.memory_space<vmem>>, %arg4: memref<1x64xf32, #tpu.memory_space<vmem>>, %arg5: memref<96x64xbf16, #tpu.memory_space<vmem>>) attributes {dimension_semantics = [#tpu.dimension_semantics<parallel>], iteration_bounds = array<i64: 2>, scalar_prefetch = 0 : i64, scratch_operands = 0 : i64, tpu.core_type = #tpu.core_type<tc>, window_params = [{transform_indices = @transform_0, window_bounds = array<i64: 96, 512>}, {pipeline_mode = #tpu.pipeline_mode<synchronous>, transform_indices = @transform_1, window_bounds = array<i64: 512, 64>}, {pipeline_mode = #tpu.pipeline_mode<synchronous>, transform_indices = @transform_2, window_bounds = array<i64: 1, 64>}, {pipeline_mode = #tpu.pipeline_mode<synchronous>, transform_indices = @transform_3, window_bounds = array<i64: 1, 64>}, {transform_indices = @transform_4, window_bounds = array<i64: 96, 64>}]} {
    %c0 = arith.constant 0 : index
    %c0_0 = arith.constant 0 : index
    %0 = vector.load %arg1[%c0, %c0_0] : memref<96x512xbf16, #tpu.memory_space<vmem>>, vector<96x512xbf16>
    %c0_1 = arith.constant 0 : index
    %c0_2 = arith.constant 0 : index
    %1 = vector.load %arg2[%c0_1, %c0_2] : memref<512x64xbf16, #tpu.memory_space<vmem>>, vector<512x64xbf16>
    %cst = arith.constant dense<0.000000e+00> : vector<96x64xf32>
    %2 = tpu.matmul %0, %1, %cst {dimension_numbers = #tpu.dot_dimension_numbers<[1], [0], [0], [1], [0, 0, 1, 1], [], []>} : vector<96x512xbf16>, vector<512x64xbf16>, vector<96x64xf32> -> vector<96x64xf32>
    %c0_3 = arith.constant 0 : index
    %c0_4 = arith.constant 0 : index
    %3 = vector.load %arg3[%c0_3, %c0_4] : memref<1x64xf32, #tpu.memory_space<vmem>>, vector<1x64xf32>
    %4 = vector.broadcast %3 : vector<1x64xf32> to vector<96x64xf32>
    %5 = arith.mulf %2, %4 : vector<96x64xf32>
    %c0_5 = arith.constant 0 : index
    %c0_6 = arith.constant 0 : index
    %6 = vector.load %arg4[%c0_5, %c0_6] : memref<1x64xf32, #tpu.memory_space<vmem>>, vector<1x64xf32>
    %7 = vector.broadcast %6 : vector<1x64xf32> to vector<96x64xf32>
    %8 = arith.addf %5, %7 : vector<96x64xf32>
    %cst_7 = arith.constant 0.000000e+00 : f32
    %9 = vector.broadcast %cst_7 : f32 to vector<96x64xf32>
    %10 = arith.maximumf %8, %9 : vector<96x64xf32>
    %11 = arith.truncf %10 : vector<96x64xf32> to vector<96x64xbf16>
    %c0_8 = arith.constant 0 : index
    %c0_9 = arith.constant 0 : index
    %12 = vector.load %arg5[%c0_8, %c0_9] : memref<96x64xbf16, #tpu.memory_space<vmem>>, vector<96x64xbf16>
    tpu.vector_store %arg5[%c0_8, %c0_9], %11 {strides = array<i32>} : memref<96x64xbf16, #tpu.memory_space<vmem>>, vector<96x64xbf16>,
    return
  }
  func.func @transform_0(%arg0: i32) -> (i32, i32) {
    %c0_i32 = arith.constant 0 : i32
    %c0_i32_0 = arith.constant 0 : i32
    return %arg0, %c0_i32 : i32, i32
  }
  func.func @transform_1(%arg0: i32) -> (i32, i32) {
    %c0_i32 = arith.constant 0 : i32
    %c0_i32_0 = arith.constant 0 : i32
    %c0_i32_1 = arith.constant 0 : i32
    return %c0_i32, %c0_i32_0 : i32, i32
  }
  func.func @transform_2(%arg0: i32) -> (i32, i32) {
    %c0_i32 = arith.constant 0 : i32
    %c0_i32_0 = arith.constant 0 : i32
    %c0_i32_1 = arith.constant 0 : i32
    return %c0_i32, %c0_i32_0 : i32, i32
  }
  func.func @transform_3(%arg0: i32) -> (i32, i32) {
    %c0_i32 = arith.constant 0 : i32
    %c0_i32_0 = arith.constant 0 : i32
    %c0_i32_1 = arith.constant 0 : i32
    return %c0_i32, %c0_i32_0 : i32, i32
  }
  func.func @transform_4(%arg0: i32) -> (i32, i32) {
    %c0_i32 = arith.constant 0 : i32
    %c0_i32_0 = arith.constant 0 : i32
    return %arg0, %c0_i32 : i32, i32
  }
}

module attributes {stable_mosaic.version = 11 : i64} {
  func.func @_conv_gemm_kernel(%arg0: i32, %arg1: memref<64x576xbf16, #tpu.memory_space<vmem>>, %arg2: memref<576x64xbf16, #tpu.memory_space<vmem>>, %arg3: memref<1x64xf32, #tpu.memory_space<vmem>>, %arg4: memref<1x64xf32, #tpu.memory_space<vmem>>, %arg5: memref<64x64xbf16, #tpu.memory_space<vmem>>) attributes {dimension_semantics = [#tpu.dimension_semantics<parallel>], iteration_bounds = array<i64: 2>, scalar_prefetch = 0 : i64, scratch_operands = 0 : i64, tpu.core_type = #tpu.core_type<tc>, window_params = [{transform_indices = @transform_0, window_bounds = array<i64: 64, 576>}, {pipeline_mode = #tpu.pipeline_mode<synchronous>, transform_indices = @transform_1, window_bounds = array<i64: 576, 64>}, {pipeline_mode = #tpu.pipeline_mode<synchronous>, transform_indices = @transform_2, window_bounds = array<i64: 1, 64>}, {pipeline_mode = #tpu.pipeline_mode<synchronous>, transform_indices = @transform_3, window_bounds = array<i64: 1, 64>}, {transform_indices = @transform_4, window_bounds = array<i64: 64, 64>}]} {
    %c0 = arith.constant 0 : index
    %c0_0 = arith.constant 0 : index
    %0 = vector.load %arg1[%c0, %c0_0] : memref<64x576xbf16, #tpu.memory_space<vmem>>, vector<64x576xbf16>
    %c0_1 = arith.constant 0 : index
    %c0_2 = arith.constant 0 : index
    %1 = vector.load %arg2[%c0_1, %c0_2] : memref<576x64xbf16, #tpu.memory_space<vmem>>, vector<576x64xbf16>
    %cst = arith.constant dense<0.000000e+00> : vector<64x64xf32>
    %2 = tpu.matmul %0, %1, %cst {dimension_numbers = #tpu.dot_dimension_numbers<[1], [0], [0], [1], [0, 0, 1, 1], [], []>} : vector<64x576xbf16>, vector<576x64xbf16>, vector<64x64xf32> -> vector<64x64xf32>
    %c0_3 = arith.constant 0 : index
    %c0_4 = arith.constant 0 : index
    %3 = vector.load %arg3[%c0_3, %c0_4] : memref<1x64xf32, #tpu.memory_space<vmem>>, vector<1x64xf32>
    %4 = vector.broadcast %3 : vector<1x64xf32> to vector<64x64xf32>
    %5 = arith.mulf %2, %4 : vector<64x64xf32>
    %c0_5 = arith.constant 0 : index
    %c0_6 = arith.constant 0 : index
    %6 = vector.load %arg4[%c0_5, %c0_6] : memref<1x64xf32, #tpu.memory_space<vmem>>, vector<1x64xf32>
    %7 = vector.broadcast %6 : vector<1x64xf32> to vector<64x64xf32>
    %8 = arith.addf %5, %7 : vector<64x64xf32>
    %cst_7 = arith.constant 0.000000e+00 : f32
    %9 = vector.broadcast %cst_7 : f32 to vector<64x64xf32>
    %10 = arith.maximumf %8, %9 : vector<64x64xf32>
    %11 = arith.truncf %10 : vector<64x64xf32> to vector<64x64xbf16>
    %c0_8 = arith.constant 0 : index
    %c0_9 = arith.constant 0 : index
    %12 = vector.load %arg5[%c0_8, %c0_9] : memref<64x64xbf16, #tpu.memory_space<vmem>>, vector<64x64xbf16>
    tpu.vector_store %arg5[%c0_8, %c0_9], %11 {strides = array<i32>} : memref<64x64xbf16, #tpu.memory_space<vmem>>, vector<64x64xbf16>,
    return
  }
  func.func @transform_0(%arg0: i32) -> (i32, i32) {
    %c0_i32 = arith.constant 0 : i32
    %c0_i32_0 = arith.constant 0 : i32
    return %arg0, %c0_i32 : i32, i32
  }
  func.func @transform_1(%arg0: i32) -> (i32, i32) {
    %c0_i32 = arith.constant 0 : i32
    %c0_i32_0 = arith.constant 0 : i32
    %c0_i32_1 = arith.constant 0 : i32
    return %c0_i32, %c0_i32_0 : i32, i32
  }
  func.func @transform_2(%arg0: i32) -> (i32, i32) {
    %c0_i32 = arith.constant 0 : i32
    %c0_i32_0 = arith.constant 0 : i32
    %c0_i32_1 = arith.constant 0 : i32
    return %c0_i32, %c0_i32_0 : i32, i32
  }
  func.func @transform_3(%arg0: i32) -> (i32, i32) {
    %c0_i32 = arith.constant 0 : i32
    %c0_i32_0 = arith.constant 0 : i32
    %c0_i32_1 = arith.constant 0 : i32
    return %c0_i32, %c0_i32_0 : i32, i32
  }
  func.func @transform_4(%arg0: i32) -> (i32, i32) {
    %c0_i32 = arith.constant 0 : i32
    %c0_i32_0 = arith.constant 0 : i32
    return %arg0, %c0_i32 : i32, i32
  }
}

module attributes {stable_mosaic.version = 11 : i64} {
  func.func @_dueling_head_kernel(%arg0: i32, %arg1: memref<16x3136xbf16, #tpu.memory_space<vmem>>, %arg2: memref<3136x1024xbf16, #tpu.memory_space<vmem>>, %arg3: memref<1x1024xf32, #tpu.memory_space<vmem>>, %arg4: memref<1024x128xbf16, #tpu.memory_space<vmem>>, %arg5: memref<1x128xf32, #tpu.memory_space<vmem>>, %arg6: memref<16x128xf32, #tpu.memory_space<vmem>>) attributes {dimension_semantics = [#tpu.dimension_semantics<parallel>], iteration_bounds = array<i64: 1>, scalar_prefetch = 0 : i64, scratch_operands = 0 : i64, tpu.core_type = #tpu.core_type<tc>, window_params = [{transform_indices = @transform_0, window_bounds = array<i64: 16, 3136>}, {pipeline_mode = #tpu.pipeline_mode<synchronous>, transform_indices = @transform_1, window_bounds = array<i64: 3136, 1024>}, {pipeline_mode = #tpu.pipeline_mode<synchronous>, transform_indices = @transform_2, window_bounds = array<i64: 1, 1024>}, {pipeline_mode = #tpu.pipeline_mode<synchronous>, transform_indices = @transform_3, window_bounds = array<i64: 1024, 128>}, {pipeline_mode = #tpu.pipeline_mode<synchronous>, transform_indices = @transform_4, window_bounds = array<i64: 1, 128>}, {transform_indices = @transform_5, window_bounds = array<i64: 16, 128>}]} {
    %c0 = arith.constant 0 : index
    %c0_0 = arith.constant 0 : index
    %0 = vector.load %arg1[%c0, %c0_0] : memref<16x3136xbf16, #tpu.memory_space<vmem>>, vector<16x3136xbf16>
    %c0_1 = arith.constant 0 : index
    %c0_2 = arith.constant 0 : index
    %1 = vector.load %arg2[%c0_1, %c0_2] : memref<3136x1024xbf16, #tpu.memory_space<vmem>>, vector<3136x1024xbf16>
    %cst = arith.constant dense<0.000000e+00> : vector<16x1024xf32>
    %2 = tpu.matmul %0, %1, %cst {dimension_numbers = #tpu.dot_dimension_numbers<[1], [0], [0], [1], [0, 0, 1, 1], [], []>} : vector<16x3136xbf16>, vector<3136x1024xbf16>, vector<16x1024xf32> -> vector<16x1024xf32>
    %c0_3 = arith.constant 0 : index
    %c0_4 = arith.constant 0 : index
    %3 = vector.load %arg3[%c0_3, %c0_4] : memref<1x1024xf32, #tpu.memory_space<vmem>>, vector<1x1024xf32>
    %4 = vector.broadcast %3 : vector<1x1024xf32> to vector<16x1024xf32>
    %5 = arith.addf %2, %4 : vector<16x1024xf32>
    %cst_5 = arith.constant 0.000000e+00 : f32
    %6 = vector.broadcast %cst_5 : f32 to vector<16x1024xf32>
    %7 = arith.maximumf %5, %6 : vector<16x1024xf32>
    %8 = arith.truncf %7 : vector<16x1024xf32> to vector<16x1024xbf16>
    %c0_6 = arith.constant 0 : index
    %c0_7 = arith.constant 0 : index
    %9 = vector.load %arg4[%c0_6, %c0_7] : memref<1024x128xbf16, #tpu.memory_space<vmem>>, vector<1024x128xbf16>
    %cst_8 = arith.constant dense<0.000000e+00> : vector<16x128xf32>
    %10 = tpu.matmul %8, %9, %cst_8 {dimension_numbers = #tpu.dot_dimension_numbers<[1], [0], [0], [1], [0, 0, 1, 1], [], []>} : vector<16x1024xbf16>, vector<1024x128xbf16>, vector<16x128xf32> -> vector<16x128xf32>
    %c0_9 = arith.constant 0 : index
    %c0_10 = arith.constant 0 : index
    %11 = vector.load %arg5[%c0_9, %c0_10] : memref<1x128xf32, #tpu.memory_space<vmem>>, vector<1x128xf32>
    %12 = vector.broadcast %11 : vector<1x128xf32> to vector<16x128xf32>
    %13 = arith.addf %10, %12 : vector<16x128xf32>
    %14 = vector.extract_strided_slice %13 {offsets = [0, 0], sizes = [16, 4], strides = [1, 1]} : vector<16x128xf32> to vector<16x4xf32>
    %15 = vector.extract_strided_slice %13 {offsets = [0, 4], sizes = [16, 1], strides = [1, 1]} : vector<16x128xf32> to vector<16x1xf32>
    %16 = vector.broadcast %15 : vector<16x1xf32> to vector<16x128xf32>
    %17 = arith.addf %16, %13 : vector<16x128xf32>
    %cst_11 = arith.constant dense<0.000000e+00> : vector<16xf32>
    %18 = vector.multi_reduction <add>, %14, %cst_11 [1] : vector<16x4xf32> to vector<16xf32>
    %19 = vector.shape_cast %18 : vector<16xf32> to vector<16x1xf32>
    %cst_12 = arith.constant 4.000000e+00 : f32
    %20 = vector.broadcast %cst_12 : f32 to vector<16x1xf32>
    %21 = arith.divf %19, %20 : vector<16x1xf32>
    %22 = vector.broadcast %21 : vector<16x1xf32> to vector<16x128xf32>
    %23 = arith.subf %17, %22 : vector<16x128xf32>
    %c0_13 = arith.constant 0 : index
    %c0_14 = arith.constant 0 : index
    %24 = vector.load %arg6[%c0_13, %c0_14] : memref<16x128xf32, #tpu.memory_space<vmem>>, vector<16x128xf32>
    tpu.vector_store %arg6[%c0_13, %c0_14], %23 {strides = array<i32>} : memref<16x128xf32, #tpu.memory_space<vmem>>, vector<16x128xf32>,
    return
  }
  func.func @transform_0(%arg0: i32) -> (i32, i32) {
    %c0_i32 = arith.constant 0 : i32
    %c0_i32_0 = arith.constant 0 : i32
    return %arg0, %c0_i32 : i32, i32
  }
  func.func @transform_1(%arg0: i32) -> (i32, i32) {
    %c0_i32 = arith.constant 0 : i32
    %c0_i32_0 = arith.constant 0 : i32
    %c0_i32_1 = arith.constant 0 : i32
    return %c0_i32, %c0_i32_0 : i32, i32
  }
  func.func @transform_2(%arg0: i32) -> (i32, i32) {
    %c0_i32 = arith.constant 0 : i32
    %c0_i32_0 = arith.constant 0 : i32
    %c0_i32_1 = arith.constant 0 : i32
    return %c0_i32, %c0_i32_0 : i32, i32
  }
  func.func @transform_3(%arg0: i32) -> (i32, i32) {
    %c0_i32 = arith.constant 0 : i32
    %c0_i32_0 = arith.constant 0 : i32
    %c0_i32_1 = arith.constant 0 : i32
    return %c0_i32, %c0_i32_0 : i32, i32
  }
  func.func @transform_4(%arg0: i32) -> (i32, i32) {
    %c0_i32 = arith.constant 0 : i32
    %c0_i32_0 = arith.constant 0 : i32
    %c0_i32_1 = arith.constant 0 : i32
    return %c0_i32, %c0_i32_0 : i32, i32
  }
  func.func @transform_5(%arg0: i32) -> (i32, i32) {
    %c0_i32 = arith.constant 0 : i32
    %c0_i32_0 = arith.constant 0 : i32
    return %arg0, %c0_i32 : i32, i32
  }
}

</mosaic_0001>

<bundles_post_ra>
// kernel: dqn_forward.4
= control target key start
LH: loop header
LB: loop body
LE: loop exit
PB: predicated region body
PF: predicated region fallthrough
CT: control target
= control target key end

     0   :  { %s1682_s15 = smov 0   ;;  %s2047_s0 = inlined_call_operand.vmem [shape: bf16[800,256], index: 0, kind: input, shape index: {}]   ;;  %s2048_s1 = inlined_call_operand.vmem [shape: bf16[256,32], index: 1, kind: input, shape index: {}]   ;;  %s2049_s2 = inlined_call_operand.vmem [shape: f32[1,32], index: 2, kind: input, shape index: {}]   ;;  %s2050_s3 = inlined_call_operand.vmem [shape: f32[1,32], index: 3, kind: input, shape index: {}]   ;;  %s2051_s4 = inlined_call_operand.vmem [shape: bf16[800,32], index: 4, kind: output, shape index: {}]  }
   0x1 LB: > { %s1337_s16 = sadd.s32 4294967295, %s1654_s15   ;;  %p1341_p0 = scmp.ge.s32.totalorder %s1654_s15, 1  ;;  %s1654_s15 = sphi %s1682_s15, %s14_s15  }
   0x2   : > { %p164_p1 = scmp.lt.s32.totalorder %s1654_s15, 3 }
   0x4   : > { %p165_p2 = pnand %p1341_p0, %p164_p1 }
   0x5   : > { %v1557_v0 = vld [vmem:[%s2048_s1] sm:$0xff] (!%p165_p2)   ;;  %v1656_v1 = vmov (!%p165_p2), 0   ;;  %s191_s19 = smul.u32 (!%p165_p2), 50, %s1337_s16  ;;  %v1558_v2 = vld [vmem:[%s2048_s1 + $0x8] sm:$0xff] (!%p165_p2)   ;;  %v1559_v3 = vld [vmem:[%s2048_s1 + $0x10] sm:$0xff] (!%p165_p2)   ;;  %vm1230_vm0 = vcmask (!%p165_p2), 257024  }
   0x6   : > { %168 = sbr.rel (%p165_p2) target bundleno = 389 (0x185), region = 36  ;;  %633 = vmatprep.subr.bf16.mxu0 (!%p165_p2), %v1656_v1  ;;  %1516 = vmatprep.subr.bf16.mxu1 (!%p165_p2), %v1656_v1  ;;  %v1560_v4 = vld [vmem:[%s2048_s1 + $0x18] sm:$0xff] (!%p165_p2)   ;;  %v1561_v5 = vld [vmem:[%s2048_s1 + $0x20] sm:$0xff] (!%p165_p2)   ;;  %v1562_v7 = vld [vmem:[%s2048_s1 + $0x28] sm:$0xff] (!%p165_p2)  }
   0x7   : > { %634 = vmatpush1.bf16.msra.mxu0 (!%p165_p2), %v1557_v0  ;;  %1532 = vmatpush1.bf16.msra.mxu1 (!%p165_p2), %v1557_v0  ;;  %p192_p3 = scmp.lt.s32.totalorder (!%p165_p2), %s191_s19, 99  ;;  %v1563_v9 = vld [vmem:[%s2048_s1 + $0x30] sm:$0xff] (!%p165_p2)   ;;  %v1564_v10 = vld [vmem:[%s2048_s1 + $0x38] sm:$0xff] (!%p165_p2)   ;;  %v1565_v11 = vld [vmem:[%s2048_s1 + $0x40] sm:$0xff] (!%p165_p2)  }
   0x8   : > { %635 = vmatprep.subr.bf16.mxu0 (!%p165_p2), %v1656_v1  ;;  %1517 = vmatprep.subr.bf16.mxu1 (!%p165_p2), %v1656_v1  ;;  %v1566_v12 = vld [vmem:[%s2048_s1 + $0x48] sm:$0xff] (!%p165_p2)   ;;  %v1567_v13 = vld [vmem:[%s2048_s1 + $0x50] sm:$0xff] (!%p165_p2)   ;;  %v1568_v14 = vld [vmem:[%s2048_s1 + $0x58] sm:$0xff] (!%p165_p2)  }
   0x9   : > { %v1569_v15 = vld [vmem:[%s2048_s1 + $0x60] sm:$0xff] (!%p165_p2)   ;;  %v1570_v16 = vld [vmem:[%s2048_s1 + $0x68] sm:$0xff] (!%p165_p2)   ;;  %v1571_v17 = vld [vmem:[%s2048_s1 + $0x70] sm:$0xff] (!%p165_p2)  }
   0xa   : > { %v1572_v18 = vld [vmem:[%s2048_s1 + $0x78] sm:$0xff] (!%p165_p2)  }
   0xb   : > { %636 = vmatpush1.bf16.msra.mxu0 (!%p165_p2), %v1558_v2  ;;  %1533 = vmatpush1.bf16.msra.mxu1 (!%p165_p2), %v1558_v2 }
   0xc   : > { %637 = vmatprep.subr.bf16.mxu0 (!%p165_p2), %v1656_v1  ;;  %1518 = vmatprep.subr.bf16.mxu1 (!%p165_p2), %v1656_v1 }
   0xd   : > { %s2053_s19 = smov (!%p192_p3, %s191_s19), 99 }
   0xe   : > { %s1465_s26 = sshll.u32 %s2053_s19, 3 }
   0xf   : > { %638 = vmatpush1.bf16.msra.mxu0 %v1559_v3  ;;  %1534 = vmatpush1.bf16.msra.mxu1 %v1559_v3  ;;  %s1719_s5 = scalar_lea.vmem %s2047_s0, %s1465_s26  ;;  %v1831_v3 = vld [vmem:[%s2049_s2] ss:$0 sm:$0xff] }
  0x10   : > { %639 = vmatprep.subr.bf16.mxu0 %v1656_v1  ;;  %1519 = vmatprep.subr.bf16.mxu1 %v1656_v1  ;;  %v1575_v6 = vld [vmem:[%s1719_s5 + $0x4] ss:$8 sps:$4 sm:$0xff]   ;;  %v1578_v8 = vld [vmem:[%s1719_s5 + $0xd4] ss:$8 sps:$4 sm:$0xff]   ;;  %v1573_v19 = vld [vmem:[%s1719_s5] ss:$8 sps:$4 sm:$0xff]  }
  0x11   : > { %665 = vmatprep.mubr.bf16.mxu0 %v1575_v6  ;;  %769 = vmatprep.mubr.bf16.mxu1 %v1578_v8  ;;  %v1576_v20 = vld [vmem:[%s1719_s5 + $0xd0] ss:$8 sps:$4 sm:$0xff]   ;;  %v1579_v21 = vld [vmem:[%s1719_s5 + $0x14] ss:$8 sps:$4 sm:$0xff]   ;;  %v1582_v22 = vld [vmem:[%s1719_s5 + $0xe4] ss:$8 sps:$4 sm:$0xff]  }
  0x12   : > { %v1581_v23 = vld [vmem:[%s1719_s5 + $0x10] ss:$8 sps:$4 sm:$0xff]   ;;  %v1584_v24 = vld [vmem:[%s1719_s5 + $0xe0] ss:$8 sps:$4 sm:$0xff]   ;;  %v1585_v25 = vld [vmem:[%s1719_s5 + $0x24] ss:$8 sps:$4 sm:$0xff]  }
  0x13   : > { %640 = vmatpush1.bf16.msra.mxu0 %v1560_v4  ;;  %1535 = vmatpush1.bf16.msra.mxu1 %v1560_v4  ;;  %v1588_v26 = vld [vmem:[%s1719_s5 + $0xf4] ss:$8 sps:$4 sm:$0xff]   ;;  %v1587_v27 = vld [vmem:[%s1719_s5 + $0x20] ss:$8 sps:$4 sm:$0xff]   ;;  %v1590_v28 = vld [vmem:[%s1719_s5 + $0xf0] ss:$8 sps:$4 sm:$0xff]  }
  0x14   : > { %641 = vmatprep.subr.bf16.mxu0 %v1656_v1  ;;  %1520 = vmatprep.subr.bf16.mxu1 %v1656_v1  ;;  %v1591_v29 = vld [vmem:[%s1719_s5 + $0x34] ss:$8 sps:$4 sm:$0xff]   ;;  %v1594_v30 = vld [vmem:[%s1719_s5 + $0x104] ss:$8 sps:$4 sm:$0xff]   ;;  %v1593_v31 = vld [vmem:[%s1719_s5 + $0x30] ss:$8 sps:$4 sm:$0xff]  }
  0x15   : > { %v1596_v32 = vld [vmem:[%s1719_s5 + $0x100] ss:$8 sps:$4 sm:$0xff]   ;;  %v1597_v33 = vld [vmem:[%s1719_s5 + $0x44] ss:$8 sps:$4 sm:$0xff]   ;;  %v1600_v34 = vld [vmem:[%s1719_s5 + $0x114] ss:$8 sps:$4 sm:$0xff]  }
  0x16   : > { %v1599_v35 = vld [vmem:[%s1719_s5 + $0x40] ss:$8 sps:$4 sm:$0xff]   ;;  %v1602_v36 = vld [vmem:[%s1719_s5 + $0x110] ss:$8 sps:$4 sm:$0xff]   ;;  %v1603_v37 = vld [vmem:[%s1719_s5 + $0x54] ss:$8 sps:$4 sm:$0xff]  }
  0x17   : > { %642 = vmatpush1.bf16.msra.mxu0 %v1561_v5  ;;  %1536 = vmatpush1.bf16.msra.mxu1 %v1561_v5  ;;  %v1606_v38 = vld [vmem:[%s1719_s5 + $0x124] ss:$8 sps:$4 sm:$0xff]   ;;  %v1605_v39 = vld [vmem:[%s1719_s5 + $0x50] ss:$8 sps:$4 sm:$0xff]   ;;  %v1608_v40 = vld [vmem:[%s1719_s5 + $0x120] ss:$8 sps:$4 sm:$0xff]  }
  0x18   : > { %643 = vmatprep.subr.bf16.mxu0 %v1656_v1  ;;  %1521 = vmatprep.subr.bf16.mxu1 %v1656_v1  ;;  %v1609_v41 = vld [vmem:[%s1719_s5 + $0x64] ss:$8 sps:$4 sm:$0xff]   ;;  %v1612_v42 = vld [vmem:[%s1719_s5 + $0x134] ss:$8 sps:$4 sm:$0xff]   ;;  %v1611_v43 = vld [vmem:[%s1719_s5 + $0x60] ss:$8 sps:$4 sm:$0xff]  }
  0x19   : > { %v1614_v44 = vld [vmem:[%s1719_s5 + $0x130] ss:$8 sps:$4 sm:$0xff]   ;;  %v1615_v45 = vld [vmem:[%s1719_s5 + $0x74] ss:$8 sps:$4 sm:$0xff]   ;;  %v1618_v46 = vld [vmem:[%s1719_s5 + $0x144] ss:$8 sps:$4 sm:$0xff]  }
  0x1a   : > { %v1617_v47 = vld [vmem:[%s1719_s5 + $0x70] ss:$8 sps:$4 sm:$0xff]   ;;  %v1620_v48 = vld [vmem:[%s1719_s5 + $0x140] ss:$8 sps:$4 sm:$0xff]   ;;  %v1621_v49 = vld [vmem:[%s1719_s5 + $0x84] ss:$8 sps:$4 sm:$0xff]  }
  0x1b   : > { %644 = vmatpush1.bf16.msra.mxu0 %v1562_v7  ;;  %1537 = vmatpush1.bf16.msra.mxu1 %v1562_v7  ;;  %v1624_v50 = vld [vmem:[%s1719_s5 + $0x154] ss:$8 sps:$4 sm:$0xff]   ;;  %v1623_v51 = vld [vmem:[%s1719_s5 + $0x80] ss:$8 sps:$4 sm:$0xff]   ;;  %v1626_v52 = vld [vmem:[%s1719_s5 + $0x150] ss:$8 sps:$4 sm:$0xff]  }
  0x1c   : > { %645 = vmatprep.subr.bf16.mxu0 %v1656_v1  ;;  %1522 = vmatprep.subr.bf16.mxu1 %v1656_v1  ;;  %v1627_v53 = vld [vmem:[%s1719_s5 + $0x94] ss:$8 sps:$4 sm:$0xff]   ;;  %v1630_v54 = vld [vmem:[%s1719_s5 + $0x164] ss:$8 sps:$4 sm:$0xff]   ;;  %v1629_v55 = vld [vmem:[%s1719_s5 + $0x90] ss:$8 sps:$4 sm:$0xff]  }
  0x1d   : > { %v1632_v56 = vld [vmem:[%s1719_s5 + $0x160] ss:$8 sps:$4 sm:$0xff]   ;;  %v1633_v57 = vld [vmem:[%s1719_s5 + $0xa4] ss:$8 sps:$4 sm:$0xff]   ;;  %v1636_v58 = vld [vmem:[%s1719_s5 + $0x174] ss:$8 sps:$4 sm:$0xff]  }
  0x1e   : > { %v1635_v59 = vld [vmem:[%s1719_s5 + $0xa0] ss:$8 sps:$4 sm:$0xff]   ;;  %v1638_v60 = vld [vmem:[%s1719_s5 + $0x170] ss:$8 sps:$4 sm:$0xff]   ;;  %v1639_v61 = vld [vmem:[%s1719_s5 + $0xb4] ss:$8 sps:$4 sm:$0xff]  }
  0x1f   : > { %646 = vmatpush1.bf16.msra.mxu0 %v1563_v9  ;;  %1538 = vmatpush1.bf16.msra.mxu1 %v1563_v9  ;;  %v1642_v62 = vld [vmem:[%s1719_s5 + $0x184] ss:$8 sps:$4 sm:$0xff]   ;;  %v1641_v63 = vld [vmem:[%s1719_s5 + $0xb0] ss:$8 sps:$4 sm:$0xff]   ;;  %v1644_v0 = vld [vmem:[%s1719_s5 + $0x180] ss:$8 sps:$4 sm:$0xff]  }
  0x20   : > { %647 = vmatprep.subr.bf16.mxu0 %v1656_v1  ;;  %1523 = vmatprep.subr.bf16.mxu1 %v1656_v1  ;;  %v1647_v2 = vld [vmem:[%s1719_s5 + $0xc0] ss:$8 sps:$4 sm:$0xff]  }
  0x21   : > { %v1836_v5 = vld [vmem:[%s2050_s3] ss:$0 sm:$0xff] }
  0x23   : > { %648 = vmatpush1.bf16.msra.mxu0 %v1564_v10  ;;  %1539 = vmatpush1.bf16.msra.mxu1 %v1564_v10 }
  0x24   : > { %649 = vmatprep.subr.bf16.mxu0 %v1656_v1  ;;  %1524 = vmatprep.subr.bf16.mxu1 %v1656_v1 }
  0x27   : > { %650 = vmatpush1.bf16.msra.mxu0 %v1565_v11  ;;  %1540 = vmatpush1.bf16.msra.mxu1 %v1565_v11 }
  0x28   : > { %651 = vmatprep.subr.bf16.mxu0 %v1656_v1  ;;  %1525 = vmatprep.subr.bf16.mxu1 %v1656_v1 }
  0x2b   : > { %652 = vmatpush1.bf16.msra.mxu0 %v1566_v12  ;;  %1541 = vmatpush1.bf16.msra.mxu1 %v1566_v12 }
  0x2c   : > { %653 = vmatprep.subr.bf16.mxu0 %v1656_v1  ;;  %1526 = vmatprep.subr.bf16.mxu1 %v1656_v1 }
  0x2f   : > { %654 = vmatpush1.bf16.msra.mxu0 %v1567_v13  ;;  %1542 = vmatpush1.bf16.msra.mxu1 %v1567_v13 }
  0x30   : > { %655 = vmatprep.subr.bf16.mxu0 %v1656_v1  ;;  %1527 = vmatprep.subr.bf16.mxu1 %v1656_v1 }
  0x33   : > { %656 = vmatpush1.bf16.msra.mxu0 %v1568_v14  ;;  %1543 = vmatpush1.bf16.msra.mxu1 %v1568_v14 }
  0x34   : > { %657 = vmatprep.subr.bf16.mxu0 %v1656_v1  ;;  %1528 = vmatprep.subr.bf16.mxu1 %v1656_v1 }
  0x37   : > { %658 = vmatpush1.bf16.msra.mxu0 %v1569_v15  ;;  %1544 = vmatpush1.bf16.msra.mxu1 %v1569_v15 }
  0x38   : > { %659 = vmatprep.subr.bf16.mxu0 %v1656_v1  ;;  %1529 = vmatprep.subr.bf16.mxu1 %v1656_v1 }
  0x3b   : > { %660 = vmatpush1.bf16.msra.mxu0 %v1570_v16  ;;  %1545 = vmatpush1.bf16.msra.mxu1 %v1570_v16 }
  0x3c   : > { %661 = vmatprep.subr.bf16.mxu0 %v1656_v1  ;;  %1530 = vmatprep.subr.bf16.mxu1 %v1656_v1 }
  0x3f   : > { %662 = vmatpush1.bf16.msra.mxu0 %v1571_v17  ;;  %1546 = vmatpush1.bf16.msra.mxu1 %v1571_v17 }
  0x40   : > { %663 = vmatprep.subr.bf16.mxu0 %v1656_v1  ;;  %1531 = vmatprep.subr.bf16.mxu1 %v1656_v1  ;;  %v1645_v1 = vld [vmem:[%s1719_s5 + $0xc4] ss:$8 sps:$4 sm:$0xff]   ;;  %s1344_s5 = sshll.u32 %s2053_s19, 2 }
  0x41   : > { %s1850_s19 = scalar_lea.vmem %s2051_s4, %s1344_s5 }
  0x43   : > { %664 = vmatpush1.bf16.msra.mxu0 %v1572_v18  ;;  %1547 = vmatpush1.bf16.msra.mxu1 %v1572_v18 }
  0x46   : > { %666 = vmatmul.mubr.bf16.vlgmr.msra.gmra.mrb[0].mxu0 %v1573_v19  ;;  %770 = vmatmul.mubr.bf16.vlgmr.msra.gmra.mrb[0].mxu1 %v1576_v20 }
  0x47   : > { %673 = vmatprep.mubr.bf16.mxu0 %v1579_v21  ;;  %777 = vmatprep.mubr.bf16.mxu1 %v1582_v22 }
  0x4e   : > { %674 = vmatmul.mubr.bf16.gmra.mrb[4].mxu0 %v1581_v23  ;;  %778 = vmatmul.mubr.bf16.gmra.mrb[4].mxu1 %v1584_v24 }
  0x4f   : > { %681 = vmatprep.mubr.bf16.mxu0 %v1585_v25  ;;  %785 = vmatprep.mubr.bf16.mxu1 %v1588_v26 }
  0x56   : > { %682 = vmatmul.mubr.bf16.gmra.mrb[8].mxu0 %v1587_v27  ;;  %786 = vmatmul.mubr.bf16.gmra.mrb[8].mxu1 %v1590_v28 }
  0x57   : > { %689 = vmatprep.mubr.bf16.mxu0 %v1591_v29  ;;  %793 = vmatprep.mubr.bf16.mxu1 %v1594_v30 }
  0x5e   : > { %690 = vmatmul.mubr.bf16.gmra.mrb[12].mxu0 %v1593_v31  ;;  %794 = vmatmul.mubr.bf16.gmra.mrb[12].mxu1 %v1596_v32 }
  0x5f   : > { %697 = vmatprep.mubr.bf16.mxu0 %v1597_v33  ;;  %801 = vmatprep.mubr.bf16.mxu1 %v1600_v34 }
  0x66   : > { %698 = vmatmul.mubr.bf16.gmra.mrb[16].mxu0 %v1599_v35  ;;  %802 = vmatmul.mubr.bf16.gmra.mrb[16].mxu1 %v1602_v36 }
  0x67   : > { %705 = vmatprep.mubr.bf16.mxu0 %v1603_v37  ;;  %809 = vmatprep.mubr.bf16.mxu1 %v1606_v38 }
  0x6e   : > { %706 = vmatmul.mubr.bf16.gmra.mrb[20].mxu0 %v1605_v39  ;;  %810 = vmatmul.mubr.bf16.gmra.mrb[20].mxu1 %v1608_v40 }
  0x6f   : > { %713 = vmatprep.mubr.bf16.mxu0 %v1609_v41  ;;  %817 = vmatprep.mubr.bf16.mxu1 %v1612_v42 }
  0x76   : > { %714 = vmatmul.mubr.bf16.gmra.mrb[24].mxu0 %v1611_v43  ;;  %818 = vmatmul.mubr.bf16.gmra.mrb[24].mxu1 %v1614_v44 }
  0x77   : > { %721 = vmatprep.mubr.bf16.mxu0 %v1615_v45  ;;  %825 = vmatprep.mubr.bf16.mxu1 %v1618_v46 }
  0x7e   : > { %722 = vmatmul.mubr.bf16.gmra.mrb[28].mxu0 %v1617_v47  ;;  %826 = vmatmul.mubr.bf16.gmra.mrb[28].mxu1 %v1620_v48 }
  0x7f   : > { %729 = vmatprep.mubr.bf16.mxu0 %v1621_v49  ;;  %833 = vmatprep.mubr.bf16.mxu1 %v1624_v50 }
  0x86   : > { %730 = vmatmul.mubr.bf16.gmra.mrb[32].mxu0 %v1623_v51  ;;  %834 = vmatmul.mubr.bf16.gmra.mrb[32].mxu1 %v1626_v52 }
  0x87   : > { %737 = vmatprep.mubr.bf16.mxu0 %v1627_v53  ;;  %841 = vmatprep.mubr.bf16.mxu1 %v1630_v54 }
  0x8e   : > { %738 = vmatmul.mubr.bf16.gmra.mrb[36].mxu0 %v1629_v55  ;;  %842 = vmatmul.mubr.bf16.gmra.mrb[36].mxu1 %v1632_v56 }
  0x8f   : > { %745 = vmatprep.mubr.bf16.mxu0 %v1633_v57  ;;  %849 = vmatprep.mubr.bf16.mxu1 %v1636_v58 }
  0x96   : > { %746 = vmatmul.mubr.bf16.gmra.mrb[40].mxu0 %v1635_v59  ;;  %850 = vmatmul.mubr.bf16.gmra.mrb[40].mxu1 %v1638_v60 }
  0x97   : > { %753 = vmatprep.mubr.bf16.mxu0 %v1639_v61  ;;  %857 = vmatprep.mubr.bf16.mxu1 %v1642_v62 }
  0x9e   : > { %754 = vmatmul.mubr.bf16.gmra.mrb[44].mxu0 %v1641_v63  ;;  %858 = vmatmul.mubr.bf16.gmra.mrb[44].mxu1 %v1644_v0 }
  0x9f   : > { %761 = vmatprep.mubr.bf16.mxu0 %v1645_v1 }
  0xa6   : > { %762 = vmatmul.mubr.bf16.gmra.mrb[48].mxu0 %v1647_v2 }
 0x119   : > { %v667_v4 = vpop.f32.mrb[0].mxu0  ;;  %v771_v6 = vpop.f32.mrb[0].mxu1 }
 0x11a   : > { %v873_v7 = vmul.f32 %v1831_v3, %v667_v4  ;;  %v669_v8 = vpop.f32.mrb[1].mxu0  ;;  %v899_v9 = vmul.f32 %v1831_v3, %v771_v6  ;;  %v773_v10 = vpop.f32.mrb[1].mxu1 }
 0x11b   : > { %v670_v11 = vpop.f32.mrb[2].mxu0  ;;  %v774_v12 = vpop.f32.mrb[2].mxu1 }
 0x11c   : > { %v930_v13 = vadd.f32 %v1836_v5, %v873_v7  ;;  %v874_v14 = vmul.f32 %v1831_v3, %v670_v11  ;;  %v672_v15 = vpop.f32.mrb[3].mxu0  ;;  %v956_v16 = vadd.f32 %v1836_v5, %v899_v9  ;;  %v900_v17 = vmul.f32 %v1831_v3, %v774_v12  ;;  %v776_v18 = vpop.f32.mrb[3].mxu1 }
 0x11e   : > { %v980_v19 = vmax.f32 %v930_v13, 0.0  ;;  %v931_v20 = vadd.f32 %v1836_v5, %v874_v14  ;;  %v1006_v21 = vmax.f32 %v956_v16, 0.0  ;;  %v957_v22 = vadd.f32 %v1836_v5, %v900_v17 }
 0x120   : > { %v1466_v23 = vpack.c.bf16 %v980_v19, %v980_v19  ;;  %v981_v24 = vmax.f32 %v931_v20, 0.0  ;;  %v1492_v25 = vpack.c.bf16 %v1006_v21, %v1006_v21  ;;  %v1007_v26 = vmax.f32 %v957_v22, 0.0 }
 0x121   : > { %v675_v27 = vpop.f32.mrb[4].mxu0  ;;  %v779_v28 = vpop.f32.mrb[4].mxu1 }
 0x122   : > { %1231 = vst.msk [vmem:[%s1850_s19] sm:$0xf] %vm1230_vm0, %v1466_v23  ;;  %v1467_v29 = vpack.c.bf16 %v981_v24, %v981_v24  ;;  %1257 = vst.msk [vmem:[%s1850_s19 + $0x68] sm:$0xf] %vm1230_vm0, %v1492_v25  ;;  %v1493_v30 = vpack.c.bf16 %v1007_v26, %v1007_v26  ;;  %v875_v31 = vmul.f32 %v1831_v3, %v675_v27  ;;  %v677_v32 = vpop.f32.mrb[5].mxu0  ;;  %v781_v34 = vpop.f32.mrb[5].mxu1 }
 0x123   : > { %v901_v33 = vmul.f32 %v1831_v3, %v779_v28  ;;  %v678_v35 = vpop.f32.mrb[6].mxu0  ;;  %v782_v36 = vpop.f32.mrb[6].mxu1 }
 0x124   : > { %1232 = vst.msk [vmem:[%s1850_s19 + $0x4] sm:$0xf] %vm1230_vm0, %v1467_v29  ;;  %1258 = vst.msk [vmem:[%s1850_s19 + $0x6c] sm:$0xf] %vm1230_vm0, %v1493_v30  ;;  %v932_v37 = vadd.f32 %v1836_v5, %v875_v31  ;;  %v876_v38 = vmul.f32 %v1831_v3, %v678_v35  ;;  %v680_v39 = vpop.f32.mrb[7].mxu0  ;;  %v902_v41 = vmul.f32 %v1831_v3, %v782_v36  ;;  %v784_v42 = vpop.f32.mrb[7].mxu1 }
 0x125   : > { %v958_v40 = vadd.f32 %v1836_v5, %v901_v33 }
 0x126   : > { %v982_v43 = vmax.f32 %v932_v37, 0.0  ;;  %v933_v44 = vadd.f32 %v1836_v5, %v876_v38  ;;  %v959_v46 = vadd.f32 %v1836_v5, %v902_v41 }
 0x127   : > { %v1008_v45 = vmax.f32 %v958_v40, 0.0 }
 0x128   : > { %v1468_v47 = vpack.c.bf16 %v982_v43, %v982_v43  ;;  %v983_v48 = vmax.f32 %v933_v44, 0.0  ;;  %v1009_v50 = vmax.f32 %v959_v46, 0.0 }
 0x129   : > { %v1494_v49 = vpack.c.bf16 %v1008_v45, %v1008_v45  ;;  %v683_v51 = vpop.f32.mrb[8].mxu0  ;;  %v787_v52 = vpop.f32.mrb[8].mxu1 }
 0x12a   : > { %1233 = vst.msk [vmem:[%s1850_s19 + $0x8] sm:$0xf] %vm1230_vm0, %v1468_v47  ;;  %v1469_v53 = vpack.c.bf16 %v983_v48, %v983_v48  ;;  %v1495_v54 = vpack.c.bf16 %v1009_v50, %v1009_v50  ;;  %v877_v55 = vmul.f32 %v1831_v3, %v683_v51  ;;  %v685_v56 = vpop.f32.mrb[9].mxu0  ;;  %v903_v57 = vmul.f32 %v1831_v3, %v787_v52  ;;  %v789_v58 = vpop.f32.mrb[9].mxu1 }
 0x12b   : > { %1259 = vst.msk [vmem:[%s1850_s19 + $0x70] sm:$0xf] %vm1230_vm0, %v1494_v49  ;;  %v686_v59 = vpop.f32.mrb[10].mxu0  ;;  %v790_v60 = vpop.f32.mrb[10].mxu1 }
 0x12c   : > { %1234 = vst.msk [vmem:[%s1850_s19 + $0xc] sm:$0xf] %vm1230_vm0, %v1469_v53  ;;  %1260 = vst.msk [vmem:[%s1850_s19 + $0x74] sm:$0xf] %vm1230_vm0, %v1495_v54  ;;  %v934_v61 = vadd.f32 %v1836_v5, %v877_v55  ;;  %v878_v62 = vmul.f32 %v1831_v3, %v686_v59  ;;  %v688_v63 = vpop.f32.mrb[11].mxu0  ;;  %v960_v0 = vadd.f32 %v1836_v5, %v903_v57  ;;  %v792_v2 = vpop.f32.mrb[11].mxu1 }
 0x12d   : > { %v904_v1 = vmul.f32 %v1831_v3, %v790_v60 }
 0x12e   : > { %v984_v4 = vmax.f32 %v934_v61, 0.0  ;;  %v935_v6 = vadd.f32 %v1836_v5, %v878_v62  ;;  %v1010_v7 = vmax.f32 %v960_v0, 0.0 }
 0x12f   : > { %v961_v8 = vadd.f32 %v1836_v5, %v904_v1 }
 0x130   : > { %v1470_v9 = vpack.c.bf16 %v984_v4, %v984_v4  ;;  %v985_v10 = vmax.f32 %v935_v6, 0.0  ;;  %v1496_v11 = vpack.c.bf16 %v1010_v7, %v1010_v7 }
 0x131   : > { %v1011_v12 = vmax.f32 %v961_v8, 0.0  ;;  %v691_v13 = vpop.f32.mrb[12].mxu0  ;;  %v795_v14 = vpop.f32.mrb[12].mxu1 }
 0x132   : > { %1235 = vst.msk [vmem:[%s1850_s19 + $0x10] sm:$0xf] %vm1230_vm0, %v1470_v9  ;;  %v1471_v15 = vpack.c.bf16 %v985_v10, %v985_v10  ;;  %1261 = vst.msk [vmem:[%s1850_s19 + $0x78] sm:$0xf] %vm1230_vm0, %v1496_v11  ;;  %v879_v17 = vmul.f32 %v1831_v3, %v691_v13  ;;  %v693_v18 = vpop.f32.mrb[13].mxu0  ;;  %v905_v19 = vmul.f32 %v1831_v3, %v795_v14  ;;  %v797_v20 = vpop.f32.mrb[13].mxu1 }
 0x133   : > { %v1497_v16 = vpack.c.bf16 %v1011_v12, %v1011_v12  ;;  %v694_v21 = vpop.f32.mrb[14].mxu0  ;;  %v798_v22 = vpop.f32.mrb[14].mxu1 }
 0x134   : > { %1236 = vst.msk [vmem:[%s1850_s19 + $0x14] sm:$0xf] %vm1230_vm0, %v1471_v15  ;;  %v936_v23 = vadd.f32 %v1836_v5, %v879_v17  ;;  %v880_v24 = vmul.f32 %v1831_v3, %v694_v21  ;;  %v696_v25 = vpop.f32.mrb[15].mxu0  ;;  %v962_v26 = vadd.f32 %v1836_v5, %v905_v19  ;;  %v906_v27 = vmul.f32 %v1831_v3, %v798_v22  ;;  %v800_v28 = vpop.f32.mrb[15].mxu1 }
 0x135   : > { %1262 = vst.msk [vmem:[%s1850_s19 + $0x7c] sm:$0xf] %vm1230_vm0, %v1497_v16 }
 0x136   : > { %v986_v29 = vmax.f32 %v936_v23, 0.0  ;;  %v937_v30 = vadd.f32 %v1836_v5, %v880_v24  ;;  %v1012_v31 = vmax.f32 %v962_v26, 0.0  ;;  %v963_v32 = vadd.f32 %v1836_v5, %v906_v27 }
 0x138   : > { %v1472_v33 = vpack.c.bf16 %v986_v29, %v986_v29  ;;  %v987_v34 = vmax.f32 %v937_v30, 0.0  ;;  %v1498_v35 = vpack.c.bf16 %v1012_v31, %v1012_v31  ;;  %v1013_v36 = vmax.f32 %v963_v32, 0.0 }
 0x139   : > { %v699_v37 = vpop.f32.mrb[16].mxu0  ;;  %v803_v38 = vpop.f32.mrb[16].mxu1 }
 0x13a   : > { %1237 = vst.msk [vmem:[%s1850_s19 + $0x18] sm:$0xf] %vm1230_vm0, %v1472_v33  ;;  %v1473_v39 = vpack.c.bf16 %v987_v34, %v987_v34  ;;  %1263 = vst.msk [vmem:[%s1850_s19 + $0x80] sm:$0xf] %vm1230_vm0, %v1498_v35  ;;  %v1499_v40 = vpack.c.bf16 %v1013_v36, %v1013_v36  ;;  %v881_v41 = vmul.f32 %v1831_v3, %v699_v37  ;;  %v701_v42 = vpop.f32.mrb[17].mxu0  ;;  %v805_v44 = vpop.f32.mrb[17].mxu1 }
 0x13b   : > { %v907_v43 = vmul.f32 %v1831_v3, %v803_v38  ;;  %v702_v45 = vpop.f32.mrb[18].mxu0  ;;  %v806_v46 = vpop.f32.mrb[18].mxu1 }
 0x13c   : > { %1238 = vst.msk [vmem:[%s1850_s19 + $0x1c] sm:$0xf] %vm1230_vm0, %v1473_v39  ;;  %1264 = vst.msk [vmem:[%s1850_s19 + $0x84] sm:$0xf] %vm1230_vm0, %v1499_v40  ;;  %v938_v47 = vadd.f32 %v1836_v5, %v881_v41  ;;  %v882_v48 = vmul.f32 %v1831_v3, %v702_v45  ;;  %v704_v49 = vpop.f32.mrb[19].mxu0  ;;  %v908_v51 = vmul.f32 %v1831_v3, %v806_v46  ;;  %v808_v52 = vpop.f32.mrb[19].mxu1 }
 0x13d   : > { %v964_v50 = vadd.f32 %v1836_v5, %v907_v43 }
 0x13e   : > { %v988_v53 = vmax.f32 %v938_v47, 0.0  ;;  %v939_v54 = vadd.f32 %v1836_v5, %v882_v48  ;;  %v965_v56 = vadd.f32 %v1836_v5, %v908_v51 }
 0x13f   : > { %v1014_v55 = vmax.f32 %v964_v50, 0.0 }
 0x140   : > { %v1474_v57 = vpack.c.bf16 %v988_v53, %v988_v53  ;;  %v989_v58 = vmax.f32 %v939_v54, 0.0  ;;  %v1015_v60 = vmax.f32 %v965_v56, 0.0 }
 0x141   : > { %v1500_v59 = vpack.c.bf16 %v1014_v55, %v1014_v55  ;;  %v707_v61 = vpop.f32.mrb[20].mxu0  ;;  %v811_v62 = vpop.f32.mrb[20].mxu1 }
 0x142   : > { %1239 = vst.msk [vmem:[%s1850_s19 + $0x20] sm:$0xf] %vm1230_vm0, %v1474_v57  ;;  %v1475_v63 = vpack.c.bf16 %v989_v58, %v989_v58  ;;  %v1501_v0 = vpack.c.bf16 %v1015_v60, %v1015_v60  ;;  %v883_v1 = vmul.f32 %v1831_v3, %v707_v61  ;;  %v709_v2 = vpop.f32.mrb[21].mxu0  ;;  %v909_v4 = vmul.f32 %v1831_v3, %v811_v62  ;;  %v813_v6 = vpop.f32.mrb[21].mxu1 }
 0x143   : > { %1265 = vst.msk [vmem:[%s1850_s19 + $0x88] sm:$0xf] %vm1230_vm0, %v1500_v59  ;;  %v710_v7 = vpop.f32.mrb[22].mxu0  ;;  %v814_v8 = vpop.f32.mrb[22].mxu1 }
 0x144   : > { %1240 = vst.msk [vmem:[%s1850_s19 + $0x24] sm:$0xf] %vm1230_vm0, %v1475_v63  ;;  %1266 = vst.msk [vmem:[%s1850_s19 + $0x8c] sm:$0xf] %vm1230_vm0, %v1501_v0  ;;  %v940_v9 = vadd.f32 %v1836_v5, %v883_v1  ;;  %v884_v10 = vmul.f32 %v1831_v3, %v710_v7  ;;  %v712_v11 = vpop.f32.mrb[23].mxu0  ;;  %v966_v12 = vadd.f32 %v1836_v5, %v909_v4  ;;  %v816_v14 = vpop.f32.mrb[23].mxu1 }
 0x145   : > { %v910_v13 = vmul.f32 %v1831_v3, %v814_v8 }
 0x146   : > { %v990_v15 = vmax.f32 %v940_v9, 0.0  ;;  %v941_v16 = vadd.f32 %v1836_v5, %v884_v10  ;;  %v1016_v17 = vmax.f32 %v966_v12, 0.0 }
 0x147   : > { %v967_v18 = vadd.f32 %v1836_v5, %v910_v13 }
 0x148   : > { %v1476_v19 = vpack.c.bf16 %v990_v15, %v990_v15  ;;  %v991_v20 = vmax.f32 %v941_v16, 0.0  ;;  %v1502_v21 = vpack.c.bf16 %v1016_v17, %v1016_v17 }
 0x149   : > { %v1017_v22 = vmax.f32 %v967_v18, 0.0  ;;  %v715_v23 = vpop.f32.mrb[24].mxu0  ;;  %v819_v24 = vpop.f32.mrb[24].mxu1 }
 0x14a   : > { %1241 = vst.msk [vmem:[%s1850_s19 + $0x28] sm:$0xf] %vm1230_vm0, %v1476_v19  ;;  %v1477_v25 = vpack.c.bf16 %v991_v20, %v991_v20  ;;  %1267 = vst.msk [vmem:[%s1850_s19 + $0x90] sm:$0xf] %vm1230_vm0, %v1502_v21  ;;  %v885_v27 = vmul.f32 %v1831_v3, %v715_v23  ;;  %v717_v28 = vpop.f32.mrb[25].mxu0  ;;  %v911_v29 = vmul.f32 %v1831_v3, %v819_v24  ;;  %v821_v30 = vpop.f32.mrb[25].mxu1 }
 0x14b   : > { %v1503_v26 = vpack.c.bf16 %v1017_v22, %v1017_v22  ;;  %v718_v31 = vpop.f32.mrb[26].mxu0  ;;  %v822_v32 = vpop.f32.mrb[26].mxu1 }
 0x14c   : > { %1242 = vst.msk [vmem:[%s1850_s19 + $0x2c] sm:$0xf] %vm1230_vm0, %v1477_v25  ;;  %v942_v33 = vadd.f32 %v1836_v5, %v885_v27  ;;  %v886_v34 = vmul.f32 %v1831_v3, %v718_v31  ;;  %v720_v35 = vpop.f32.mrb[27].mxu0  ;;  %v968_v36 = vadd.f32 %v1836_v5, %v911_v29  ;;  %v912_v37 = vmul.f32 %v1831_v3, %v822_v32  ;;  %v824_v38 = vpop.f32.mrb[27].mxu1 }
 0x14d   : > { %1268 = vst.msk [vmem:[%s1850_s19 + $0x94] sm:$0xf] %vm1230_vm0, %v1503_v26 }
 0x14e   : > { %v992_v39 = vmax.f32 %v942_v33, 0.0  ;;  %v943_v40 = vadd.f32 %v1836_v5, %v886_v34  ;;  %v1018_v41 = vmax.f32 %v968_v36, 0.0  ;;  %v969_v42 = vadd.f32 %v1836_v5, %v912_v37 }
 0x150   : > { %v1478_v43 = vpack.c.bf16 %v992_v39, %v992_v39  ;;  %v993_v44 = vmax.f32 %v943_v40, 0.0  ;;  %v1504_v45 = vpack.c.bf16 %v1018_v41, %v1018_v41  ;;  %v1019_v46 = vmax.f32 %v969_v42, 0.0 }
 0x151   : > { %v723_v47 = vpop.f32.mrb[28].mxu0  ;;  %v827_v48 = vpop.f32.mrb[28].mxu1 }
 0x152   : > { %1243 = vst.msk [vmem:[%s1850_s19 + $0x30] sm:$0xf] %vm1230_vm0, %v1478_v43  ;;  %v1479_v49 = vpack.c.bf16 %v993_v44, %v993_v44  ;;  %1269 = vst.msk [vmem:[%s1850_s19 + $0x98] sm:$0xf] %vm1230_vm0, %v1504_v45  ;;  %v1505_v50 = vpack.c.bf16 %v1019_v46, %v1019_v46  ;;  %v887_v51 = vmul.f32 %v1831_v3, %v723_v47  ;;  %v725_v52 = vpop.f32.mrb[29].mxu0  ;;  %v829_v54 = vpop.f32.mrb[29].mxu1 }
 0x153   : > { %v913_v53 = vmul.f32 %v1831_v3, %v827_v48  ;;  %v726_v55 = vpop.f32.mrb[30].mxu0  ;;  %v830_v56 = vpop.f32.mrb[30].mxu1 }
 0x154   : > { %1244 = vst.msk [vmem:[%s1850_s19 + $0x34] sm:$0xf] %vm1230_vm0, %v1479_v49  ;;  %1270 = vst.msk [vmem:[%s1850_s19 + $0x9c] sm:$0xf] %vm1230_vm0, %v1505_v50  ;;  %v944_v57 = vadd.f32 %v1836_v5, %v887_v51  ;;  %v888_v58 = vmul.f32 %v1831_v3, %v726_v55  ;;  %v728_v59 = vpop.f32.mrb[31].mxu0  ;;  %v914_v61 = vmul.f32 %v1831_v3, %v830_v56  ;;  %v832_v62 = vpop.f32.mrb[31].mxu1 }
 0x155   : > { %v970_v60 = vadd.f32 %v1836_v5, %v913_v53 }
 0x156   : > { %v994_v63 = vmax.f32 %v944_v57, 0.0  ;;  %v945_v0 = vadd.f32 %v1836_v5, %v888_v58  ;;  %v971_v2 = vadd.f32 %v1836_v5, %v914_v61 }
 0x157   : > { %v1020_v1 = vmax.f32 %v970_v60, 0.0 }
 0x158   : > { %v1480_v4 = vpack.c.bf16 %v994_v63, %v994_v63  ;;  %v995_v6 = vmax.f32 %v945_v0, 0.0  ;;  %v1021_v8 = vmax.f32 %v971_v2, 0.0 }
 0x159   : > { %v1506_v7 = vpack.c.bf16 %v1020_v1, %v1020_v1  ;;  %v731_v9 = vpop.f32.mrb[32].mxu0  ;;  %v835_v10 = vpop.f32.mrb[32].mxu1 }
 0x15a   : > { %1245 = vst.msk [vmem:[%s1850_s19 + $0x38] sm:$0xf] %vm1230_vm0, %v1480_v4  ;;  %v1481_v11 = vpack.c.bf16 %v995_v6, %v995_v6  ;;  %v1507_v12 = vpack.c.bf16 %v1021_v8, %v1021_v8  ;;  %v889_v13 = vmul.f32 %v1831_v3, %v731_v9  ;;  %v733_v14 = vpop.f32.mrb[33].mxu0  ;;  %v915_v15 = vmul.f32 %v1831_v3, %v835_v10  ;;  %v837_v16 = vpop.f32.mrb[33].mxu1 }
 0x15b   : > { %1271 = vst.msk [vmem:[%s1850_s19 + $0xa0] sm:$0xf] %vm1230_vm0, %v1506_v7  ;;  %v734_v17 = vpop.f32.mrb[34].mxu0  ;;  %v838_v18 = vpop.f32.mrb[34].mxu1 }
 0x15c   : > { %1246 = vst.msk [vmem:[%s1850_s19 + $0x3c] sm:$0xf] %vm1230_vm0, %v1481_v11  ;;  %1272 = vst.msk [vmem:[%s1850_s19 + $0xa4] sm:$0xf] %vm1230_vm0, %v1507_v12  ;;  %v946_v19 = vadd.f32 %v1836_v5, %v889_v13  ;;  %v890_v20 = vmul.f32 %v1831_v3, %v734_v17  ;;  %v736_v21 = vpop.f32.mrb[35].mxu0  ;;  %v972_v22 = vadd.f32 %v1836_v5, %v915_v15  ;;  %v840_v24 = vpop.f32.mrb[35].mxu1 }
 0x15d   : > { %v916_v23 = vmul.f32 %v1831_v3, %v838_v18 }
 0x15e   : > { %v996_v25 = vmax.f32 %v946_v19, 0.0  ;;  %v947_v26 = vadd.f32 %v1836_v5, %v890_v20  ;;  %v1022_v27 = vmax.f32 %v972_v22, 0.0 }
 0x15f   : > { %v973_v28 = vadd.f32 %v1836_v5, %v916_v23 }
 0x160   : > { %v1482_v29 = vpack.c.bf16 %v996_v25, %v996_v25  ;;  %v997_v30 = vmax.f32 %v947_v26, 0.0  ;;  %v1508_v31 = vpack.c.bf16 %v1022_v27, %v1022_v27 }
 0x161   : > { %v1023_v32 = vmax.f32 %v973_v28, 0.0  ;;  %v739_v33 = vpop.f32.mrb[36].mxu0  ;;  %v843_v34 = vpop.f32.mrb[36].mxu1 }
 0x162   : > { %1247 = vst.msk [vmem:[%s1850_s19 + $0x40] sm:$0xf] %vm1230_vm0, %v1482_v29  ;;  %v1483_v35 = vpack.c.bf16 %v997_v30, %v997_v30  ;;  %1273 = vst.msk [vmem:[%s1850_s19 + $0xa8] sm:$0xf] %vm1230_vm0, %v1508_v31  ;;  %v891_v37 = vmul.f32 %v1831_v3, %v739_v33  ;;  %v741_v38 = vpop.f32.mrb[37].mxu0  ;;  %v917_v39 = vmul.f32 %v1831_v3, %v843_v34  ;;  %v845_v40 = vpop.f32.mrb[37].mxu1 }
 0x163   : > { %v1509_v36 = vpack.c.bf16 %v1023_v32, %v1023_v32  ;;  %v742_v41 = vpop.f32.mrb[38].mxu0  ;;  %v846_v42 = vpop.f32.mrb[38].mxu1 }
 0x164   : > { %1248 = vst.msk [vmem:[%s1850_s19 + $0x44] sm:$0xf] %vm1230_vm0, %v1483_v35  ;;  %v948_v43 = vadd.f32 %v1836_v5, %v891_v37  ;;  %v892_v44 = vmul.f32 %v1831_v3, %v742_v41  ;;  %v744_v45 = vpop.f32.mrb[39].mxu0  ;;  %v974_v46 = vadd.f32 %v1836_v5, %v917_v39  ;;  %v918_v47 = vmul.f32 %v1831_v3, %v846_v42  ;;  %v848_v48 = vpop.f32.mrb[39].mxu1 }
 0x165   : > { %1274 = vst.msk [vmem:[%s1850_s19 + $0xac] sm:$0xf] %vm1230_vm0, %v1509_v36 }
 0x166   : > { %v998_v49 = vmax.f32 %v948_v43, 0.0  ;;  %v949_v50 = vadd.f32 %v1836_v5, %v892_v44  ;;  %v1024_v51 = vmax.f32 %v974_v46, 0.0  ;;  %v975_v52 = vadd.f32 %v1836_v5, %v918_v47 }
 0x168   : > { %v1484_v53 = vpack.c.bf16 %v998_v49, %v998_v49  ;;  %v999_v54 = vmax.f32 %v949_v50, 0.0  ;;  %v1510_v55 = vpack.c.bf16 %v1024_v51, %v1024_v51  ;;  %v1025_v56 = vmax.f32 %v975_v52, 0.0 }
 0x169   : > { %v747_v57 = vpop.f32.mrb[40].mxu0  ;;  %v851_v58 = vpop.f32.mrb[40].mxu1 }
 0x16a   : > { %1249 = vst.msk [vmem:[%s1850_s19 + $0x48] sm:$0xf] %vm1230_vm0, %v1484_v53  ;;  %v1485_v59 = vpack.c.bf16 %v999_v54, %v999_v54  ;;  %1275 = vst.msk [vmem:[%s1850_s19 + $0xb0] sm:$0xf] %vm1230_vm0, %v1510_v55  ;;  %v1511_v60 = vpack.c.bf16 %v1025_v56, %v1025_v56  ;;  %v893_v61 = vmul.f32 %v1831_v3, %v747_v57  ;;  %v749_v62 = vpop.f32.mrb[41].mxu0  ;;  %v853_v0 = vpop.f32.mrb[41].mxu1 }
 0x16b   : > { %v919_v63 = vmul.f32 %v1831_v3, %v851_v58  ;;  %v750_v1 = vpop.f32.mrb[42].mxu0  ;;  %v854_v2 = vpop.f32.mrb[42].mxu1 }
 0x16c   : > { %1250 = vst.msk [vmem:[%s1850_s19 + $0x4c] sm:$0xf] %vm1230_vm0, %v1485_v59  ;;  %1276 = vst.msk [vmem:[%s1850_s19 + $0xb4] sm:$0xf] %vm1230_vm0, %v1511_v60  ;;  %v950_v4 = vadd.f32 %v1836_v5, %v893_v61  ;;  %v894_v6 = vmul.f32 %v1831_v3, %v750_v1  ;;  %v752_v7 = vpop.f32.mrb[43].mxu0  ;;  %v920_v9 = vmul.f32 %v1831_v3, %v854_v2  ;;  %v856_v10 = vpop.f32.mrb[43].mxu1 }
 0x16d   : > { %v976_v8 = vadd.f32 %v1836_v5, %v919_v63 }
 0x16e   : > { %v1000_v11 = vmax.f32 %v950_v4, 0.0  ;;  %v951_v12 = vadd.f32 %v1836_v5, %v894_v6  ;;  %v977_v14 = vadd.f32 %v1836_v5, %v920_v9 }
 0x16f   : > { %v1026_v13 = vmax.f32 %v976_v8, 0.0 }
 0x170   : > { %v1486_v15 = vpack.c.bf16 %v1000_v11, %v1000_v11  ;;  %v1001_v16 = vmax.f32 %v951_v12, 0.0  ;;  %v1027_v18 = vmax.f32 %v977_v14, 0.0 }
 0x171   : > { %v1512_v17 = vpack.c.bf16 %v1026_v13, %v1026_v13  ;;  %v755_v19 = vpop.f32.mrb[44].mxu0  ;;  %v859_v20 = vpop.f32.mrb[44].mxu1 }
 0x172   : > { %1251 = vst.msk [vmem:[%s1850_s19 + $0x50] sm:$0xf] %vm1230_vm0, %v1486_v15  ;;  %v1487_v21 = vpack.c.bf16 %v1001_v16, %v1001_v16  ;;  %v1513_v22 = vpack.c.bf16 %v1027_v18, %v1027_v18  ;;  %v895_v23 = vmul.f32 %v1831_v3, %v755_v19  ;;  %v757_v24 = vpop.f32.mrb[45].mxu0  ;;  %v921_v25 = vmul.f32 %v1831_v3, %v859_v20  ;;  %v861_v26 = vpop.f32.mrb[45].mxu1 }
 0x173   : > { %1277 = vst.msk [vmem:[%s1850_s19 + $0xb8] sm:$0xf] %vm1230_vm0, %v1512_v17  ;;  %v758_v27 = vpop.f32.mrb[46].mxu0  ;;  %v862_v28 = vpop.f32.mrb[46].mxu1 }
 0x174   : > { %1252 = vst.msk [vmem:[%s1850_s19 + $0x54] sm:$0xf] %vm1230_vm0, %v1487_v21  ;;  %1278 = vst.msk [vmem:[%s1850_s19 + $0xbc] sm:$0xf] %vm1230_vm0, %v1513_v22  ;;  %v952_v29 = vadd.f32 %v1836_v5, %v895_v23  ;;  %v896_v30 = vmul.f32 %v1831_v3, %v758_v27  ;;  %v760_v31 = vpop.f32.mrb[47].mxu0  ;;  %v978_v32 = vadd.f32 %v1836_v5, %v921_v25  ;;  %v864_v34 = vpop.f32.mrb[47].mxu1 }
 0x175   : > { %v922_v33 = vmul.f32 %v1831_v3, %v862_v28 }
 0x176   : > { %v1002_v35 = vmax.f32 %v952_v29, 0.0  ;;  %v953_v36 = vadd.f32 %v1836_v5, %v896_v30  ;;  %v1028_v37 = vmax.f32 %v978_v32, 0.0 }
 0x177   : > { %v979_v38 = vadd.f32 %v1836_v5, %v922_v33 }
 0x178   : > { %v1488_v39 = vpack.c.bf16 %v1002_v35, %v1002_v35  ;;  %v1003_v40 = vmax.f32 %v953_v36, 0.0  ;;  %v1514_v41 = vpack.c.bf16 %v1028_v37, %v1028_v37 }
 0x179   : > { %v1029_v42 = vmax.f32 %v979_v38, 0.0  ;;  %v763_v43 = vpop.f32.mrb[48].mxu0 }
 0x17a   : > { %1253 = vst.msk [vmem:[%s1850_s19 + $0x58] sm:$0xf] %vm1230_vm0, %v1488_v39  ;;  %v1489_v44 = vpack.c.bf16 %v1003_v40, %v1003_v40  ;;  %1279 = vst.msk [vmem:[%s1850_s19 + $0xc0] sm:$0xf] %vm1230_vm0, %v1514_v41  ;;  %v897_v46 = vmul.f32 %v1831_v3, %v763_v43  ;;  %v765_v47 = vpop.f32.mrb[49].mxu0 }
 0x17b   : > { %v1515_v45 = vpack.c.bf16 %v1029_v42, %v1029_v42  ;;  %v766_v48 = vpop.f32.mrb[50].mxu0 }
 0x17c   : > { %1254 = vst.msk [vmem:[%s1850_s19 + $0x5c] sm:$0xf] %vm1230_vm0, %v1489_v44  ;;  %v954_v49 = vadd.f32 %v1836_v5, %v897_v46  ;;  %v898_v50 = vmul.f32 %v1831_v3, %v766_v48  ;;  %v768_v51 = vpop.f32.mrb[51].mxu0 }
 0x17d   : > { %1280 = vst.msk [vmem:[%s1850_s19 + $0xc4] sm:$0xf] %vm1230_vm0, %v1515_v45 }
 0x17e   : > { %v1004_v52 = vmax.f32 %v954_v49, 0.0  ;;  %v955_v53 = vadd.f32 %v1836_v5, %v898_v50 }
 0x180   : > { %v1490_v54 = vpack.c.bf16 %v1004_v52, %v1004_v52  ;;  %v1005_v55 = vmax.f32 %v955_v53, 0.0 }
 0x182   : > { %1255 = vst.msk [vmem:[%s1850_s19 + $0x60] sm:$0xf] %vm1230_vm0, %v1490_v54  ;;  %v1491_v56 = vpack.c.bf16 %v1005_v55, %v1005_v55 }
 0x184   : > { %1256 = vst.msk [vmem:[%s1850_s19 + $0x64] sm:$0xf] %vm1230_vm0, %v1491_v56 }
 0x185 PF: > { %s14_s15 = sadd.s32 1, %s1654_s15  }
 0x186   : > { %p11_p4 = scmp.ge.s32.totalorder %s14_s15, 4  }
 0x188   :  { %13 = sbr.rel (!%p11_p4) target bundleno = 1 (0x1), region = 66 }

// kernel: dqn_forward.5
= control target key start
LH: loop header
LB: loop body
LE: loop exit
PB: predicated region body
PF: predicated region fallthrough
CT: control target
= control target key end

     0   :  { %s1240_s15 = smov 0   ;;  %s1445_s0 = inlined_call_operand.vmem [shape: bf16[192,512], index: 0, kind: input, shape index: {}]   ;;  %s1446_s1 = inlined_call_operand.vmem [shape: bf16[512,64], index: 1, kind: input, shape index: {}]   ;;  %s1447_s2 = inlined_call_operand.vmem [shape: f32[1,64], index: 2, kind: input, shape index: {}]   ;;  %s1448_s3 = inlined_call_operand.vmem [shape: f32[1,64], index: 3, kind: input, shape index: {}]   ;;  %s1449_s4 = inlined_call_operand.vmem [shape: bf16[192,64], index: 4, kind: output, shape index: {}]  }
   0x1 LB: > { %s934_s16 = sadd.s32 4294967295, %s1213_s15   ;;  %p938_p0 = scmp.ge.s32.totalorder %s1213_s15, 1  ;;  %s1213_s15 = sphi %s1240_s15, %s14_s15  }
   0x2   : > { %p164_p1 = scmp.lt.s32.totalorder %s1213_s15, 3 }
   0x4   : > { %p165_p2 = pnand %p938_p0, %p164_p1 }
   0x5   : > { %v1139_v0 = vld [vmem:[%s1446_s1 + $0x40] sm:$0xff] (!%p165_p2)   ;;  %v1143_v4 = vld [vmem:[%s1446_s1 + $0x48] sm:$0xff] (!%p165_p2)   ;;  %v1147_v8 = vld [vmem:[%s1446_s1 + $0x50] sm:$0xff] (!%p165_p2)   ;;  %s191_s23 = smul.u32 (!%p165_p2), 12, %s934_s16  ;;  %vm865_vm0 = vcmask (!%p165_p2), 519168  }
   0x6   : > { %168 = sbr.rel (%p165_p2) target bundleno = 308 (0x134), region = 36  ;;  %v1140_v1 = vld [vmem:[%s1446_s1 + $0xc0] sm:$0xff] (!%p165_p2)   ;;  %1027 = vmatprep.subr.bf16.mxu0 (!%p165_p2), %v1139_v0  ;;  %v1144_v5 = vld [vmem:[%s1446_s1 + $0xc8] sm:$0xff] (!%p165_p2)   ;;  %v1148_v9 = vld [vmem:[%s1446_s1 + $0xd0] sm:$0xff] (!%p165_p2)  }
   0x7   : > { %v1141_v2 = vld [vmem:[%s1446_s1] sm:$0xff] (!%p165_p2)   ;;  %1079 = vmatprep.subr.bf16.mxu1 (!%p165_p2), %v1140_v1  ;;  %v1145_v6 = vld [vmem:[%s1446_s1 + $0x8] sm:$0xff] (!%p165_p2)   ;;  %v1149_v10 = vld [vmem:[%s1446_s1 + $0x10] sm:$0xff] (!%p165_p2)   ;;  %p192_p3 = scmp.lt.s32.totalorder (!%p165_p2), %s191_s23, 23 }
   0x8   : > { %v1142_v3 = vld [vmem:[%s1446_s1 + $0x80] sm:$0xff] (!%p165_p2)   ;;  %1028 = vmatpush3.bf16.msra.mxu0 (!%p165_p2), %v1141_v2  ;;  %v1146_v7 = vld [vmem:[%s1446_s1 + $0x88] sm:$0xff] (!%p165_p2)   ;;  %v1150_v11 = vld [vmem:[%s1446_s1 + $0x90] sm:$0xff] (!%p165_p2)  }
   0x9   : > { %1080 = vmatpush3.bf16.msra.mxu1 (!%p165_p2), %v1142_v3  ;;  %1029 = vmatprep.subr.bf16.mxu0 (!%p165_p2), %v1143_v4  ;;  %v1151_v12 = vld [vmem:[%s1446_s1 + $0x58] sm:$0xff] (!%p165_p2)   ;;  %v1155_v16 = vld [vmem:[%s1446_s1 + $0x60] sm:$0xff] (!%p165_p2)   ;;  %v1159_v20 = vld [vmem:[%s1446_s1 + $0x68] sm:$0xff] (!%p165_p2)  }
   0xa   : > { %1081 = vmatprep.subr.bf16.mxu1 (!%p165_p2), %v1144_v5  ;;  %v1152_v13 = vld [vmem:[%s1446_s1 + $0xd8] sm:$0xff] (!%p165_p2)   ;;  %v1156_v17 = vld [vmem:[%s1446_s1 + $0xe0] sm:$0xff] (!%p165_p2)   ;;  %v1160_v21 = vld [vmem:[%s1446_s1 + $0xe8] sm:$0xff] (!%p165_p2)  }
   0xb   : > { %v1153_v14 = vld [vmem:[%s1446_s1 + $0x18] sm:$0xff] (!%p165_p2)   ;;  %v1157_v18 = vld [vmem:[%s1446_s1 + $0x20] sm:$0xff] (!%p165_p2)   ;;  %v1161_v22 = vld [vmem:[%s1446_s1 + $0x28] sm:$0xff] (!%p165_p2)  }
   0xc   : > { %1030 = vmatpush3.bf16.msra.mxu0 (!%p165_p2), %v1145_v6  ;;  %v1154_v15 = vld [vmem:[%s1446_s1 + $0x98] sm:$0xff] (!%p165_p2)   ;;  %v1158_v19 = vld [vmem:[%s1446_s1 + $0xa0] sm:$0xff] (!%p165_p2)   ;;  %v1162_v23 = vld [vmem:[%s1446_s1 + $0xa8] sm:$0xff] (!%p165_p2)  }
   0xd   : > { %1082 = vmatpush3.bf16.msra.mxu1 %v1146_v7  ;;  %1031 = vmatprep.subr.bf16.mxu0 %v1147_v8  ;;  %s1451_s23 = smov (!%p192_p3, %s191_s23), 23  ;;  %v1163_v24 = vld [vmem:[%s1446_s1 + $0x70] sm:$0xff]   ;;  %v1167_v28 = vld [vmem:[%s1446_s1 + $0x78] sm:$0xff]   ;;  %v1381_v1 = vld [vmem:[%s1447_s2] ss:$0 sm:$0xff] }
   0xe   : > { %1083 = vmatprep.subr.bf16.mxu1 %v1148_v9  ;;  %v1164_v25 = vld [vmem:[%s1446_s1 + $0xf0] sm:$0xff]   ;;  %s1014_s24 = sshll.u32 %s1451_s23, 4  ;;  %v1168_v29 = vld [vmem:[%s1446_s1 + $0xf8] sm:$0xff]   ;;  %v1386_v6 = vld [vmem:[%s1448_s3] ss:$0 sm:$0xff]  ;;  %s941_s17 = sshll.u32 %s1451_s23, 2 }
   0xf   : > { %v1165_v26 = vld [vmem:[%s1446_s1 + $0x30] sm:$0xff]   ;;  %s1346_s6 = scalar_lea.vmem %s1445_s0, %s1014_s24  ;;  %v1169_v30 = vld [vmem:[%s1446_s1 + $0x38] sm:$0xff]   ;;  %s1396_s20 = scalar_lea.vmem %s1449_s4, %s941_s17 }
  0x10   : > { %1032 = vmatpush3.bf16.msra.mxu0 %v1149_v10  ;;  %v1166_v27 = vld [vmem:[%s1446_s1 + $0xb0] sm:$0xff]   ;;  %v1170_v31 = vld [vmem:[%s1446_s1 + $0xb8] sm:$0xff]  }
  0x11   : > { %1084 = vmatpush3.bf16.msra.mxu1 %v1150_v11  ;;  %1033 = vmatprep.subr.bf16.mxu0 %v1151_v12  ;;  %v1171_v32 = vld [vmem:[%s1346_s6] ss:$16 sps:$4 sm:$0xff]   ;;  %v1173_v33 = vld [vmem:[%s1346_s6 + $0x4] ss:$16 sps:$4 sm:$0xff]   ;;  %v1174_v34 = vld [vmem:[%s1346_s6 + $0x8] ss:$16 sps:$4 sm:$0xff]  }
  0x12   : > { %1085 = vmatprep.subr.bf16.mxu1 %v1152_v13  ;;  %v1176_v35 = vld [vmem:[%s1346_s6 + $0xc] ss:$16 sps:$4 sm:$0xff]   ;;  %637 = vmatprep.mubr.bf16.mxu0 %v1173_v33  ;;  %v1177_v36 = vld [vmem:[%s1346_s6 + $0x24] ss:$16 sps:$4 sm:$0xff]   ;;  %v1181_v38 = vld [vmem:[%s1346_s6 + $0x20] ss:$16 sps:$4 sm:$0xff]  }
  0x13   : > { %718 = vmatprep.mubr.bf16.mxu1 %v1176_v35  ;;  %v1179_v37 = vld [vmem:[%s1346_s6 + $0x2c] ss:$16 sps:$4 sm:$0xff]   ;;  %v1182_v39 = vld [vmem:[%s1346_s6 + $0x28] ss:$16 sps:$4 sm:$0xff]   ;;  %v1183_v40 = vld [vmem:[%s1346_s6 + $0x44] ss:$16 sps:$4 sm:$0xff]  }
  0x14   : > { %1034 = vmatpush3.bf16.msra.mxu0 %v1153_v14  ;;  %v1185_v41 = vld [vmem:[%s1346_s6 + $0x4c] ss:$16 sps:$4 sm:$0xff]   ;;  %v1187_v42 = vld [vmem:[%s1346_s6 + $0x40] ss:$16 sps:$4 sm:$0xff]   ;;  %v1188_v43 = vld [vmem:[%s1346_s6 + $0x48] ss:$16 sps:$4 sm:$0xff]  }
  0x15   : > { %1086 = vmatpush3.bf16.msra.mxu1 %v1154_v15  ;;  %1035 = vmatprep.subr.bf16.mxu0 %v1155_v16  ;;  %v1189_v44 = vld [vmem:[%s1346_s6 + $0x64] ss:$16 sps:$4 sm:$0xff]   ;;  %v1191_v45 = vld [vmem:[%s1346_s6 + $0x6c] ss:$16 sps:$4 sm:$0xff]   ;;  %v1193_v46 = vld [vmem:[%s1346_s6 + $0x60] ss:$16 sps:$4 sm:$0xff]  }
  0x16   : > { %1087 = vmatprep.subr.bf16.mxu1 %v1156_v17  ;;  %v1194_v47 = vld [vmem:[%s1346_s6 + $0x68] ss:$16 sps:$4 sm:$0xff]   ;;  %v1195_v48 = vld [vmem:[%s1346_s6 + $0x84] ss:$16 sps:$4 sm:$0xff]   ;;  %v1197_v49 = vld [vmem:[%s1346_s6 + $0x8c] ss:$16 sps:$4 sm:$0xff]  }
  0x17   : > { %v1199_v50 = vld [vmem:[%s1346_s6 + $0x80] ss:$16 sps:$4 sm:$0xff]   ;;  %v1200_v51 = vld [vmem:[%s1346_s6 + $0x88] ss:$16 sps:$4 sm:$0xff]   ;;  %v1201_v52 = vld [vmem:[%s1346_s6 + $0xa4] ss:$16 sps:$4 sm:$0xff]  }
  0x18   : > { %1036 = vmatpush3.bf16.msra.mxu0 %v1157_v18  ;;  %v1203_v53 = vld [vmem:[%s1346_s6 + $0xac] ss:$16 sps:$4 sm:$0xff]   ;;  %v1205_v54 = vld [vmem:[%s1346_s6 + $0xa0] ss:$16 sps:$4 sm:$0xff]   ;;  %v1206_v55 = vld [vmem:[%s1346_s6 + $0xa8] ss:$16 sps:$4 sm:$0xff]  }
  0x19   : > { %1088 = vmatpush3.bf16.msra.mxu1 %v1158_v19  ;;  %1037 = vmatprep.subr.bf16.mxu0 %v1159_v20 }
  0x1a   : > { %1089 = vmatprep.subr.bf16.mxu1 %v1160_v21 }
  0x1c   : > { %1038 = vmatpush3.bf16.msra.mxu0 %v1161_v22 }
  0x1d   : > { %1090 = vmatpush3.bf16.msra.mxu1 %v1162_v23  ;;  %1039 = vmatprep.subr.bf16.mxu0 %v1163_v24 }
  0x1e   : > { %1091 = vmatprep.subr.bf16.mxu1 %v1164_v25 }
  0x20   : > { %1040 = vmatpush3.bf16.msra.mxu0 %v1165_v26 }
  0x21   : > { %1092 = vmatpush3.bf16.msra.mxu1 %v1166_v27  ;;  %1041 = vmatprep.subr.bf16.mxu0 %v1167_v28 }
  0x22   : > { %1093 = vmatprep.subr.bf16.mxu1 %v1168_v29 }
  0x24   : > { %1042 = vmatpush3.bf16.msra.mxu0 %v1169_v30 }
  0x25   : > { %1094 = vmatpush3.bf16.msra.mxu1 %v1170_v31 }
  0x27   : > { %638 = vmatmul.mubr.bf16.vlgmr.msra.gmra.mrb[0].mxu0 %v1171_v32 }
  0x28   : > { %719 = vmatmul.mubr.bf16.vlgmr.msra.gmra.mrb[0].mxu1 %v1174_v34  ;;  %645 = vmatprep.mubr.bf16.mxu0 %v1177_v36 }
  0x29   : > { %726 = vmatprep.mubr.bf16.mxu1 %v1179_v37 }
  0x2f   : > { %646 = vmatmul.mubr.bf16.gmra.mrb[4].mxu0 %v1181_v38 }
  0x30   : > { %727 = vmatmul.mubr.bf16.gmra.mrb[4].mxu1 %v1182_v39  ;;  %653 = vmatprep.mubr.bf16.mxu0 %v1183_v40 }
  0x31   : > { %734 = vmatprep.mubr.bf16.mxu1 %v1185_v41 }
  0x37   : > { %654 = vmatmul.mubr.bf16.gmra.mrb[8].mxu0 %v1187_v42 }
  0x38   : > { %735 = vmatmul.mubr.bf16.gmra.mrb[8].mxu1 %v1188_v43  ;;  %661 = vmatprep.mubr.bf16.mxu0 %v1189_v44 }
  0x39   : > { %742 = vmatprep.mubr.bf16.mxu1 %v1191_v45 }
  0x3f   : > { %662 = vmatmul.mubr.bf16.gmra.mrb[12].mxu0 %v1193_v46 }
  0x40   : > { %743 = vmatmul.mubr.bf16.gmra.mrb[12].mxu1 %v1194_v47  ;;  %669 = vmatprep.mubr.bf16.mxu0 %v1195_v48 }
  0x41   : > { %750 = vmatprep.mubr.bf16.mxu1 %v1197_v49 }
  0x47   : > { %670 = vmatmul.mubr.bf16.gmra.mrb[16].mxu0 %v1199_v50 }
  0x48   : > { %751 = vmatmul.mubr.bf16.gmra.mrb[16].mxu1 %v1200_v51  ;;  %677 = vmatprep.mubr.bf16.mxu0 %v1201_v52 }
  0x49   : > { %758 = vmatprep.mubr.bf16.mxu1 %v1203_v53 }
  0x4f   : > { %678 = vmatmul.mubr.bf16.gmra.mrb[20].mxu0 %v1205_v54 }
  0x50   : > { %759 = vmatmul.mubr.bf16.gmra.mrb[20].mxu1 %v1206_v55 }
  0xfa   : > { %v1043_v56 = vpop.f32.mrb[0].mxu0 }
  0xfb   : > { %v1095_v57 = vpop.f32.mrb[0].mxu1  ;;  %v1044_v58 = vpop.f32.mrb[1].mxu0 }
  0xfc   : > { %v1045_v59 = vadd.f32 %v1044_v58, %v1043_v56  ;;  %v1096_v60 = vpop.f32.mrb[1].mxu1  ;;  %v1046_v61 = vpop.f32.mrb[2].mxu0 }
  0xfd   : > { %v1097_v62 = vadd.f32 %v1096_v60, %v1095_v57  ;;  %v1098_v63 = vpop.f32.mrb[2].mxu1  ;;  %v1047_v0 = vpop.f32.mrb[3].mxu0 }
  0xfe   : > { %v1048_v2 = vadd.f32 %v1047_v0, %v1046_v61  ;;  %v1099_v3 = vpop.f32.mrb[3].mxu1 }
  0xff   : > { %v721_v4 = vadd.f32 %v1097_v62, %v1045_v59  ;;  %v1100_v5 = vadd.f32 %v1099_v3, %v1098_v63 }
 0x101   : > { %v774_v7 = vmul.f32 %v1381_v1, %v721_v4  ;;  %v724_v8 = vadd.f32 %v1100_v5, %v1048_v2 }
 0x102   : > { %v1049_v9 = vpop.f32.mrb[4].mxu0 }
 0x103   : > { %v793_v10 = vadd.f32 %v1386_v6, %v774_v7  ;;  %v775_v11 = vmul.f32 %v1381_v1, %v724_v8  ;;  %v1101_v12 = vpop.f32.mrb[4].mxu1  ;;  %v1050_v13 = vpop.f32.mrb[5].mxu0 }
 0x104   : > { %v1051_v14 = vadd.f32 %v1050_v13, %v1049_v9  ;;  %v1102_v15 = vpop.f32.mrb[5].mxu1  ;;  %v1052_v16 = vpop.f32.mrb[6].mxu0 }
 0x105   : > { %v805_v17 = vmax.f32 %v793_v10, 0.0  ;;  %v794_v18 = vadd.f32 %v1386_v6, %v775_v11  ;;  %v1103_v19 = vadd.f32 %v1102_v15, %v1101_v12  ;;  %v1104_v20 = vpop.f32.mrb[6].mxu1  ;;  %v1053_v21 = vpop.f32.mrb[7].mxu0 }
 0x106   : > { %v1054_v22 = vadd.f32 %v1053_v21, %v1052_v16  ;;  %v1105_v23 = vpop.f32.mrb[7].mxu1 }
 0x107   : > { %v1015_v24 = vpack.c.bf16 %v805_v17, %v805_v17  ;;  %v806_v25 = vmax.f32 %v794_v18, 0.0  ;;  %v729_v26 = vadd.f32 %v1103_v19, %v1051_v14  ;;  %v1106_v27 = vadd.f32 %v1105_v23, %v1104_v20 }
 0x109   : > { %866 = vst.msk [vmem:[%s1396_s20] sm:$0xf] %vm865_vm0, %v1015_v24  ;;  %v1016_v28 = vpack.c.bf16 %v806_v25, %v806_v25  ;;  %v776_v29 = vmul.f32 %v1381_v1, %v729_v26  ;;  %v732_v30 = vadd.f32 %v1106_v27, %v1054_v22 }
 0x10a   : > { %v1055_v31 = vpop.f32.mrb[8].mxu0 }
 0x10b   : > { %867 = vst.msk [vmem:[%s1396_s20 + $0x4] sm:$0xf] %vm865_vm0, %v1016_v28  ;;  %v795_v32 = vadd.f32 %v1386_v6, %v776_v29  ;;  %v777_v33 = vmul.f32 %v1381_v1, %v732_v30  ;;  %v1107_v34 = vpop.f32.mrb[8].mxu1  ;;  %v1056_v35 = vpop.f32.mrb[9].mxu0 }
 0x10c   : > { %v1057_v36 = vadd.f32 %v1056_v35, %v1055_v31  ;;  %v1108_v37 = vpop.f32.mrb[9].mxu1  ;;  %v1058_v38 = vpop.f32.mrb[10].mxu0 }
 0x10d   : > { %v807_v39 = vmax.f32 %v795_v32, 0.0  ;;  %v796_v40 = vadd.f32 %v1386_v6, %v777_v33  ;;  %v1109_v41 = vadd.f32 %v1108_v37, %v1107_v34  ;;  %v1110_v42 = vpop.f32.mrb[10].mxu1  ;;  %v1059_v43 = vpop.f32.mrb[11].mxu0 }
 0x10e   : > { %v1060_v44 = vadd.f32 %v1059_v43, %v1058_v38  ;;  %v1111_v45 = vpop.f32.mrb[11].mxu1 }
 0x10f   : > { %v1017_v46 = vpack.c.bf16 %v807_v39, %v807_v39  ;;  %v808_v47 = vmax.f32 %v796_v40, 0.0  ;;  %v737_v48 = vadd.f32 %v1109_v41, %v1057_v36  ;;  %v1112_v49 = vadd.f32 %v1111_v45, %v1110_v42 }
 0x111   : > { %868 = vst.msk [vmem:[%s1396_s20 + $0x8] sm:$0xf] %vm865_vm0, %v1017_v46  ;;  %v1018_v50 = vpack.c.bf16 %v808_v47, %v808_v47  ;;  %v778_v51 = vmul.f32 %v1381_v1, %v737_v48  ;;  %v740_v52 = vadd.f32 %v1112_v49, %v1060_v44 }
 0x112   : > { %v1061_v53 = vpop.f32.mrb[12].mxu0 }
 0x113   : > { %869 = vst.msk [vmem:[%s1396_s20 + $0xc] sm:$0xf] %vm865_vm0, %v1018_v50  ;;  %v797_v54 = vadd.f32 %v1386_v6, %v778_v51  ;;  %v779_v55 = vmul.f32 %v1381_v1, %v740_v52  ;;  %v1113_v56 = vpop.f32.mrb[12].mxu1  ;;  %v1062_v57 = vpop.f32.mrb[13].mxu0 }
 0x114   : > { %v1063_v58 = vadd.f32 %v1062_v57, %v1061_v53  ;;  %v1114_v59 = vpop.f32.mrb[13].mxu1  ;;  %v1064_v60 = vpop.f32.mrb[14].mxu0 }
 0x115   : > { %v809_v61 = vmax.f32 %v797_v54, 0.0  ;;  %v798_v62 = vadd.f32 %v1386_v6, %v779_v55  ;;  %v1115_v63 = vadd.f32 %v1114_v59, %v1113_v56  ;;  %v1116_v0 = vpop.f32.mrb[14].mxu1  ;;  %v1065_v2 = vpop.f32.mrb[15].mxu0 }
 0x116   : > { %v1066_v3 = vadd.f32 %v1065_v2, %v1064_v60  ;;  %v1117_v4 = vpop.f32.mrb[15].mxu1 }
 0x117   : > { %v1019_v5 = vpack.c.bf16 %v809_v61, %v809_v61  ;;  %v810_v7 = vmax.f32 %v798_v62, 0.0  ;;  %v745_v8 = vadd.f32 %v1115_v63, %v1063_v58  ;;  %v1118_v9 = vadd.f32 %v1117_v4, %v1116_v0 }
 0x119   : > { %870 = vst.msk [vmem:[%s1396_s20 + $0x10] sm:$0xf] %vm865_vm0, %v1019_v5  ;;  %v1020_v10 = vpack.c.bf16 %v810_v7, %v810_v7  ;;  %v780_v11 = vmul.f32 %v1381_v1, %v745_v8  ;;  %v748_v12 = vadd.f32 %v1118_v9, %v1066_v3 }
 0x11a   : > { %v1067_v13 = vpop.f32.mrb[16].mxu0 }
 0x11b   : > { %871 = vst.msk [vmem:[%s1396_s20 + $0x14] sm:$0xf] %vm865_vm0, %v1020_v10  ;;  %v799_v14 = vadd.f32 %v1386_v6, %v780_v11  ;;  %v781_v15 = vmul.f32 %v1381_v1, %v748_v12  ;;  %v1119_v16 = vpop.f32.mrb[16].mxu1  ;;  %v1068_v17 = vpop.f32.mrb[17].mxu0 }
 0x11c   : > { %v1069_v18 = vadd.f32 %v1068_v17, %v1067_v13  ;;  %v1120_v19 = vpop.f32.mrb[17].mxu1  ;;  %v1070_v20 = vpop.f32.mrb[18].mxu0 }
 0x11d   : > { %v811_v21 = vmax.f32 %v799_v14, 0.0  ;;  %v800_v22 = vadd.f32 %v1386_v6, %v781_v15  ;;  %v1121_v23 = vadd.f32 %v1120_v19, %v1119_v16  ;;  %v1122_v24 = vpop.f32.mrb[18].mxu1  ;;  %v1071_v25 = vpop.f32.mrb[19].mxu0 }
 0x11e   : > { %v1072_v26 = vadd.f32 %v1071_v25, %v1070_v20  ;;  %v1123_v27 = vpop.f32.mrb[19].mxu1 }
 0x11f   : > { %v1021_v28 = vpack.c.bf16 %v811_v21, %v811_v21  ;;  %v812_v29 = vmax.f32 %v800_v22, 0.0  ;;  %v753_v30 = vadd.f32 %v1121_v23, %v1069_v18  ;;  %v1124_v31 = vadd.f32 %v1123_v27, %v1122_v24 }
 0x121   : > { %872 = vst.msk [vmem:[%s1396_s20 + $0x18] sm:$0xf] %vm865_vm0, %v1021_v28  ;;  %v1022_v32 = vpack.c.bf16 %v812_v29, %v812_v29  ;;  %v782_v33 = vmul.f32 %v1381_v1, %v753_v30  ;;  %v756_v34 = vadd.f32 %v1124_v31, %v1072_v26 }
 0x122   : > { %v1073_v35 = vpop.f32.mrb[20].mxu0 }
 0x123   : > { %873 = vst.msk [vmem:[%s1396_s20 + $0x1c] sm:$0xf] %vm865_vm0, %v1022_v32  ;;  %v801_v36 = vadd.f32 %v1386_v6, %v782_v33  ;;  %v783_v37 = vmul.f32 %v1381_v1, %v756_v34  ;;  %v1125_v38 = vpop.f32.mrb[20].mxu1  ;;  %v1074_v39 = vpop.f32.mrb[21].mxu0 }
 0x124   : > { %v1075_v40 = vadd.f32 %v1074_v39, %v1073_v35  ;;  %v1126_v41 = vpop.f32.mrb[21].mxu1  ;;  %v1076_v42 = vpop.f32.mrb[22].mxu0 }
 0x125   : > { %v813_v43 = vmax.f32 %v801_v36, 0.0  ;;  %v802_v44 = vadd.f32 %v1386_v6, %v783_v37  ;;  %v1127_v45 = vadd.f32 %v1126_v41, %v1125_v38  ;;  %v1128_v46 = vpop.f32.mrb[22].mxu1  ;;  %v1077_v47 = vpop.f32.mrb[23].mxu0 }
 0x126   : > { %v1078_v48 = vadd.f32 %v1077_v47, %v1076_v42  ;;  %v1129_v49 = vpop.f32.mrb[23].mxu1 }
 0x127   : > { %v1023_v50 = vpack.c.bf16 %v813_v43, %v813_v43  ;;  %v814_v51 = vmax.f32 %v802_v44, 0.0  ;;  %v761_v52 = vadd.f32 %v1127_v45, %v1075_v40  ;;  %v1130_v53 = vadd.f32 %v1129_v49, %v1128_v46 }
 0x129   : > { %874 = vst.msk [vmem:[%s1396_s20 + $0x20] sm:$0xf] %vm865_vm0, %v1023_v50  ;;  %v1024_v54 = vpack.c.bf16 %v814_v51, %v814_v51  ;;  %v784_v55 = vmul.f32 %v1381_v1, %v761_v52  ;;  %v764_v56 = vadd.f32 %v1130_v53, %v1078_v48 }
 0x12b   : > { %875 = vst.msk [vmem:[%s1396_s20 + $0x24] sm:$0xf] %vm865_vm0, %v1024_v54  ;;  %v803_v57 = vadd.f32 %v1386_v6, %v784_v55  ;;  %v785_v58 = vmul.f32 %v1381_v1, %v764_v56 }
 0x12d   : > { %v815_v59 = vmax.f32 %v803_v57, 0.0  ;;  %v804_v60 = vadd.f32 %v1386_v6, %v785_v58 }
 0x12f   : > { %v1025_v61 = vpack.c.bf16 %v815_v59, %v815_v59  ;;  %v816_v62 = vmax.f32 %v804_v60, 0.0 }
 0x131   : > { %876 = vst.msk [vmem:[%s1396_s20 + $0x28] sm:$0xf] %vm865_vm0, %v1025_v61  ;;  %v1026_v63 = vpack.c.bf16 %v816_v62, %v816_v62 }
 0x133   : > { %877 = vst.msk [vmem:[%s1396_s20 + $0x2c] sm:$0xf] %vm865_vm0, %v1026_v63 }
 0x134 PF: > { %s14_s15 = sadd.s32 1, %s1213_s15  }
 0x135   : > { %p11_p4 = scmp.ge.s32.totalorder %s14_s15, 4  }
 0x137   :  { %13 = sbr.rel (!%p11_p4) target bundleno = 1 (0x1), region = 66 }

// kernel: dqn_forward.6
= control target key start
LH: loop header
LB: loop body
LE: loop exit
PB: predicated region body
PF: predicated region fallthrough
CT: control target
= control target key end

     0   :  { %s1267_s15 = smov 0   ;;  %s1434_s0 = inlined_call_operand.vmem [shape: bf16[128,576], index: 0, kind: input, shape index: {}]   ;;  %s1435_s1 = inlined_call_operand.vmem [shape: bf16[576,64], index: 1, kind: input, shape index: {}]   ;;  %s1436_s2 = inlined_call_operand.vmem [shape: f32[1,64], index: 2, kind: input, shape index: {}]   ;;  %s1437_s3 = inlined_call_operand.vmem [shape: f32[1,64], index: 3, kind: input, shape index: {}]   ;;  %s1438_s4 = inlined_call_operand.vmem [shape: bf16[128,64], index: 4, kind: output, shape index: {}]  }
   0x1 LB: > { %s960_s16 = sadd.s32 4294967295, %s1240_s15   ;;  %p964_p0 = scmp.ge.s32.totalorder %s1240_s15, 1  ;;  %s1240_s15 = sphi %s1267_s15, %s14_s15  }
   0x2   : > { %p164_p1 = scmp.lt.s32.totalorder %s1240_s15, 3 }
   0x4   : > { %p165_p2 = pnand %p964_p0, %p164_p1 }
   0x5   : > { %v1170_v0 = vld [vmem:[%s1435_s1 + $0x40] sm:$0xff] (!%p165_p2)   ;;  %v1174_v4 = vld [vmem:[%s1435_s1 + $0x48] sm:$0xff] (!%p165_p2)   ;;  %v1178_v8 = vld [vmem:[%s1435_s1 + $0x50] sm:$0xff] (!%p165_p2)   ;;  %s965_s23 = sshll.u32 (!%p165_p2), %s960_s16, 3  ;;  %vm617_vm0 = vcmask (!%p165_p2), 523264   ;;  %vm895_vm1 = vcmask (!%p165_p2), 519168  }
   0x6   : > { %168 = sbr.rel (%p165_p2) target bundleno = 298 (0x12a), region = 36  ;;  %v1171_v1 = vld [vmem:[%s1435_s1 + $0xc0] sm:$0xff] (!%p165_p2)   ;;  %1049 = vmatprep.subr.bf16.mxu0 (!%p165_p2), %v1170_v0  ;;  %v1175_v5 = vld [vmem:[%s1435_s1 + $0xc8] sm:$0xff] (!%p165_p2)   ;;  %v1179_v9 = vld [vmem:[%s1435_s1 + $0xd0] sm:$0xff] (!%p165_p2)   ;;  %p192_p3 = scmp.lt.s32.totalorder (!%p165_p2), %s965_s23, 15 }
   0x7   : > { %v1172_v2 = vld [vmem:[%s1435_s1] sm:$0xff] (!%p165_p2)   ;;  %1089 = vmatprep.subr.bf16.mxu1 (!%p165_p2), %v1171_v1  ;;  %v1176_v6 = vld [vmem:[%s1435_s1 + $0x8] sm:$0xff] (!%p165_p2)   ;;  %v1180_v10 = vld [vmem:[%s1435_s1 + $0x10] sm:$0xff] (!%p165_p2)  }
   0x8   : > { %v1173_v3 = vld [vmem:[%s1435_s1 + $0x80] sm:$0xff] (!%p165_p2)   ;;  %1050 = vmatpush3.bf16.msra.mxu0 (!%p165_p2), %v1172_v2  ;;  %v1177_v7 = vld [vmem:[%s1435_s1 + $0x88] sm:$0xff] (!%p165_p2)   ;;  %v1181_v11 = vld [vmem:[%s1435_s1 + $0x90] sm:$0xff] (!%p165_p2)  }
   0x9   : > { %1090 = vmatpush3.bf16.msra.mxu1 (!%p165_p2), %v1173_v3  ;;  %1051 = vmatprep.subr.bf16.mxu0 (!%p165_p2), %v1174_v4  ;;  %v1182_v12 = vld [vmem:[%s1435_s1 + $0x58] sm:$0xff] (!%p165_p2)   ;;  %v1186_v16 = vld [vmem:[%s1435_s1 + $0x60] sm:$0xff] (!%p165_p2)   ;;  %v1190_v20 = vld [vmem:[%s1435_s1 + $0x68] sm:$0xff] (!%p165_p2)  }
   0xa   : > { %1091 = vmatprep.subr.bf16.mxu1 (!%p165_p2), %v1175_v5  ;;  %v1183_v13 = vld [vmem:[%s1435_s1 + $0xd8] sm:$0xff] (!%p165_p2)   ;;  %v1187_v17 = vld [vmem:[%s1435_s1 + $0xe0] sm:$0xff] (!%p165_p2)   ;;  %v1191_v21 = vld [vmem:[%s1435_s1 + $0xe8] sm:$0xff] (!%p165_p2)  }
   0xb   : > { %v1184_v14 = vld [vmem:[%s1435_s1 + $0x18] sm:$0xff] (!%p165_p2)   ;;  %v1188_v18 = vld [vmem:[%s1435_s1 + $0x20] sm:$0xff] (!%p165_p2)   ;;  %v1192_v22 = vld [vmem:[%s1435_s1 + $0x28] sm:$0xff] (!%p165_p2)  }
   0xc   : > { %1052 = vmatpush3.bf16.msra.mxu0 (!%p165_p2), %v1176_v6  ;;  %v1185_v15 = vld [vmem:[%s1435_s1 + $0x98] sm:$0xff] (!%p165_p2)   ;;  %v1189_v19 = vld [vmem:[%s1435_s1 + $0xa0] sm:$0xff] (!%p165_p2)   ;;  %v1193_v23 = vld [vmem:[%s1435_s1 + $0xa8] sm:$0xff] (!%p165_p2)  }
   0xd   : > { %1092 = vmatpush3.bf16.msra.mxu1 %v1177_v7  ;;  %1053 = vmatprep.subr.bf16.mxu0 %v1178_v8  ;;  %s1440_s23 = smov (!%p192_p3, %s965_s23), 15  ;;  %v1194_v24 = vld [vmem:[%s1435_s1 + $0x70] sm:$0xff]   ;;  %v1198_v28 = vld [vmem:[%s1435_s1 + $0x78] sm:$0xff]   ;;  %v1208_v36 = vld [vmem:[%s1435_s1 + $0x100] sm:$0xff]  }
   0xe   : > { %1093 = vmatprep.subr.bf16.mxu1 %v1179_v9  ;;  %v1195_v25 = vld [vmem:[%s1435_s1 + $0xf0] sm:$0xff]   ;;  %s1161_s21 = smul.u32 20, %s1440_s23  ;;  %v1199_v29 = vld [vmem:[%s1435_s1 + $0xf8] sm:$0xff]   ;;  %v1215_v39 = vld [vmem:[%s1435_s1 + $0x108] sm:$0xff]   ;;  %s968_s26 = sshll.u32 %s1440_s23, 2 }
   0xf   : > { %v1196_v26 = vld [vmem:[%s1435_s1 + $0x30] sm:$0xff]   ;;  %v1200_v30 = vld [vmem:[%s1435_s1 + $0x38] sm:$0xff]   ;;  %s202_s29 = scalar_lea.vmem %s1438_s4, %s968_s26 }
  0x10   : > { %1054 = vmatpush3.bf16.msra.mxu0 %v1180_v10  ;;  %v1197_v27 = vld [vmem:[%s1435_s1 + $0xb0] sm:$0xff]   ;;  %s1373_s6 = scalar_lea.vmem %s1434_s0, %s1161_s21  ;;  %v1201_v31 = vld [vmem:[%s1435_s1 + $0xb8] sm:$0xff]  }
  0x11   : > { %1094 = vmatpush3.bf16.msra.mxu1 %v1181_v11  ;;  %1055 = vmatprep.subr.bf16.mxu0 %v1182_v12  ;;  %v1202_v32 = vld [vmem:[%s1373_s6] ss:$20 sps:$4 sm:$0xff]   ;;  %v1204_v33 = vld [vmem:[%s1373_s6 + $0x4] ss:$20 sps:$4 sm:$0xff]   ;;  %v1205_v34 = vld [vmem:[%s1373_s6 + $0x8] ss:$20 sps:$4 sm:$0xff]  }
  0x12   : > { %1095 = vmatprep.subr.bf16.mxu1 %v1183_v13  ;;  %v1207_v35 = vld [vmem:[%s1373_s6 + $0xc] ss:$20 sps:$4 sm:$0xff]   ;;  %662 = vmatprep.mubr.bf16.mxu0 %v1204_v33  ;;  %v1211_v38 = vld [vmem:[%s1373_s6 + $0x34] ss:$20 sps:$4 sm:$0xff]   ;;  %v1214_v41 = vld [vmem:[%s1373_s6 + $0x30] ss:$20 sps:$4 sm:$0xff]  }
  0x13   : > { %727 = vmatprep.mubr.bf16.mxu1 %v1207_v35  ;;  %v1209_v37 = vld [vmem:[%s1373_s6 + $0x2c] ss:$20 sps:$4 sm:$0xff]   ;;  %v1213_v40 = vld [vmem:[%s1373_s6 + $0x28] ss:$20 sps:$4 sm:$0xff]   ;;  %v1222_v44 = vld [vmem:[%s1435_s1 + $0x110] sm:$0xff]  }
  0x14   : > { %1056 = vmatpush3.bf16.msra.mxu0 %v1184_v14  ;;  %v1216_v42 = vld [vmem:[%s1373_s6 + $0x54] ss:$20 sps:$4 sm:$0xff]   ;;  %v1218_v43 = vld [vmem:[%s1373_s6 + $0x5c] ss:$20 sps:$4 sm:$0xff]   ;;  %v1221_v47 = vld [vmem:[%s1373_s6 + $0x58] ss:$20 sps:$4 sm:$0xff]  }
  0x15   : > { %1096 = vmatpush3.bf16.msra.mxu1 %v1185_v15  ;;  %1057 = vmatprep.subr.bf16.mxu0 %v1186_v16  ;;  %v1229_v45 = vld [vmem:[%s1435_s1 + $0x118] sm:$0xff]   ;;  %v1220_v46 = vld [vmem:[%s1373_s6 + $0x50] ss:$20 sps:$4 sm:$0xff]   ;;  %v1228_v51 = vld [vmem:[%s1373_s6 + $0x80] ss:$20 sps:$4 sm:$0xff]  }
  0x16   : > { %1097 = vmatprep.subr.bf16.mxu1 %v1187_v17  ;;  %v1223_v48 = vld [vmem:[%s1373_s6 + $0x7c] ss:$20 sps:$4 sm:$0xff]   ;;  %v1225_v49 = vld [vmem:[%s1373_s6 + $0x84] ss:$20 sps:$4 sm:$0xff]   ;;  %v1231_v53 = vld [vmem:[%s1373_s6 + $0x60] ss:$20 sps:$4 sm:$0xff]  }
  0x17   : > { %v1227_v50 = vld [vmem:[%s1373_s6 + $0x78] ss:$20 sps:$4 sm:$0xff]   ;;  %v1230_v52 = vld [vmem:[%s1373_s6 + $0x10] ss:$20 sps:$4 sm:$0xff]   ;;  %v1233_v55 = vld [vmem:[%s1373_s6 + $0x88] ss:$20 sps:$4 sm:$0xff]  }
  0x18   : > { %1058 = vmatpush3.bf16.msra.mxu0 %v1188_v18  ;;  %v1232_v54 = vld [vmem:[%s1373_s6 + $0x38] ss:$20 sps:$4 sm:$0xff]  }
  0x19   : > { %1098 = vmatpush3.bf16.msra.mxu1 %v1189_v19  ;;  %1059 = vmatprep.subr.bf16.mxu0 %v1190_v20 }
  0x1a   : > { %1099 = vmatprep.subr.bf16.mxu1 %v1191_v21 }
  0x1c   : > { %1060 = vmatpush3.bf16.msra.mxu0 %v1192_v22 }
  0x1d   : > { %1100 = vmatpush3.bf16.msra.mxu1 %v1193_v23  ;;  %1061 = vmatprep.subr.bf16.mxu0 %v1194_v24 }
  0x1e   : > { %1101 = vmatprep.subr.bf16.mxu1 %v1195_v25 }
  0x20   : > { %1062 = vmatpush3.bf16.msra.mxu0 %v1196_v26 }
  0x21   : > { %1102 = vmatpush3.bf16.msra.mxu1 %v1197_v27  ;;  %1063 = vmatprep.subr.bf16.mxu0 %v1198_v28 }
  0x22   : > { %1103 = vmatprep.subr.bf16.mxu1 %v1199_v29 }
  0x24   : > { %1064 = vmatpush3.bf16.msra.mxu0 %v1200_v30 }
  0x25   : > { %1104 = vmatpush3.bf16.msra.mxu1 %v1201_v31  ;;  %1137 = vmatprep.subr.bf16.mxu0 %v1208_v36 }
  0x26   : > { %1153 = vmatprep.subr.bf16.mxu1 %v1208_v36 }
  0x27   : > { %663 = vmatmul.mubr.bf16.vlgmr.msra.gmra.mrb[0].mxu0 %v1202_v32 }
  0x28   : > { %728 = vmatmul.mubr.bf16.vlgmr.msra.gmra.mrb[0].mxu1 %v1205_v34  ;;  %1138 = vmatpush3.bf16.msra.mxu0 %v1208_v36 }
  0x29   : > { %1157 = vmatpush3.bf16.msra.mxu1 %v1208_v36  ;;  %670 = vmatprep.mubr.bf16.mxu0 %v1209_v37 }
  0x2a   : > { %735 = vmatprep.mubr.bf16.mxu1 %v1211_v38  ;;  %1139 = vmatprep.subr.bf16.mxu0 %v1215_v39 }
  0x2b   : > { %1154 = vmatprep.subr.bf16.mxu1 %v1215_v39 }
  0x2c   : > { %1140 = vmatpush3.bf16.msra.mxu0 %v1215_v39 }
  0x2d   : > { %1158 = vmatpush3.bf16.msra.mxu1 %v1215_v39  ;;  %1141 = vmatprep.subr.bf16.mxu0 %v1222_v44 }
  0x2e   : > { %1155 = vmatprep.subr.bf16.mxu1 %v1222_v44 }
  0x2f   : > { %671 = vmatmul.mubr.bf16.gmra.mrb[4].mxu0 %v1213_v40 }
  0x30   : > { %736 = vmatmul.mubr.bf16.gmra.mrb[4].mxu1 %v1214_v41  ;;  %678 = vmatprep.mubr.bf16.mxu0 %v1216_v42 }
  0x31   : > { %743 = vmatprep.mubr.bf16.mxu1 %v1218_v43  ;;  %1142 = vmatpush3.bf16.msra.mxu0 %v1222_v44 }
  0x32   : > { %1159 = vmatpush3.bf16.msra.mxu1 %v1222_v44  ;;  %1143 = vmatprep.subr.bf16.mxu0 %v1229_v45 }
  0x33   : > { %1156 = vmatprep.subr.bf16.mxu1 %v1229_v45 }
  0x35   : > { %1144 = vmatpush3.bf16.msra.mxu0 %v1229_v45 }
  0x36   : > { %1160 = vmatpush3.bf16.msra.mxu1 %v1229_v45 }
  0x37   : > { %679 = vmatmul.mubr.bf16.gmra.mrb[8].mxu0 %v1220_v46 }
  0x38   : > { %744 = vmatmul.mubr.bf16.gmra.mrb[8].mxu1 %v1221_v47  ;;  %686 = vmatprep.mubr.bf16.mxu0 %v1223_v48 }
  0x39   : > { %751 = vmatprep.mubr.bf16.mxu1 %v1225_v49  ;;  %v1029_v49 = vld [vmem:[%s1436_s2] ss:$0 sm:$0xff] }
  0x3f   : > { %687 = vmatmul.mubr.bf16.gmra.mrb[12].mxu0 %v1227_v50 }
  0x40   : > { %752 = vmatmul.mubr.bf16.gmra.mrb[12].mxu1 %v1228_v51  ;;  %1145 = vmatprep.mubr.msk.bf16.mxu0 %vm617_vm0, %v1230_v52 }
  0x41   : > { %1149 = vmatprep.mubr.msk.bf16.mxu1 %vm617_vm0, %v1231_v53  ;;  %v1030_v53 = vld [vmem:[%s1437_s3] ss:$0 sm:$0xff] }
  0x47   : > { %1146 = vmatmul.mubr.msk.bf16.vlgmr.msra.gmra.mrb[16].mxu0 %vm617_vm0, %v1232_v54 }
  0x48   : > { %1150 = vmatmul.mubr.msk.bf16.vlgmr.msra.gmra.mrb[16].mxu1 %vm617_vm0, %v1233_v55 }
  0xfa   : > { %v1065_v56 = vpop.f32.mrb[0].mxu0 }
  0xfb   : > { %v1105_v57 = vpop.f32.mrb[0].mxu1  ;;  %v1066_v58 = vpop.f32.mrb[1].mxu0 }
  0xfc   : > { %v1067_v59 = vadd.f32 %v1066_v58, %v1065_v56  ;;  %v1106_v60 = vpop.f32.mrb[1].mxu1  ;;  %v1068_v61 = vpop.f32.mrb[2].mxu0 }
  0xfd   : > { %v1107_v62 = vadd.f32 %v1106_v60, %v1105_v57  ;;  %v1108_v63 = vpop.f32.mrb[2].mxu1  ;;  %v1069_v0 = vpop.f32.mrb[3].mxu0 }
  0xfe   : > { %v1070_v1 = vadd.f32 %v1069_v0, %v1068_v61  ;;  %v1109_v2 = vpop.f32.mrb[3].mxu1 }
  0xff   : > { %v1110_v3 = vadd.f32 %v1109_v2, %v1108_v63  ;;  %v730_v4 = vadd.f32 %v1107_v62, %v1067_v59 }
 0x101   : > { %v733_v5 = vadd.f32 %v1110_v3, %v1070_v1 }
 0x102   : > { %v1071_v6 = vpop.f32.mrb[4].mxu0 }
 0x103   : > { %v1111_v7 = vpop.f32.mrb[4].mxu1  ;;  %v1072_v8 = vpop.f32.mrb[5].mxu0 }
 0x104   : > { %v1073_v9 = vadd.f32 %v1072_v8, %v1071_v6  ;;  %v1112_v10 = vpop.f32.mrb[5].mxu1  ;;  %v1074_v11 = vpop.f32.mrb[6].mxu0 }
 0x105   : > { %v1113_v12 = vadd.f32 %v1112_v10, %v1111_v7  ;;  %v1114_v13 = vpop.f32.mrb[6].mxu1  ;;  %v1075_v14 = vpop.f32.mrb[7].mxu0 }
 0x106   : > { %v1076_v15 = vadd.f32 %v1075_v14, %v1074_v11  ;;  %v1115_v16 = vpop.f32.mrb[7].mxu1 }
 0x107   : > { %v1116_v17 = vadd.f32 %v1115_v16, %v1114_v13  ;;  %v738_v18 = vadd.f32 %v1113_v12, %v1073_v9 }
 0x109   : > { %v741_v19 = vadd.f32 %v1116_v17, %v1076_v15 }
 0x10a   : > { %v1077_v20 = vpop.f32.mrb[8].mxu0 }
 0x10b   : > { %v1117_v21 = vpop.f32.mrb[8].mxu1  ;;  %v1078_v22 = vpop.f32.mrb[9].mxu0 }
 0x10c   : > { %v1079_v23 = vadd.f32 %v1078_v22, %v1077_v20  ;;  %v1118_v24 = vpop.f32.mrb[9].mxu1  ;;  %v1080_v25 = vpop.f32.mrb[10].mxu0 }
 0x10d   : > { %v1119_v26 = vadd.f32 %v1118_v24, %v1117_v21  ;;  %v1120_v27 = vpop.f32.mrb[10].mxu1  ;;  %v1081_v28 = vpop.f32.mrb[11].mxu0 }
 0x10e   : > { %v1082_v29 = vadd.f32 %v1081_v28, %v1080_v25  ;;  %v1121_v30 = vpop.f32.mrb[11].mxu1 }
 0x10f   : > { %v1122_v31 = vadd.f32 %v1121_v30, %v1120_v27  ;;  %v746_v32 = vadd.f32 %v1119_v26, %v1079_v23 }
 0x111   : > { %v749_v33 = vadd.f32 %v1122_v31, %v1082_v29 }
 0x112   : > { %v1083_v34 = vpop.f32.mrb[12].mxu0 }
 0x113   : > { %v1123_v35 = vpop.f32.mrb[12].mxu1  ;;  %v1084_v36 = vpop.f32.mrb[13].mxu0 }
 0x114   : > { %v1085_v37 = vadd.f32 %v1084_v36, %v1083_v34  ;;  %v1124_v38 = vpop.f32.mrb[13].mxu1  ;;  %v1086_v39 = vpop.f32.mrb[14].mxu0 }
 0x115   : > { %v1125_v40 = vadd.f32 %v1124_v38, %v1123_v35  ;;  %v1126_v41 = vpop.f32.mrb[14].mxu1  ;;  %v1087_v42 = vpop.f32.mrb[15].mxu0 }
 0x116   : > { %v1088_v43 = vadd.f32 %v1087_v42, %v1086_v39  ;;  %v1127_v44 = vpop.f32.mrb[15].mxu1 }
 0x117   : > { %v1128_v45 = vadd.f32 %v1127_v44, %v1126_v41  ;;  %v754_v46 = vadd.f32 %v1125_v40, %v1085_v37 }
 0x119   : > { %v757_v47 = vadd.f32 %v1128_v45, %v1088_v43 }
 0x11a   : > { %v1147_v48 = vpop.f32.mrb[16].mxu0 }
 0x11b   : > { %v803_v50 = vadd.f32 %v1147_v48, %v738_v18  ;;  %v1151_v51 = vpop.f32.mrb[16].mxu1  ;;  %v794_v52 = vpop.f32.mrb[17].mxu0 }
 0x11c   : > { %v819_v54 = vadd.f32 %v1151_v51, %v754_v46  ;;  %v795_v55 = vadd.f32 %v794_v52, %v730_v4  ;;  %v810_v56 = vpop.f32.mrb[17].mxu1  ;;  %v1148_v57 = vpop.f32.mrb[18].mxu0 }
 0x11d   : > { %v834_v58 = vmul.f32 %v1029_v49, %v803_v50  ;;  %v811_v59 = vadd.f32 %v810_v56, %v746_v32  ;;  %v806_v60 = vadd.f32 %v1148_v57, %v741_v19  ;;  %v1152_v61 = vpop.f32.mrb[18].mxu1  ;;  %v797_v62 = vpop.f32.mrb[19].mxu0 }
 0x11e   : > { %v838_v63 = vmul.f32 %v1029_v49, %v819_v54  ;;  %v832_v0 = vmul.f32 %v1029_v49, %v795_v55  ;;  %v822_v1 = vadd.f32 %v1152_v61, %v757_v47  ;;  %v798_v2 = vadd.f32 %v797_v62, %v733_v5  ;;  %v813_v3 = vpop.f32.mrb[19].mxu1 }
 0x11f   : > { %v849_v6 = vadd.f32 %v1030_v53, %v834_v58  ;;  %v836_v7 = vmul.f32 %v1029_v49, %v811_v59  ;;  %v835_v8 = vmul.f32 %v1029_v49, %v806_v60  ;;  %v814_v9 = vadd.f32 %v813_v3, %v749_v33 }
 0x120   : > { %v853_v10 = vadd.f32 %v1030_v53, %v838_v63  ;;  %v847_v4 = vadd.f32 %v1030_v53, %v832_v0  ;;  %v839_v11 = vmul.f32 %v1029_v49, %v822_v1  ;;  %v833_v12 = vmul.f32 %v1029_v49, %v798_v2 }
 0x121   : > { %v857_v13 = vmax.f32 %v849_v6, 0.0  ;;  %v851_v14 = vadd.f32 %v1030_v53, %v836_v7  ;;  %v850_v15 = vadd.f32 %v1030_v53, %v835_v8  ;;  %v837_v16 = vmul.f32 %v1029_v49, %v814_v9 }
 0x122   : > { %v861_v17 = vmax.f32 %v853_v10, 0.0  ;;  %v855_v5 = vmax.f32 %v847_v4, 0.0  ;;  %v854_v18 = vadd.f32 %v1030_v53, %v839_v11  ;;  %v848_v19 = vadd.f32 %v1030_v53, %v833_v12 }
 0x123   : > { %v1043_v20 = vpack.c.bf16 %v857_v13, %v857_v13  ;;  %v859_v21 = vmax.f32 %v851_v14, 0.0  ;;  %v858_v22 = vmax.f32 %v850_v15, 0.0  ;;  %v852_v23 = vadd.f32 %v1030_v53, %v837_v16 }
 0x124   : > { %v1047_v24 = vpack.c.bf16 %v861_v17, %v861_v17  ;;  %v1041_v25 = vpack.c.bf16 %v855_v5, %v855_v5  ;;  %v862_v26 = vmax.f32 %v854_v18, 0.0  ;;  %v856_v27 = vmax.f32 %v848_v19, 0.0 }
 0x125   : > { %898 = vst.msk [vmem:[%s202_s29 + $0x8] sm:$0xf] %vm895_vm1, %v1043_v20  ;;  %v1045_v28 = vpack.c.bf16 %v859_v21, %v859_v21  ;;  %v1044_v29 = vpack.c.bf16 %v858_v22, %v858_v22  ;;  %v860_v30 = vmax.f32 %v852_v23, 0.0 }
 0x126   : > { %902 = vst.msk [vmem:[%s202_s29 + $0x18] sm:$0xf] %vm895_vm1, %v1047_v24  ;;  %896 = vst.msk [vmem:[%s202_s29] sm:$0xf] %vm895_vm1, %v1041_v25  ;;  %v1048_v31 = vpack.c.bf16 %v862_v26, %v862_v26  ;;  %v1042_v32 = vpack.c.bf16 %v856_v27, %v856_v27 }
 0x127   : > { %900 = vst.msk [vmem:[%s202_s29 + $0x10] sm:$0xf] %vm895_vm1, %v1045_v28  ;;  %899 = vst.msk [vmem:[%s202_s29 + $0xc] sm:$0xf] %vm895_vm1, %v1044_v29  ;;  %v1046_v33 = vpack.c.bf16 %v860_v30, %v860_v30 }
 0x128   : > { %903 = vst.msk [vmem:[%s202_s29 + $0x1c] sm:$0xf] %vm895_vm1, %v1048_v31  ;;  %897 = vst.msk [vmem:[%s202_s29 + $0x4] sm:$0xf] %vm895_vm1, %v1042_v32 }
 0x129   : > { %901 = vst.msk [vmem:[%s202_s29 + $0x14] sm:$0xf] %vm895_vm1, %v1046_v33 }
 0x12a PF: > { %s14_s15 = sadd.s32 1, %s1240_s15  }
 0x12b   : > { %p11_p4 = scmp.ge.s32.totalorder %s14_s15, 4  }
 0x12d   :  { %13 = sbr.rel (!%p11_p4) target bundleno = 1 (0x1), region = 66 }

// kernel: dqn_forward.7
= control target key start
LH: loop header
LB: loop body
LE: loop exit
PB: predicated region body
PF: predicated region fallthrough
CT: control target
= control target key end

     0   :  { %vm9622_vm0 = vcmask 523264   ;;  %vm12581_vm1 = vcmask 31744   ;;  %s19811_s1 = inlined_call_operand.vmem [shape: bf16[3136,1024], index: 1, kind: input, shape index: {}]   ;;  %s19812_s0 = inlined_call_operand.vmem [shape: bf16[16,3136], index: 0, kind: input, shape index: {}]   ;;  %s19813_s2 = inlined_call_operand.vmem [shape: f32[1,1024], index: 2, kind: input, shape index: {}]   ;;  %s19814_s3 = inlined_call_operand.vmem [shape: bf16[1024,128], index: 3, kind: input, shape index: {}]   ;;  %s19815_s4 = inlined_call_operand.vmem [shape: f32[1,128], index: 4, kind: input, shape index: {}]   ;;  %s19816_s5 = inlined_call_operand.vmem [shape: f32[16,128], index: 5, kind: output, shape index: {}]  }
   0x1   :  { %v47_v0 = vld [vmem:[%s19811_s1] sm:$0xff]  ;;  %v48_v2 = vld [vmem:[%s19811_s1 + $0x8] sm:$0xff] }
   0x2   :  { %v51_v1 = vld [vmem:[%s19811_s1 + $0x20] sm:$0xff]  ;;  %v52_v4 = vld [vmem:[%s19811_s1 + $0x28] sm:$0xff] }
   0x3   :  { %v12625_v3 = vcombine.high %v47_v0, %v51_v1  ;;  %v12624_v5 = vcombine.low %v47_v0, %v51_v1  ;;  %v55_v6 = vld [vmem:[%s19811_s1 + $0x40] sm:$0xff]  ;;  %v12627_v8 = vcombine.high %v48_v2, %v52_v4  ;;  %v12626_v9 = vcombine.low %v48_v2, %v52_v4  ;;  %v56_v11 = vld [vmem:[%s19811_s1 + $0x48] sm:$0xff] }
   0x4   :  { %v59_v7 = vld [vmem:[%s19811_s1 + $0x60] sm:$0xff]  ;;  %v60_v12 = vld [vmem:[%s19811_s1 + $0x68] sm:$0xff] }
   0x5   :  { %v12633_v10 = vcombine.high %v55_v6, %v59_v7  ;;  %v63_v13 = vld [vmem:[%s19811_s1 + $0x80] sm:$0xff]  ;;  %9626 = vmatprep.subr.bf16.mxu0 %v12625_v3  ;;  %v12635_v14 = vcombine.high %v56_v11, %v60_v12  ;;  %v64_v16 = vld [vmem:[%s19811_s1 + $0x88] sm:$0xff]  ;;  %10185 = vmatprep.subr.bf16.mxu1 %v12627_v8  ;;  %v12632_v18 = vcombine.low %v55_v6, %v59_v7 }
   0x6   :  { %v67_v15 = vld [vmem:[%s19811_s1 + $0xa0] sm:$0xff]  ;;  %v68_v17 = vld [vmem:[%s19811_s1 + $0xa8] sm:$0xff]  ;;  %9627 = vmatpush1.bf16.msra.mxu0 %v12624_v5  ;;  %10186 = vmatpush1.bf16.msra.mxu1 %v12626_v9  ;;  %v12634_v19 = vcombine.low %v56_v11, %v60_v12 }
   0x7   :  { %9628 = vmatprep.subr.bf16.mxu0 %v12633_v10  ;;  %v12641_v20 = vcombine.high %v63_v13, %v67_v15  ;;  %10187 = vmatprep.subr.bf16.mxu1 %v12635_v14  ;;  %v12643_v21 = vcombine.high %v64_v16, %v68_v17  ;;  %v71_v22 = vld [vmem:[%s19811_s1 + $0xc0] sm:$0xff]  ;;  %v72_v24 = vld [vmem:[%s19811_s1 + $0xc8] sm:$0xff]  ;;  %v12640_v26 = vcombine.low %v63_v13, %v67_v15 }
   0x8   :  { %v75_v23 = vld [vmem:[%s19811_s1 + $0xe0] sm:$0xff]  ;;  %v76_v25 = vld [vmem:[%s19811_s1 + $0xe8] sm:$0xff]  ;;  %v12642_v27 = vcombine.low %v64_v16, %v68_v17 }
   0x9   :  { %v12649_v28 = vcombine.high %v71_v22, %v75_v23  ;;  %v12651_v29 = vcombine.high %v72_v24, %v76_v25  ;;  %v79_v30 = vld [vmem:[%s19811_s1 + $0x100] sm:$0xff]  ;;  %v80_v32 = vld [vmem:[%s19811_s1 + $0x108] sm:$0xff]  ;;  %v12648_v34 = vcombine.low %v71_v22, %v75_v23  ;;  %v12650_v35 = vcombine.low %v72_v24, %v76_v25 }
   0xa   :  { %9629 = vmatpush1.bf16.msra.mxu0 %v12632_v18  ;;  %10188 = vmatpush1.bf16.msra.mxu1 %v12634_v19  ;;  %v83_v31 = vld [vmem:[%s19811_s1 + $0x120] sm:$0xff]  ;;  %v84_v33 = vld [vmem:[%s19811_s1 + $0x128] sm:$0xff] }
   0xb   :  { %9630 = vmatprep.subr.bf16.mxu0 %v12641_v20  ;;  %10189 = vmatprep.subr.bf16.mxu1 %v12643_v21  ;;  %v12657_v36 = vcombine.high %v79_v30, %v83_v31  ;;  %v12659_v37 = vcombine.high %v80_v32, %v84_v33  ;;  %v87_v38 = vld [vmem:[%s19811_s1 + $0x140] sm:$0xff]  ;;  %v88_v40 = vld [vmem:[%s19811_s1 + $0x148] sm:$0xff]  ;;  %v12656_v42 = vcombine.low %v79_v30, %v83_v31 }
   0xc   :  { %v91_v39 = vld [vmem:[%s19811_s1 + $0x160] sm:$0xff]  ;;  %v92_v41 = vld [vmem:[%s19811_s1 + $0x168] sm:$0xff]  ;;  %v12658_v43 = vcombine.low %v80_v32, %v84_v33 }
   0xd   :  { %v12665_v44 = vcombine.high %v87_v38, %v91_v39  ;;  %v12667_v45 = vcombine.high %v88_v40, %v92_v41  ;;  %v95_v46 = vld [vmem:[%s19811_s1 + $0x180] sm:$0xff]  ;;  %v96_v48 = vld [vmem:[%s19811_s1 + $0x188] sm:$0xff]  ;;  %v12664_v50 = vcombine.low %v87_v38, %v91_v39  ;;  %v12666_v51 = vcombine.low %v88_v40, %v92_v41 }
   0xe   :  { %9631 = vmatpush1.bf16.msra.mxu0 %v12640_v26  ;;  %10190 = vmatpush1.bf16.msra.mxu1 %v12642_v27  ;;  %v99_v47 = vld [vmem:[%s19811_s1 + $0x1a0] sm:$0xff]  ;;  %v100_v49 = vld [vmem:[%s19811_s1 + $0x1a8] sm:$0xff] }
   0xf   :  { %9632 = vmatprep.subr.bf16.mxu0 %v12649_v28  ;;  %10191 = vmatprep.subr.bf16.mxu1 %v12651_v29  ;;  %v12673_v52 = vcombine.high %v95_v46, %v99_v47  ;;  %v12675_v53 = vcombine.high %v96_v48, %v100_v49  ;;  %v103_v54 = vld [vmem:[%s19811_s1 + $0x1c0] sm:$0xff]  ;;  %v104_v57 = vld [vmem:[%s19811_s1 + $0x1c8] sm:$0xff]  ;;  %v12672_v59 = vcombine.low %v95_v46, %v99_v47 }
  0x10   :  { %v107_v55 = vld [vmem:[%s19811_s1 + $0x1e0] sm:$0xff]  ;;  %v108_v58 = vld [vmem:[%s19811_s1 + $0x1e8] sm:$0xff]  ;;  %v12674_v60 = vcombine.low %v96_v48, %v100_v49 }
  0x11   :  { %v14561_v56 = vld [vmem:[%s19812_s0 + $0x4] ss:$100 sps:$4 sm:$0xff]   ;;  %v12681_v61 = vcombine.high %v103_v54, %v107_v55  ;;  %v12683_v62 = vcombine.high %v104_v57, %v108_v58  ;;  %v12680_v3 = vcombine.low %v103_v54, %v107_v55  ;;  %v12682_v4 = vcombine.low %v104_v57, %v108_v58 }
  0x12   :  { %9633 = vmatpush1.bf16.msra.mxu0 %v12648_v34  ;;  %10192 = vmatpush1.bf16.msra.mxu1 %v12650_v35  ;;  %v111_v63 = vld [vmem:[%s19811_s1 + $0x200] sm:$0xff]  ;;  %v112_v1 = vld [vmem:[%s19811_s1 + $0x208] sm:$0xff] }
  0x13   :  { %9634 = vmatprep.subr.bf16.mxu0 %v12657_v36  ;;  %10193 = vmatprep.subr.bf16.mxu1 %v12659_v37  ;;  %v115_v0 = vld [vmem:[%s19811_s1 + $0x220] sm:$0xff]  ;;  %v116_v2 = vld [vmem:[%s19811_s1 + $0x228] sm:$0xff] }
  0x14   :  { %9658 = vmatprep.mubr.bf16.mxu0 %v14561_v56  ;;  %10217 = vmatprep.mubr.bf16.mxu1 %v14561_v56  ;;  %v12689_v5 = vcombine.high %v111_v63, %v115_v0  ;;  %v12691_v6 = vcombine.high %v112_v1, %v116_v2  ;;  %v119_v7 = vld [vmem:[%s19811_s1 + $0x240] sm:$0xff]  ;;  %v120_v9 = vld [vmem:[%s19811_s1 + $0x248] sm:$0xff]  ;;  %v12688_v11 = vcombine.low %v111_v63, %v115_v0 }
  0x15   :  { %v123_v8 = vld [vmem:[%s19811_s1 + $0x260] sm:$0xff]  ;;  %v124_v10 = vld [vmem:[%s19811_s1 + $0x268] sm:$0xff]  ;;  %v12690_v12 = vcombine.low %v112_v1, %v116_v2 }
  0x16   :  { %9635 = vmatpush1.bf16.msra.mxu0 %v12656_v42  ;;  %10194 = vmatpush1.bf16.msra.mxu1 %v12658_v43  ;;  %v12697_v13 = vcombine.high %v119_v7, %v123_v8  ;;  %v12699_v14 = vcombine.high %v120_v9, %v124_v10  ;;  %v127_v15 = vld [vmem:[%s19811_s1 + $0x280] sm:$0xff]  ;;  %v128_v17 = vld [vmem:[%s19811_s1 + $0x288] sm:$0xff]  ;;  %v12696_v19 = vcombine.low %v119_v7, %v123_v8 }
  0x17   :  { %9636 = vmatprep.subr.bf16.mxu0 %v12665_v44  ;;  %10195 = vmatprep.subr.bf16.mxu1 %v12667_v45  ;;  %v131_v16 = vld [vmem:[%s19811_s1 + $0x2a0] sm:$0xff]  ;;  %v132_v18 = vld [vmem:[%s19811_s1 + $0x2a8] sm:$0xff]  ;;  %v12698_v20 = vcombine.low %v120_v9, %v124_v10 }
  0x18   :  { %v12705_v21 = vcombine.high %v127_v15, %v131_v16  ;;  %v12707_v22 = vcombine.high %v128_v17, %v132_v18  ;;  %v135_v23 = vld [vmem:[%s19811_s1 + $0x2c0] sm:$0xff]  ;;  %v136_v25 = vld [vmem:[%s19811_s1 + $0x2c8] sm:$0xff]  ;;  %v12704_v27 = vcombine.low %v127_v15, %v131_v16  ;;  %v12706_v28 = vcombine.low %v128_v17, %v132_v18 }
  0x19   :  { %v139_v24 = vld [vmem:[%s19811_s1 + $0x2e0] sm:$0xff]  ;;  %v140_v26 = vld [vmem:[%s19811_s1 + $0x2e8] sm:$0xff] }
  0x1a   :  { %9637 = vmatpush1.bf16.msra.mxu0 %v12664_v50  ;;  %10196 = vmatpush1.bf16.msra.mxu1 %v12666_v51  ;;  %v12713_v29 = vcombine.high %v135_v23, %v139_v24  ;;  %v12715_v30 = vcombine.high %v136_v25, %v140_v26  ;;  %v143_v31 = vld [vmem:[%s19811_s1 + $0x300] sm:$0xff]  ;;  %v144_v33 = vld [vmem:[%s19811_s1 + $0x308] sm:$0xff]  ;;  %v12712_v35 = vcombine.low %v135_v23, %v139_v24 }
  0x1b   :  { %9638 = vmatprep.subr.bf16.mxu0 %v12673_v52  ;;  %10197 = vmatprep.subr.bf16.mxu1 %v12675_v53  ;;  %v147_v32 = vld [vmem:[%s19811_s1 + $0x320] sm:$0xff]  ;;  %v148_v34 = vld [vmem:[%s19811_s1 + $0x328] sm:$0xff]  ;;  %v12714_v36 = vcombine.low %v136_v25, %v140_v26 }
  0x1c   :  { %v12721_v37 = vcombine.high %v143_v31, %v147_v32  ;;  %v12723_v38 = vcombine.high %v144_v33, %v148_v34  ;;  %v151_v39 = vld [vmem:[%s19811_s1 + $0x340] sm:$0xff]  ;;  %v152_v41 = vld [vmem:[%s19811_s1 + $0x348] sm:$0xff]  ;;  %v12720_v43 = vcombine.low %v143_v31, %v147_v32  ;;  %v12722_v44 = vcombine.low %v144_v33, %v148_v34 }
  0x1d   :  { %v155_v40 = vld [vmem:[%s19811_s1 + $0x360] sm:$0xff]  ;;  %v156_v42 = vld [vmem:[%s19811_s1 + $0x368] sm:$0xff] }
  0x1e   :  { %9639 = vmatpush1.bf16.msra.mxu0 %v12672_v59  ;;  %10198 = vmatpush1.bf16.msra.mxu1 %v12674_v60  ;;  %v12729_v45 = vcombine.high %v151_v39, %v155_v40  ;;  %v12731_v46 = vcombine.high %v152_v41, %v156_v42  ;;  %v159_v47 = vld [vmem:[%s19811_s1 + $0x380] sm:$0xff]  ;;  %v160_v49 = vld [vmem:[%s19811_s1 + $0x388] sm:$0xff]  ;;  %v12728_v51 = vcombine.low %v151_v39, %v155_v40 }
  0x1f   :  { %9640 = vmatprep.subr.bf16.mxu0 %v12681_v61  ;;  %10199 = vmatprep.subr.bf16.mxu1 %v12683_v62  ;;  %v163_v48 = vld [vmem:[%s19811_s1 + $0x3a0] sm:$0xff]  ;;  %v164_v50 = vld [vmem:[%s19811_s1 + $0x3a8] sm:$0xff]  ;;  %v12730_v52 = vcombine.low %v152_v41, %v156_v42 }
  0x20   :  { %v12737_v53 = vcombine.high %v159_v47, %v163_v48  ;;  %v12739_v54 = vcombine.high %v160_v49, %v164_v50  ;;  %v167_v55 = vld [vmem:[%s19811_s1 + $0x3c0] sm:$0xff]  ;;  %v168_v57 = vld [vmem:[%s19811_s1 + $0x3c8] sm:$0xff]  ;;  %v12736_v59 = vcombine.low %v159_v47, %v163_v48  ;;  %v12738_v60 = vcombine.low %v160_v49, %v164_v50 }
  0x21   :  { %v171_v56 = vld [vmem:[%s19811_s1 + $0x3e0] sm:$0xff]  ;;  %v172_v58 = vld [vmem:[%s19811_s1 + $0x3e8] sm:$0xff] }
  0x22   :  { %9641 = vmatpush1.bf16.msra.mxu0 %v12680_v3  ;;  %10200 = vmatpush1.bf16.msra.mxu1 %v12682_v4  ;;  %v12745_v61 = vcombine.high %v167_v55, %v171_v56  ;;  %v12747_v62 = vcombine.high %v168_v57, %v172_v58  ;;  %v175_v63 = vld [vmem:[%s19811_s1 + $0x400] sm:$0xff]  ;;  %v176_v1 = vld [vmem:[%s19811_s1 + $0x408] sm:$0xff]  ;;  %v12744_v3 = vcombine.low %v167_v55, %v171_v56 }
  0x23   :  { %9642 = vmatprep.subr.bf16.mxu0 %v12689_v5  ;;  %10201 = vmatprep.subr.bf16.mxu1 %v12691_v6  ;;  %v179_v0 = vld [vmem:[%s19811_s1 + $0x420] sm:$0xff]  ;;  %v180_v2 = vld [vmem:[%s19811_s1 + $0x428] sm:$0xff]  ;;  %v12746_v4 = vcombine.low %v168_v57, %v172_v58 }
  0x24   :  { %v12753_v5 = vcombine.high %v175_v63, %v179_v0  ;;  %v12755_v6 = vcombine.high %v176_v1, %v180_v2  ;;  %v183_v7 = vld [vmem:[%s19811_s1 + $0x440] sm:$0xff]  ;;  %v184_v10 = vld [vmem:[%s19811_s1 + $0x448] sm:$0xff] }
  0x25   :  { %v187_v8 = vld [vmem:[%s19811_s1 + $0x460] sm:$0xff]  ;;  %v14564_v18 = vld [vmem:[%s19812_s0 + $0xc] ss:$100 sps:$4 sm:$0xff]  }
  0x26   :  { %9643 = vmatpush1.bf16.msra.mxu0 %v12688_v11  ;;  %10202 = vmatpush1.bf16.msra.mxu1 %v12690_v12  ;;  %v14563_v9 = vld [vmem:[%s19812_s0] ss:$100 sps:$4 sm:$0xff]   ;;  %v188_v11 = vld [vmem:[%s19811_s1 + $0x468] sm:$0xff]  ;;  %v12752_v12 = vcombine.low %v175_v63, %v179_v0 }
  0x27   :  { %9644 = vmatprep.subr.bf16.mxu0 %v12697_v13  ;;  %10203 = vmatprep.subr.bf16.mxu1 %v12699_v14  ;;  %v12754_v13 = vcombine.low %v176_v1, %v180_v2  ;;  %v12761_v14 = vcombine.high %v183_v7, %v187_v8  ;;  %v191_v15 = vld [vmem:[%s19811_s1 + $0x480] sm:$0xff]  ;;  %v12763_v16 = vcombine.high %v184_v10, %v188_v11  ;;  %v208_v34 = vld [vmem:[%s19811_s1 + $0x508] sm:$0xff] }
  0x28   :  { %v195_v17 = vld [vmem:[%s19811_s1 + $0x4a0] sm:$0xff]  ;;  %v216_v42 = vld [vmem:[%s19811_s1 + $0x548] sm:$0xff] }
  0x29   :  { %v12769_v23 = vcombine.high %v191_v15, %v195_v17  ;;  %v199_v24 = vld [vmem:[%s19811_s1 + $0x4c0] sm:$0xff] }
  0x2a   :  { %9645 = vmatpush1.bf16.msra.mxu0 %v12696_v19  ;;  %10204 = vmatpush1.bf16.msra.mxu1 %v12698_v20  ;;  %v192_v19 = vld [vmem:[%s19811_s1 + $0x488] sm:$0xff]  ;;  %v203_v25 = vld [vmem:[%s19811_s1 + $0x4e0] sm:$0xff] }
  0x2b   :  { %9646 = vmatprep.subr.bf16.mxu0 %v12705_v21  ;;  %10205 = vmatprep.subr.bf16.mxu1 %v12707_v22  ;;  %v196_v20 = vld [vmem:[%s19811_s1 + $0x4a8] sm:$0xff]  ;;  %v12760_v21 = vcombine.low %v183_v7, %v187_v8  ;;  %v12762_v22 = vcombine.low %v184_v10, %v188_v11  ;;  %v12777_v31 = vcombine.high %v199_v24, %v203_v25  ;;  %v207_v32 = vld [vmem:[%s19811_s1 + $0x500] sm:$0xff] }
  0x2c   :  { %v12771_v26 = vcombine.high %v192_v19, %v196_v20  ;;  %v211_v33 = vld [vmem:[%s19811_s1 + $0x520] sm:$0xff]  ;;  %v248_v11 = vld [vmem:[%s19811_s1 + $0x648] sm:$0xff] }
  0x2d   :  { %v12785_v39 = vcombine.high %v207_v32, %v211_v33  ;;  %v215_v40 = vld [vmem:[%s19811_s1 + $0x540] sm:$0xff] }
  0x2e   :  { %9647 = vmatpush1.bf16.msra.mxu0 %v12704_v27  ;;  %10206 = vmatpush1.bf16.msra.mxu1 %v12706_v28  ;;  %v200_v27 = vld [vmem:[%s19811_s1 + $0x4c8] sm:$0xff]  ;;  %v219_v41 = vld [vmem:[%s19811_s1 + $0x560] sm:$0xff] }
  0x2f   :  { %9648 = vmatprep.subr.bf16.mxu0 %v12713_v29  ;;  %10207 = vmatprep.subr.bf16.mxu1 %v12715_v30  ;;  %v204_v28 = vld [vmem:[%s19811_s1 + $0x4e8] sm:$0xff]  ;;  %v12768_v29 = vcombine.low %v191_v15, %v195_v17  ;;  %v12770_v30 = vcombine.low %v192_v19, %v196_v20  ;;  %v12793_v47 = vcombine.high %v215_v40, %v219_v41  ;;  %v223_v49 = vld [vmem:[%s19811_s1 + $0x580] sm:$0xff] }
  0x30   :  { %v227_v50 = vld [vmem:[%s19811_s1 + $0x5a0] sm:$0xff]  ;;  %v256_v19 = vld [vmem:[%s19811_s1 + $0x688] sm:$0xff] }
  0x31   :  { %v12801_v55 = vcombine.high %v223_v49, %v227_v50  ;;  %v231_v57 = vld [vmem:[%s19811_s1 + $0x5c0] sm:$0xff]  ;;  %v260_v20 = vld [vmem:[%s19811_s1 + $0x6a8] sm:$0xff] }
  0x32   :  { %9649 = vmatpush1.bf16.msra.mxu0 %v12712_v35  ;;  %10208 = vmatpush1.bf16.msra.mxu1 %v12714_v36  ;;  %v12779_v35 = vcombine.high %v200_v27, %v204_v28  ;;  %v212_v36 = vld [vmem:[%s19811_s1 + $0x528] sm:$0xff]  ;;  %v235_v58 = vld [vmem:[%s19811_s1 + $0x5e0] sm:$0xff] }
  0x33   :  { %9650 = vmatprep.subr.bf16.mxu0 %v12721_v37  ;;  %10209 = vmatprep.subr.bf16.mxu1 %v12723_v38  ;;  %v12776_v37 = vcombine.low %v199_v24, %v203_v25  ;;  %v12778_v38 = vcombine.low %v200_v27, %v204_v28  ;;  %v12809_v63 = vcombine.high %v231_v57, %v235_v58  ;;  %v239_v1 = vld [vmem:[%s19811_s1 + $0x600] sm:$0xff]  ;;  %v264_v27 = vld [vmem:[%s19811_s1 + $0x6c8] sm:$0xff] }
  0x34   :  { %v243_v2 = vld [vmem:[%s19811_s1 + $0x620] sm:$0xff]  ;;  %v12835_v24 = vcombine.high %v256_v19, %v260_v20  ;;  %v268_v28 = vld [vmem:[%s19811_s1 + $0x6e8] sm:$0xff] }
  0x35   :  { %v12817_v7 = vcombine.high %v239_v1, %v243_v2  ;;  %v251_v10 = vld [vmem:[%s19811_s1 + $0x660] sm:$0xff] }
  0x36   :  { %9651 = vmatpush1.bf16.msra.mxu0 %v12720_v43  ;;  %10210 = vmatpush1.bf16.msra.mxu1 %v12722_v44  ;;  %v12787_v43 = vcombine.high %v208_v34, %v212_v36  ;;  %v220_v44 = vld [vmem:[%s19811_s1 + $0x568] sm:$0xff]  ;;  %v255_v17 = vld [vmem:[%s19811_s1 + $0x680] sm:$0xff] }
  0x37   :  { %9652 = vmatprep.subr.bf16.mxu0 %v12729_v45  ;;  %10211 = vmatprep.subr.bf16.mxu1 %v12731_v46  ;;  %v12784_v45 = vcombine.low %v207_v32, %v211_v33  ;;  %v12786_v46 = vcombine.low %v208_v34, %v212_v36  ;;  %v12795_v48 = vcombine.high %v216_v42, %v220_v44  ;;  %v263_v25 = vld [vmem:[%s19811_s1 + $0x6c0] sm:$0xff]  ;;  %v276_v36 = vld [vmem:[%s19811_s1 + $0x728] sm:$0xff] }
  0x38   :  { %v12843_v32 = vcombine.high %v264_v27, %v268_v28  ;;  %v271_v33 = vld [vmem:[%s19811_s1 + $0x700] sm:$0xff] }
  0x39   :  { %v275_v34 = vld [vmem:[%s19811_s1 + $0x720] sm:$0xff] }
  0x3a   :  { %9653 = vmatpush1.bf16.msra.mxu0 %v12728_v51  ;;  %10212 = vmatpush1.bf16.msra.mxu1 %v12730_v52  ;;  %v224_v51 = vld [vmem:[%s19811_s1 + $0x588] sm:$0xff] }
  0x3b   :  { %9654 = vmatprep.subr.bf16.mxu0 %v12737_v53  ;;  %10213 = vmatprep.subr.bf16.mxu1 %v12739_v54  ;;  %v228_v52 = vld [vmem:[%s19811_s1 + $0x5a8] sm:$0xff]  ;;  %v12792_v53 = vcombine.low %v215_v40, %v219_v41  ;;  %v12794_v54 = vcombine.low %v216_v42, %v220_v44  ;;  %v279_v41 = vld [vmem:[%s19811_s1 + $0x740] sm:$0xff] }
  0x3c   :  { %v12803_v56 = vcombine.high %v224_v51, %v228_v52  ;;  %v283_v42 = vld [vmem:[%s19811_s1 + $0x760] sm:$0xff]  ;;  %v284_v44 = vld [vmem:[%s19811_s1 + $0x768] sm:$0xff] }
  0x3e   :  { %9655 = vmatpush1.bf16.msra.mxu0 %v12736_v59  ;;  %10214 = vmatpush1.bf16.msra.mxu1 %v12738_v60  ;;  %v232_v59 = vld [vmem:[%s19811_s1 + $0x5c8] sm:$0xff] }
  0x3f   :  { %9656 = vmatprep.subr.bf16.mxu0 %v12745_v61  ;;  %10215 = vmatprep.subr.bf16.mxu1 %v12747_v62  ;;  %v236_v60 = vld [vmem:[%s19811_s1 + $0x5e8] sm:$0xff]  ;;  %v12800_v61 = vcombine.low %v223_v49, %v227_v50  ;;  %v12802_v62 = vcombine.low %v224_v51, %v228_v52  ;;  %v287_v49 = vld [vmem:[%s19811_s1 + $0x780] sm:$0xff] }
  0x40   :  { %v12811_v0 = vcombine.high %v232_v59, %v236_v60  ;;  %v291_v50 = vld [vmem:[%s19811_s1 + $0x7a0] sm:$0xff]  ;;  %v288_v51 = vld [vmem:[%s19811_s1 + $0x788] sm:$0xff] }
  0x41   :  { %v292_v52 = vld [vmem:[%s19811_s1 + $0x7a8] sm:$0xff] }
  0x42   :  { %9657 = vmatpush1.bf16.msra.mxu0 %v12744_v3  ;;  %10216 = vmatpush1.bf16.msra.mxu1 %v12746_v4  ;;  %v240_v3 = vld [vmem:[%s19811_s1 + $0x608] sm:$0xff] }
  0x43   :  { %9669 = vmatprep.subr.bf16.mxu0 %v12753_v5  ;;  %10228 = vmatprep.subr.bf16.mxu1 %v12755_v6  ;;  %v244_v4 = vld [vmem:[%s19811_s1 + $0x628] sm:$0xff]  ;;  %v12808_v5 = vcombine.low %v231_v57, %v235_v58  ;;  %v12810_v6 = vcombine.low %v232_v59, %v236_v60  ;;  %v295_v57 = vld [vmem:[%s19811_s1 + $0x7c0] sm:$0xff] }
  0x44   :  { %v12819_v8 = vcombine.high %v240_v3, %v244_v4  ;;  %v299_v58 = vld [vmem:[%s19811_s1 + $0x7e0] sm:$0xff]  ;;  %v296_v59 = vld [vmem:[%s19811_s1 + $0x7c8] sm:$0xff] }
  0x45   :  { %9659 = vmatmul.mubr.bf16.vlgmr.msra.gmra.mrb[0].mxu0 %v14563_v9  ;;  %10218 = vmatmul.mubr.bf16.vlgmr.msra.gmra.mrb[0].mxu1 %v14563_v9  ;;  %v247_v9 = vld [vmem:[%s19811_s1 + $0x640] sm:$0xff]  ;;  %v300_v60 = vld [vmem:[%s19811_s1 + $0x7e8] sm:$0xff] }
  0x46   :  { %9670 = vmatpush1.bf16.msra.mxu0 %v12752_v12  ;;  %10229 = vmatpush1.bf16.msra.mxu1 %v12754_v13  ;;  %v252_v12 = vld [vmem:[%s19811_s1 + $0x668] sm:$0xff]  ;;  %v12816_v13 = vcombine.low %v239_v1, %v243_v2  ;;  %v12825_v15 = vcombine.high %v247_v9, %v251_v10  ;;  %v303_v1 = vld [vmem:[%s19811_s1 + $0x800] sm:$0xff] }
  0x47   :  { %9671 = vmatprep.subr.bf16.mxu0 %v12761_v14  ;;  %10230 = vmatprep.subr.bf16.mxu1 %v12763_v16  ;;  %v12818_v14 = vcombine.low %v240_v3, %v244_v4  ;;  %v12827_v16 = vcombine.high %v248_v11, %v252_v12  ;;  %v307_v2 = vld [vmem:[%s19811_s1 + $0x820] sm:$0xff]  ;;  %v304_v3 = vld [vmem:[%s19811_s1 + $0x808] sm:$0xff] }
  0x48   :  { %9701 = vmatprep.mubr.bf16.mxu0 %v14564_v18  ;;  %10260 = vmatprep.mubr.bf16.mxu1 %v14564_v18  ;;  %v259_v18 = vld [vmem:[%s19811_s1 + $0x6a0] sm:$0xff]  ;;  %v308_v4 = vld [vmem:[%s19811_s1 + $0x828] sm:$0xff] }
  0x4a   :  { %9672 = vmatpush1.bf16.msra.mxu0 %v12760_v21  ;;  %10231 = vmatpush1.bf16.msra.mxu1 %v12762_v22  ;;  %v12824_v21 = vcombine.low %v247_v9, %v251_v10  ;;  %v12826_v22 = vcombine.low %v248_v11, %v252_v12  ;;  %v311_v9 = vld [vmem:[%s19811_s1 + $0x840] sm:$0xff]  ;;  %v14566_v11 = vld [vmem:[%s19812_s0 + $0x8] ss:$100 sps:$4 sm:$0xff]  }
  0x4b   :  { %9673 = vmatprep.subr.bf16.mxu0 %v12769_v23  ;;  %10232 = vmatprep.subr.bf16.mxu1 %v12771_v26  ;;  %v12833_v23 = vcombine.high %v255_v17, %v259_v18  ;;  %v267_v26 = vld [vmem:[%s19811_s1 + $0x6e0] sm:$0xff]  ;;  %v312_v12 = vld [vmem:[%s19811_s1 + $0x848] sm:$0xff] }
  0x4c   :  { %v315_v10 = vld [vmem:[%s19811_s1 + $0x860] sm:$0xff] }
  0x4e   :  { %9674 = vmatpush1.bf16.msra.mxu0 %v12768_v29  ;;  %10233 = vmatpush1.bf16.msra.mxu1 %v12770_v30  ;;  %v12832_v29 = vcombine.low %v255_v17, %v259_v18  ;;  %v12834_v30 = vcombine.low %v256_v19, %v260_v20  ;;  %v319_v18 = vld [vmem:[%s19811_s1 + $0x880] sm:$0xff]  ;;  %v14567_v20 = vld [vmem:[%s19812_s0 + $0x14] ss:$100 sps:$4 sm:$0xff]  }
  0x4f   :  { %9675 = vmatprep.subr.bf16.mxu0 %v12777_v31  ;;  %10234 = vmatprep.subr.bf16.mxu1 %v12779_v35  ;;  %v12841_v31 = vcombine.high %v263_v25, %v267_v26  ;;  %v272_v35 = vld [vmem:[%s19811_s1 + $0x708] sm:$0xff]  ;;  %v323_v19 = vld [vmem:[%s19811_s1 + $0x8a0] sm:$0xff] }
  0x50   :  { %v12851_v40 = vcombine.high %v272_v35, %v276_v36 }
  0x52   :  { %9676 = vmatpush1.bf16.msra.mxu0 %v12776_v37  ;;  %10235 = vmatpush1.bf16.msra.mxu1 %v12778_v38  ;;  %v12840_v37 = vcombine.low %v263_v25, %v267_v26  ;;  %v12842_v38 = vcombine.low %v264_v27, %v268_v28  ;;  %v12897_v25 = vcombine.high %v319_v18, %v323_v19  ;;  %v327_v27 = vld [vmem:[%s19811_s1 + $0x8c0] sm:$0xff] }
  0x53   :  { %9677 = vmatprep.subr.bf16.mxu0 %v12785_v39  ;;  %10236 = vmatprep.subr.bf16.mxu1 %v12787_v43  ;;  %v12849_v39 = vcombine.high %v271_v33, %v275_v34  ;;  %v280_v43 = vld [vmem:[%s19811_s1 + $0x748] sm:$0xff]  ;;  %v331_v28 = vld [vmem:[%s19811_s1 + $0x8e0] sm:$0xff] }
  0x56   :  { %9678 = vmatpush1.bf16.msra.mxu0 %v12784_v45  ;;  %10237 = vmatpush1.bf16.msra.mxu1 %v12786_v46  ;;  %v12848_v45 = vcombine.low %v271_v33, %v275_v34  ;;  %v12850_v46 = vcombine.low %v272_v35, %v276_v36  ;;  %v12905_v33 = vcombine.high %v327_v27, %v331_v28  ;;  %v335_v35 = vld [vmem:[%s19811_s1 + $0x900] sm:$0xff] }
  0x57   :  { %9679 = vmatprep.subr.bf16.mxu0 %v12793_v47  ;;  %10238 = vmatprep.subr.bf16.mxu1 %v12795_v48  ;;  %v12857_v47 = vcombine.high %v279_v41, %v283_v42  ;;  %v12859_v48 = vcombine.high %v280_v43, %v284_v44  ;;  %v339_v36 = vld [vmem:[%s19811_s1 + $0x920] sm:$0xff] }
  0x5a   :  { %9680 = vmatpush1.bf16.msra.mxu0 %v12792_v53  ;;  %10239 = vmatpush1.bf16.msra.mxu1 %v12794_v54  ;;  %v12856_v53 = vcombine.low %v279_v41, %v283_v42  ;;  %v12858_v54 = vcombine.low %v280_v43, %v284_v44  ;;  %v12913_v41 = vcombine.high %v335_v35, %v339_v36  ;;  %v343_v43 = vld [vmem:[%s19811_s1 + $0x940] sm:$0xff] }
  0x5b   :  { %9681 = vmatprep.subr.bf16.mxu0 %v12801_v55  ;;  %10240 = vmatprep.subr.bf16.mxu1 %v12803_v56  ;;  %v12865_v55 = vcombine.high %v287_v49, %v291_v50  ;;  %v12867_v56 = vcombine.high %v288_v51, %v292_v52  ;;  %v347_v44 = vld [vmem:[%s19811_s1 + $0x960] sm:$0xff] }
  0x5e   :  { %9682 = vmatpush1.bf16.msra.mxu0 %v12800_v61  ;;  %10241 = vmatpush1.bf16.msra.mxu1 %v12802_v62  ;;  %v12864_v61 = vcombine.low %v287_v49, %v291_v50  ;;  %v12866_v62 = vcombine.low %v288_v51, %v292_v52  ;;  %v12921_v49 = vcombine.high %v343_v43, %v347_v44  ;;  %v351_v51 = vld [vmem:[%s19811_s1 + $0x980] sm:$0xff] }
  0x5f   :  { %9683 = vmatprep.subr.bf16.mxu0 %v12809_v63  ;;  %10242 = vmatprep.subr.bf16.mxu1 %v12811_v0  ;;  %v12873_v63 = vcombine.high %v295_v57, %v299_v58  ;;  %v12875_v0 = vcombine.high %v296_v59, %v300_v60  ;;  %v355_v52 = vld [vmem:[%s19811_s1 + $0x9a0] sm:$0xff] }
  0x62   :  { %9684 = vmatpush1.bf16.msra.mxu0 %v12808_v5  ;;  %10243 = vmatpush1.bf16.msra.mxu1 %v12810_v6  ;;  %v12872_v5 = vcombine.low %v295_v57, %v299_v58  ;;  %v12874_v6 = vcombine.low %v296_v59, %v300_v60  ;;  %v12929_v57 = vcombine.high %v351_v51, %v355_v52  ;;  %v359_v59 = vld [vmem:[%s19811_s1 + $0x9c0] sm:$0xff] }
  0x63   :  { %9685 = vmatprep.subr.bf16.mxu0 %v12817_v7  ;;  %10244 = vmatprep.subr.bf16.mxu1 %v12819_v8  ;;  %v12881_v7 = vcombine.high %v303_v1, %v307_v2  ;;  %v12883_v8 = vcombine.high %v304_v3, %v308_v4  ;;  %v363_v60 = vld [vmem:[%s19811_s1 + $0x9e0] sm:$0xff] }
  0x66   :  { %9686 = vmatpush1.bf16.msra.mxu0 %v12816_v13  ;;  %10245 = vmatpush1.bf16.msra.mxu1 %v12818_v14  ;;  %v316_v13 = vld [vmem:[%s19811_s1 + $0x868] sm:$0xff]  ;;  %v12880_v14 = vcombine.low %v303_v1, %v307_v2  ;;  %v12937_v1 = vcombine.high %v359_v59, %v363_v60 }
  0x67   :  { %9687 = vmatprep.subr.bf16.mxu0 %v12825_v15  ;;  %10246 = vmatprep.subr.bf16.mxu1 %v12827_v16  ;;  %v12882_v15 = vcombine.low %v304_v3, %v308_v4  ;;  %v12889_v16 = vcombine.high %v311_v9, %v315_v10  ;;  %v12891_v17 = vcombine.high %v312_v12, %v316_v13  ;;  %v367_v3 = vld [vmem:[%s19811_s1 + $0xa00] sm:$0xff] }
  0x68   :  { %v371_v4 = vld [vmem:[%s19811_s1 + $0xa20] sm:$0xff] }
  0x6a   :  { %9688 = vmatpush1.bf16.msra.mxu0 %v12824_v21  ;;  %10247 = vmatpush1.bf16.msra.mxu1 %v12826_v22  ;;  %v320_v21 = vld [vmem:[%s19811_s1 + $0x888] sm:$0xff] }
  0x6b   :  { %9689 = vmatprep.subr.bf16.mxu0 %v12833_v23  ;;  %10248 = vmatprep.subr.bf16.mxu1 %v12835_v24  ;;  %v324_v22 = vld [vmem:[%s19811_s1 + $0x8a8] sm:$0xff]  ;;  %v12888_v23 = vcombine.low %v311_v9, %v315_v10  ;;  %v12890_v24 = vcombine.low %v312_v12, %v316_v13  ;;  %v12945_v9 = vcombine.high %v367_v3, %v371_v4  ;;  %v379_v12 = vld [vmem:[%s19811_s1 + $0xa60] sm:$0xff] }
  0x6c   :  { %v12899_v26 = vcombine.high %v320_v21, %v324_v22  ;;  %v376_v13 = vld [vmem:[%s19811_s1 + $0xa48] sm:$0xff] }
  0x6e   :  { %9690 = vmatpush1.bf16.msra.mxu0 %v12832_v29  ;;  %10249 = vmatpush1.bf16.msra.mxu1 %v12834_v30  ;;  %v328_v29 = vld [vmem:[%s19811_s1 + $0x8c8] sm:$0xff] }
  0x6f   :  { %9691 = vmatprep.subr.bf16.mxu0 %v12841_v31  ;;  %10250 = vmatprep.subr.bf16.mxu1 %v12843_v32  ;;  %v332_v30 = vld [vmem:[%s19811_s1 + $0x8e8] sm:$0xff]  ;;  %v12896_v31 = vcombine.low %v319_v18, %v323_v19  ;;  %v12898_v32 = vcombine.low %v320_v21, %v324_v22  ;;  %v383_v19 = vld [vmem:[%s19811_s1 + $0xa80] sm:$0xff] }
  0x70   :  { %v12907_v34 = vcombine.high %v328_v29, %v332_v30  ;;  %v384_v21 = vld [vmem:[%s19811_s1 + $0xa88] sm:$0xff] }
  0x71   :  { %v388_v22 = vld [vmem:[%s19811_s1 + $0xaa8] sm:$0xff] }
  0x72   :  { %9692 = vmatpush1.bf16.msra.mxu0 %v12840_v37  ;;  %10251 = vmatpush1.bf16.msra.mxu1 %v12842_v38  ;;  %v336_v37 = vld [vmem:[%s19811_s1 + $0x908] sm:$0xff] }
  0x73   :  { %9693 = vmatprep.subr.bf16.mxu0 %v12849_v39  ;;  %10252 = vmatprep.subr.bf16.mxu1 %v12851_v40  ;;  %v340_v38 = vld [vmem:[%s19811_s1 + $0x928] sm:$0xff]  ;;  %v12904_v39 = vcombine.low %v327_v27, %v331_v28  ;;  %v12906_v40 = vcombine.low %v328_v29, %v332_v30  ;;  %v391_v27 = vld [vmem:[%s19811_s1 + $0xac0] sm:$0xff] }
  0x74   :  { %v12915_v42 = vcombine.high %v336_v37, %v340_v38  ;;  %v395_v28 = vld [vmem:[%s19811_s1 + $0xae0] sm:$0xff]  ;;  %v392_v29 = vld [vmem:[%s19811_s1 + $0xac8] sm:$0xff] }
  0x75   :  { %v396_v30 = vld [vmem:[%s19811_s1 + $0xae8] sm:$0xff] }
  0x76   :  { %9694 = vmatpush1.bf16.msra.mxu0 %v12848_v45  ;;  %10253 = vmatpush1.bf16.msra.mxu1 %v12850_v46  ;;  %v344_v45 = vld [vmem:[%s19811_s1 + $0x948] sm:$0xff] }
  0x77   :  { %9695 = vmatprep.subr.bf16.mxu0 %v12857_v47  ;;  %10254 = vmatprep.subr.bf16.mxu1 %v12859_v48  ;;  %v348_v46 = vld [vmem:[%s19811_s1 + $0x968] sm:$0xff]  ;;  %v12912_v47 = vcombine.low %v335_v35, %v339_v36  ;;  %v12914_v48 = vcombine.low %v336_v37, %v340_v38  ;;  %v399_v35 = vld [vmem:[%s19811_s1 + $0xb00] sm:$0xff] }
  0x78   :  { %v12923_v50 = vcombine.high %v344_v45, %v348_v46  ;;  %v403_v36 = vld [vmem:[%s19811_s1 + $0xb20] sm:$0xff]  ;;  %v400_v37 = vld [vmem:[%s19811_s1 + $0xb08] sm:$0xff] }
  0x79   :  { %v404_v38 = vld [vmem:[%s19811_s1 + $0xb28] sm:$0xff] }
  0x7a   :  { %9696 = vmatpush1.bf16.msra.mxu0 %v12856_v53  ;;  %10255 = vmatpush1.bf16.msra.mxu1 %v12858_v54  ;;  %v352_v53 = vld [vmem:[%s19811_s1 + $0x988] sm:$0xff] }
  0x7b   :  { %9697 = vmatprep.subr.bf16.mxu0 %v12865_v55  ;;  %10256 = vmatprep.subr.bf16.mxu1 %v12867_v56  ;;  %v356_v54 = vld [vmem:[%s19811_s1 + $0x9a8] sm:$0xff]  ;;  %v12920_v55 = vcombine.low %v343_v43, %v347_v44  ;;  %v12922_v56 = vcombine.low %v344_v45, %v348_v46  ;;  %v407_v43 = vld [vmem:[%s19811_s1 + $0xb40] sm:$0xff] }
  0x7c   :  { %v12931_v58 = vcombine.high %v352_v53, %v356_v54  ;;  %v411_v44 = vld [vmem:[%s19811_s1 + $0xb60] sm:$0xff]  ;;  %v408_v45 = vld [vmem:[%s19811_s1 + $0xb48] sm:$0xff] }
  0x7d   :  { %v412_v46 = vld [vmem:[%s19811_s1 + $0xb68] sm:$0xff] }
  0x7e   :  { %9698 = vmatpush1.bf16.msra.mxu0 %v12864_v61  ;;  %10257 = vmatpush1.bf16.msra.mxu1 %v12866_v62  ;;  %v360_v61 = vld [vmem:[%s19811_s1 + $0x9c8] sm:$0xff] }
  0x7f   :  { %9699 = vmatprep.subr.bf16.mxu0 %v12873_v63  ;;  %10258 = vmatprep.subr.bf16.mxu1 %v12875_v0  ;;  %v364_v62 = vld [vmem:[%s19811_s1 + $0x9e8] sm:$0xff]  ;;  %v12928_v63 = vcombine.low %v351_v51, %v355_v52  ;;  %v12930_v0 = vcombine.low %v352_v53, %v356_v54  ;;  %v415_v51 = vld [vmem:[%s19811_s1 + $0xb80] sm:$0xff] }
  0x80   :  { %v12939_v2 = vcombine.high %v360_v61, %v364_v62  ;;  %v419_v52 = vld [vmem:[%s19811_s1 + $0xba0] sm:$0xff]  ;;  %v416_v53 = vld [vmem:[%s19811_s1 + $0xb88] sm:$0xff] }
  0x81   :  { %v420_v54 = vld [vmem:[%s19811_s1 + $0xba8] sm:$0xff] }
  0x82   :  { %9700 = vmatpush1.bf16.msra.mxu0 %v12872_v5  ;;  %10259 = vmatpush1.bf16.msra.mxu1 %v12874_v6  ;;  %v368_v5 = vld [vmem:[%s19811_s1 + $0xa08] sm:$0xff] }
  0x83   :  { %9712 = vmatprep.subr.bf16.mxu0 %v12881_v7  ;;  %10271 = vmatprep.subr.bf16.mxu1 %v12883_v8  ;;  %v372_v6 = vld [vmem:[%s19811_s1 + $0xa28] sm:$0xff]  ;;  %v12936_v7 = vcombine.low %v359_v59, %v363_v60  ;;  %v12938_v8 = vcombine.low %v360_v61, %v364_v62  ;;  %v423_v59 = vld [vmem:[%s19811_s1 + $0xbc0] sm:$0xff] }
  0x84   :  { %v12947_v10 = vcombine.high %v368_v5, %v372_v6  ;;  %v427_v60 = vld [vmem:[%s19811_s1 + $0xbe0] sm:$0xff]  ;;  %v424_v61 = vld [vmem:[%s19811_s1 + $0xbc8] sm:$0xff] }
  0x85   :  { %9702 = vmatmul.mubr.bf16.vlgmr.msra.gmra.mrb[0].mxu0 %v14566_v11  ;;  %10261 = vmatmul.mubr.bf16.vlgmr.msra.gmra.mrb[0].mxu1 %v14566_v11  ;;  %v375_v11 = vld [vmem:[%s19811_s1 + $0xa40] sm:$0xff]  ;;  %v428_v62 = vld [vmem:[%s19811_s1 + $0xbe8] sm:$0xff] }
  0x86   :  { %9713 = vmatpush1.bf16.msra.mxu0 %v12880_v14  ;;  %10272 = vmatpush1.bf16.msra.mxu1 %v12882_v15  ;;  %v380_v14 = vld [vmem:[%s19811_s1 + $0xa68] sm:$0xff]  ;;  %v12944_v15 = vcombine.low %v367_v3, %v371_v4  ;;  %v431_v3 = vld [vmem:[%s19811_s1 + $0xc00] sm:$0xff] }
  0x87   :  { %9714 = vmatprep.subr.bf16.mxu0 %v12889_v16  ;;  %10273 = vmatprep.subr.bf16.mxu1 %v12891_v17  ;;  %v12946_v16 = vcombine.low %v368_v5, %v372_v6  ;;  %v12953_v17 = vcombine.high %v375_v11, %v379_v12  ;;  %v12955_v18 = vcombine.high %v376_v13, %v380_v14  ;;  %v435_v4 = vld [vmem:[%s19811_s1 + $0xc20] sm:$0xff]  ;;  %v432_v5 = vld [vmem:[%s19811_s1 + $0xc08] sm:$0xff] }
  0x88   :  { %9744 = vmatprep.mubr.bf16.mxu0 %v14567_v20  ;;  %10303 = vmatprep.mubr.bf16.mxu1 %v14567_v20  ;;  %v387_v20 = vld [vmem:[%s19811_s1 + $0xaa0] sm:$0xff]  ;;  %v436_v6 = vld [vmem:[%s19811_s1 + $0xc28] sm:$0xff] }
  0x8a   :  { %9715 = vmatpush1.bf16.msra.mxu0 %v12888_v23  ;;  %10274 = vmatpush1.bf16.msra.mxu1 %v12890_v24  ;;  %v12952_v23 = vcombine.low %v375_v11, %v379_v12  ;;  %v12954_v24 = vcombine.low %v376_v13, %v380_v14  ;;  %v439_v11 = vld [vmem:[%s19811_s1 + $0xc40] sm:$0xff]  ;;  %v14569_v13 = vld [vmem:[%s19812_s0 + $0x10] ss:$100 sps:$4 sm:$0xff]   ;;  %v440_v14 = vld [vmem:[%s19811_s1 + $0xc48] sm:$0xff] }
  0x8b   :  { %9716 = vmatprep.subr.bf16.mxu0 %v12897_v25  ;;  %10275 = vmatprep.subr.bf16.mxu1 %v12899_v26  ;;  %v12961_v25 = vcombine.high %v383_v19, %v387_v20  ;;  %v12963_v26 = vcombine.high %v384_v21, %v388_v22  ;;  %v443_v12 = vld [vmem:[%s19811_s1 + $0xc60] sm:$0xff] }
  0x8e   :  { %9717 = vmatpush1.bf16.msra.mxu0 %v12896_v31  ;;  %10276 = vmatpush1.bf16.msra.mxu1 %v12898_v32  ;;  %v12960_v31 = vcombine.low %v383_v19, %v387_v20  ;;  %v12962_v32 = vcombine.low %v384_v21, %v388_v22  ;;  %v447_v20 = vld [vmem:[%s19811_s1 + $0xc80] sm:$0xff] }
  0x8f   :  { %9718 = vmatprep.subr.bf16.mxu0 %v12905_v33  ;;  %10277 = vmatprep.subr.bf16.mxu1 %v12907_v34  ;;  %v12969_v33 = vcombine.high %v391_v27, %v395_v28  ;;  %v12971_v34 = vcombine.high %v392_v29, %v396_v30  ;;  %v451_v21 = vld [vmem:[%s19811_s1 + $0xca0] sm:$0xff] }
  0x90   :  { %v14570_v22 = vld [vmem:[%s19812_s0 + $0x1c] ss:$100 sps:$4 sm:$0xff]  }
  0x92   :  { %9719 = vmatpush1.bf16.msra.mxu0 %v12904_v39  ;;  %10278 = vmatpush1.bf16.msra.mxu1 %v12906_v40  ;;  %v12968_v39 = vcombine.low %v391_v27, %v395_v28  ;;  %v12970_v40 = vcombine.low %v392_v29, %v396_v30  ;;  %v13025_v27 = vcombine.high %v447_v20, %v451_v21  ;;  %v455_v29 = vld [vmem:[%s19811_s1 + $0xcc0] sm:$0xff] }
  0x93   :  { %9720 = vmatprep.subr.bf16.mxu0 %v12913_v41  ;;  %10279 = vmatprep.subr.bf16.mxu1 %v12915_v42  ;;  %v12977_v41 = vcombine.high %v399_v35, %v403_v36  ;;  %v12979_v42 = vcombine.high %v400_v37, %v404_v38  ;;  %v459_v30 = vld [vmem:[%s19811_s1 + $0xce0] sm:$0xff] }
  0x96   :  { %9721 = vmatpush1.bf16.msra.mxu0 %v12912_v47  ;;  %10280 = vmatpush1.bf16.msra.mxu1 %v12914_v48  ;;  %v12976_v47 = vcombine.low %v399_v35, %v403_v36  ;;  %v12978_v48 = vcombine.low %v400_v37, %v404_v38  ;;  %v13033_v35 = vcombine.high %v455_v29, %v459_v30  ;;  %v463_v37 = vld [vmem:[%s19811_s1 + $0xd00] sm:$0xff] }
  0x97   :  { %9722 = vmatprep.subr.bf16.mxu0 %v12921_v49  ;;  %10281 = vmatprep.subr.bf16.mxu1 %v12923_v50  ;;  %v12985_v49 = vcombine.high %v407_v43, %v411_v44  ;;  %v12987_v50 = vcombine.high %v408_v45, %v412_v46  ;;  %v467_v38 = vld [vmem:[%s19811_s1 + $0xd20] sm:$0xff] }
  0x9a   :  { %9723 = vmatpush1.bf16.msra.mxu0 %v12920_v55  ;;  %10282 = vmatpush1.bf16.msra.mxu1 %v12922_v56  ;;  %v12984_v55 = vcombine.low %v407_v43, %v411_v44  ;;  %v12986_v56 = vcombine.low %v408_v45, %v412_v46  ;;  %v13041_v43 = vcombine.high %v463_v37, %v467_v38  ;;  %v471_v45 = vld [vmem:[%s19811_s1 + $0xd40] sm:$0xff] }
  0x9b   :  { %9724 = vmatprep.subr.bf16.mxu0 %v12929_v57  ;;  %10283 = vmatprep.subr.bf16.mxu1 %v12931_v58  ;;  %v12993_v57 = vcombine.high %v415_v51, %v419_v52  ;;  %v12995_v58 = vcombine.high %v416_v53, %v420_v54  ;;  %v475_v46 = vld [vmem:[%s19811_s1 + $0xd60] sm:$0xff] }
  0x9e   :  { %9725 = vmatpush1.bf16.msra.mxu0 %v12928_v63  ;;  %10284 = vmatpush1.bf16.msra.mxu1 %v12930_v0  ;;  %v12992_v63 = vcombine.low %v415_v51, %v419_v52  ;;  %v12994_v0 = vcombine.low %v416_v53, %v420_v54  ;;  %v13049_v51 = vcombine.high %v471_v45, %v475_v46  ;;  %v479_v53 = vld [vmem:[%s19811_s1 + $0xd80] sm:$0xff] }
  0x9f   :  { %9726 = vmatprep.subr.bf16.mxu0 %v12937_v1  ;;  %10285 = vmatprep.subr.bf16.mxu1 %v12939_v2  ;;  %v13001_v1 = vcombine.high %v423_v59, %v427_v60  ;;  %v13003_v2 = vcombine.high %v424_v61, %v428_v62  ;;  %v483_v54 = vld [vmem:[%s19811_s1 + $0xda0] sm:$0xff] }
  0xa2   :  { %9727 = vmatpush1.bf16.msra.mxu0 %v12936_v7  ;;  %10286 = vmatpush1.bf16.msra.mxu1 %v12938_v8  ;;  %v13000_v7 = vcombine.low %v423_v59, %v427_v60  ;;  %v13002_v8 = vcombine.low %v424_v61, %v428_v62  ;;  %v13057_v59 = vcombine.high %v479_v53, %v483_v54  ;;  %v487_v61 = vld [vmem:[%s19811_s1 + $0xdc0] sm:$0xff] }
  0xa3   :  { %9728 = vmatprep.subr.bf16.mxu0 %v12945_v9  ;;  %10287 = vmatprep.subr.bf16.mxu1 %v12947_v10  ;;  %v13009_v9 = vcombine.high %v431_v3, %v435_v4  ;;  %v13011_v10 = vcombine.high %v432_v5, %v436_v6  ;;  %v491_v62 = vld [vmem:[%s19811_s1 + $0xde0] sm:$0xff] }
  0xa6   :  { %9729 = vmatpush1.bf16.msra.mxu0 %v12944_v15  ;;  %10288 = vmatpush1.bf16.msra.mxu1 %v12946_v16  ;;  %v444_v15 = vld [vmem:[%s19811_s1 + $0xc68] sm:$0xff]  ;;  %v13008_v16 = vcombine.low %v431_v3, %v435_v4  ;;  %v13065_v3 = vcombine.high %v487_v61, %v491_v62 }
  0xa7   :  { %9730 = vmatprep.subr.bf16.mxu0 %v12953_v17  ;;  %10289 = vmatprep.subr.bf16.mxu1 %v12955_v18  ;;  %v13010_v17 = vcombine.low %v432_v5, %v436_v6  ;;  %v13017_v18 = vcombine.high %v439_v11, %v443_v12  ;;  %v13019_v19 = vcombine.high %v440_v14, %v444_v15  ;;  %v495_v5 = vld [vmem:[%s19811_s1 + $0xe00] sm:$0xff] }
  0xa8   :  { %v499_v6 = vld [vmem:[%s19811_s1 + $0xe20] sm:$0xff] }
  0xaa   :  { %9731 = vmatpush1.bf16.msra.mxu0 %v12952_v23  ;;  %10290 = vmatpush1.bf16.msra.mxu1 %v12954_v24  ;;  %v448_v23 = vld [vmem:[%s19811_s1 + $0xc88] sm:$0xff] }
  0xab   :  { %9732 = vmatprep.subr.bf16.mxu0 %v12961_v25  ;;  %10291 = vmatprep.subr.bf16.mxu1 %v12963_v26  ;;  %v452_v24 = vld [vmem:[%s19811_s1 + $0xca8] sm:$0xff]  ;;  %v13016_v25 = vcombine.low %v439_v11, %v443_v12  ;;  %v13018_v26 = vcombine.low %v440_v14, %v444_v15  ;;  %v13073_v11 = vcombine.high %v495_v5, %v499_v6  ;;  %v507_v14 = vld [vmem:[%s19811_s1 + $0xe60] sm:$0xff] }
  0xac   :  { %v13027_v28 = vcombine.high %v448_v23, %v452_v24  ;;  %v504_v15 = vld [vmem:[%s19811_s1 + $0xe48] sm:$0xff] }
  0xae   :  { %9733 = vmatpush1.bf16.msra.mxu0 %v12960_v31  ;;  %10292 = vmatpush1.bf16.msra.mxu1 %v12962_v32  ;;  %v456_v31 = vld [vmem:[%s19811_s1 + $0xcc8] sm:$0xff] }
  0xaf   :  { %9734 = vmatprep.subr.bf16.mxu0 %v12969_v33  ;;  %10293 = vmatprep.subr.bf16.mxu1 %v12971_v34  ;;  %v460_v32 = vld [vmem:[%s19811_s1 + $0xce8] sm:$0xff]  ;;  %v13024_v33 = vcombine.low %v447_v20, %v451_v21  ;;  %v13026_v34 = vcombine.low %v448_v23, %v452_v24  ;;  %v511_v21 = vld [vmem:[%s19811_s1 + $0xe80] sm:$0xff] }
  0xb0   :  { %v13035_v36 = vcombine.high %v456_v31, %v460_v32  ;;  %v512_v23 = vld [vmem:[%s19811_s1 + $0xe88] sm:$0xff] }
  0xb1   :  { %v516_v24 = vld [vmem:[%s19811_s1 + $0xea8] sm:$0xff] }
  0xb2   :  { %9735 = vmatpush1.bf16.msra.mxu0 %v12968_v39  ;;  %10294 = vmatpush1.bf16.msra.mxu1 %v12970_v40  ;;  %v464_v39 = vld [vmem:[%s19811_s1 + $0xd08] sm:$0xff] }
  0xb3   :  { %9736 = vmatprep.subr.bf16.mxu0 %v12977_v41  ;;  %10295 = vmatprep.subr.bf16.mxu1 %v12979_v42  ;;  %v468_v40 = vld [vmem:[%s19811_s1 + $0xd28] sm:$0xff]  ;;  %v13032_v41 = vcombine.low %v455_v29, %v459_v30  ;;  %v13034_v42 = vcombine.low %v456_v31, %v460_v32  ;;  %v519_v29 = vld [vmem:[%s19811_s1 + $0xec0] sm:$0xff] }
  0xb4   :  { %v13043_v44 = vcombine.high %v464_v39, %v468_v40  ;;  %v523_v30 = vld [vmem:[%s19811_s1 + $0xee0] sm:$0xff]  ;;  %v520_v31 = vld [vmem:[%s19811_s1 + $0xec8] sm:$0xff] }
  0xb5   :  { %v524_v32 = vld [vmem:[%s19811_s1 + $0xee8] sm:$0xff] }
  0xb6   :  { %9737 = vmatpush1.bf16.msra.mxu0 %v12976_v47  ;;  %10296 = vmatpush1.bf16.msra.mxu1 %v12978_v48  ;;  %v472_v47 = vld [vmem:[%s19811_s1 + $0xd48] sm:$0xff] }
  0xb7   :  { %9738 = vmatprep.subr.bf16.mxu0 %v12985_v49  ;;  %10297 = vmatprep.subr.bf16.mxu1 %v12987_v50  ;;  %v476_v48 = vld [vmem:[%s19811_s1 + $0xd68] sm:$0xff]  ;;  %v13040_v49 = vcombine.low %v463_v37, %v467_v38  ;;  %v13042_v50 = vcombine.low %v464_v39, %v468_v40  ;;  %v527_v37 = vld [vmem:[%s19811_s1 + $0xf00] sm:$0xff] }
  0xb8   :  { %v13051_v52 = vcombine.high %v472_v47, %v476_v48  ;;  %v531_v38 = vld [vmem:[%s19811_s1 + $0xf20] sm:$0xff]  ;;  %v528_v39 = vld [vmem:[%s19811_s1 + $0xf08] sm:$0xff] }
  0xb9   :  { %v532_v40 = vld [vmem:[%s19811_s1 + $0xf28] sm:$0xff] }
  0xba   :  { %9739 = vmatpush1.bf16.msra.mxu0 %v12984_v55  ;;  %10298 = vmatpush1.bf16.msra.mxu1 %v12986_v56  ;;  %v480_v55 = vld [vmem:[%s19811_s1 + $0xd88] sm:$0xff] }
  0xbb   :  { %9740 = vmatprep.subr.bf16.mxu0 %v12993_v57  ;;  %10299 = vmatprep.subr.bf16.mxu1 %v12995_v58  ;;  %v484_v56 = vld [vmem:[%s19811_s1 + $0xda8] sm:$0xff]  ;;  %v13048_v57 = vcombine.low %v471_v45, %v475_v46  ;;  %v13050_v58 = vcombine.low %v472_v47, %v476_v48  ;;  %v535_v45 = vld [vmem:[%s19811_s1 + $0xf40] sm:$0xff] }
  0xbc   :  { %v13059_v60 = vcombine.high %v480_v55, %v484_v56  ;;  %v539_v46 = vld [vmem:[%s19811_s1 + $0xf60] sm:$0xff]  ;;  %v536_v47 = vld [vmem:[%s19811_s1 + $0xf48] sm:$0xff] }
  0xbd   :  { %v540_v48 = vld [vmem:[%s19811_s1 + $0xf68] sm:$0xff] }
  0xbe   :  { %9741 = vmatpush1.bf16.msra.mxu0 %v12992_v63  ;;  %10300 = vmatpush1.bf16.msra.mxu1 %v12994_v0  ;;  %v488_v63 = vld [vmem:[%s19811_s1 + $0xdc8] sm:$0xff] }
  0xbf   :  { %9742 = vmatprep.subr.bf16.mxu0 %v13001_v1  ;;  %10301 = vmatprep.subr.bf16.mxu1 %v13003_v2  ;;  %v492_v0 = vld [vmem:[%s19811_s1 + $0xde8] sm:$0xff]  ;;  %v13056_v1 = vcombine.low %v479_v53, %v483_v54  ;;  %v13058_v2 = vcombine.low %v480_v55, %v484_v56  ;;  %v543_v53 = vld [vmem:[%s19811_s1 + $0xf80] sm:$0xff] }
  0xc0   :  { %v13067_v4 = vcombine.high %v488_v63, %v492_v0  ;;  %v547_v54 = vld [vmem:[%s19811_s1 + $0xfa0] sm:$0xff]  ;;  %v544_v55 = vld [vmem:[%s19811_s1 + $0xf88] sm:$0xff] }
  0xc1   :  { %v548_v56 = vld [vmem:[%s19811_s1 + $0xfa8] sm:$0xff] }
  0xc2   :  { %9743 = vmatpush1.bf16.msra.mxu0 %v13000_v7  ;;  %10302 = vmatpush1.bf16.msra.mxu1 %v13002_v8  ;;  %v496_v7 = vld [vmem:[%s19811_s1 + $0xe08] sm:$0xff] }
  0xc3   :  { %9755 = vmatprep.subr.bf16.mxu0 %v13009_v9  ;;  %10314 = vmatprep.subr.bf16.mxu1 %v13011_v10  ;;  %v500_v8 = vld [vmem:[%s19811_s1 + $0xe28] sm:$0xff]  ;;  %v13064_v9 = vcombine.low %v487_v61, %v491_v62  ;;  %v13066_v10 = vcombine.low %v488_v63, %v492_v0  ;;  %v551_v61 = vld [vmem:[%s19811_s1 + $0xfc0] sm:$0xff] }
  0xc4   :  { %v13075_v12 = vcombine.high %v496_v7, %v500_v8  ;;  %v555_v62 = vld [vmem:[%s19811_s1 + $0xfe0] sm:$0xff]  ;;  %v552_v63 = vld [vmem:[%s19811_s1 + $0xfc8] sm:$0xff] }
  0xc5   :  { %9745 = vmatmul.mubr.bf16.vlgmr.msra.gmra.mrb[0].mxu0 %v14569_v13  ;;  %10304 = vmatmul.mubr.bf16.vlgmr.msra.gmra.mrb[0].mxu1 %v14569_v13  ;;  %v503_v13 = vld [vmem:[%s19811_s1 + $0xe40] sm:$0xff]  ;;  %v556_v0 = vld [vmem:[%s19811_s1 + $0xfe8] sm:$0xff] }
  0xc6   :  { %9756 = vmatpush1.bf16.msra.mxu0 %v13008_v16  ;;  %10315 = vmatpush1.bf16.msra.mxu1 %v13010_v17  ;;  %v508_v16 = vld [vmem:[%s19811_s1 + $0xe68] sm:$0xff]  ;;  %v13072_v17 = vcombine.low %v495_v5, %v499_v6  ;;  %v559_v5 = vld [vmem:[%s19811_s1 + $0x1000] sm:$0xff] }
  0xc7   :  { %9757 = vmatprep.subr.bf16.mxu0 %v13017_v18  ;;  %10316 = vmatprep.subr.bf16.mxu1 %v13019_v19  ;;  %v13074_v18 = vcombine.low %v496_v7, %v500_v8  ;;  %v13081_v19 = vcombine.high %v503_v13, %v507_v14  ;;  %v13083_v20 = vcombine.high %v504_v15, %v508_v16  ;;  %v563_v6 = vld [vmem:[%s19811_s1 + $0x1020] sm:$0xff]  ;;  %v560_v7 = vld [vmem:[%s19811_s1 + $0x1008] sm:$0xff] }
  0xc8   :  { %9787 = vmatprep.mubr.bf16.mxu0 %v14570_v22  ;;  %10346 = vmatprep.mubr.bf16.mxu1 %v14570_v22  ;;  %v515_v22 = vld [vmem:[%s19811_s1 + $0xea0] sm:$0xff]  ;;  %v564_v8 = vld [vmem:[%s19811_s1 + $0x1028] sm:$0xff] }
  0xca   :  { %9758 = vmatpush1.bf16.msra.mxu0 %v13016_v25  ;;  %10317 = vmatpush1.bf16.msra.mxu1 %v13018_v26  ;;  %v13080_v25 = vcombine.low %v503_v13, %v507_v14  ;;  %v13082_v26 = vcombine.low %v504_v15, %v508_v16  ;;  %v567_v13 = vld [vmem:[%s19811_s1 + $0x1040] sm:$0xff]  ;;  %v14572_v15 = vld [vmem:[%s19812_s0 + $0x18] ss:$100 sps:$4 sm:$0xff]   ;;  %v568_v16 = vld [vmem:[%s19811_s1 + $0x1048] sm:$0xff] }
  0xcb   :  { %9759 = vmatprep.subr.bf16.mxu0 %v13025_v27  ;;  %10318 = vmatprep.subr.bf16.mxu1 %v13027_v28  ;;  %v13089_v27 = vcombine.high %v511_v21, %v515_v22  ;;  %v13091_v28 = vcombine.high %v512_v23, %v516_v24  ;;  %v571_v14 = vld [vmem:[%s19811_s1 + $0x1060] sm:$0xff] }
  0xce   :  { %9760 = vmatpush1.bf16.msra.mxu0 %v13024_v33  ;;  %10319 = vmatpush1.bf16.msra.mxu1 %v13026_v34  ;;  %v13088_v33 = vcombine.low %v511_v21, %v515_v22  ;;  %v13090_v34 = vcombine.low %v512_v23, %v516_v24  ;;  %v575_v22 = vld [vmem:[%s19811_s1 + $0x1080] sm:$0xff] }
  0xcf   :  { %9761 = vmatprep.subr.bf16.mxu0 %v13033_v35  ;;  %10320 = vmatprep.subr.bf16.mxu1 %v13035_v36  ;;  %v13097_v35 = vcombine.high %v519_v29, %v523_v30  ;;  %v13099_v36 = vcombine.high %v520_v31, %v524_v32  ;;  %v579_v23 = vld [vmem:[%s19811_s1 + $0x10a0] sm:$0xff] }
  0xd0   :  { %v14573_v24 = vld [vmem:[%s19812_s0 + $0x24] ss:$100 sps:$4 sm:$0xff]  }
  0xd2   :  { %9762 = vmatpush1.bf16.msra.mxu0 %v13032_v41  ;;  %10321 = vmatpush1.bf16.msra.mxu1 %v13034_v42  ;;  %v13096_v41 = vcombine.low %v519_v29, %v523_v30  ;;  %v13098_v42 = vcombine.low %v520_v31, %v524_v32  ;;  %v13153_v29 = vcombine.high %v575_v22, %v579_v23  ;;  %v583_v31 = vld [vmem:[%s19811_s1 + $0x10c0] sm:$0xff] }
  0xd3   :  { %9763 = vmatprep.subr.bf16.mxu0 %v13041_v43  ;;  %10322 = vmatprep.subr.bf16.mxu1 %v13043_v44  ;;  %v13105_v43 = vcombine.high %v527_v37, %v531_v38  ;;  %v13107_v44 = vcombine.high %v528_v39, %v532_v40  ;;  %v587_v32 = vld [vmem:[%s19811_s1 + $0x10e0] sm:$0xff] }
  0xd6   :  { %9764 = vmatpush1.bf16.msra.mxu0 %v13040_v49  ;;  %10323 = vmatpush1.bf16.msra.mxu1 %v13042_v50  ;;  %v13104_v49 = vcombine.low %v527_v37, %v531_v38  ;;  %v13106_v50 = vcombine.low %v528_v39, %v532_v40  ;;  %v13161_v37 = vcombine.high %v583_v31, %v587_v32  ;;  %v591_v39 = vld [vmem:[%s19811_s1 + $0x1100] sm:$0xff] }
  0xd7   :  { %9765 = vmatprep.subr.bf16.mxu0 %v13049_v51  ;;  %10324 = vmatprep.subr.bf16.mxu1 %v13051_v52  ;;  %v13113_v51 = vcombine.high %v535_v45, %v539_v46  ;;  %v13115_v52 = vcombine.high %v536_v47, %v540_v48  ;;  %v595_v40 = vld [vmem:[%s19811_s1 + $0x1120] sm:$0xff] }
  0xda   :  { %9766 = vmatpush1.bf16.msra.mxu0 %v13048_v57  ;;  %10325 = vmatpush1.bf16.msra.mxu1 %v13050_v58  ;;  %v13112_v57 = vcombine.low %v535_v45, %v539_v46  ;;  %v13114_v58 = vcombine.low %v536_v47, %v540_v48  ;;  %v13169_v45 = vcombine.high %v591_v39, %v595_v40  ;;  %v599_v47 = vld [vmem:[%s19811_s1 + $0x1140] sm:$0xff] }
  0xdb   :  { %9767 = vmatprep.subr.bf16.mxu0 %v13057_v59  ;;  %10326 = vmatprep.subr.bf16.mxu1 %v13059_v60  ;;  %v13121_v59 = vcombine.high %v543_v53, %v547_v54  ;;  %v13123_v60 = vcombine.high %v544_v55, %v548_v56  ;;  %v603_v48 = vld [vmem:[%s19811_s1 + $0x1160] sm:$0xff] }
  0xde   :  { %9768 = vmatpush1.bf16.msra.mxu0 %v13056_v1  ;;  %10327 = vmatpush1.bf16.msra.mxu1 %v13058_v2  ;;  %v13120_v1 = vcombine.low %v543_v53, %v547_v54  ;;  %v13122_v2 = vcombine.low %v544_v55, %v548_v56  ;;  %v13177_v53 = vcombine.high %v599_v47, %v603_v48  ;;  %v607_v55 = vld [vmem:[%s19811_s1 + $0x1180] sm:$0xff] }
  0xdf   :  { %9769 = vmatprep.subr.bf16.mxu0 %v13065_v3  ;;  %10328 = vmatprep.subr.bf16.mxu1 %v13067_v4  ;;  %v13129_v3 = vcombine.high %v551_v61, %v555_v62  ;;  %v13131_v4 = vcombine.high %v552_v63, %v556_v0  ;;  %v611_v56 = vld [vmem:[%s19811_s1 + $0x11a0] sm:$0xff] }
  0xe2   :  { %9770 = vmatpush1.bf16.msra.mxu0 %v13064_v9  ;;  %10329 = vmatpush1.bf16.msra.mxu1 %v13066_v10  ;;  %v13128_v9 = vcombine.low %v551_v61, %v555_v62  ;;  %v13130_v10 = vcombine.low %v552_v63, %v556_v0  ;;  %v13185_v61 = vcombine.high %v607_v55, %v611_v56  ;;  %v615_v63 = vld [vmem:[%s19811_s1 + $0x11c0] sm:$0xff] }
  0xe3   :  { %9771 = vmatprep.subr.bf16.mxu0 %v13073_v11  ;;  %10330 = vmatprep.subr.bf16.mxu1 %v13075_v12  ;;  %v13137_v11 = vcombine.high %v559_v5, %v563_v6  ;;  %v13139_v12 = vcombine.high %v560_v7, %v564_v8  ;;  %v619_v0 = vld [vmem:[%s19811_s1 + $0x11e0] sm:$0xff] }
  0xe6   :  { %9772 = vmatpush1.bf16.msra.mxu0 %v13072_v17  ;;  %10331 = vmatpush1.bf16.msra.mxu1 %v13074_v18  ;;  %v572_v17 = vld [vmem:[%s19811_s1 + $0x1068] sm:$0xff]  ;;  %v13136_v18 = vcombine.low %v559_v5, %v563_v6  ;;  %v13193_v5 = vcombine.high %v615_v63, %v619_v0 }
  0xe7   :  { %9773 = vmatprep.subr.bf16.mxu0 %v13081_v19  ;;  %10332 = vmatprep.subr.bf16.mxu1 %v13083_v20  ;;  %v13138_v19 = vcombine.low %v560_v7, %v564_v8  ;;  %v13145_v20 = vcombine.high %v567_v13, %v571_v14  ;;  %v13147_v21 = vcombine.high %v568_v16, %v572_v17  ;;  %v623_v7 = vld [vmem:[%s19811_s1 + $0x1200] sm:$0xff] }
  0xe8   :  { %v627_v8 = vld [vmem:[%s19811_s1 + $0x1220] sm:$0xff] }
  0xea   :  { %9774 = vmatpush1.bf16.msra.mxu0 %v13080_v25  ;;  %10333 = vmatpush1.bf16.msra.mxu1 %v13082_v26  ;;  %v576_v25 = vld [vmem:[%s19811_s1 + $0x1088] sm:$0xff] }
  0xeb   :  { %9775 = vmatprep.subr.bf16.mxu0 %v13089_v27  ;;  %10334 = vmatprep.subr.bf16.mxu1 %v13091_v28  ;;  %v580_v26 = vld [vmem:[%s19811_s1 + $0x10a8] sm:$0xff]  ;;  %v13144_v27 = vcombine.low %v567_v13, %v571_v14  ;;  %v13146_v28 = vcombine.low %v568_v16, %v572_v17  ;;  %v13201_v13 = vcombine.high %v623_v7, %v627_v8  ;;  %v635_v16 = vld [vmem:[%s19811_s1 + $0x1260] sm:$0xff] }
  0xec   :  { %v13155_v30 = vcombine.high %v576_v25, %v580_v26  ;;  %v632_v17 = vld [vmem:[%s19811_s1 + $0x1248] sm:$0xff] }
  0xee   :  { %9776 = vmatpush1.bf16.msra.mxu0 %v13088_v33  ;;  %10335 = vmatpush1.bf16.msra.mxu1 %v13090_v34  ;;  %v584_v33 = vld [vmem:[%s19811_s1 + $0x10c8] sm:$0xff] }
  0xef   :  { %9777 = vmatprep.subr.bf16.mxu0 %v13097_v35  ;;  %10336 = vmatprep.subr.bf16.mxu1 %v13099_v36  ;;  %v588_v34 = vld [vmem:[%s19811_s1 + $0x10e8] sm:$0xff]  ;;  %v13152_v35 = vcombine.low %v575_v22, %v579_v23  ;;  %v13154_v36 = vcombine.low %v576_v25, %v580_v26  ;;  %v639_v23 = vld [vmem:[%s19811_s1 + $0x1280] sm:$0xff] }
  0xf0   :  { %v13163_v38 = vcombine.high %v584_v33, %v588_v34  ;;  %v640_v25 = vld [vmem:[%s19811_s1 + $0x1288] sm:$0xff] }
  0xf1   :  { %v644_v26 = vld [vmem:[%s19811_s1 + $0x12a8] sm:$0xff] }
  0xf2   :  { %9778 = vmatpush1.bf16.msra.mxu0 %v13096_v41  ;;  %10337 = vmatpush1.bf16.msra.mxu1 %v13098_v42  ;;  %v592_v41 = vld [vmem:[%s19811_s1 + $0x1108] sm:$0xff] }
  0xf3   :  { %9779 = vmatprep.subr.bf16.mxu0 %v13105_v43  ;;  %10338 = vmatprep.subr.bf16.mxu1 %v13107_v44  ;;  %v596_v42 = vld [vmem:[%s19811_s1 + $0x1128] sm:$0xff]  ;;  %v13160_v43 = vcombine.low %v583_v31, %v587_v32  ;;  %v13162_v44 = vcombine.low %v584_v33, %v588_v34  ;;  %v647_v31 = vld [vmem:[%s19811_s1 + $0x12c0] sm:$0xff] }
  0xf4   :  { %v13171_v46 = vcombine.high %v592_v41, %v596_v42  ;;  %v651_v32 = vld [vmem:[%s19811_s1 + $0x12e0] sm:$0xff]  ;;  %v648_v33 = vld [vmem:[%s19811_s1 + $0x12c8] sm:$0xff] }
  0xf5   :  { %v652_v34 = vld [vmem:[%s19811_s1 + $0x12e8] sm:$0xff] }
  0xf6   :  { %9780 = vmatpush1.bf16.msra.mxu0 %v13104_v49  ;;  %10339 = vmatpush1.bf16.msra.mxu1 %v13106_v50  ;;  %v600_v49 = vld [vmem:[%s19811_s1 + $0x1148] sm:$0xff] }
  0xf7   :  { %9781 = vmatprep.subr.bf16.mxu0 %v13113_v51  ;;  %10340 = vmatprep.subr.bf16.mxu1 %v13115_v52  ;;  %v604_v50 = vld [vmem:[%s19811_s1 + $0x1168] sm:$0xff]  ;;  %v13168_v51 = vcombine.low %v591_v39, %v595_v40  ;;  %v13170_v52 = vcombine.low %v592_v41, %v596_v42  ;;  %v655_v39 = vld [vmem:[%s19811_s1 + $0x1300] sm:$0xff] }
  0xf8   :  { %v13179_v54 = vcombine.high %v600_v49, %v604_v50  ;;  %v659_v40 = vld [vmem:[%s19811_s1 + $0x1320] sm:$0xff]  ;;  %v656_v41 = vld [vmem:[%s19811_s1 + $0x1308] sm:$0xff] }
  0xf9   :  { %v660_v42 = vld [vmem:[%s19811_s1 + $0x1328] sm:$0xff] }
  0xfa   :  { %9782 = vmatpush1.bf16.msra.mxu0 %v13112_v57  ;;  %10341 = vmatpush1.bf16.msra.mxu1 %v13114_v58  ;;  %v608_v57 = vld [vmem:[%s19811_s1 + $0x1188] sm:$0xff] }
  0xfb   :  { %9783 = vmatprep.subr.bf16.mxu0 %v13121_v59  ;;  %10342 = vmatprep.subr.bf16.mxu1 %v13123_v60  ;;  %v612_v58 = vld [vmem:[%s19811_s1 + $0x11a8] sm:$0xff]  ;;  %v13176_v59 = vcombine.low %v599_v47, %v603_v48  ;;  %v13178_v60 = vcombine.low %v600_v49, %v604_v50  ;;  %v663_v47 = vld [vmem:[%s19811_s1 + $0x1340] sm:$0xff] }
  0xfc   :  { %v13187_v62 = vcombine.high %v608_v57, %v612_v58  ;;  %v667_v48 = vld [vmem:[%s19811_s1 + $0x1360] sm:$0xff]  ;;  %v664_v49 = vld [vmem:[%s19811_s1 + $0x1348] sm:$0xff] }
  0xfd   :  { %v668_v50 = vld [vmem:[%s19811_s1 + $0x1368] sm:$0xff] }
  0xfe   :  { %9784 = vmatpush1.bf16.msra.mxu0 %v13120_v1  ;;  %10343 = vmatpush1.bf16.msra.mxu1 %v13122_v2  ;;  %v616_v1 = vld [vmem:[%s19811_s1 + $0x11c8] sm:$0xff] }
  0xff   :  { %9785 = vmatprep.subr.bf16.mxu0 %v13129_v3  ;;  %10344 = vmatprep.subr.bf16.mxu1 %v13131_v4  ;;  %v620_v2 = vld [vmem:[%s19811_s1 + $0x11e8] sm:$0xff]  ;;  %v13184_v3 = vcombine.low %v607_v55, %v611_v56  ;;  %v13186_v4 = vcombine.low %v608_v57, %v612_v58  ;;  %v671_v55 = vld [vmem:[%s19811_s1 + $0x1380] sm:$0xff] }
 0x100   :  { %v13195_v6 = vcombine.high %v616_v1, %v620_v2  ;;  %v675_v56 = vld [vmem:[%s19811_s1 + $0x13a0] sm:$0xff]  ;;  %v672_v57 = vld [vmem:[%s19811_s1 + $0x1388] sm:$0xff] }
 0x101   :  { %v676_v58 = vld [vmem:[%s19811_s1 + $0x13a8] sm:$0xff] }
 0x102   :  { %9786 = vmatpush1.bf16.msra.mxu0 %v13128_v9  ;;  %10345 = vmatpush1.bf16.msra.mxu1 %v13130_v10  ;;  %v624_v9 = vld [vmem:[%s19811_s1 + $0x1208] sm:$0xff] }
 0x103   :  { %9798 = vmatprep.subr.bf16.mxu0 %v13137_v11  ;;  %10357 = vmatprep.subr.bf16.mxu1 %v13139_v12  ;;  %v628_v10 = vld [vmem:[%s19811_s1 + $0x1228] sm:$0xff]  ;;  %v13192_v11 = vcombine.low %v615_v63, %v619_v0  ;;  %v13194_v12 = vcombine.low %v616_v1, %v620_v2  ;;  %v679_v63 = vld [vmem:[%s19811_s1 + $0x13c0] sm:$0xff] }
 0x104   :  { %v13203_v14 = vcombine.high %v624_v9, %v628_v10  ;;  %v683_v0 = vld [vmem:[%s19811_s1 + $0x13e0] sm:$0xff]  ;;  %v680_v1 = vld [vmem:[%s19811_s1 + $0x13c8] sm:$0xff] }
 0x105   :  { %9788 = vmatmul.mubr.bf16.vlgmr.msra.gmra.mrb[0].mxu0 %v14572_v15  ;;  %10347 = vmatmul.mubr.bf16.vlgmr.msra.gmra.mrb[0].mxu1 %v14572_v15  ;;  %v631_v15 = vld [vmem:[%s19811_s1 + $0x1240] sm:$0xff]  ;;  %v684_v2 = vld [vmem:[%s19811_s1 + $0x13e8] sm:$0xff] }
 0x106   :  { %9799 = vmatpush1.bf16.msra.mxu0 %v13136_v18  ;;  %10358 = vmatpush1.bf16.msra.mxu1 %v13138_v19  ;;  %v636_v18 = vld [vmem:[%s19811_s1 + $0x1268] sm:$0xff]  ;;  %v13200_v19 = vcombine.low %v623_v7, %v627_v8  ;;  %v687_v7 = vld [vmem:[%s19811_s1 + $0x1400] sm:$0xff] }
 0x107   :  { %9800 = vmatprep.subr.bf16.mxu0 %v13145_v20  ;;  %10359 = vmatprep.subr.bf16.mxu1 %v13147_v21  ;;  %v13202_v20 = vcombine.low %v624_v9, %v628_v10  ;;  %v13209_v21 = vcombine.high %v631_v15, %v635_v16  ;;  %v13211_v22 = vcombine.high %v632_v17, %v636_v18  ;;  %v691_v8 = vld [vmem:[%s19811_s1 + $0x1420] sm:$0xff]  ;;  %v688_v9 = vld [vmem:[%s19811_s1 + $0x1408] sm:$0xff] }
 0x108   :  { %9830 = vmatprep.mubr.bf16.mxu0 %v14573_v24  ;;  %10389 = vmatprep.mubr.bf16.mxu1 %v14573_v24  ;;  %v643_v24 = vld [vmem:[%s19811_s1 + $0x12a0] sm:$0xff]  ;;  %v692_v10 = vld [vmem:[%s19811_s1 + $0x1428] sm:$0xff] }
 0x10a   :  { %9801 = vmatpush1.bf16.msra.mxu0 %v13144_v27  ;;  %10360 = vmatpush1.bf16.msra.mxu1 %v13146_v28  ;;  %v13208_v27 = vcombine.low %v631_v15, %v635_v16  ;;  %v13210_v28 = vcombine.low %v632_v17, %v636_v18  ;;  %v695_v15 = vld [vmem:[%s19811_s1 + $0x1440] sm:$0xff]  ;;  %v696_v18 = vld [vmem:[%s19811_s1 + $0x1448] sm:$0xff] }
 0x10b   :  { %9802 = vmatprep.subr.bf16.mxu0 %v13153_v29  ;;  %10361 = vmatprep.subr.bf16.mxu1 %v13155_v30  ;;  %v13217_v29 = vcombine.high %v639_v23, %v643_v24  ;;  %v13219_v30 = vcombine.high %v640_v25, %v644_v26  ;;  %v699_v16 = vld [vmem:[%s19811_s1 + $0x1460] sm:$0xff] }
 0x10c   :  { %v14575_v17 = vld [vmem:[%s19812_s0 + $0x20] ss:$100 sps:$4 sm:$0xff]  }
 0x10e   :  { %9803 = vmatpush1.bf16.msra.mxu0 %v13152_v35  ;;  %10362 = vmatpush1.bf16.msra.mxu1 %v13154_v36  ;;  %v13216_v35 = vcombine.low %v639_v23, %v643_v24  ;;  %v13218_v36 = vcombine.low %v640_v25, %v644_v26  ;;  %v703_v24 = vld [vmem:[%s19811_s1 + $0x1480] sm:$0xff]  ;;  %v14576_v26 = vld [vmem:[%s19812_s0 + $0x2c] ss:$100 sps:$4 sm:$0xff]  }
 0x10f   :  { %9804 = vmatprep.subr.bf16.mxu0 %v13161_v37  ;;  %10363 = vmatprep.subr.bf16.mxu1 %v13163_v38  ;;  %v13225_v37 = vcombine.high %v647_v31, %v651_v32  ;;  %v13227_v38 = vcombine.high %v648_v33, %v652_v34  ;;  %v707_v25 = vld [vmem:[%s19811_s1 + $0x14a0] sm:$0xff] }
 0x112   :  { %9805 = vmatpush1.bf16.msra.mxu0 %v13160_v43  ;;  %10364 = vmatpush1.bf16.msra.mxu1 %v13162_v44  ;;  %v13224_v43 = vcombine.low %v647_v31, %v651_v32  ;;  %v13226_v44 = vcombine.low %v648_v33, %v652_v34  ;;  %v13281_v31 = vcombine.high %v703_v24, %v707_v25  ;;  %v711_v33 = vld [vmem:[%s19811_s1 + $0x14c0] sm:$0xff] }
 0x113   :  { %9806 = vmatprep.subr.bf16.mxu0 %v13169_v45  ;;  %10365 = vmatprep.subr.bf16.mxu1 %v13171_v46  ;;  %v13233_v45 = vcombine.high %v655_v39, %v659_v40  ;;  %v13235_v46 = vcombine.high %v656_v41, %v660_v42  ;;  %v715_v34 = vld [vmem:[%s19811_s1 + $0x14e0] sm:$0xff] }
 0x116   :  { %9807 = vmatpush1.bf16.msra.mxu0 %v13168_v51  ;;  %10366 = vmatpush1.bf16.msra.mxu1 %v13170_v52  ;;  %v13232_v51 = vcombine.low %v655_v39, %v659_v40  ;;  %v13234_v52 = vcombine.low %v656_v41, %v660_v42  ;;  %v13289_v39 = vcombine.high %v711_v33, %v715_v34  ;;  %v719_v41 = vld [vmem:[%s19811_s1 + $0x1500] sm:$0xff] }
 0x117   :  { %9808 = vmatprep.subr.bf16.mxu0 %v13177_v53  ;;  %10367 = vmatprep.subr.bf16.mxu1 %v13179_v54  ;;  %v13241_v53 = vcombine.high %v663_v47, %v667_v48  ;;  %v13243_v54 = vcombine.high %v664_v49, %v668_v50  ;;  %v723_v42 = vld [vmem:[%s19811_s1 + $0x1520] sm:$0xff] }
 0x11a   :  { %9809 = vmatpush1.bf16.msra.mxu0 %v13176_v59  ;;  %10368 = vmatpush1.bf16.msra.mxu1 %v13178_v60  ;;  %v13240_v59 = vcombine.low %v663_v47, %v667_v48  ;;  %v13242_v60 = vcombine.low %v664_v49, %v668_v50  ;;  %v13297_v47 = vcombine.high %v719_v41, %v723_v42  ;;  %v727_v49 = vld [vmem:[%s19811_s1 + $0x1540] sm:$0xff] }
 0x11b   :  { %9810 = vmatprep.subr.bf16.mxu0 %v13185_v61  ;;  %10369 = vmatprep.subr.bf16.mxu1 %v13187_v62  ;;  %v13249_v61 = vcombine.high %v671_v55, %v675_v56  ;;  %v13251_v62 = vcombine.high %v672_v57, %v676_v58  ;;  %v731_v50 = vld [vmem:[%s19811_s1 + $0x1560] sm:$0xff] }
 0x11e   :  { %9811 = vmatpush1.bf16.msra.mxu0 %v13184_v3  ;;  %10370 = vmatpush1.bf16.msra.mxu1 %v13186_v4  ;;  %v13248_v3 = vcombine.low %v671_v55, %v675_v56  ;;  %v13250_v4 = vcombine.low %v672_v57, %v676_v58  ;;  %v13305_v55 = vcombine.high %v727_v49, %v731_v50  ;;  %v735_v57 = vld [vmem:[%s19811_s1 + $0x1580] sm:$0xff] }
 0x11f   :  { %9812 = vmatprep.subr.bf16.mxu0 %v13193_v5  ;;  %10371 = vmatprep.subr.bf16.mxu1 %v13195_v6  ;;  %v13257_v5 = vcombine.high %v679_v63, %v683_v0  ;;  %v13259_v6 = vcombine.high %v680_v1, %v684_v2  ;;  %v739_v58 = vld [vmem:[%s19811_s1 + $0x15a0] sm:$0xff] }
 0x122   :  { %9813 = vmatpush1.bf16.msra.mxu0 %v13192_v11  ;;  %10372 = vmatpush1.bf16.msra.mxu1 %v13194_v12  ;;  %v13256_v11 = vcombine.low %v679_v63, %v683_v0  ;;  %v13258_v12 = vcombine.low %v680_v1, %v684_v2  ;;  %v13313_v63 = vcombine.high %v735_v57, %v739_v58  ;;  %v743_v1 = vld [vmem:[%s19811_s1 + $0x15c0] sm:$0xff] }
 0x123   :  { %9814 = vmatprep.subr.bf16.mxu0 %v13201_v13  ;;  %10373 = vmatprep.subr.bf16.mxu1 %v13203_v14  ;;  %v13265_v13 = vcombine.high %v687_v7, %v691_v8  ;;  %v13267_v14 = vcombine.high %v688_v9, %v692_v10  ;;  %v747_v2 = vld [vmem:[%s19811_s1 + $0x15e0] sm:$0xff] }
 0x126   :  { %9815 = vmatpush1.bf16.msra.mxu0 %v13200_v19  ;;  %10374 = vmatpush1.bf16.msra.mxu1 %v13202_v20  ;;  %v700_v19 = vld [vmem:[%s19811_s1 + $0x1468] sm:$0xff]  ;;  %v13264_v20 = vcombine.low %v687_v7, %v691_v8  ;;  %v13321_v7 = vcombine.high %v743_v1, %v747_v2 }
 0x127   :  { %9816 = vmatprep.subr.bf16.mxu0 %v13209_v21  ;;  %10375 = vmatprep.subr.bf16.mxu1 %v13211_v22  ;;  %v13266_v21 = vcombine.low %v688_v9, %v692_v10  ;;  %v13273_v22 = vcombine.high %v695_v15, %v699_v16  ;;  %v13275_v23 = vcombine.high %v696_v18, %v700_v19  ;;  %v751_v9 = vld [vmem:[%s19811_s1 + $0x1600] sm:$0xff] }
 0x128   :  { %v755_v10 = vld [vmem:[%s19811_s1 + $0x1620] sm:$0xff] }
 0x12a   :  { %9817 = vmatpush1.bf16.msra.mxu0 %v13208_v27  ;;  %10376 = vmatpush1.bf16.msra.mxu1 %v13210_v28  ;;  %v704_v27 = vld [vmem:[%s19811_s1 + $0x1488] sm:$0xff] }
 0x12b   :  { %9818 = vmatprep.subr.bf16.mxu0 %v13217_v29  ;;  %10377 = vmatprep.subr.bf16.mxu1 %v13219_v30  ;;  %v708_v28 = vld [vmem:[%s19811_s1 + $0x14a8] sm:$0xff]  ;;  %v13272_v29 = vcombine.low %v695_v15, %v699_v16  ;;  %v13274_v30 = vcombine.low %v696_v18, %v700_v19  ;;  %v13329_v15 = vcombine.high %v751_v9, %v755_v10  ;;  %v763_v18 = vld [vmem:[%s19811_s1 + $0x1660] sm:$0xff] }
 0x12c   :  { %v13283_v32 = vcombine.high %v704_v27, %v708_v28  ;;  %v760_v19 = vld [vmem:[%s19811_s1 + $0x1648] sm:$0xff] }
 0x12e   :  { %9819 = vmatpush1.bf16.msra.mxu0 %v13216_v35  ;;  %10378 = vmatpush1.bf16.msra.mxu1 %v13218_v36  ;;  %v712_v35 = vld [vmem:[%s19811_s1 + $0x14c8] sm:$0xff] }
 0x12f   :  { %9820 = vmatprep.subr.bf16.mxu0 %v13225_v37  ;;  %10379 = vmatprep.subr.bf16.mxu1 %v13227_v38  ;;  %v716_v36 = vld [vmem:[%s19811_s1 + $0x14e8] sm:$0xff]  ;;  %v13280_v37 = vcombine.low %v703_v24, %v707_v25  ;;  %v13282_v38 = vcombine.low %v704_v27, %v708_v28  ;;  %v767_v25 = vld [vmem:[%s19811_s1 + $0x1680] sm:$0xff] }
 0x130   :  { %v13291_v40 = vcombine.high %v712_v35, %v716_v36  ;;  %v768_v27 = vld [vmem:[%s19811_s1 + $0x1688] sm:$0xff] }
 0x131   :  { %v772_v28 = vld [vmem:[%s19811_s1 + $0x16a8] sm:$0xff] }
 0x132   :  { %9821 = vmatpush1.bf16.msra.mxu0 %v13224_v43  ;;  %10380 = vmatpush1.bf16.msra.mxu1 %v13226_v44  ;;  %v720_v43 = vld [vmem:[%s19811_s1 + $0x1508] sm:$0xff] }
 0x133   :  { %9822 = vmatprep.subr.bf16.mxu0 %v13233_v45  ;;  %10381 = vmatprep.subr.bf16.mxu1 %v13235_v46  ;;  %v724_v44 = vld [vmem:[%s19811_s1 + $0x1528] sm:$0xff]  ;;  %v13288_v45 = vcombine.low %v711_v33, %v715_v34  ;;  %v13290_v46 = vcombine.low %v712_v35, %v716_v36  ;;  %v775_v33 = vld [vmem:[%s19811_s1 + $0x16c0] sm:$0xff] }
 0x134   :  { %v13299_v48 = vcombine.high %v720_v43, %v724_v44  ;;  %v779_v34 = vld [vmem:[%s19811_s1 + $0x16e0] sm:$0xff]  ;;  %v776_v35 = vld [vmem:[%s19811_s1 + $0x16c8] sm:$0xff] }
 0x135   :  { %v780_v36 = vld [vmem:[%s19811_s1 + $0x16e8] sm:$0xff] }
 0x136   :  { %9823 = vmatpush1.bf16.msra.mxu0 %v13232_v51  ;;  %10382 = vmatpush1.bf16.msra.mxu1 %v13234_v52  ;;  %v728_v51 = vld [vmem:[%s19811_s1 + $0x1548] sm:$0xff] }
 0x137   :  { %9824 = vmatprep.subr.bf16.mxu0 %v13241_v53  ;;  %10383 = vmatprep.subr.bf16.mxu1 %v13243_v54  ;;  %v732_v52 = vld [vmem:[%s19811_s1 + $0x1568] sm:$0xff]  ;;  %v13296_v53 = vcombine.low %v719_v41, %v723_v42  ;;  %v13298_v54 = vcombine.low %v720_v43, %v724_v44  ;;  %v783_v41 = vld [vmem:[%s19811_s1 + $0x1700] sm:$0xff] }
 0x138   :  { %v13307_v56 = vcombine.high %v728_v51, %v732_v52  ;;  %v787_v42 = vld [vmem:[%s19811_s1 + $0x1720] sm:$0xff]  ;;  %v784_v43 = vld [vmem:[%s19811_s1 + $0x1708] sm:$0xff] }
 0x139   :  { %v788_v44 = vld [vmem:[%s19811_s1 + $0x1728] sm:$0xff] }
 0x13a   :  { %9825 = vmatpush1.bf16.msra.mxu0 %v13240_v59  ;;  %10384 = vmatpush1.bf16.msra.mxu1 %v13242_v60  ;;  %v736_v59 = vld [vmem:[%s19811_s1 + $0x1588] sm:$0xff] }
 0x13b   :  { %9826 = vmatprep.subr.bf16.mxu0 %v13249_v61  ;;  %10385 = vmatprep.subr.bf16.mxu1 %v13251_v62  ;;  %v740_v60 = vld [vmem:[%s19811_s1 + $0x15a8] sm:$0xff]  ;;  %v13304_v61 = vcombine.low %v727_v49, %v731_v50  ;;  %v13306_v62 = vcombine.low %v728_v51, %v732_v52  ;;  %v791_v49 = vld [vmem:[%s19811_s1 + $0x1740] sm:$0xff] }
 0x13c   :  { %v13315_v0 = vcombine.high %v736_v59, %v740_v60  ;;  %v795_v50 = vld [vmem:[%s19811_s1 + $0x1760] sm:$0xff]  ;;  %v792_v51 = vld [vmem:[%s19811_s1 + $0x1748] sm:$0xff] }
 0x13d   :  { %v796_v52 = vld [vmem:[%s19811_s1 + $0x1768] sm:$0xff] }
 0x13e   :  { %9827 = vmatpush1.bf16.msra.mxu0 %v13248_v3  ;;  %10386 = vmatpush1.bf16.msra.mxu1 %v13250_v4  ;;  %v744_v3 = vld [vmem:[%s19811_s1 + $0x15c8] sm:$0xff] }
 0x13f   :  { %9828 = vmatprep.subr.bf16.mxu0 %v13257_v5  ;;  %10387 = vmatprep.subr.bf16.mxu1 %v13259_v6  ;;  %v748_v4 = vld [vmem:[%s19811_s1 + $0x15e8] sm:$0xff]  ;;  %v13312_v5 = vcombine.low %v735_v57, %v739_v58  ;;  %v13314_v6 = vcombine.low %v736_v59, %v740_v60  ;;  %v799_v57 = vld [vmem:[%s19811_s1 + $0x1780] sm:$0xff] }
 0x140   :  { %v13323_v8 = vcombine.high %v744_v3, %v748_v4  ;;  %v803_v58 = vld [vmem:[%s19811_s1 + $0x17a0] sm:$0xff]  ;;  %v800_v59 = vld [vmem:[%s19811_s1 + $0x1788] sm:$0xff] }
 0x141   :  { %v804_v60 = vld [vmem:[%s19811_s1 + $0x17a8] sm:$0xff] }
 0x142   :  { %9829 = vmatpush1.bf16.msra.mxu0 %v13256_v11  ;;  %10388 = vmatpush1.bf16.msra.mxu1 %v13258_v12  ;;  %v752_v11 = vld [vmem:[%s19811_s1 + $0x1608] sm:$0xff] }
 0x143   :  { %9841 = vmatprep.subr.bf16.mxu0 %v13265_v13  ;;  %10400 = vmatprep.subr.bf16.mxu1 %v13267_v14  ;;  %v756_v12 = vld [vmem:[%s19811_s1 + $0x1628] sm:$0xff]  ;;  %v13320_v13 = vcombine.low %v743_v1, %v747_v2  ;;  %v13322_v14 = vcombine.low %v744_v3, %v748_v4  ;;  %v807_v1 = vld [vmem:[%s19811_s1 + $0x17c0] sm:$0xff] }
 0x144   :  { %v13331_v16 = vcombine.high %v752_v11, %v756_v12  ;;  %v811_v2 = vld [vmem:[%s19811_s1 + $0x17e0] sm:$0xff]  ;;  %v808_v3 = vld [vmem:[%s19811_s1 + $0x17c8] sm:$0xff] }
 0x145   :  { %9831 = vmatmul.mubr.bf16.vlgmr.msra.gmra.mrb[0].mxu0 %v14575_v17  ;;  %10390 = vmatmul.mubr.bf16.vlgmr.msra.gmra.mrb[0].mxu1 %v14575_v17  ;;  %v759_v17 = vld [vmem:[%s19811_s1 + $0x1640] sm:$0xff]  ;;  %v812_v4 = vld [vmem:[%s19811_s1 + $0x17e8] sm:$0xff] }
 0x146   :  { %9842 = vmatpush1.bf16.msra.mxu0 %v13264_v20  ;;  %10401 = vmatpush1.bf16.msra.mxu1 %v13266_v21  ;;  %v764_v20 = vld [vmem:[%s19811_s1 + $0x1668] sm:$0xff]  ;;  %v13328_v21 = vcombine.low %v751_v9, %v755_v10  ;;  %v815_v9 = vld [vmem:[%s19811_s1 + $0x1800] sm:$0xff] }
 0x147   :  { %9843 = vmatprep.subr.bf16.mxu0 %v13273_v22  ;;  %10402 = vmatprep.subr.bf16.mxu1 %v13275_v23  ;;  %v13330_v22 = vcombine.low %v752_v11, %v756_v12  ;;  %v13337_v23 = vcombine.high %v759_v17, %v763_v18  ;;  %v13339_v24 = vcombine.high %v760_v19, %v764_v20  ;;  %v819_v10 = vld [vmem:[%s19811_s1 + $0x1820] sm:$0xff]  ;;  %v816_v11 = vld [vmem:[%s19811_s1 + $0x1808] sm:$0xff] }
 0x148   :  { %9873 = vmatprep.mubr.bf16.mxu0 %v14576_v26  ;;  %10432 = vmatprep.mubr.bf16.mxu1 %v14576_v26  ;;  %v771_v26 = vld [vmem:[%s19811_s1 + $0x16a0] sm:$0xff]  ;;  %v820_v12 = vld [vmem:[%s19811_s1 + $0x1828] sm:$0xff] }
 0x14a   :  { %9844 = vmatpush1.bf16.msra.mxu0 %v13272_v29  ;;  %10403 = vmatpush1.bf16.msra.mxu1 %v13274_v30  ;;  %v13336_v29 = vcombine.low %v759_v17, %v763_v18  ;;  %v13338_v30 = vcombine.low %v760_v19, %v764_v20  ;;  %v823_v17 = vld [vmem:[%s19811_s1 + $0x1840] sm:$0xff]  ;;  %v14578_v19 = vld [vmem:[%s19812_s0 + $0x28] ss:$100 sps:$4 sm:$0xff]  }
 0x14b   :  { %9845 = vmatprep.subr.bf16.mxu0 %v13281_v31  ;;  %10404 = vmatprep.subr.bf16.mxu1 %v13283_v32  ;;  %v13345_v31 = vcombine.high %v767_v25, %v771_v26  ;;  %v13347_v32 = vcombine.high %v768_v27, %v772_v28  ;;  %v827_v18 = vld [vmem:[%s19811_s1 + $0x1860] sm:$0xff]  ;;  %v824_v20 = vld [vmem:[%s19811_s1 + $0x1848] sm:$0xff] }
 0x14e   :  { %9846 = vmatpush1.bf16.msra.mxu0 %v13280_v37  ;;  %10405 = vmatpush1.bf16.msra.mxu1 %v13282_v38  ;;  %v13344_v37 = vcombine.low %v767_v25, %v771_v26  ;;  %v13346_v38 = vcombine.low %v768_v27, %v772_v28  ;;  %v831_v26 = vld [vmem:[%s19811_s1 + $0x1880] sm:$0xff]  ;;  %v14579_v28 = vld [vmem:[%s19812_s0 + $0x34] ss:$100 sps:$4 sm:$0xff]  }
 0x14f   :  { %9847 = vmatprep.subr.bf16.mxu0 %v13289_v39  ;;  %10406 = vmatprep.subr.bf16.mxu1 %v13291_v40  ;;  %v13353_v39 = vcombine.high %v775_v33, %v779_v34  ;;  %v13355_v40 = vcombine.high %v776_v35, %v780_v36  ;;  %v835_v27 = vld [vmem:[%s19811_s1 + $0x18a0] sm:$0xff] }
 0x152   :  { %9848 = vmatpush1.bf16.msra.mxu0 %v13288_v45  ;;  %10407 = vmatpush1.bf16.msra.mxu1 %v13290_v46  ;;  %v13352_v45 = vcombine.low %v775_v33, %v779_v34  ;;  %v13354_v46 = vcombine.low %v776_v35, %v780_v36  ;;  %v13409_v33 = vcombine.high %v831_v26, %v835_v27  ;;  %v839_v35 = vld [vmem:[%s19811_s1 + $0x18c0] sm:$0xff] }
 0x153   :  { %9849 = vmatprep.subr.bf16.mxu0 %v13297_v47  ;;  %10408 = vmatprep.subr.bf16.mxu1 %v13299_v48  ;;  %v13361_v47 = vcombine.high %v783_v41, %v787_v42  ;;  %v13363_v48 = vcombine.high %v784_v43, %v788_v44  ;;  %v843_v36 = vld [vmem:[%s19811_s1 + $0x18e0] sm:$0xff] }
 0x156   :  { %9850 = vmatpush1.bf16.msra.mxu0 %v13296_v53  ;;  %10409 = vmatpush1.bf16.msra.mxu1 %v13298_v54  ;;  %v13360_v53 = vcombine.low %v783_v41, %v787_v42  ;;  %v13362_v54 = vcombine.low %v784_v43, %v788_v44  ;;  %v13417_v41 = vcombine.high %v839_v35, %v843_v36  ;;  %v847_v43 = vld [vmem:[%s19811_s1 + $0x1900] sm:$0xff] }
 0x157   :  { %9851 = vmatprep.subr.bf16.mxu0 %v13305_v55  ;;  %10410 = vmatprep.subr.bf16.mxu1 %v13307_v56  ;;  %v13369_v55 = vcombine.high %v791_v49, %v795_v50  ;;  %v13371_v56 = vcombine.high %v792_v51, %v796_v52  ;;  %v851_v44 = vld [vmem:[%s19811_s1 + $0x1920] sm:$0xff] }
 0x15a   :  { %9852 = vmatpush1.bf16.msra.mxu0 %v13304_v61  ;;  %10411 = vmatpush1.bf16.msra.mxu1 %v13306_v62  ;;  %v13368_v61 = vcombine.low %v791_v49, %v795_v50  ;;  %v13370_v62 = vcombine.low %v792_v51, %v796_v52  ;;  %v13425_v49 = vcombine.high %v847_v43, %v851_v44  ;;  %v855_v51 = vld [vmem:[%s19811_s1 + $0x1940] sm:$0xff] }
 0x15b   :  { %9853 = vmatprep.subr.bf16.mxu0 %v13313_v63  ;;  %10412 = vmatprep.subr.bf16.mxu1 %v13315_v0  ;;  %v13377_v63 = vcombine.high %v799_v57, %v803_v58  ;;  %v13379_v0 = vcombine.high %v800_v59, %v804_v60  ;;  %v859_v52 = vld [vmem:[%s19811_s1 + $0x1960] sm:$0xff] }
 0x15e   :  { %9854 = vmatpush1.bf16.msra.mxu0 %v13312_v5  ;;  %10413 = vmatpush1.bf16.msra.mxu1 %v13314_v6  ;;  %v13376_v5 = vcombine.low %v799_v57, %v803_v58  ;;  %v13378_v6 = vcombine.low %v800_v59, %v804_v60  ;;  %v13433_v57 = vcombine.high %v855_v51, %v859_v52  ;;  %v863_v59 = vld [vmem:[%s19811_s1 + $0x1980] sm:$0xff] }
 0x15f   :  { %9855 = vmatprep.subr.bf16.mxu0 %v13321_v7  ;;  %10414 = vmatprep.subr.bf16.mxu1 %v13323_v8  ;;  %v13385_v7 = vcombine.high %v807_v1, %v811_v2  ;;  %v13387_v8 = vcombine.high %v808_v3, %v812_v4  ;;  %v867_v60 = vld [vmem:[%s19811_s1 + $0x19a0] sm:$0xff] }
 0x162   :  { %9856 = vmatpush1.bf16.msra.mxu0 %v13320_v13  ;;  %10415 = vmatpush1.bf16.msra.mxu1 %v13322_v14  ;;  %v13384_v13 = vcombine.low %v807_v1, %v811_v2  ;;  %v13386_v14 = vcombine.low %v808_v3, %v812_v4  ;;  %v13441_v1 = vcombine.high %v863_v59, %v867_v60  ;;  %v871_v3 = vld [vmem:[%s19811_s1 + $0x19c0] sm:$0xff] }
 0x163   :  { %9857 = vmatprep.subr.bf16.mxu0 %v13329_v15  ;;  %10416 = vmatprep.subr.bf16.mxu1 %v13331_v16  ;;  %v13393_v15 = vcombine.high %v815_v9, %v819_v10  ;;  %v13395_v16 = vcombine.high %v816_v11, %v820_v12  ;;  %v875_v4 = vld [vmem:[%s19811_s1 + $0x19e0] sm:$0xff] }
 0x166   :  { %9858 = vmatpush1.bf16.msra.mxu0 %v13328_v21  ;;  %10417 = vmatpush1.bf16.msra.mxu1 %v13330_v22  ;;  %v828_v21 = vld [vmem:[%s19811_s1 + $0x1868] sm:$0xff]  ;;  %v13392_v22 = vcombine.low %v815_v9, %v819_v10  ;;  %v13449_v9 = vcombine.high %v871_v3, %v875_v4 }
 0x167   :  { %9859 = vmatprep.subr.bf16.mxu0 %v13337_v23  ;;  %10418 = vmatprep.subr.bf16.mxu1 %v13339_v24  ;;  %v13394_v23 = vcombine.low %v816_v11, %v820_v12  ;;  %v13401_v24 = vcombine.high %v823_v17, %v827_v18  ;;  %v13403_v25 = vcombine.high %v824_v20, %v828_v21  ;;  %v879_v11 = vld [vmem:[%s19811_s1 + $0x1a00] sm:$0xff] }
 0x168   :  { %v883_v12 = vld [vmem:[%s19811_s1 + $0x1a20] sm:$0xff] }
 0x16a   :  { %9860 = vmatpush1.bf16.msra.mxu0 %v13336_v29  ;;  %10419 = vmatpush1.bf16.msra.mxu1 %v13338_v30  ;;  %v832_v29 = vld [vmem:[%s19811_s1 + $0x1888] sm:$0xff] }
 0x16b   :  { %9861 = vmatprep.subr.bf16.mxu0 %v13345_v31  ;;  %10420 = vmatprep.subr.bf16.mxu1 %v13347_v32  ;;  %v836_v30 = vld [vmem:[%s19811_s1 + $0x18a8] sm:$0xff]  ;;  %v13400_v31 = vcombine.low %v823_v17, %v827_v18  ;;  %v13402_v32 = vcombine.low %v824_v20, %v828_v21  ;;  %v13457_v17 = vcombine.high %v879_v11, %v883_v12  ;;  %v891_v20 = vld [vmem:[%s19811_s1 + $0x1a60] sm:$0xff] }
 0x16c   :  { %v13411_v34 = vcombine.high %v832_v29, %v836_v30  ;;  %v888_v21 = vld [vmem:[%s19811_s1 + $0x1a48] sm:$0xff] }
 0x16e   :  { %9862 = vmatpush1.bf16.msra.mxu0 %v13344_v37  ;;  %10421 = vmatpush1.bf16.msra.mxu1 %v13346_v38  ;;  %v840_v37 = vld [vmem:[%s19811_s1 + $0x18c8] sm:$0xff] }
 0x16f   :  { %9863 = vmatprep.subr.bf16.mxu0 %v13353_v39  ;;  %10422 = vmatprep.subr.bf16.mxu1 %v13355_v40  ;;  %v844_v38 = vld [vmem:[%s19811_s1 + $0x18e8] sm:$0xff]  ;;  %v13408_v39 = vcombine.low %v831_v26, %v835_v27  ;;  %v13410_v40 = vcombine.low %v832_v29, %v836_v30  ;;  %v895_v27 = vld [vmem:[%s19811_s1 + $0x1a80] sm:$0xff] }
 0x170   :  { %v13419_v42 = vcombine.high %v840_v37, %v844_v38  ;;  %v896_v29 = vld [vmem:[%s19811_s1 + $0x1a88] sm:$0xff] }
 0x171   :  { %v900_v30 = vld [vmem:[%s19811_s1 + $0x1aa8] sm:$0xff] }
 0x172   :  { %9864 = vmatpush1.bf16.msra.mxu0 %v13352_v45  ;;  %10423 = vmatpush1.bf16.msra.mxu1 %v13354_v46  ;;  %v848_v45 = vld [vmem:[%s19811_s1 + $0x1908] sm:$0xff] }
 0x173   :  { %9865 = vmatprep.subr.bf16.mxu0 %v13361_v47  ;;  %10424 = vmatprep.subr.bf16.mxu1 %v13363_v48  ;;  %v852_v46 = vld [vmem:[%s19811_s1 + $0x1928] sm:$0xff]  ;;  %v13416_v47 = vcombine.low %v839_v35, %v843_v36  ;;  %v13418_v48 = vcombine.low %v840_v37, %v844_v38  ;;  %v903_v35 = vld [vmem:[%s19811_s1 + $0x1ac0] sm:$0xff] }
 0x174   :  { %v13427_v50 = vcombine.high %v848_v45, %v852_v46  ;;  %v907_v36 = vld [vmem:[%s19811_s1 + $0x1ae0] sm:$0xff]  ;;  %v904_v37 = vld [vmem:[%s19811_s1 + $0x1ac8] sm:$0xff] }
 0x175   :  { %v908_v38 = vld [vmem:[%s19811_s1 + $0x1ae8] sm:$0xff] }
 0x176   :  { %9866 = vmatpush1.bf16.msra.mxu0 %v13360_v53  ;;  %10425 = vmatpush1.bf16.msra.mxu1 %v13362_v54  ;;  %v856_v53 = vld [vmem:[%s19811_s1 + $0x1948] sm:$0xff] }
 0x177   :  { %9867 = vmatprep.subr.bf16.mxu0 %v13369_v55  ;;  %10426 = vmatprep.subr.bf16.mxu1 %v13371_v56  ;;  %v860_v54 = vld [vmem:[%s19811_s1 + $0x1968] sm:$0xff]  ;;  %v13424_v55 = vcombine.low %v847_v43, %v851_v44  ;;  %v13426_v56 = vcombine.low %v848_v45, %v852_v46  ;;  %v911_v43 = vld [vmem:[%s19811_s1 + $0x1b00] sm:$0xff] }
 0x178   :  { %v13435_v58 = vcombine.high %v856_v53, %v860_v54  ;;  %v915_v44 = vld [vmem:[%s19811_s1 + $0x1b20] sm:$0xff]  ;;  %v912_v45 = vld [vmem:[%s19811_s1 + $0x1b08] sm:$0xff] }
 0x179   :  { %v916_v46 = vld [vmem:[%s19811_s1 + $0x1b28] sm:$0xff] }
 0x17a   :  { %9868 = vmatpush1.bf16.msra.mxu0 %v13368_v61  ;;  %10427 = vmatpush1.bf16.msra.mxu1 %v13370_v62  ;;  %v864_v61 = vld [vmem:[%s19811_s1 + $0x1988] sm:$0xff] }
 0x17b   :  { %9869 = vmatprep.subr.bf16.mxu0 %v13377_v63  ;;  %10428 = vmatprep.subr.bf16.mxu1 %v13379_v0  ;;  %v868_v62 = vld [vmem:[%s19811_s1 + $0x19a8] sm:$0xff]  ;;  %v13432_v63 = vcombine.low %v855_v51, %v859_v52  ;;  %v13434_v0 = vcombine.low %v856_v53, %v860_v54  ;;  %v919_v51 = vld [vmem:[%s19811_s1 + $0x1b40] sm:$0xff] }
 0x17c   :  { %v13443_v2 = vcombine.high %v864_v61, %v868_v62  ;;  %v923_v52 = vld [vmem:[%s19811_s1 + $0x1b60] sm:$0xff]  ;;  %v920_v53 = vld [vmem:[%s19811_s1 + $0x1b48] sm:$0xff] }
 0x17d   :  { %v924_v54 = vld [vmem:[%s19811_s1 + $0x1b68] sm:$0xff] }
 0x17e   :  { %9870 = vmatpush1.bf16.msra.mxu0 %v13376_v5  ;;  %10429 = vmatpush1.bf16.msra.mxu1 %v13378_v6  ;;  %v872_v5 = vld [vmem:[%s19811_s1 + $0x19c8] sm:$0xff] }
 0x17f   :  { %9871 = vmatprep.subr.bf16.mxu0 %v13385_v7  ;;  %10430 = vmatprep.subr.bf16.mxu1 %v13387_v8  ;;  %v876_v6 = vld [vmem:[%s19811_s1 + $0x19e8] sm:$0xff]  ;;  %v13440_v7 = vcombine.low %v863_v59, %v867_v60  ;;  %v13442_v8 = vcombine.low %v864_v61, %v868_v62  ;;  %v927_v59 = vld [vmem:[%s19811_s1 + $0x1b80] sm:$0xff] }
 0x180   :  { %v13451_v10 = vcombine.high %v872_v5, %v876_v6  ;;  %v931_v60 = vld [vmem:[%s19811_s1 + $0x1ba0] sm:$0xff]  ;;  %v928_v61 = vld [vmem:[%s19811_s1 + $0x1b88] sm:$0xff] }
 0x181   :  { %v932_v62 = vld [vmem:[%s19811_s1 + $0x1ba8] sm:$0xff] }
 0x182   :  { %9872 = vmatpush1.bf16.msra.mxu0 %v13384_v13  ;;  %10431 = vmatpush1.bf16.msra.mxu1 %v13386_v14  ;;  %v880_v13 = vld [vmem:[%s19811_s1 + $0x1a08] sm:$0xff] }
 0x183   :  { %9884 = vmatprep.subr.bf16.mxu0 %v13393_v15  ;;  %10443 = vmatprep.subr.bf16.mxu1 %v13395_v16  ;;  %v884_v14 = vld [vmem:[%s19811_s1 + $0x1a28] sm:$0xff]  ;;  %v13448_v15 = vcombine.low %v871_v3, %v875_v4  ;;  %v13450_v16 = vcombine.low %v872_v5, %v876_v6  ;;  %v935_v3 = vld [vmem:[%s19811_s1 + $0x1bc0] sm:$0xff] }
 0x184   :  { %v13459_v18 = vcombine.high %v880_v13, %v884_v14  ;;  %v939_v4 = vld [vmem:[%s19811_s1 + $0x1be0] sm:$0xff]  ;;  %v936_v5 = vld [vmem:[%s19811_s1 + $0x1bc8] sm:$0xff] }
 0x185   :  { %9874 = vmatmul.mubr.bf16.vlgmr.msra.gmra.mrb[0].mxu0 %v14578_v19  ;;  %10433 = vmatmul.mubr.bf16.vlgmr.msra.gmra.mrb[0].mxu1 %v14578_v19  ;;  %v887_v19 = vld [vmem:[%s19811_s1 + $0x1a40] sm:$0xff]  ;;  %v940_v6 = vld [vmem:[%s19811_s1 + $0x1be8] sm:$0xff] }
 0x186   :  { %9885 = vmatpush1.bf16.msra.mxu0 %v13392_v22  ;;  %10444 = vmatpush1.bf16.msra.mxu1 %v13394_v23  ;;  %v892_v22 = vld [vmem:[%s19811_s1 + $0x1a68] sm:$0xff]  ;;  %v13456_v23 = vcombine.low %v879_v11, %v883_v12  ;;  %v943_v11 = vld [vmem:[%s19811_s1 + $0x1c00] sm:$0xff] }
 0x187   :  { %9886 = vmatprep.subr.bf16.mxu0 %v13401_v24  ;;  %10445 = vmatprep.subr.bf16.mxu1 %v13403_v25  ;;  %v13458_v24 = vcombine.low %v880_v13, %v884_v14  ;;  %v13465_v25 = vcombine.high %v887_v19, %v891_v20  ;;  %v13467_v26 = vcombine.high %v888_v21, %v892_v22  ;;  %v947_v12 = vld [vmem:[%s19811_s1 + $0x1c20] sm:$0xff]  ;;  %v944_v13 = vld [vmem:[%s19811_s1 + $0x1c08] sm:$0xff] }
 0x188   :  { %9916 = vmatprep.mubr.bf16.mxu0 %v14579_v28  ;;  %10475 = vmatprep.mubr.bf16.mxu1 %v14579_v28  ;;  %v899_v28 = vld [vmem:[%s19811_s1 + $0x1aa0] sm:$0xff]  ;;  %v948_v14 = vld [vmem:[%s19811_s1 + $0x1c28] sm:$0xff] }
 0x18a   :  { %9887 = vmatpush1.bf16.msra.mxu0 %v13400_v31  ;;  %10446 = vmatpush1.bf16.msra.mxu1 %v13402_v32  ;;  %v13464_v31 = vcombine.low %v887_v19, %v891_v20  ;;  %v13466_v32 = vcombine.low %v888_v21, %v892_v22  ;;  %v951_v19 = vld [vmem:[%s19811_s1 + $0x1c40] sm:$0xff]  ;;  %v14581_v21 = vld [vmem:[%s19812_s0 + $0x30] ss:$100 sps:$4 sm:$0xff]   ;;  %v952_v22 = vld [vmem:[%s19811_s1 + $0x1c48] sm:$0xff] }
 0x18b   :  { %9888 = vmatprep.subr.bf16.mxu0 %v13409_v33  ;;  %10447 = vmatprep.subr.bf16.mxu1 %v13411_v34  ;;  %v13473_v33 = vcombine.high %v895_v27, %v899_v28  ;;  %v13475_v34 = vcombine.high %v896_v29, %v900_v30  ;;  %v955_v20 = vld [vmem:[%s19811_s1 + $0x1c60] sm:$0xff] }
 0x18e   :  { %9889 = vmatpush1.bf16.msra.mxu0 %v13408_v39  ;;  %10448 = vmatpush1.bf16.msra.mxu1 %v13410_v40  ;;  %v13472_v39 = vcombine.low %v895_v27, %v899_v28  ;;  %v13474_v40 = vcombine.low %v896_v29, %v900_v30  ;;  %v959_v28 = vld [vmem:[%s19811_s1 + $0x1c80] sm:$0xff] }
 0x18f   :  { %9890 = vmatprep.subr.bf16.mxu0 %v13417_v41  ;;  %10449 = vmatprep.subr.bf16.mxu1 %v13419_v42  ;;  %v13481_v41 = vcombine.high %v903_v35, %v907_v36  ;;  %v13483_v42 = vcombine.high %v904_v37, %v908_v38  ;;  %v963_v29 = vld [vmem:[%s19811_s1 + $0x1ca0] sm:$0xff] }
 0x190   :  { %v14582_v30 = vld [vmem:[%s19812_s0 + $0x3c] ss:$100 sps:$4 sm:$0xff]  }
 0x192   :  { %9891 = vmatpush1.bf16.msra.mxu0 %v13416_v47  ;;  %10450 = vmatpush1.bf16.msra.mxu1 %v13418_v48  ;;  %v13480_v47 = vcombine.low %v903_v35, %v907_v36  ;;  %v13482_v48 = vcombine.low %v904_v37, %v908_v38  ;;  %v13537_v35 = vcombine.high %v959_v28, %v963_v29  ;;  %v967_v37 = vld [vmem:[%s19811_s1 + $0x1cc0] sm:$0xff] }
 0x193   :  { %9892 = vmatprep.subr.bf16.mxu0 %v13425_v49  ;;  %10451 = vmatprep.subr.bf16.mxu1 %v13427_v50  ;;  %v13489_v49 = vcombine.high %v911_v43, %v915_v44  ;;  %v13491_v50 = vcombine.high %v912_v45, %v916_v46  ;;  %v971_v38 = vld [vmem:[%s19811_s1 + $0x1ce0] sm:$0xff] }
 0x196   :  { %9893 = vmatpush1.bf16.msra.mxu0 %v13424_v55  ;;  %10452 = vmatpush1.bf16.msra.mxu1 %v13426_v56  ;;  %v13488_v55 = vcombine.low %v911_v43, %v915_v44  ;;  %v13490_v56 = vcombine.low %v912_v45, %v916_v46  ;;  %v13545_v43 = vcombine.high %v967_v37, %v971_v38  ;;  %v975_v45 = vld [vmem:[%s19811_s1 + $0x1d00] sm:$0xff] }
 0x197   :  { %9894 = vmatprep.subr.bf16.mxu0 %v13433_v57  ;;  %10453 = vmatprep.subr.bf16.mxu1 %v13435_v58  ;;  %v13497_v57 = vcombine.high %v919_v51, %v923_v52  ;;  %v13499_v58 = vcombine.high %v920_v53, %v924_v54  ;;  %v979_v46 = vld [vmem:[%s19811_s1 + $0x1d20] sm:$0xff] }
 0x19a   :  { %9895 = vmatpush1.bf16.msra.mxu0 %v13432_v63  ;;  %10454 = vmatpush1.bf16.msra.mxu1 %v13434_v0  ;;  %v13496_v63 = vcombine.low %v919_v51, %v923_v52  ;;  %v13498_v0 = vcombine.low %v920_v53, %v924_v54  ;;  %v13553_v51 = vcombine.high %v975_v45, %v979_v46  ;;  %v983_v53 = vld [vmem:[%s19811_s1 + $0x1d40] sm:$0xff] }
 0x19b   :  { %9896 = vmatprep.subr.bf16.mxu0 %v13441_v1  ;;  %10455 = vmatprep.subr.bf16.mxu1 %v13443_v2  ;;  %v13505_v1 = vcombine.high %v927_v59, %v931_v60  ;;  %v13507_v2 = vcombine.high %v928_v61, %v932_v62  ;;  %v987_v54 = vld [vmem:[%s19811_s1 + $0x1d60] sm:$0xff] }
 0x19e   :  { %9897 = vmatpush1.bf16.msra.mxu0 %v13440_v7  ;;  %10456 = vmatpush1.bf16.msra.mxu1 %v13442_v8  ;;  %v13504_v7 = vcombine.low %v927_v59, %v931_v60  ;;  %v13506_v8 = vcombine.low %v928_v61, %v932_v62  ;;  %v13561_v59 = vcombine.high %v983_v53, %v987_v54  ;;  %v991_v61 = vld [vmem:[%s19811_s1 + $0x1d80] sm:$0xff] }
 0x19f   :  { %9898 = vmatprep.subr.bf16.mxu0 %v13449_v9  ;;  %10457 = vmatprep.subr.bf16.mxu1 %v13451_v10  ;;  %v13513_v9 = vcombine.high %v935_v3, %v939_v4  ;;  %v13515_v10 = vcombine.high %v936_v5, %v940_v6  ;;  %v995_v62 = vld [vmem:[%s19811_s1 + $0x1da0] sm:$0xff] }
 0x1a2   :  { %9899 = vmatpush1.bf16.msra.mxu0 %v13448_v15  ;;  %10458 = vmatpush1.bf16.msra.mxu1 %v13450_v16  ;;  %v13512_v15 = vcombine.low %v935_v3, %v939_v4  ;;  %v13514_v16 = vcombine.low %v936_v5, %v940_v6  ;;  %v13569_v3 = vcombine.high %v991_v61, %v995_v62  ;;  %v999_v5 = vld [vmem:[%s19811_s1 + $0x1dc0] sm:$0xff] }
 0x1a3   :  { %9900 = vmatprep.subr.bf16.mxu0 %v13457_v17  ;;  %10459 = vmatprep.subr.bf16.mxu1 %v13459_v18  ;;  %v13521_v17 = vcombine.high %v943_v11, %v947_v12  ;;  %v13523_v18 = vcombine.high %v944_v13, %v948_v14  ;;  %v1003_v6 = vld [vmem:[%s19811_s1 + $0x1de0] sm:$0xff] }
 0x1a6   :  { %9901 = vmatpush1.bf16.msra.mxu0 %v13456_v23  ;;  %10460 = vmatpush1.bf16.msra.mxu1 %v13458_v24  ;;  %v956_v23 = vld [vmem:[%s19811_s1 + $0x1c68] sm:$0xff]  ;;  %v13520_v24 = vcombine.low %v943_v11, %v947_v12  ;;  %v13577_v11 = vcombine.high %v999_v5, %v1003_v6 }
 0x1a7   :  { %9902 = vmatprep.subr.bf16.mxu0 %v13465_v25  ;;  %10461 = vmatprep.subr.bf16.mxu1 %v13467_v26  ;;  %v13522_v25 = vcombine.low %v944_v13, %v948_v14  ;;  %v13529_v26 = vcombine.high %v951_v19, %v955_v20  ;;  %v13531_v27 = vcombine.high %v952_v22, %v956_v23  ;;  %v1007_v13 = vld [vmem:[%s19811_s1 + $0x1e00] sm:$0xff] }
 0x1a8   :  { %v1011_v14 = vld [vmem:[%s19811_s1 + $0x1e20] sm:$0xff] }
 0x1aa   :  { %9903 = vmatpush1.bf16.msra.mxu0 %v13464_v31  ;;  %10462 = vmatpush1.bf16.msra.mxu1 %v13466_v32  ;;  %v960_v31 = vld [vmem:[%s19811_s1 + $0x1c88] sm:$0xff] }
 0x1ab   :  { %9904 = vmatprep.subr.bf16.mxu0 %v13473_v33  ;;  %10463 = vmatprep.subr.bf16.mxu1 %v13475_v34  ;;  %v964_v32 = vld [vmem:[%s19811_s1 + $0x1ca8] sm:$0xff]  ;;  %v13528_v33 = vcombine.low %v951_v19, %v955_v20  ;;  %v13530_v34 = vcombine.low %v952_v22, %v956_v23  ;;  %v13585_v19 = vcombine.high %v1007_v13, %v1011_v14  ;;  %v1019_v22 = vld [vmem:[%s19811_s1 + $0x1e60] sm:$0xff] }
 0x1ac   :  { %v13539_v36 = vcombine.high %v960_v31, %v964_v32  ;;  %v1016_v23 = vld [vmem:[%s19811_s1 + $0x1e48] sm:$0xff] }
 0x1ae   :  { %9905 = vmatpush1.bf16.msra.mxu0 %v13472_v39  ;;  %10464 = vmatpush1.bf16.msra.mxu1 %v13474_v40  ;;  %v968_v39 = vld [vmem:[%s19811_s1 + $0x1cc8] sm:$0xff] }
 0x1af   :  { %9906 = vmatprep.subr.bf16.mxu0 %v13481_v41  ;;  %10465 = vmatprep.subr.bf16.mxu1 %v13483_v42  ;;  %v972_v40 = vld [vmem:[%s19811_s1 + $0x1ce8] sm:$0xff]  ;;  %v13536_v41 = vcombine.low %v959_v28, %v963_v29  ;;  %v13538_v42 = vcombine.low %v960_v31, %v964_v32  ;;  %v1023_v29 = vld [vmem:[%s19811_s1 + $0x1e80] sm:$0xff] }
 0x1b0   :  { %v13547_v44 = vcombine.high %v968_v39, %v972_v40  ;;  %v1024_v31 = vld [vmem:[%s19811_s1 + $0x1e88] sm:$0xff] }
 0x1b1   :  { %v1028_v32 = vld [vmem:[%s19811_s1 + $0x1ea8] sm:$0xff] }
 0x1b2   :  { %9907 = vmatpush1.bf16.msra.mxu0 %v13480_v47  ;;  %10466 = vmatpush1.bf16.msra.mxu1 %v13482_v48  ;;  %v976_v47 = vld [vmem:[%s19811_s1 + $0x1d08] sm:$0xff] }
 0x1b3   :  { %9908 = vmatprep.subr.bf16.mxu0 %v13489_v49  ;;  %10467 = vmatprep.subr.bf16.mxu1 %v13491_v50  ;;  %v980_v48 = vld [vmem:[%s19811_s1 + $0x1d28] sm:$0xff]  ;;  %v13544_v49 = vcombine.low %v967_v37, %v971_v38  ;;  %v13546_v50 = vcombine.low %v968_v39, %v972_v40  ;;  %v1031_v37 = vld [vmem:[%s19811_s1 + $0x1ec0] sm:$0xff] }
 0x1b4   :  { %v13555_v52 = vcombine.high %v976_v47, %v980_v48  ;;  %v1035_v38 = vld [vmem:[%s19811_s1 + $0x1ee0] sm:$0xff]  ;;  %v1032_v39 = vld [vmem:[%s19811_s1 + $0x1ec8] sm:$0xff] }
 0x1b5   :  { %v1036_v40 = vld [vmem:[%s19811_s1 + $0x1ee8] sm:$0xff] }
 0x1b6   :  { %9909 = vmatpush1.bf16.msra.mxu0 %v13488_v55  ;;  %10468 = vmatpush1.bf16.msra.mxu1 %v13490_v56  ;;  %v984_v55 = vld [vmem:[%s19811_s1 + $0x1d48] sm:$0xff] }
 0x1b7   :  { %9910 = vmatprep.subr.bf16.mxu0 %v13497_v57  ;;  %10469 = vmatprep.subr.bf16.mxu1 %v13499_v58  ;;  %v988_v56 = vld [vmem:[%s19811_s1 + $0x1d68] sm:$0xff]  ;;  %v13552_v57 = vcombine.low %v975_v45, %v979_v46  ;;  %v13554_v58 = vcombine.low %v976_v47, %v980_v48  ;;  %v1039_v45 = vld [vmem:[%s19811_s1 + $0x1f00] sm:$0xff] }
 0x1b8   :  { %v13563_v60 = vcombine.high %v984_v55, %v988_v56  ;;  %v1043_v46 = vld [vmem:[%s19811_s1 + $0x1f20] sm:$0xff]  ;;  %v1040_v47 = vld [vmem:[%s19811_s1 + $0x1f08] sm:$0xff] }
 0x1b9   :  { %v1044_v48 = vld [vmem:[%s19811_s1 + $0x1f28] sm:$0xff] }
 0x1ba   :  { %9911 = vmatpush1.bf16.msra.mxu0 %v13496_v63  ;;  %10470 = vmatpush1.bf16.msra.mxu1 %v13498_v0  ;;  %v992_v63 = vld [vmem:[%s19811_s1 + $0x1d88] sm:$0xff] }
 0x1bb   :  { %9912 = vmatprep.subr.bf16.mxu0 %v13505_v1  ;;  %10471 = vmatprep.subr.bf16.mxu1 %v13507_v2  ;;  %v996_v0 = vld [vmem:[%s19811_s1 + $0x1da8] sm:$0xff]  ;;  %v13560_v1 = vcombine.low %v983_v53, %v987_v54  ;;  %v13562_v2 = vcombine.low %v984_v55, %v988_v56  ;;  %v1047_v53 = vld [vmem:[%s19811_s1 + $0x1f40] sm:$0xff] }
 0x1bc   :  { %v13571_v4 = vcombine.high %v992_v63, %v996_v0  ;;  %v1051_v54 = vld [vmem:[%s19811_s1 + $0x1f60] sm:$0xff]  ;;  %v1048_v55 = vld [vmem:[%s19811_s1 + $0x1f48] sm:$0xff] }
 0x1bd   :  { %v1052_v56 = vld [vmem:[%s19811_s1 + $0x1f68] sm:$0xff] }
 0x1be   :  { %9913 = vmatpush1.bf16.msra.mxu0 %v13504_v7  ;;  %10472 = vmatpush1.bf16.msra.mxu1 %v13506_v8  ;;  %v1000_v7 = vld [vmem:[%s19811_s1 + $0x1dc8] sm:$0xff] }
 0x1bf   :  { %9914 = vmatprep.subr.bf16.mxu0 %v13513_v9  ;;  %10473 = vmatprep.subr.bf16.mxu1 %v13515_v10  ;;  %v1004_v8 = vld [vmem:[%s19811_s1 + $0x1de8] sm:$0xff]  ;;  %v13568_v9 = vcombine.low %v991_v61, %v995_v62  ;;  %v13570_v10 = vcombine.low %v992_v63, %v996_v0  ;;  %v1055_v61 = vld [vmem:[%s19811_s1 + $0x1f80] sm:$0xff] }
 0x1c0   :  { %v13579_v12 = vcombine.high %v1000_v7, %v1004_v8  ;;  %v1059_v62 = vld [vmem:[%s19811_s1 + $0x1fa0] sm:$0xff]  ;;  %v1056_v63 = vld [vmem:[%s19811_s1 + $0x1f88] sm:$0xff] }
 0x1c1   :  { %v1060_v0 = vld [vmem:[%s19811_s1 + $0x1fa8] sm:$0xff] }
 0x1c2   :  { %9915 = vmatpush1.bf16.msra.mxu0 %v13512_v15  ;;  %10474 = vmatpush1.bf16.msra.mxu1 %v13514_v16  ;;  %v1008_v15 = vld [vmem:[%s19811_s1 + $0x1e08] sm:$0xff] }
 0x1c3   :  { %9927 = vmatprep.subr.bf16.mxu0 %v13521_v17  ;;  %10486 = vmatprep.subr.bf16.mxu1 %v13523_v18  ;;  %v1012_v16 = vld [vmem:[%s19811_s1 + $0x1e28] sm:$0xff]  ;;  %v13576_v17 = vcombine.low %v999_v5, %v1003_v6  ;;  %v13578_v18 = vcombine.low %v1000_v7, %v1004_v8  ;;  %v1063_v5 = vld [vmem:[%s19811_s1 + $0x1fc0] sm:$0xff] }
 0x1c4   :  { %v13587_v20 = vcombine.high %v1008_v15, %v1012_v16  ;;  %v1067_v6 = vld [vmem:[%s19811_s1 + $0x1fe0] sm:$0xff]  ;;  %v1064_v7 = vld [vmem:[%s19811_s1 + $0x1fc8] sm:$0xff] }
 0x1c5   :  { %9917 = vmatmul.mubr.bf16.vlgmr.msra.gmra.mrb[0].mxu0 %v14581_v21  ;;  %10476 = vmatmul.mubr.bf16.vlgmr.msra.gmra.mrb[0].mxu1 %v14581_v21  ;;  %v1015_v21 = vld [vmem:[%s19811_s1 + $0x1e40] sm:$0xff]  ;;  %v1068_v8 = vld [vmem:[%s19811_s1 + $0x1fe8] sm:$0xff] }
 0x1c6   :  { %9928 = vmatpush1.bf16.msra.mxu0 %v13520_v24  ;;  %10487 = vmatpush1.bf16.msra.mxu1 %v13522_v25  ;;  %v1020_v24 = vld [vmem:[%s19811_s1 + $0x1e68] sm:$0xff]  ;;  %v13584_v25 = vcombine.low %v1007_v13, %v1011_v14  ;;  %v1071_v13 = vld [vmem:[%s19811_s1 + $0x2000] sm:$0xff] }
 0x1c7   :  { %9929 = vmatprep.subr.bf16.mxu0 %v13529_v26  ;;  %10488 = vmatprep.subr.bf16.mxu1 %v13531_v27  ;;  %v13586_v26 = vcombine.low %v1008_v15, %v1012_v16  ;;  %v13593_v27 = vcombine.high %v1015_v21, %v1019_v22  ;;  %v13595_v28 = vcombine.high %v1016_v23, %v1020_v24  ;;  %v1075_v14 = vld [vmem:[%s19811_s1 + $0x2020] sm:$0xff]  ;;  %v1072_v15 = vld [vmem:[%s19811_s1 + $0x2008] sm:$0xff] }
 0x1c8   :  { %9959 = vmatprep.mubr.bf16.mxu0 %v14582_v30  ;;  %10518 = vmatprep.mubr.bf16.mxu1 %v14582_v30  ;;  %v1027_v30 = vld [vmem:[%s19811_s1 + $0x1ea0] sm:$0xff]  ;;  %v1076_v16 = vld [vmem:[%s19811_s1 + $0x2028] sm:$0xff] }
 0x1ca   :  { %9930 = vmatpush1.bf16.msra.mxu0 %v13528_v33  ;;  %10489 = vmatpush1.bf16.msra.mxu1 %v13530_v34  ;;  %v13592_v33 = vcombine.low %v1015_v21, %v1019_v22  ;;  %v13594_v34 = vcombine.low %v1016_v23, %v1020_v24  ;;  %v1079_v21 = vld [vmem:[%s19811_s1 + $0x2040] sm:$0xff]  ;;  %v14584_v23 = vld [vmem:[%s19812_s0 + $0x38] ss:$100 sps:$4 sm:$0xff]   ;;  %v1080_v24 = vld [vmem:[%s19811_s1 + $0x2048] sm:$0xff] }
 0x1cb   :  { %9931 = vmatprep.subr.bf16.mxu0 %v13537_v35  ;;  %10490 = vmatprep.subr.bf16.mxu1 %v13539_v36  ;;  %v13601_v35 = vcombine.high %v1023_v29, %v1027_v30  ;;  %v13603_v36 = vcombine.high %v1024_v31, %v1028_v32  ;;  %v1083_v22 = vld [vmem:[%s19811_s1 + $0x2060] sm:$0xff] }
 0x1ce   :  { %9932 = vmatpush1.bf16.msra.mxu0 %v13536_v41  ;;  %10491 = vmatpush1.bf16.msra.mxu1 %v13538_v42  ;;  %v13600_v41 = vcombine.low %v1023_v29, %v1027_v30  ;;  %v13602_v42 = vcombine.low %v1024_v31, %v1028_v32  ;;  %v1087_v30 = vld [vmem:[%s19811_s1 + $0x2080] sm:$0xff] }
 0x1cf   :  { %9933 = vmatprep.subr.bf16.mxu0 %v13545_v43  ;;  %10492 = vmatprep.subr.bf16.mxu1 %v13547_v44  ;;  %v13609_v43 = vcombine.high %v1031_v37, %v1035_v38  ;;  %v13611_v44 = vcombine.high %v1032_v39, %v1036_v40  ;;  %v1091_v31 = vld [vmem:[%s19811_s1 + $0x20a0] sm:$0xff] }
 0x1d0   :  { %v14585_v32 = vld [vmem:[%s19812_s0 + $0x44] ss:$100 sps:$4 sm:$0xff]  }
 0x1d2   :  { %9934 = vmatpush1.bf16.msra.mxu0 %v13544_v49  ;;  %10493 = vmatpush1.bf16.msra.mxu1 %v13546_v50  ;;  %v13608_v49 = vcombine.low %v1031_v37, %v1035_v38  ;;  %v13610_v50 = vcombine.low %v1032_v39, %v1036_v40  ;;  %v13665_v37 = vcombine.high %v1087_v30, %v1091_v31  ;;  %v1095_v39 = vld [vmem:[%s19811_s1 + $0x20c0] sm:$0xff] }
 0x1d3   :  { %9935 = vmatprep.subr.bf16.mxu0 %v13553_v51  ;;  %10494 = vmatprep.subr.bf16.mxu1 %v13555_v52  ;;  %v13617_v51 = vcombine.high %v1039_v45, %v1043_v46  ;;  %v13619_v52 = vcombine.high %v1040_v47, %v1044_v48  ;;  %v1099_v40 = vld [vmem:[%s19811_s1 + $0x20e0] sm:$0xff] }
 0x1d6   :  { %9936 = vmatpush1.bf16.msra.mxu0 %v13552_v57  ;;  %10495 = vmatpush1.bf16.msra.mxu1 %v13554_v58  ;;  %v13616_v57 = vcombine.low %v1039_v45, %v1043_v46  ;;  %v13618_v58 = vcombine.low %v1040_v47, %v1044_v48  ;;  %v13673_v45 = vcombine.high %v1095_v39, %v1099_v40  ;;  %v1103_v47 = vld [vmem:[%s19811_s1 + $0x2100] sm:$0xff] }
 0x1d7   :  { %9937 = vmatprep.subr.bf16.mxu0 %v13561_v59  ;;  %10496 = vmatprep.subr.bf16.mxu1 %v13563_v60  ;;  %v13625_v59 = vcombine.high %v1047_v53, %v1051_v54  ;;  %v13627_v60 = vcombine.high %v1048_v55, %v1052_v56  ;;  %v1107_v48 = vld [vmem:[%s19811_s1 + $0x2120] sm:$0xff] }
 0x1da   :  { %9938 = vmatpush1.bf16.msra.mxu0 %v13560_v1  ;;  %10497 = vmatpush1.bf16.msra.mxu1 %v13562_v2  ;;  %v13624_v1 = vcombine.low %v1047_v53, %v1051_v54  ;;  %v13626_v2 = vcombine.low %v1048_v55, %v1052_v56  ;;  %v13681_v53 = vcombine.high %v1103_v47, %v1107_v48  ;;  %v1111_v55 = vld [vmem:[%s19811_s1 + $0x2140] sm:$0xff] }
 0x1db   :  { %9939 = vmatprep.subr.bf16.mxu0 %v13569_v3  ;;  %10498 = vmatprep.subr.bf16.mxu1 %v13571_v4  ;;  %v13633_v3 = vcombine.high %v1055_v61, %v1059_v62  ;;  %v13635_v4 = vcombine.high %v1056_v63, %v1060_v0  ;;  %v1115_v56 = vld [vmem:[%s19811_s1 + $0x2160] sm:$0xff] }
 0x1de   :  { %9940 = vmatpush1.bf16.msra.mxu0 %v13568_v9  ;;  %10499 = vmatpush1.bf16.msra.mxu1 %v13570_v10  ;;  %v13632_v9 = vcombine.low %v1055_v61, %v1059_v62  ;;  %v13634_v10 = vcombine.low %v1056_v63, %v1060_v0  ;;  %v13689_v61 = vcombine.high %v1111_v55, %v1115_v56  ;;  %v1119_v63 = vld [vmem:[%s19811_s1 + $0x2180] sm:$0xff] }
 0x1df   :  { %9941 = vmatprep.subr.bf16.mxu0 %v13577_v11  ;;  %10500 = vmatprep.subr.bf16.mxu1 %v13579_v12  ;;  %v13641_v11 = vcombine.high %v1063_v5, %v1067_v6  ;;  %v13643_v12 = vcombine.high %v1064_v7, %v1068_v8  ;;  %v1123_v0 = vld [vmem:[%s19811_s1 + $0x21a0] sm:$0xff] }
 0x1e2   :  { %9942 = vmatpush1.bf16.msra.mxu0 %v13576_v17  ;;  %10501 = vmatpush1.bf16.msra.mxu1 %v13578_v18  ;;  %v13640_v17 = vcombine.low %v1063_v5, %v1067_v6  ;;  %v13642_v18 = vcombine.low %v1064_v7, %v1068_v8  ;;  %v13697_v5 = vcombine.high %v1119_v63, %v1123_v0  ;;  %v1127_v7 = vld [vmem:[%s19811_s1 + $0x21c0] sm:$0xff] }
 0x1e3   :  { %9943 = vmatprep.subr.bf16.mxu0 %v13585_v19  ;;  %10502 = vmatprep.subr.bf16.mxu1 %v13587_v20  ;;  %v13649_v19 = vcombine.high %v1071_v13, %v1075_v14  ;;  %v13651_v20 = vcombine.high %v1072_v15, %v1076_v16  ;;  %v1131_v8 = vld [vmem:[%s19811_s1 + $0x21e0] sm:$0xff] }
 0x1e6   :  { %9944 = vmatpush1.bf16.msra.mxu0 %v13584_v25  ;;  %10503 = vmatpush1.bf16.msra.mxu1 %v13586_v26  ;;  %v1084_v25 = vld [vmem:[%s19811_s1 + $0x2068] sm:$0xff]  ;;  %v13648_v26 = vcombine.low %v1071_v13, %v1075_v14  ;;  %v13705_v13 = vcombine.high %v1127_v7, %v1131_v8 }
 0x1e7   :  { %9945 = vmatprep.subr.bf16.mxu0 %v13593_v27  ;;  %10504 = vmatprep.subr.bf16.mxu1 %v13595_v28  ;;  %v13650_v27 = vcombine.low %v1072_v15, %v1076_v16  ;;  %v13657_v28 = vcombine.high %v1079_v21, %v1083_v22  ;;  %v13659_v29 = vcombine.high %v1080_v24, %v1084_v25  ;;  %v1135_v15 = vld [vmem:[%s19811_s1 + $0x2200] sm:$0xff] }
 0x1e8   :  { %v1139_v16 = vld [vmem:[%s19811_s1 + $0x2220] sm:$0xff] }
 0x1ea   :  { %9946 = vmatpush1.bf16.msra.mxu0 %v13592_v33  ;;  %10505 = vmatpush1.bf16.msra.mxu1 %v13594_v34  ;;  %v1088_v33 = vld [vmem:[%s19811_s1 + $0x2088] sm:$0xff] }
 0x1eb   :  { %9947 = vmatprep.subr.bf16.mxu0 %v13601_v35  ;;  %10506 = vmatprep.subr.bf16.mxu1 %v13603_v36  ;;  %v1092_v34 = vld [vmem:[%s19811_s1 + $0x20a8] sm:$0xff]  ;;  %v13656_v35 = vcombine.low %v1079_v21, %v1083_v22  ;;  %v13658_v36 = vcombine.low %v1080_v24, %v1084_v25  ;;  %v13713_v21 = vcombine.high %v1135_v15, %v1139_v16  ;;  %v1147_v24 = vld [vmem:[%s19811_s1 + $0x2260] sm:$0xff] }
 0x1ec   :  { %v13667_v38 = vcombine.high %v1088_v33, %v1092_v34  ;;  %v1144_v25 = vld [vmem:[%s19811_s1 + $0x2248] sm:$0xff] }
 0x1ee   :  { %9948 = vmatpush1.bf16.msra.mxu0 %v13600_v41  ;;  %10507 = vmatpush1.bf16.msra.mxu1 %v13602_v42  ;;  %v1096_v41 = vld [vmem:[%s19811_s1 + $0x20c8] sm:$0xff] }
 0x1ef   :  { %9949 = vmatprep.subr.bf16.mxu0 %v13609_v43  ;;  %10508 = vmatprep.subr.bf16.mxu1 %v13611_v44  ;;  %v1100_v42 = vld [vmem:[%s19811_s1 + $0x20e8] sm:$0xff]  ;;  %v13664_v43 = vcombine.low %v1087_v30, %v1091_v31  ;;  %v13666_v44 = vcombine.low %v1088_v33, %v1092_v34  ;;  %v1151_v31 = vld [vmem:[%s19811_s1 + $0x2280] sm:$0xff] }
 0x1f0   :  { %v13675_v46 = vcombine.high %v1096_v41, %v1100_v42  ;;  %v1152_v33 = vld [vmem:[%s19811_s1 + $0x2288] sm:$0xff] }
 0x1f1   :  { %v1156_v34 = vld [vmem:[%s19811_s1 + $0x22a8] sm:$0xff] }
 0x1f2   :  { %9950 = vmatpush1.bf16.msra.mxu0 %v13608_v49  ;;  %10509 = vmatpush1.bf16.msra.mxu1 %v13610_v50  ;;  %v1104_v49 = vld [vmem:[%s19811_s1 + $0x2108] sm:$0xff] }
 0x1f3   :  { %9951 = vmatprep.subr.bf16.mxu0 %v13617_v51  ;;  %10510 = vmatprep.subr.bf16.mxu1 %v13619_v52  ;;  %v1108_v50 = vld [vmem:[%s19811_s1 + $0x2128] sm:$0xff]  ;;  %v13672_v51 = vcombine.low %v1095_v39, %v1099_v40  ;;  %v13674_v52 = vcombine.low %v1096_v41, %v1100_v42  ;;  %v1159_v39 = vld [vmem:[%s19811_s1 + $0x22c0] sm:$0xff] }
 0x1f4   :  { %v13683_v54 = vcombine.high %v1104_v49, %v1108_v50  ;;  %v1163_v40 = vld [vmem:[%s19811_s1 + $0x22e0] sm:$0xff]  ;;  %v1160_v41 = vld [vmem:[%s19811_s1 + $0x22c8] sm:$0xff] }
 0x1f5   :  { %v1164_v42 = vld [vmem:[%s19811_s1 + $0x22e8] sm:$0xff] }
 0x1f6   :  { %9952 = vmatpush1.bf16.msra.mxu0 %v13616_v57  ;;  %10511 = vmatpush1.bf16.msra.mxu1 %v13618_v58  ;;  %v1112_v57 = vld [vmem:[%s19811_s1 + $0x2148] sm:$0xff] }
 0x1f7   :  { %9953 = vmatprep.subr.bf16.mxu0 %v13625_v59  ;;  %10512 = vmatprep.subr.bf16.mxu1 %v13627_v60  ;;  %v1116_v58 = vld [vmem:[%s19811_s1 + $0x2168] sm:$0xff]  ;;  %v13680_v59 = vcombine.low %v1103_v47, %v1107_v48  ;;  %v13682_v60 = vcombine.low %v1104_v49, %v1108_v50  ;;  %v1167_v47 = vld [vmem:[%s19811_s1 + $0x2300] sm:$0xff] }
 0x1f8   :  { %v13691_v62 = vcombine.high %v1112_v57, %v1116_v58  ;;  %v1171_v48 = vld [vmem:[%s19811_s1 + $0x2320] sm:$0xff]  ;;  %v1168_v49 = vld [vmem:[%s19811_s1 + $0x2308] sm:$0xff] }
 0x1f9   :  { %v1172_v50 = vld [vmem:[%s19811_s1 + $0x2328] sm:$0xff] }
 0x1fa   :  { %9954 = vmatpush1.bf16.msra.mxu0 %v13624_v1  ;;  %10513 = vmatpush1.bf16.msra.mxu1 %v13626_v2  ;;  %v1120_v1 = vld [vmem:[%s19811_s1 + $0x2188] sm:$0xff] }
 0x1fb   :  { %9955 = vmatprep.subr.bf16.mxu0 %v13633_v3  ;;  %10514 = vmatprep.subr.bf16.mxu1 %v13635_v4  ;;  %v1124_v2 = vld [vmem:[%s19811_s1 + $0x21a8] sm:$0xff]  ;;  %v13688_v3 = vcombine.low %v1111_v55, %v1115_v56  ;;  %v13690_v4 = vcombine.low %v1112_v57, %v1116_v58  ;;  %v1175_v55 = vld [vmem:[%s19811_s1 + $0x2340] sm:$0xff] }
 0x1fc   :  { %v13699_v6 = vcombine.high %v1120_v1, %v1124_v2  ;;  %v1179_v56 = vld [vmem:[%s19811_s1 + $0x2360] sm:$0xff]  ;;  %v1176_v57 = vld [vmem:[%s19811_s1 + $0x2348] sm:$0xff] }
 0x1fd   :  { %v1180_v58 = vld [vmem:[%s19811_s1 + $0x2368] sm:$0xff] }
 0x1fe   :  { %9956 = vmatpush1.bf16.msra.mxu0 %v13632_v9  ;;  %10515 = vmatpush1.bf16.msra.mxu1 %v13634_v10  ;;  %v1128_v9 = vld [vmem:[%s19811_s1 + $0x21c8] sm:$0xff] }
 0x1ff   :  { %9957 = vmatprep.subr.bf16.mxu0 %v13641_v11  ;;  %10516 = vmatprep.subr.bf16.mxu1 %v13643_v12  ;;  %v1132_v10 = vld [vmem:[%s19811_s1 + $0x21e8] sm:$0xff]  ;;  %v13696_v11 = vcombine.low %v1119_v63, %v1123_v0  ;;  %v13698_v12 = vcombine.low %v1120_v1, %v1124_v2  ;;  %v1183_v63 = vld [vmem:[%s19811_s1 + $0x2380] sm:$0xff] }
 0x200   :  { %v13707_v14 = vcombine.high %v1128_v9, %v1132_v10  ;;  %v1187_v0 = vld [vmem:[%s19811_s1 + $0x23a0] sm:$0xff]  ;;  %v1184_v1 = vld [vmem:[%s19811_s1 + $0x2388] sm:$0xff] }
 0x201   :  { %v1188_v2 = vld [vmem:[%s19811_s1 + $0x23a8] sm:$0xff] }
 0x202   :  { %9958 = vmatpush1.bf16.msra.mxu0 %v13640_v17  ;;  %10517 = vmatpush1.bf16.msra.mxu1 %v13642_v18  ;;  %v1136_v17 = vld [vmem:[%s19811_s1 + $0x2208] sm:$0xff] }
 0x203   :  { %9970 = vmatprep.subr.bf16.mxu0 %v13649_v19  ;;  %10529 = vmatprep.subr.bf16.mxu1 %v13651_v20  ;;  %v1140_v18 = vld [vmem:[%s19811_s1 + $0x2228] sm:$0xff]  ;;  %v13704_v19 = vcombine.low %v1127_v7, %v1131_v8  ;;  %v13706_v20 = vcombine.low %v1128_v9, %v1132_v10  ;;  %v1191_v7 = vld [vmem:[%s19811_s1 + $0x23c0] sm:$0xff] }
 0x204   :  { %v13715_v22 = vcombine.high %v1136_v17, %v1140_v18  ;;  %v1195_v8 = vld [vmem:[%s19811_s1 + $0x23e0] sm:$0xff]  ;;  %v1192_v9 = vld [vmem:[%s19811_s1 + $0x23c8] sm:$0xff] }
 0x205   :  { %9960 = vmatmul.mubr.bf16.vlgmr.msra.gmra.mrb[0].mxu0 %v14584_v23  ;;  %10519 = vmatmul.mubr.bf16.vlgmr.msra.gmra.mrb[0].mxu1 %v14584_v23  ;;  %v1143_v23 = vld [vmem:[%s19811_s1 + $0x2240] sm:$0xff]  ;;  %v1196_v10 = vld [vmem:[%s19811_s1 + $0x23e8] sm:$0xff] }
 0x206   :  { %9971 = vmatpush1.bf16.msra.mxu0 %v13648_v26  ;;  %10530 = vmatpush1.bf16.msra.mxu1 %v13650_v27  ;;  %v1148_v26 = vld [vmem:[%s19811_s1 + $0x2268] sm:$0xff]  ;;  %v13712_v27 = vcombine.low %v1135_v15, %v1139_v16  ;;  %v1199_v15 = vld [vmem:[%s19811_s1 + $0x2400] sm:$0xff] }
 0x207   :  { %9972 = vmatprep.subr.bf16.mxu0 %v13657_v28  ;;  %10531 = vmatprep.subr.bf16.mxu1 %v13659_v29  ;;  %v13714_v28 = vcombine.low %v1136_v17, %v1140_v18  ;;  %v13721_v29 = vcombine.high %v1143_v23, %v1147_v24  ;;  %v13723_v30 = vcombine.high %v1144_v25, %v1148_v26  ;;  %v1203_v16 = vld [vmem:[%s19811_s1 + $0x2420] sm:$0xff]  ;;  %v1200_v17 = vld [vmem:[%s19811_s1 + $0x2408] sm:$0xff] }
 0x208   :  { %10002 = vmatprep.mubr.bf16.mxu0 %v14585_v32  ;;  %10561 = vmatprep.mubr.bf16.mxu1 %v14585_v32  ;;  %v1155_v32 = vld [vmem:[%s19811_s1 + $0x22a0] sm:$0xff]  ;;  %v1204_v18 = vld [vmem:[%s19811_s1 + $0x2428] sm:$0xff] }
 0x20a   :  { %9973 = vmatpush1.bf16.msra.mxu0 %v13656_v35  ;;  %10532 = vmatpush1.bf16.msra.mxu1 %v13658_v36  ;;  %v13720_v35 = vcombine.low %v1143_v23, %v1147_v24  ;;  %v13722_v36 = vcombine.low %v1144_v25, %v1148_v26  ;;  %v1207_v23 = vld [vmem:[%s19811_s1 + $0x2440] sm:$0xff]  ;;  %v1208_v26 = vld [vmem:[%s19811_s1 + $0x2448] sm:$0xff] }
 0x20b   :  { %9974 = vmatprep.subr.bf16.mxu0 %v13665_v37  ;;  %10533 = vmatprep.subr.bf16.mxu1 %v13667_v38  ;;  %v13729_v37 = vcombine.high %v1151_v31, %v1155_v32  ;;  %v13731_v38 = vcombine.high %v1152_v33, %v1156_v34  ;;  %v1211_v24 = vld [vmem:[%s19811_s1 + $0x2460] sm:$0xff] }
 0x20c   :  { %v14587_v25 = vld [vmem:[%s19812_s0 + $0x40] ss:$100 sps:$4 sm:$0xff]  }
 0x20e   :  { %9975 = vmatpush1.bf16.msra.mxu0 %v13664_v43  ;;  %10534 = vmatpush1.bf16.msra.mxu1 %v13666_v44  ;;  %v13728_v43 = vcombine.low %v1151_v31, %v1155_v32  ;;  %v13730_v44 = vcombine.low %v1152_v33, %v1156_v34  ;;  %v1215_v32 = vld [vmem:[%s19811_s1 + $0x2480] sm:$0xff]  ;;  %v14588_v34 = vld [vmem:[%s19812_s0 + $0x4c] ss:$100 sps:$4 sm:$0xff]  }
 0x20f   :  { %9976 = vmatprep.subr.bf16.mxu0 %v13673_v45  ;;  %10535 = vmatprep.subr.bf16.mxu1 %v13675_v46  ;;  %v13737_v45 = vcombine.high %v1159_v39, %v1163_v40  ;;  %v13739_v46 = vcombine.high %v1160_v41, %v1164_v42  ;;  %v1219_v33 = vld [vmem:[%s19811_s1 + $0x24a0] sm:$0xff] }
 0x212   :  { %9977 = vmatpush1.bf16.msra.mxu0 %v13672_v51  ;;  %10536 = vmatpush1.bf16.msra.mxu1 %v13674_v52  ;;  %v13736_v51 = vcombine.low %v1159_v39, %v1163_v40  ;;  %v13738_v52 = vcombine.low %v1160_v41, %v1164_v42  ;;  %v13793_v39 = vcombine.high %v1215_v32, %v1219_v33  ;;  %v1223_v41 = vld [vmem:[%s19811_s1 + $0x24c0] sm:$0xff] }
 0x213   :  { %9978 = vmatprep.subr.bf16.mxu0 %v13681_v53  ;;  %10537 = vmatprep.subr.bf16.mxu1 %v13683_v54  ;;  %v13745_v53 = vcombine.high %v1167_v47, %v1171_v48  ;;  %v13747_v54 = vcombine.high %v1168_v49, %v1172_v50  ;;  %v1227_v42 = vld [vmem:[%s19811_s1 + $0x24e0] sm:$0xff] }
 0x216   :  { %9979 = vmatpush1.bf16.msra.mxu0 %v13680_v59  ;;  %10538 = vmatpush1.bf16.msra.mxu1 %v13682_v60  ;;  %v13744_v59 = vcombine.low %v1167_v47, %v1171_v48  ;;  %v13746_v60 = vcombine.low %v1168_v49, %v1172_v50  ;;  %v13801_v47 = vcombine.high %v1223_v41, %v1227_v42  ;;  %v1231_v49 = vld [vmem:[%s19811_s1 + $0x2500] sm:$0xff] }
 0x217   :  { %9980 = vmatprep.subr.bf16.mxu0 %v13689_v61  ;;  %10539 = vmatprep.subr.bf16.mxu1 %v13691_v62  ;;  %v13753_v61 = vcombine.high %v1175_v55, %v1179_v56  ;;  %v13755_v62 = vcombine.high %v1176_v57, %v1180_v58  ;;  %v1235_v50 = vld [vmem:[%s19811_s1 + $0x2520] sm:$0xff] }
 0x21a   :  { %9981 = vmatpush1.bf16.msra.mxu0 %v13688_v3  ;;  %10540 = vmatpush1.bf16.msra.mxu1 %v13690_v4  ;;  %v13752_v3 = vcombine.low %v1175_v55, %v1179_v56  ;;  %v13754_v4 = vcombine.low %v1176_v57, %v1180_v58  ;;  %v13809_v55 = vcombine.high %v1231_v49, %v1235_v50  ;;  %v1239_v57 = vld [vmem:[%s19811_s1 + $0x2540] sm:$0xff] }
 0x21b   :  { %9982 = vmatprep.subr.bf16.mxu0 %v13697_v5  ;;  %10541 = vmatprep.subr.bf16.mxu1 %v13699_v6  ;;  %v13761_v5 = vcombine.high %v1183_v63, %v1187_v0  ;;  %v13763_v6 = vcombine.high %v1184_v1, %v1188_v2  ;;  %v1243_v58 = vld [vmem:[%s19811_s1 + $0x2560] sm:$0xff] }
 0x21e   :  { %9983 = vmatpush1.bf16.msra.mxu0 %v13696_v11  ;;  %10542 = vmatpush1.bf16.msra.mxu1 %v13698_v12  ;;  %v13760_v11 = vcombine.low %v1183_v63, %v1187_v0  ;;  %v13762_v12 = vcombine.low %v1184_v1, %v1188_v2  ;;  %v13817_v63 = vcombine.high %v1239_v57, %v1243_v58  ;;  %v1247_v1 = vld [vmem:[%s19811_s1 + $0x2580] sm:$0xff] }
 0x21f   :  { %9984 = vmatprep.subr.bf16.mxu0 %v13705_v13  ;;  %10543 = vmatprep.subr.bf16.mxu1 %v13707_v14  ;;  %v13769_v13 = vcombine.high %v1191_v7, %v1195_v8  ;;  %v13771_v14 = vcombine.high %v1192_v9, %v1196_v10  ;;  %v1251_v2 = vld [vmem:[%s19811_s1 + $0x25a0] sm:$0xff] }
 0x222   :  { %9985 = vmatpush1.bf16.msra.mxu0 %v13704_v19  ;;  %10544 = vmatpush1.bf16.msra.mxu1 %v13706_v20  ;;  %v13768_v19 = vcombine.low %v1191_v7, %v1195_v8  ;;  %v13770_v20 = vcombine.low %v1192_v9, %v1196_v10  ;;  %v13825_v7 = vcombine.high %v1247_v1, %v1251_v2  ;;  %v1255_v9 = vld [vmem:[%s19811_s1 + $0x25c0] sm:$0xff] }
 0x223   :  { %9986 = vmatprep.subr.bf16.mxu0 %v13713_v21  ;;  %10545 = vmatprep.subr.bf16.mxu1 %v13715_v22  ;;  %v13777_v21 = vcombine.high %v1199_v15, %v1203_v16  ;;  %v13779_v22 = vcombine.high %v1200_v17, %v1204_v18  ;;  %v1259_v10 = vld [vmem:[%s19811_s1 + $0x25e0] sm:$0xff] }
 0x226   :  { %9987 = vmatpush1.bf16.msra.mxu0 %v13712_v27  ;;  %10546 = vmatpush1.bf16.msra.mxu1 %v13714_v28  ;;  %v1212_v27 = vld [vmem:[%s19811_s1 + $0x2468] sm:$0xff]  ;;  %v13776_v28 = vcombine.low %v1199_v15, %v1203_v16  ;;  %v13833_v15 = vcombine.high %v1255_v9, %v1259_v10 }
 0x227   :  { %9988 = vmatprep.subr.bf16.mxu0 %v13721_v29  ;;  %10547 = vmatprep.subr.bf16.mxu1 %v13723_v30  ;;  %v13778_v29 = vcombine.low %v1200_v17, %v1204_v18  ;;  %v13785_v30 = vcombine.high %v1207_v23, %v1211_v24  ;;  %v13787_v31 = vcombine.high %v1208_v26, %v1212_v27  ;;  %v1263_v17 = vld [vmem:[%s19811_s1 + $0x2600] sm:$0xff] }
 0x228   :  { %v1267_v18 = vld [vmem:[%s19811_s1 + $0x2620] sm:$0xff] }
 0x22a   :  { %9989 = vmatpush1.bf16.msra.mxu0 %v13720_v35  ;;  %10548 = vmatpush1.bf16.msra.mxu1 %v13722_v36  ;;  %v1216_v35 = vld [vmem:[%s19811_s1 + $0x2488] sm:$0xff] }
 0x22b   :  { %9990 = vmatprep.subr.bf16.mxu0 %v13729_v37  ;;  %10549 = vmatprep.subr.bf16.mxu1 %v13731_v38  ;;  %v1220_v36 = vld [vmem:[%s19811_s1 + $0x24a8] sm:$0xff]  ;;  %v13784_v37 = vcombine.low %v1207_v23, %v1211_v24  ;;  %v13786_v38 = vcombine.low %v1208_v26, %v1212_v27  ;;  %v13841_v23 = vcombine.high %v1263_v17, %v1267_v18  ;;  %v1275_v26 = vld [vmem:[%s19811_s1 + $0x2660] sm:$0xff] }
 0x22c   :  { %v13795_v40 = vcombine.high %v1216_v35, %v1220_v36  ;;  %v1272_v27 = vld [vmem:[%s19811_s1 + $0x2648] sm:$0xff] }
 0x22e   :  { %9991 = vmatpush1.bf16.msra.mxu0 %v13728_v43  ;;  %10550 = vmatpush1.bf16.msra.mxu1 %v13730_v44  ;;  %v1224_v43 = vld [vmem:[%s19811_s1 + $0x24c8] sm:$0xff] }
 0x22f   :  { %9992 = vmatprep.subr.bf16.mxu0 %v13737_v45  ;;  %10551 = vmatprep.subr.bf16.mxu1 %v13739_v46  ;;  %v1228_v44 = vld [vmem:[%s19811_s1 + $0x24e8] sm:$0xff]  ;;  %v13792_v45 = vcombine.low %v1215_v32, %v1219_v33  ;;  %v13794_v46 = vcombine.low %v1216_v35, %v1220_v36  ;;  %v1279_v33 = vld [vmem:[%s19811_s1 + $0x2680] sm:$0xff] }
 0x230   :  { %v13803_v48 = vcombine.high %v1224_v43, %v1228_v44  ;;  %v1280_v35 = vld [vmem:[%s19811_s1 + $0x2688] sm:$0xff] }
 0x231   :  { %v1284_v36 = vld [vmem:[%s19811_s1 + $0x26a8] sm:$0xff] }
 0x232   :  { %9993 = vmatpush1.bf16.msra.mxu0 %v13736_v51  ;;  %10552 = vmatpush1.bf16.msra.mxu1 %v13738_v52  ;;  %v1232_v51 = vld [vmem:[%s19811_s1 + $0x2508] sm:$0xff] }
 0x233   :  { %9994 = vmatprep.subr.bf16.mxu0 %v13745_v53  ;;  %10553 = vmatprep.subr.bf16.mxu1 %v13747_v54  ;;  %v1236_v52 = vld [vmem:[%s19811_s1 + $0x2528] sm:$0xff]  ;;  %v13800_v53 = vcombine.low %v1223_v41, %v1227_v42  ;;  %v13802_v54 = vcombine.low %v1224_v43, %v1228_v44  ;;  %v1287_v41 = vld [vmem:[%s19811_s1 + $0x26c0] sm:$0xff] }
 0x234   :  { %v13811_v56 = vcombine.high %v1232_v51, %v1236_v52  ;;  %v1291_v42 = vld [vmem:[%s19811_s1 + $0x26e0] sm:$0xff]  ;;  %v1288_v43 = vld [vmem:[%s19811_s1 + $0x26c8] sm:$0xff] }
 0x235   :  { %v1292_v44 = vld [vmem:[%s19811_s1 + $0x26e8] sm:$0xff] }
 0x236   :  { %9995 = vmatpush1.bf16.msra.mxu0 %v13744_v59  ;;  %10554 = vmatpush1.bf16.msra.mxu1 %v13746_v60  ;;  %v1240_v59 = vld [vmem:[%s19811_s1 + $0x2548] sm:$0xff] }
 0x237   :  { %9996 = vmatprep.subr.bf16.mxu0 %v13753_v61  ;;  %10555 = vmatprep.subr.bf16.mxu1 %v13755_v62  ;;  %v1244_v60 = vld [vmem:[%s19811_s1 + $0x2568] sm:$0xff]  ;;  %v13808_v61 = vcombine.low %v1231_v49, %v1235_v50  ;;  %v13810_v62 = vcombine.low %v1232_v51, %v1236_v52  ;;  %v1295_v49 = vld [vmem:[%s19811_s1 + $0x2700] sm:$0xff] }
 0x238   :  { %v13819_v0 = vcombine.high %v1240_v59, %v1244_v60  ;;  %v1299_v50 = vld [vmem:[%s19811_s1 + $0x2720] sm:$0xff]  ;;  %v1296_v51 = vld [vmem:[%s19811_s1 + $0x2708] sm:$0xff] }
 0x239   :  { %v1300_v52 = vld [vmem:[%s19811_s1 + $0x2728] sm:$0xff] }
 0x23a   :  { %9997 = vmatpush1.bf16.msra.mxu0 %v13752_v3  ;;  %10556 = vmatpush1.bf16.msra.mxu1 %v13754_v4  ;;  %v1248_v3 = vld [vmem:[%s19811_s1 + $0x2588] sm:$0xff] }
 0x23b   :  { %9998 = vmatprep.subr.bf16.mxu0 %v13761_v5  ;;  %10557 = vmatprep.subr.bf16.mxu1 %v13763_v6  ;;  %v1252_v4 = vld [vmem:[%s19811_s1 + $0x25a8] sm:$0xff]  ;;  %v13816_v5 = vcombine.low %v1239_v57, %v1243_v58  ;;  %v13818_v6 = vcombine.low %v1240_v59, %v1244_v60  ;;  %v1303_v57 = vld [vmem:[%s19811_s1 + $0x2740] sm:$0xff] }
 0x23c   :  { %v13827_v8 = vcombine.high %v1248_v3, %v1252_v4  ;;  %v1307_v58 = vld [vmem:[%s19811_s1 + $0x2760] sm:$0xff]  ;;  %v1304_v59 = vld [vmem:[%s19811_s1 + $0x2748] sm:$0xff] }
 0x23d   :  { %v1308_v60 = vld [vmem:[%s19811_s1 + $0x2768] sm:$0xff] }
 0x23e   :  { %9999 = vmatpush1.bf16.msra.mxu0 %v13760_v11  ;;  %10558 = vmatpush1.bf16.msra.mxu1 %v13762_v12  ;;  %v1256_v11 = vld [vmem:[%s19811_s1 + $0x25c8] sm:$0xff] }
 0x23f   :  { %10000 = vmatprep.subr.bf16.mxu0 %v13769_v13  ;;  %10559 = vmatprep.subr.bf16.mxu1 %v13771_v14  ;;  %v1260_v12 = vld [vmem:[%s19811_s1 + $0x25e8] sm:$0xff]  ;;  %v13824_v13 = vcombine.low %v1247_v1, %v1251_v2  ;;  %v13826_v14 = vcombine.low %v1248_v3, %v1252_v4  ;;  %v1311_v1 = vld [vmem:[%s19811_s1 + $0x2780] sm:$0xff] }
 0x240   :  { %v13835_v16 = vcombine.high %v1256_v11, %v1260_v12  ;;  %v1315_v2 = vld [vmem:[%s19811_s1 + $0x27a0] sm:$0xff]  ;;  %v1312_v3 = vld [vmem:[%s19811_s1 + $0x2788] sm:$0xff] }
 0x241   :  { %v1316_v4 = vld [vmem:[%s19811_s1 + $0x27a8] sm:$0xff] }
 0x242   :  { %10001 = vmatpush1.bf16.msra.mxu0 %v13768_v19  ;;  %10560 = vmatpush1.bf16.msra.mxu1 %v13770_v20  ;;  %v1264_v19 = vld [vmem:[%s19811_s1 + $0x2608] sm:$0xff] }
 0x243   :  { %10013 = vmatprep.subr.bf16.mxu0 %v13777_v21  ;;  %10572 = vmatprep.subr.bf16.mxu1 %v13779_v22  ;;  %v1268_v20 = vld [vmem:[%s19811_s1 + $0x2628] sm:$0xff]  ;;  %v13832_v21 = vcombine.low %v1255_v9, %v1259_v10  ;;  %v13834_v22 = vcombine.low %v1256_v11, %v1260_v12  ;;  %v1319_v9 = vld [vmem:[%s19811_s1 + $0x27c0] sm:$0xff] }
 0x244   :  { %v13843_v24 = vcombine.high %v1264_v19, %v1268_v20  ;;  %v1323_v10 = vld [vmem:[%s19811_s1 + $0x27e0] sm:$0xff]  ;;  %v1320_v11 = vld [vmem:[%s19811_s1 + $0x27c8] sm:$0xff] }
 0x245   :  { %10003 = vmatmul.mubr.bf16.vlgmr.msra.gmra.mrb[0].mxu0 %v14587_v25  ;;  %10562 = vmatmul.mubr.bf16.vlgmr.msra.gmra.mrb[0].mxu1 %v14587_v25  ;;  %v1271_v25 = vld [vmem:[%s19811_s1 + $0x2640] sm:$0xff]  ;;  %v1324_v12 = vld [vmem:[%s19811_s1 + $0x27e8] sm:$0xff] }
 0x246   :  { %10014 = vmatpush1.bf16.msra.mxu0 %v13776_v28  ;;  %10573 = vmatpush1.bf16.msra.mxu1 %v13778_v29  ;;  %v1276_v28 = vld [vmem:[%s19811_s1 + $0x2668] sm:$0xff]  ;;  %v13840_v29 = vcombine.low %v1263_v17, %v1267_v18  ;;  %v1327_v17 = vld [vmem:[%s19811_s1 + $0x2800] sm:$0xff] }
 0x247   :  { %10015 = vmatprep.subr.bf16.mxu0 %v13785_v30  ;;  %10574 = vmatprep.subr.bf16.mxu1 %v13787_v31  ;;  %v13842_v30 = vcombine.low %v1264_v19, %v1268_v20  ;;  %v13849_v31 = vcombine.high %v1271_v25, %v1275_v26  ;;  %v13851_v32 = vcombine.high %v1272_v27, %v1276_v28  ;;  %v1331_v18 = vld [vmem:[%s19811_s1 + $0x2820] sm:$0xff]  ;;  %v1328_v19 = vld [vmem:[%s19811_s1 + $0x2808] sm:$0xff] }
 0x248   :  { %10045 = vmatprep.mubr.bf16.mxu0 %v14588_v34  ;;  %10604 = vmatprep.mubr.bf16.mxu1 %v14588_v34  ;;  %v1283_v34 = vld [vmem:[%s19811_s1 + $0x26a0] sm:$0xff]  ;;  %v1332_v20 = vld [vmem:[%s19811_s1 + $0x2828] sm:$0xff] }
 0x24a   :  { %10016 = vmatpush1.bf16.msra.mxu0 %v13784_v37  ;;  %10575 = vmatpush1.bf16.msra.mxu1 %v13786_v38  ;;  %v13848_v37 = vcombine.low %v1271_v25, %v1275_v26  ;;  %v13850_v38 = vcombine.low %v1272_v27, %v1276_v28  ;;  %v1335_v25 = vld [vmem:[%s19811_s1 + $0x2840] sm:$0xff]  ;;  %v14590_v27 = vld [vmem:[%s19812_s0 + $0x48] ss:$100 sps:$4 sm:$0xff]  }
 0x24b   :  { %10017 = vmatprep.subr.bf16.mxu0 %v13793_v39  ;;  %10576 = vmatprep.subr.bf16.mxu1 %v13795_v40  ;;  %v13857_v39 = vcombine.high %v1279_v33, %v1283_v34  ;;  %v13859_v40 = vcombine.high %v1280_v35, %v1284_v36  ;;  %v1339_v26 = vld [vmem:[%s19811_s1 + $0x2860] sm:$0xff]  ;;  %v1336_v28 = vld [vmem:[%s19811_s1 + $0x2848] sm:$0xff] }
 0x24e   :  { %10018 = vmatpush1.bf16.msra.mxu0 %v13792_v45  ;;  %10577 = vmatpush1.bf16.msra.mxu1 %v13794_v46  ;;  %v13856_v45 = vcombine.low %v1279_v33, %v1283_v34  ;;  %v13858_v46 = vcombine.low %v1280_v35, %v1284_v36  ;;  %v1343_v34 = vld [vmem:[%s19811_s1 + $0x2880] sm:$0xff]  ;;  %v14591_v36 = vld [vmem:[%s19812_s0 + $0x54] ss:$100 sps:$4 sm:$0xff]  }
 0x24f   :  { %10019 = vmatprep.subr.bf16.mxu0 %v13801_v47  ;;  %10578 = vmatprep.subr.bf16.mxu1 %v13803_v48  ;;  %v13865_v47 = vcombine.high %v1287_v41, %v1291_v42  ;;  %v13867_v48 = vcombine.high %v1288_v43, %v1292_v44  ;;  %v1347_v35 = vld [vmem:[%s19811_s1 + $0x28a0] sm:$0xff] }
 0x252   :  { %10020 = vmatpush1.bf16.msra.mxu0 %v13800_v53  ;;  %10579 = vmatpush1.bf16.msra.mxu1 %v13802_v54  ;;  %v13864_v53 = vcombine.low %v1287_v41, %v1291_v42  ;;  %v13866_v54 = vcombine.low %v1288_v43, %v1292_v44  ;;  %v13921_v41 = vcombine.high %v1343_v34, %v1347_v35  ;;  %v1351_v43 = vld [vmem:[%s19811_s1 + $0x28c0] sm:$0xff] }
 0x253   :  { %10021 = vmatprep.subr.bf16.mxu0 %v13809_v55  ;;  %10580 = vmatprep.subr.bf16.mxu1 %v13811_v56  ;;  %v13873_v55 = vcombine.high %v1295_v49, %v1299_v50  ;;  %v13875_v56 = vcombine.high %v1296_v51, %v1300_v52  ;;  %v1355_v44 = vld [vmem:[%s19811_s1 + $0x28e0] sm:$0xff] }
 0x256   :  { %10022 = vmatpush1.bf16.msra.mxu0 %v13808_v61  ;;  %10581 = vmatpush1.bf16.msra.mxu1 %v13810_v62  ;;  %v13872_v61 = vcombine.low %v1295_v49, %v1299_v50  ;;  %v13874_v62 = vcombine.low %v1296_v51, %v1300_v52  ;;  %v13929_v49 = vcombine.high %v1351_v43, %v1355_v44  ;;  %v1359_v51 = vld [vmem:[%s19811_s1 + $0x2900] sm:$0xff] }
 0x257   :  { %10023 = vmatprep.subr.bf16.mxu0 %v13817_v63  ;;  %10582 = vmatprep.subr.bf16.mxu1 %v13819_v0  ;;  %v13881_v63 = vcombine.high %v1303_v57, %v1307_v58  ;;  %v13883_v0 = vcombine.high %v1304_v59, %v1308_v60  ;;  %v1363_v52 = vld [vmem:[%s19811_s1 + $0x2920] sm:$0xff] }
 0x25a   :  { %10024 = vmatpush1.bf16.msra.mxu0 %v13816_v5  ;;  %10583 = vmatpush1.bf16.msra.mxu1 %v13818_v6  ;;  %v13880_v5 = vcombine.low %v1303_v57, %v1307_v58  ;;  %v13882_v6 = vcombine.low %v1304_v59, %v1308_v60  ;;  %v13937_v57 = vcombine.high %v1359_v51, %v1363_v52  ;;  %v1367_v59 = vld [vmem:[%s19811_s1 + $0x2940] sm:$0xff] }
 0x25b   :  { %10025 = vmatprep.subr.bf16.mxu0 %v13825_v7  ;;  %10584 = vmatprep.subr.bf16.mxu1 %v13827_v8  ;;  %v13889_v7 = vcombine.high %v1311_v1, %v1315_v2  ;;  %v13891_v8 = vcombine.high %v1312_v3, %v1316_v4  ;;  %v1371_v60 = vld [vmem:[%s19811_s1 + $0x2960] sm:$0xff] }
 0x25e   :  { %10026 = vmatpush1.bf16.msra.mxu0 %v13824_v13  ;;  %10585 = vmatpush1.bf16.msra.mxu1 %v13826_v14  ;;  %v13888_v13 = vcombine.low %v1311_v1, %v1315_v2  ;;  %v13890_v14 = vcombine.low %v1312_v3, %v1316_v4  ;;  %v13945_v1 = vcombine.high %v1367_v59, %v1371_v60  ;;  %v1375_v3 = vld [vmem:[%s19811_s1 + $0x2980] sm:$0xff] }
 0x25f   :  { %10027 = vmatprep.subr.bf16.mxu0 %v13833_v15  ;;  %10586 = vmatprep.subr.bf16.mxu1 %v13835_v16  ;;  %v13897_v15 = vcombine.high %v1319_v9, %v1323_v10  ;;  %v13899_v16 = vcombine.high %v1320_v11, %v1324_v12  ;;  %v1379_v4 = vld [vmem:[%s19811_s1 + $0x29a0] sm:$0xff] }
 0x262   :  { %10028 = vmatpush1.bf16.msra.mxu0 %v13832_v21  ;;  %10587 = vmatpush1.bf16.msra.mxu1 %v13834_v22  ;;  %v13896_v21 = vcombine.low %v1319_v9, %v1323_v10  ;;  %v13898_v22 = vcombine.low %v1320_v11, %v1324_v12  ;;  %v13953_v9 = vcombine.high %v1375_v3, %v1379_v4  ;;  %v1383_v11 = vld [vmem:[%s19811_s1 + $0x29c0] sm:$0xff] }
 0x263   :  { %10029 = vmatprep.subr.bf16.mxu0 %v13841_v23  ;;  %10588 = vmatprep.subr.bf16.mxu1 %v13843_v24  ;;  %v13905_v23 = vcombine.high %v1327_v17, %v1331_v18  ;;  %v13907_v24 = vcombine.high %v1328_v19, %v1332_v20  ;;  %v1387_v12 = vld [vmem:[%s19811_s1 + $0x29e0] sm:$0xff] }
 0x266   :  { %10030 = vmatpush1.bf16.msra.mxu0 %v13840_v29  ;;  %10589 = vmatpush1.bf16.msra.mxu1 %v13842_v30  ;;  %v1340_v29 = vld [vmem:[%s19811_s1 + $0x2868] sm:$0xff]  ;;  %v13904_v30 = vcombine.low %v1327_v17, %v1331_v18  ;;  %v13961_v17 = vcombine.high %v1383_v11, %v1387_v12 }
 0x267   :  { %10031 = vmatprep.subr.bf16.mxu0 %v13849_v31  ;;  %10590 = vmatprep.subr.bf16.mxu1 %v13851_v32  ;;  %v13906_v31 = vcombine.low %v1328_v19, %v1332_v20  ;;  %v13913_v32 = vcombine.high %v1335_v25, %v1339_v26  ;;  %v13915_v33 = vcombine.high %v1336_v28, %v1340_v29  ;;  %v1391_v19 = vld [vmem:[%s19811_s1 + $0x2a00] sm:$0xff] }
 0x268   :  { %v1395_v20 = vld [vmem:[%s19811_s1 + $0x2a20] sm:$0xff] }
 0x26a   :  { %10032 = vmatpush1.bf16.msra.mxu0 %v13848_v37  ;;  %10591 = vmatpush1.bf16.msra.mxu1 %v13850_v38  ;;  %v1344_v37 = vld [vmem:[%s19811_s1 + $0x2888] sm:$0xff] }
 0x26b   :  { %10033 = vmatprep.subr.bf16.mxu0 %v13857_v39  ;;  %10592 = vmatprep.subr.bf16.mxu1 %v13859_v40  ;;  %v1348_v38 = vld [vmem:[%s19811_s1 + $0x28a8] sm:$0xff]  ;;  %v13912_v39 = vcombine.low %v1335_v25, %v1339_v26  ;;  %v13914_v40 = vcombine.low %v1336_v28, %v1340_v29  ;;  %v13969_v25 = vcombine.high %v1391_v19, %v1395_v20  ;;  %v1403_v28 = vld [vmem:[%s19811_s1 + $0x2a60] sm:$0xff] }
 0x26c   :  { %v13923_v42 = vcombine.high %v1344_v37, %v1348_v38  ;;  %v1400_v29 = vld [vmem:[%s19811_s1 + $0x2a48] sm:$0xff] }
 0x26e   :  { %10034 = vmatpush1.bf16.msra.mxu0 %v13856_v45  ;;  %10593 = vmatpush1.bf16.msra.mxu1 %v13858_v46  ;;  %v1352_v45 = vld [vmem:[%s19811_s1 + $0x28c8] sm:$0xff] }
 0x26f   :  { %10035 = vmatprep.subr.bf16.mxu0 %v13865_v47  ;;  %10594 = vmatprep.subr.bf16.mxu1 %v13867_v48  ;;  %v1356_v46 = vld [vmem:[%s19811_s1 + $0x28e8] sm:$0xff]  ;;  %v13920_v47 = vcombine.low %v1343_v34, %v1347_v35  ;;  %v13922_v48 = vcombine.low %v1344_v37, %v1348_v38  ;;  %v1407_v35 = vld [vmem:[%s19811_s1 + $0x2a80] sm:$0xff] }
 0x270   :  { %v13931_v50 = vcombine.high %v1352_v45, %v1356_v46  ;;  %v1408_v37 = vld [vmem:[%s19811_s1 + $0x2a88] sm:$0xff] }
 0x271   :  { %v1412_v38 = vld [vmem:[%s19811_s1 + $0x2aa8] sm:$0xff] }
 0x272   :  { %10036 = vmatpush1.bf16.msra.mxu0 %v13864_v53  ;;  %10595 = vmatpush1.bf16.msra.mxu1 %v13866_v54  ;;  %v1360_v53 = vld [vmem:[%s19811_s1 + $0x2908] sm:$0xff] }
 0x273   :  { %10037 = vmatprep.subr.bf16.mxu0 %v13873_v55  ;;  %10596 = vmatprep.subr.bf16.mxu1 %v13875_v56  ;;  %v1364_v54 = vld [vmem:[%s19811_s1 + $0x2928] sm:$0xff]  ;;  %v13928_v55 = vcombine.low %v1351_v43, %v1355_v44  ;;  %v13930_v56 = vcombine.low %v1352_v45, %v1356_v46  ;;  %v1415_v43 = vld [vmem:[%s19811_s1 + $0x2ac0] sm:$0xff] }
 0x274   :  { %v13939_v58 = vcombine.high %v1360_v53, %v1364_v54  ;;  %v1419_v44 = vld [vmem:[%s19811_s1 + $0x2ae0] sm:$0xff]  ;;  %v1416_v45 = vld [vmem:[%s19811_s1 + $0x2ac8] sm:$0xff] }
 0x275   :  { %v1420_v46 = vld [vmem:[%s19811_s1 + $0x2ae8] sm:$0xff] }
 0x276   :  { %10038 = vmatpush1.bf16.msra.mxu0 %v13872_v61  ;;  %10597 = vmatpush1.bf16.msra.mxu1 %v13874_v62  ;;  %v1368_v61 = vld [vmem:[%s19811_s1 + $0x2948] sm:$0xff] }
 0x277   :  { %10039 = vmatprep.subr.bf16.mxu0 %v13881_v63  ;;  %10598 = vmatprep.subr.bf16.mxu1 %v13883_v0  ;;  %v1372_v62 = vld [vmem:[%s19811_s1 + $0x2968] sm:$0xff]  ;;  %v13936_v63 = vcombine.low %v1359_v51, %v1363_v52  ;;  %v13938_v0 = vcombine.low %v1360_v53, %v1364_v54  ;;  %v1423_v51 = vld [vmem:[%s19811_s1 + $0x2b00] sm:$0xff] }
 0x278   :  { %v13947_v2 = vcombine.high %v1368_v61, %v1372_v62  ;;  %v1427_v52 = vld [vmem:[%s19811_s1 + $0x2b20] sm:$0xff]  ;;  %v1424_v53 = vld [vmem:[%s19811_s1 + $0x2b08] sm:$0xff] }
 0x279   :  { %v1428_v54 = vld [vmem:[%s19811_s1 + $0x2b28] sm:$0xff] }
 0x27a   :  { %10040 = vmatpush1.bf16.msra.mxu0 %v13880_v5  ;;  %10599 = vmatpush1.bf16.msra.mxu1 %v13882_v6  ;;  %v1376_v5 = vld [vmem:[%s19811_s1 + $0x2988] sm:$0xff] }
 0x27b   :  { %10041 = vmatprep.subr.bf16.mxu0 %v13889_v7  ;;  %10600 = vmatprep.subr.bf16.mxu1 %v13891_v8  ;;  %v1380_v6 = vld [vmem:[%s19811_s1 + $0x29a8] sm:$0xff]  ;;  %v13944_v7 = vcombine.low %v1367_v59, %v1371_v60  ;;  %v13946_v8 = vcombine.low %v1368_v61, %v1372_v62  ;;  %v1431_v59 = vld [vmem:[%s19811_s1 + $0x2b40] sm:$0xff] }
 0x27c   :  { %v13955_v10 = vcombine.high %v1376_v5, %v1380_v6  ;;  %v1435_v60 = vld [vmem:[%s19811_s1 + $0x2b60] sm:$0xff]  ;;  %v1432_v61 = vld [vmem:[%s19811_s1 + $0x2b48] sm:$0xff] }
 0x27d   :  { %v1436_v62 = vld [vmem:[%s19811_s1 + $0x2b68] sm:$0xff] }
 0x27e   :  { %10042 = vmatpush1.bf16.msra.mxu0 %v13888_v13  ;;  %10601 = vmatpush1.bf16.msra.mxu1 %v13890_v14  ;;  %v1384_v13 = vld [vmem:[%s19811_s1 + $0x29c8] sm:$0xff] }
 0x27f   :  { %10043 = vmatprep.subr.bf16.mxu0 %v13897_v15  ;;  %10602 = vmatprep.subr.bf16.mxu1 %v13899_v16  ;;  %v1388_v14 = vld [vmem:[%s19811_s1 + $0x29e8] sm:$0xff]  ;;  %v13952_v15 = vcombine.low %v1375_v3, %v1379_v4  ;;  %v13954_v16 = vcombine.low %v1376_v5, %v1380_v6  ;;  %v1439_v3 = vld [vmem:[%s19811_s1 + $0x2b80] sm:$0xff] }
 0x280   :  { %v13963_v18 = vcombine.high %v1384_v13, %v1388_v14  ;;  %v1443_v4 = vld [vmem:[%s19811_s1 + $0x2ba0] sm:$0xff]  ;;  %v1440_v5 = vld [vmem:[%s19811_s1 + $0x2b88] sm:$0xff] }
 0x281   :  { %v1444_v6 = vld [vmem:[%s19811_s1 + $0x2ba8] sm:$0xff] }
 0x282   :  { %10044 = vmatpush1.bf16.msra.mxu0 %v13896_v21  ;;  %10603 = vmatpush1.bf16.msra.mxu1 %v13898_v22  ;;  %v1392_v21 = vld [vmem:[%s19811_s1 + $0x2a08] sm:$0xff] }
 0x283   :  { %10056 = vmatprep.subr.bf16.mxu0 %v13905_v23  ;;  %10615 = vmatprep.subr.bf16.mxu1 %v13907_v24  ;;  %v1396_v22 = vld [vmem:[%s19811_s1 + $0x2a28] sm:$0xff]  ;;  %v13960_v23 = vcombine.low %v1383_v11, %v1387_v12  ;;  %v13962_v24 = vcombine.low %v1384_v13, %v1388_v14  ;;  %v1447_v11 = vld [vmem:[%s19811_s1 + $0x2bc0] sm:$0xff] }
 0x284   :  { %v13971_v26 = vcombine.high %v1392_v21, %v1396_v22  ;;  %v1451_v12 = vld [vmem:[%s19811_s1 + $0x2be0] sm:$0xff]  ;;  %v1448_v13 = vld [vmem:[%s19811_s1 + $0x2bc8] sm:$0xff] }
 0x285   :  { %10046 = vmatmul.mubr.bf16.vlgmr.msra.gmra.mrb[0].mxu0 %v14590_v27  ;;  %10605 = vmatmul.mubr.bf16.vlgmr.msra.gmra.mrb[0].mxu1 %v14590_v27  ;;  %v1399_v27 = vld [vmem:[%s19811_s1 + $0x2a40] sm:$0xff]  ;;  %v1452_v14 = vld [vmem:[%s19811_s1 + $0x2be8] sm:$0xff] }
 0x286   :  { %10057 = vmatpush1.bf16.msra.mxu0 %v13904_v30  ;;  %10616 = vmatpush1.bf16.msra.mxu1 %v13906_v31  ;;  %v1404_v30 = vld [vmem:[%s19811_s1 + $0x2a68] sm:$0xff]  ;;  %v13968_v31 = vcombine.low %v1391_v19, %v1395_v20  ;;  %v1455_v19 = vld [vmem:[%s19811_s1 + $0x2c00] sm:$0xff] }
 0x287   :  { %10058 = vmatprep.subr.bf16.mxu0 %v13913_v32  ;;  %10617 = vmatprep.subr.bf16.mxu1 %v13915_v33  ;;  %v13970_v32 = vcombine.low %v1392_v21, %v1396_v22  ;;  %v13977_v33 = vcombine.high %v1399_v27, %v1403_v28  ;;  %v13979_v34 = vcombine.high %v1400_v29, %v1404_v30  ;;  %v1459_v20 = vld [vmem:[%s19811_s1 + $0x2c20] sm:$0xff]  ;;  %v1456_v21 = vld [vmem:[%s19811_s1 + $0x2c08] sm:$0xff] }
 0x288   :  { %10088 = vmatprep.mubr.bf16.mxu0 %v14591_v36  ;;  %10647 = vmatprep.mubr.bf16.mxu1 %v14591_v36  ;;  %v1411_v36 = vld [vmem:[%s19811_s1 + $0x2aa0] sm:$0xff]  ;;  %v1460_v22 = vld [vmem:[%s19811_s1 + $0x2c28] sm:$0xff] }
 0x28a   :  { %10059 = vmatpush1.bf16.msra.mxu0 %v13912_v39  ;;  %10618 = vmatpush1.bf16.msra.mxu1 %v13914_v40  ;;  %v13976_v39 = vcombine.low %v1399_v27, %v1403_v28  ;;  %v13978_v40 = vcombine.low %v1400_v29, %v1404_v30  ;;  %v1463_v27 = vld [vmem:[%s19811_s1 + $0x2c40] sm:$0xff]  ;;  %v14593_v29 = vld [vmem:[%s19812_s0 + $0x50] ss:$100 sps:$4 sm:$0xff]   ;;  %v1464_v30 = vld [vmem:[%s19811_s1 + $0x2c48] sm:$0xff] }
 0x28b   :  { %10060 = vmatprep.subr.bf16.mxu0 %v13921_v41  ;;  %10619 = vmatprep.subr.bf16.mxu1 %v13923_v42  ;;  %v13985_v41 = vcombine.high %v1407_v35, %v1411_v36  ;;  %v13987_v42 = vcombine.high %v1408_v37, %v1412_v38  ;;  %v1467_v28 = vld [vmem:[%s19811_s1 + $0x2c60] sm:$0xff] }
 0x28e   :  { %10061 = vmatpush1.bf16.msra.mxu0 %v13920_v47  ;;  %10620 = vmatpush1.bf16.msra.mxu1 %v13922_v48  ;;  %v13984_v47 = vcombine.low %v1407_v35, %v1411_v36  ;;  %v13986_v48 = vcombine.low %v1408_v37, %v1412_v38  ;;  %v1471_v36 = vld [vmem:[%s19811_s1 + $0x2c80] sm:$0xff] }
 0x28f   :  { %10062 = vmatprep.subr.bf16.mxu0 %v13929_v49  ;;  %10621 = vmatprep.subr.bf16.mxu1 %v13931_v50  ;;  %v13993_v49 = vcombine.high %v1415_v43, %v1419_v44  ;;  %v13995_v50 = vcombine.high %v1416_v45, %v1420_v46  ;;  %v1475_v37 = vld [vmem:[%s19811_s1 + $0x2ca0] sm:$0xff] }
 0x290   :  { %v14594_v38 = vld [vmem:[%s19812_s0 + $0x5c] ss:$100 sps:$4 sm:$0xff]  }
 0x292   :  { %10063 = vmatpush1.bf16.msra.mxu0 %v13928_v55  ;;  %10622 = vmatpush1.bf16.msra.mxu1 %v13930_v56  ;;  %v13992_v55 = vcombine.low %v1415_v43, %v1419_v44  ;;  %v13994_v56 = vcombine.low %v1416_v45, %v1420_v46  ;;  %v14049_v43 = vcombine.high %v1471_v36, %v1475_v37  ;;  %v1479_v45 = vld [vmem:[%s19811_s1 + $0x2cc0] sm:$0xff] }
 0x293   :  { %10064 = vmatprep.subr.bf16.mxu0 %v13937_v57  ;;  %10623 = vmatprep.subr.bf16.mxu1 %v13939_v58  ;;  %v14001_v57 = vcombine.high %v1423_v51, %v1427_v52  ;;  %v14003_v58 = vcombine.high %v1424_v53, %v1428_v54  ;;  %v1483_v46 = vld [vmem:[%s19811_s1 + $0x2ce0] sm:$0xff] }
 0x296   :  { %10065 = vmatpush1.bf16.msra.mxu0 %v13936_v63  ;;  %10624 = vmatpush1.bf16.msra.mxu1 %v13938_v0  ;;  %v14000_v63 = vcombine.low %v1423_v51, %v1427_v52  ;;  %v14002_v0 = vcombine.low %v1424_v53, %v1428_v54  ;;  %v14057_v51 = vcombine.high %v1479_v45, %v1483_v46  ;;  %v1487_v53 = vld [vmem:[%s19811_s1 + $0x2d00] sm:$0xff] }
 0x297   :  { %10066 = vmatprep.subr.bf16.mxu0 %v13945_v1  ;;  %10625 = vmatprep.subr.bf16.mxu1 %v13947_v2  ;;  %v14009_v1 = vcombine.high %v1431_v59, %v1435_v60  ;;  %v14011_v2 = vcombine.high %v1432_v61, %v1436_v62  ;;  %v1491_v54 = vld [vmem:[%s19811_s1 + $0x2d20] sm:$0xff] }
 0x29a   :  { %10067 = vmatpush1.bf16.msra.mxu0 %v13944_v7  ;;  %10626 = vmatpush1.bf16.msra.mxu1 %v13946_v8  ;;  %v14008_v7 = vcombine.low %v1431_v59, %v1435_v60  ;;  %v14010_v8 = vcombine.low %v1432_v61, %v1436_v62  ;;  %v14065_v59 = vcombine.high %v1487_v53, %v1491_v54  ;;  %v1495_v61 = vld [vmem:[%s19811_s1 + $0x2d40] sm:$0xff] }
 0x29b   :  { %10068 = vmatprep.subr.bf16.mxu0 %v13953_v9  ;;  %10627 = vmatprep.subr.bf16.mxu1 %v13955_v10  ;;  %v14017_v9 = vcombine.high %v1439_v3, %v1443_v4  ;;  %v14019_v10 = vcombine.high %v1440_v5, %v1444_v6  ;;  %v1499_v62 = vld [vmem:[%s19811_s1 + $0x2d60] sm:$0xff] }
 0x29e   :  { %10069 = vmatpush1.bf16.msra.mxu0 %v13952_v15  ;;  %10628 = vmatpush1.bf16.msra.mxu1 %v13954_v16  ;;  %v14016_v15 = vcombine.low %v1439_v3, %v1443_v4  ;;  %v14018_v16 = vcombine.low %v1440_v5, %v1444_v6  ;;  %v14073_v3 = vcombine.high %v1495_v61, %v1499_v62  ;;  %v1503_v5 = vld [vmem:[%s19811_s1 + $0x2d80] sm:$0xff] }
 0x29f   :  { %10070 = vmatprep.subr.bf16.mxu0 %v13961_v17  ;;  %10629 = vmatprep.subr.bf16.mxu1 %v13963_v18  ;;  %v14025_v17 = vcombine.high %v1447_v11, %v1451_v12  ;;  %v14027_v18 = vcombine.high %v1448_v13, %v1452_v14  ;;  %v1507_v6 = vld [vmem:[%s19811_s1 + $0x2da0] sm:$0xff] }
 0x2a2   :  { %10071 = vmatpush1.bf16.msra.mxu0 %v13960_v23  ;;  %10630 = vmatpush1.bf16.msra.mxu1 %v13962_v24  ;;  %v14024_v23 = vcombine.low %v1447_v11, %v1451_v12  ;;  %v14026_v24 = vcombine.low %v1448_v13, %v1452_v14  ;;  %v14081_v11 = vcombine.high %v1503_v5, %v1507_v6  ;;  %v1511_v13 = vld [vmem:[%s19811_s1 + $0x2dc0] sm:$0xff] }
 0x2a3   :  { %10072 = vmatprep.subr.bf16.mxu0 %v13969_v25  ;;  %10631 = vmatprep.subr.bf16.mxu1 %v13971_v26  ;;  %v14033_v25 = vcombine.high %v1455_v19, %v1459_v20  ;;  %v14035_v26 = vcombine.high %v1456_v21, %v1460_v22  ;;  %v1515_v14 = vld [vmem:[%s19811_s1 + $0x2de0] sm:$0xff] }
 0x2a6   :  { %10073 = vmatpush1.bf16.msra.mxu0 %v13968_v31  ;;  %10632 = vmatpush1.bf16.msra.mxu1 %v13970_v32  ;;  %v1468_v31 = vld [vmem:[%s19811_s1 + $0x2c68] sm:$0xff]  ;;  %v14032_v32 = vcombine.low %v1455_v19, %v1459_v20  ;;  %v14089_v19 = vcombine.high %v1511_v13, %v1515_v14 }
 0x2a7   :  { %10074 = vmatprep.subr.bf16.mxu0 %v13977_v33  ;;  %10633 = vmatprep.subr.bf16.mxu1 %v13979_v34  ;;  %v14034_v33 = vcombine.low %v1456_v21, %v1460_v22  ;;  %v14041_v34 = vcombine.high %v1463_v27, %v1467_v28  ;;  %v14043_v35 = vcombine.high %v1464_v30, %v1468_v31  ;;  %v1519_v21 = vld [vmem:[%s19811_s1 + $0x2e00] sm:$0xff] }
 0x2a8   :  { %v1523_v22 = vld [vmem:[%s19811_s1 + $0x2e20] sm:$0xff] }
 0x2aa   :  { %10075 = vmatpush1.bf16.msra.mxu0 %v13976_v39  ;;  %10634 = vmatpush1.bf16.msra.mxu1 %v13978_v40  ;;  %v1472_v39 = vld [vmem:[%s19811_s1 + $0x2c88] sm:$0xff] }
 0x2ab   :  { %10076 = vmatprep.subr.bf16.mxu0 %v13985_v41  ;;  %10635 = vmatprep.subr.bf16.mxu1 %v13987_v42  ;;  %v1476_v40 = vld [vmem:[%s19811_s1 + $0x2ca8] sm:$0xff]  ;;  %v14040_v41 = vcombine.low %v1463_v27, %v1467_v28  ;;  %v14042_v42 = vcombine.low %v1464_v30, %v1468_v31  ;;  %v14097_v27 = vcombine.high %v1519_v21, %v1523_v22  ;;  %v1531_v30 = vld [vmem:[%s19811_s1 + $0x2e60] sm:$0xff] }
 0x2ac   :  { %v14051_v44 = vcombine.high %v1472_v39, %v1476_v40  ;;  %v1528_v31 = vld [vmem:[%s19811_s1 + $0x2e48] sm:$0xff] }
 0x2ae   :  { %10077 = vmatpush1.bf16.msra.mxu0 %v13984_v47  ;;  %10636 = vmatpush1.bf16.msra.mxu1 %v13986_v48  ;;  %v1480_v47 = vld [vmem:[%s19811_s1 + $0x2cc8] sm:$0xff] }
 0x2af   :  { %10078 = vmatprep.subr.bf16.mxu0 %v13993_v49  ;;  %10637 = vmatprep.subr.bf16.mxu1 %v13995_v50  ;;  %v1484_v48 = vld [vmem:[%s19811_s1 + $0x2ce8] sm:$0xff]  ;;  %v14048_v49 = vcombine.low %v1471_v36, %v1475_v37  ;;  %v14050_v50 = vcombine.low %v1472_v39, %v1476_v40  ;;  %v1535_v37 = vld [vmem:[%s19811_s1 + $0x2e80] sm:$0xff] }
 0x2b0   :  { %v14059_v52 = vcombine.high %v1480_v47, %v1484_v48  ;;  %v1536_v39 = vld [vmem:[%s19811_s1 + $0x2e88] sm:$0xff] }
 0x2b1   :  { %v1540_v40 = vld [vmem:[%s19811_s1 + $0x2ea8] sm:$0xff] }
 0x2b2   :  { %10079 = vmatpush1.bf16.msra.mxu0 %v13992_v55  ;;  %10638 = vmatpush1.bf16.msra.mxu1 %v13994_v56  ;;  %v1488_v55 = vld [vmem:[%s19811_s1 + $0x2d08] sm:$0xff] }
 0x2b3   :  { %10080 = vmatprep.subr.bf16.mxu0 %v14001_v57  ;;  %10639 = vmatprep.subr.bf16.mxu1 %v14003_v58  ;;  %v1492_v56 = vld [vmem:[%s19811_s1 + $0x2d28] sm:$0xff]  ;;  %v14056_v57 = vcombine.low %v1479_v45, %v1483_v46  ;;  %v14058_v58 = vcombine.low %v1480_v47, %v1484_v48  ;;  %v1543_v45 = vld [vmem:[%s19811_s1 + $0x2ec0] sm:$0xff] }
 0x2b4   :  { %v14067_v60 = vcombine.high %v1488_v55, %v1492_v56  ;;  %v1547_v46 = vld [vmem:[%s19811_s1 + $0x2ee0] sm:$0xff]  ;;  %v1544_v47 = vld [vmem:[%s19811_s1 + $0x2ec8] sm:$0xff] }
 0x2b5   :  { %v1548_v48 = vld [vmem:[%s19811_s1 + $0x2ee8] sm:$0xff] }
 0x2b6   :  { %10081 = vmatpush1.bf16.msra.mxu0 %v14000_v63  ;;  %10640 = vmatpush1.bf16.msra.mxu1 %v14002_v0  ;;  %v1496_v63 = vld [vmem:[%s19811_s1 + $0x2d48] sm:$0xff] }
 0x2b7   :  { %10082 = vmatprep.subr.bf16.mxu0 %v14009_v1  ;;  %10641 = vmatprep.subr.bf16.mxu1 %v14011_v2  ;;  %v1500_v0 = vld [vmem:[%s19811_s1 + $0x2d68] sm:$0xff]  ;;  %v14064_v1 = vcombine.low %v1487_v53, %v1491_v54  ;;  %v14066_v2 = vcombine.low %v1488_v55, %v1492_v56  ;;  %v1551_v53 = vld [vmem:[%s19811_s1 + $0x2f00] sm:$0xff] }
 0x2b8   :  { %v14075_v4 = vcombine.high %v1496_v63, %v1500_v0  ;;  %v1555_v54 = vld [vmem:[%s19811_s1 + $0x2f20] sm:$0xff]  ;;  %v1552_v55 = vld [vmem:[%s19811_s1 + $0x2f08] sm:$0xff] }
 0x2b9   :  { %v1556_v56 = vld [vmem:[%s19811_s1 + $0x2f28] sm:$0xff] }
 0x2ba   :  { %10083 = vmatpush1.bf16.msra.mxu0 %v14008_v7  ;;  %10642 = vmatpush1.bf16.msra.mxu1 %v14010_v8  ;;  %v1504_v7 = vld [vmem:[%s19811_s1 + $0x2d88] sm:$0xff] }
 0x2bb   :  { %10084 = vmatprep.subr.bf16.mxu0 %v14017_v9  ;;  %10643 = vmatprep.subr.bf16.mxu1 %v14019_v10  ;;  %v1508_v8 = vld [vmem:[%s19811_s1 + $0x2da8] sm:$0xff]  ;;  %v14072_v9 = vcombine.low %v1495_v61, %v1499_v62  ;;  %v14074_v10 = vcombine.low %v1496_v63, %v1500_v0  ;;  %v1559_v61 = vld [vmem:[%s19811_s1 + $0x2f40] sm:$0xff] }
 0x2bc   :  { %v14083_v12 = vcombine.high %v1504_v7, %v1508_v8  ;;  %v1563_v62 = vld [vmem:[%s19811_s1 + $0x2f60] sm:$0xff]  ;;  %v1560_v63 = vld [vmem:[%s19811_s1 + $0x2f48] sm:$0xff] }
 0x2bd   :  { %v1564_v0 = vld [vmem:[%s19811_s1 + $0x2f68] sm:$0xff] }
 0x2be   :  { %10085 = vmatpush1.bf16.msra.mxu0 %v14016_v15  ;;  %10644 = vmatpush1.bf16.msra.mxu1 %v14018_v16  ;;  %v1512_v15 = vld [vmem:[%s19811_s1 + $0x2dc8] sm:$0xff] }
 0x2bf   :  { %10086 = vmatprep.subr.bf16.mxu0 %v14025_v17  ;;  %10645 = vmatprep.subr.bf16.mxu1 %v14027_v18  ;;  %v1516_v16 = vld [vmem:[%s19811_s1 + $0x2de8] sm:$0xff]  ;;  %v14080_v17 = vcombine.low %v1503_v5, %v1507_v6  ;;  %v14082_v18 = vcombine.low %v1504_v7, %v1508_v8  ;;  %v1567_v5 = vld [vmem:[%s19811_s1 + $0x2f80] sm:$0xff] }
 0x2c0   :  { %v14091_v20 = vcombine.high %v1512_v15, %v1516_v16  ;;  %v1571_v6 = vld [vmem:[%s19811_s1 + $0x2fa0] sm:$0xff]  ;;  %v1568_v7 = vld [vmem:[%s19811_s1 + $0x2f88] sm:$0xff] }
 0x2c1   :  { %v1572_v8 = vld [vmem:[%s19811_s1 + $0x2fa8] sm:$0xff] }
 0x2c2   :  { %10087 = vmatpush1.bf16.msra.mxu0 %v14024_v23  ;;  %10646 = vmatpush1.bf16.msra.mxu1 %v14026_v24  ;;  %v1520_v23 = vld [vmem:[%s19811_s1 + $0x2e08] sm:$0xff] }
 0x2c3   :  { %10099 = vmatprep.subr.bf16.mxu0 %v14033_v25  ;;  %10658 = vmatprep.subr.bf16.mxu1 %v14035_v26  ;;  %v1524_v24 = vld [vmem:[%s19811_s1 + $0x2e28] sm:$0xff]  ;;  %v14088_v25 = vcombine.low %v1511_v13, %v1515_v14  ;;  %v14090_v26 = vcombine.low %v1512_v15, %v1516_v16  ;;  %v1575_v13 = vld [vmem:[%s19811_s1 + $0x2fc0] sm:$0xff] }
 0x2c4   :  { %v14099_v28 = vcombine.high %v1520_v23, %v1524_v24  ;;  %v1579_v14 = vld [vmem:[%s19811_s1 + $0x2fe0] sm:$0xff]  ;;  %v1576_v15 = vld [vmem:[%s19811_s1 + $0x2fc8] sm:$0xff] }
 0x2c5   :  { %10089 = vmatmul.mubr.bf16.vlgmr.msra.gmra.mrb[0].mxu0 %v14593_v29  ;;  %10648 = vmatmul.mubr.bf16.vlgmr.msra.gmra.mrb[0].mxu1 %v14593_v29  ;;  %v1527_v29 = vld [vmem:[%s19811_s1 + $0x2e40] sm:$0xff]  ;;  %v1580_v16 = vld [vmem:[%s19811_s1 + $0x2fe8] sm:$0xff] }
 0x2c6   :  { %10100 = vmatpush1.bf16.msra.mxu0 %v14032_v32  ;;  %10659 = vmatpush1.bf16.msra.mxu1 %v14034_v33  ;;  %v1532_v32 = vld [vmem:[%s19811_s1 + $0x2e68] sm:$0xff]  ;;  %v14096_v33 = vcombine.low %v1519_v21, %v1523_v22  ;;  %v1583_v21 = vld [vmem:[%s19811_s1 + $0x3000] sm:$0xff] }
 0x2c7   :  { %10101 = vmatprep.subr.bf16.mxu0 %v14041_v34  ;;  %10660 = vmatprep.subr.bf16.mxu1 %v14043_v35  ;;  %v14098_v34 = vcombine.low %v1520_v23, %v1524_v24  ;;  %v14105_v35 = vcombine.high %v1527_v29, %v1531_v30  ;;  %v14107_v36 = vcombine.high %v1528_v31, %v1532_v32  ;;  %v1587_v22 = vld [vmem:[%s19811_s1 + $0x3020] sm:$0xff]  ;;  %v1584_v23 = vld [vmem:[%s19811_s1 + $0x3008] sm:$0xff] }
 0x2c8   :  { %10131 = vmatprep.mubr.bf16.mxu0 %v14594_v38  ;;  %10690 = vmatprep.mubr.bf16.mxu1 %v14594_v38  ;;  %v1539_v38 = vld [vmem:[%s19811_s1 + $0x2ea0] sm:$0xff]  ;;  %v1588_v24 = vld [vmem:[%s19811_s1 + $0x3028] sm:$0xff] }
 0x2ca   :  { %10102 = vmatpush1.bf16.msra.mxu0 %v14040_v41  ;;  %10661 = vmatpush1.bf16.msra.mxu1 %v14042_v42  ;;  %v14104_v41 = vcombine.low %v1527_v29, %v1531_v30  ;;  %v14106_v42 = vcombine.low %v1528_v31, %v1532_v32  ;;  %v1591_v29 = vld [vmem:[%s19811_s1 + $0x3040] sm:$0xff]  ;;  %v14596_v31 = vld [vmem:[%s19812_s0 + $0x58] ss:$100 sps:$4 sm:$0xff]   ;;  %v1592_v32 = vld [vmem:[%s19811_s1 + $0x3048] sm:$0xff] }
 0x2cb   :  { %10103 = vmatprep.subr.bf16.mxu0 %v14049_v43  ;;  %10662 = vmatprep.subr.bf16.mxu1 %v14051_v44  ;;  %v14113_v43 = vcombine.high %v1535_v37, %v1539_v38  ;;  %v14115_v44 = vcombine.high %v1536_v39, %v1540_v40  ;;  %v1595_v30 = vld [vmem:[%s19811_s1 + $0x3060] sm:$0xff] }
 0x2ce   :  { %10104 = vmatpush1.bf16.msra.mxu0 %v14048_v49  ;;  %10663 = vmatpush1.bf16.msra.mxu1 %v14050_v50  ;;  %v14112_v49 = vcombine.low %v1535_v37, %v1539_v38  ;;  %v14114_v50 = vcombine.low %v1536_v39, %v1540_v40  ;;  %v1599_v38 = vld [vmem:[%s19811_s1 + $0x3080] sm:$0xff]  ;;  %v1600_v40 = vld [vmem:[%s19811_s1 + $0x3088] sm:$0xff] }
 0x2cf   :  { %10105 = vmatprep.subr.bf16.mxu0 %v14057_v51  ;;  %10664 = vmatprep.subr.bf16.mxu1 %v14059_v52  ;;  %v14121_v51 = vcombine.high %v1543_v45, %v1547_v46  ;;  %v14123_v52 = vcombine.high %v1544_v47, %v1548_v48  ;;  %v1603_v39 = vld [vmem:[%s19811_s1 + $0x30a0] sm:$0xff] }
 0x2d2   :  { %10106 = vmatpush1.bf16.msra.mxu0 %v14056_v57  ;;  %10665 = vmatpush1.bf16.msra.mxu1 %v14058_v58  ;;  %v14120_v57 = vcombine.low %v1543_v45, %v1547_v46  ;;  %v14122_v58 = vcombine.low %v1544_v47, %v1548_v48  ;;  %v1607_v46 = vld [vmem:[%s19811_s1 + $0x30c0] sm:$0xff]  ;;  %v14688_v48 = vmov 0  }
 0x2d3   :  { %10107 = vmatprep.subr.bf16.mxu0 %v14065_v59  ;;  %10666 = vmatprep.subr.bf16.mxu1 %v14067_v60  ;;  %v14129_v59 = vcombine.high %v1551_v53, %v1555_v54  ;;  %v14131_v60 = vcombine.high %v1552_v55, %v1556_v56  ;;  %v1611_v47 = vld [vmem:[%s19811_s1 + $0x30e0] sm:$0xff] }
 0x2d6   :  { %10108 = vmatpush1.bf16.msra.mxu0 %v14064_v1  ;;  %10667 = vmatpush1.bf16.msra.mxu1 %v14066_v2  ;;  %v14128_v1 = vcombine.low %v1551_v53, %v1555_v54  ;;  %v14130_v2 = vcombine.low %v1552_v55, %v1556_v56  ;;  %v14185_v53 = vcombine.high %v1607_v46, %v1611_v47  ;;  %v49_v55 = vld [vmem:[%s19811_s1 + $0x10] sm:$0xff] }
 0x2d7   :  { %10109 = vmatprep.subr.bf16.mxu0 %v14073_v3  ;;  %10668 = vmatprep.subr.bf16.mxu1 %v14075_v4  ;;  %v14137_v3 = vcombine.high %v1559_v61, %v1563_v62  ;;  %v14139_v4 = vcombine.high %v1560_v63, %v1564_v0  ;;  %v53_v56 = vld [vmem:[%s19811_s1 + $0x30] sm:$0xff] }
 0x2da   :  { %10110 = vmatpush1.bf16.msra.mxu0 %v14072_v9  ;;  %10669 = vmatpush1.bf16.msra.mxu1 %v14074_v10  ;;  %v14136_v9 = vcombine.low %v1559_v61, %v1563_v62  ;;  %v14138_v10 = vcombine.low %v1560_v63, %v1564_v0  ;;  %v12629_v61 = vcombine.high %v49_v55, %v53_v56  ;;  %v57_v63 = vld [vmem:[%s19811_s1 + $0x50] sm:$0xff] }
 0x2db   :  { %10111 = vmatprep.subr.bf16.mxu0 %v14081_v11  ;;  %10670 = vmatprep.subr.bf16.mxu1 %v14083_v12  ;;  %v14145_v11 = vcombine.high %v1567_v5, %v1571_v6  ;;  %v14147_v12 = vcombine.high %v1568_v7, %v1572_v8  ;;  %v61_v0 = vld [vmem:[%s19811_s1 + $0x70] sm:$0xff] }
 0x2de   :  { %10112 = vmatpush1.bf16.msra.mxu0 %v14080_v17  ;;  %10671 = vmatpush1.bf16.msra.mxu1 %v14082_v18  ;;  %v14144_v17 = vcombine.low %v1567_v5, %v1571_v6  ;;  %v14146_v18 = vcombine.low %v1568_v7, %v1572_v8  ;;  %v12637_v6 = vcombine.high %v57_v63, %v61_v0  ;;  %v65_v8 = vld [vmem:[%s19811_s1 + $0x90] sm:$0xff] }
 0x2df   :  { %10113 = vmatprep.subr.bf16.mxu0 %v14089_v19  ;;  %10672 = vmatprep.subr.bf16.mxu1 %v14091_v20  ;;  %v14153_v19 = vcombine.high %v1575_v13, %v1579_v14  ;;  %v14155_v20 = vcombine.high %v1576_v15, %v1580_v16 }
 0x2e2   :  { %10114 = vmatpush1.bf16.msra.mxu0 %v14088_v25  ;;  %10673 = vmatpush1.bf16.msra.mxu1 %v14090_v26  ;;  %v14152_v25 = vcombine.low %v1575_v13, %v1579_v14  ;;  %v14154_v26 = vcombine.low %v1576_v15, %v1580_v16  ;;  %v73_v16 = vld [vmem:[%s19811_s1 + $0xd0] sm:$0xff] }
 0x2e3   :  { %10115 = vmatprep.subr.bf16.mxu0 %v14097_v27  ;;  %10674 = vmatprep.subr.bf16.mxu1 %v14099_v28  ;;  %v14161_v27 = vcombine.high %v1583_v21, %v1587_v22  ;;  %v14163_v28 = vcombine.high %v1584_v23, %v1588_v24 }
 0x2e6   :  { %10116 = vmatpush1.bf16.msra.mxu0 %v14096_v33  ;;  %10675 = vmatpush1.bf16.msra.mxu1 %v14098_v34  ;;  %v1596_v33 = vld [vmem:[%s19811_s1 + $0x3068] sm:$0xff]  ;;  %v14160_v34 = vcombine.low %v1583_v21, %v1587_v22 }
 0x2e7   :  { %10117 = vmatprep.subr.bf16.mxu0 %v14105_v35  ;;  %10676 = vmatprep.subr.bf16.mxu1 %v14107_v36  ;;  %v14162_v35 = vcombine.low %v1584_v23, %v1588_v24  ;;  %v14169_v36 = vcombine.high %v1591_v29, %v1595_v30  ;;  %v14171_v37 = vcombine.high %v1592_v32, %v1596_v33 }
 0x2ea   :  { %10118 = vmatpush1.bf16.msra.mxu0 %v14104_v41  ;;  %10677 = vmatpush1.bf16.msra.mxu1 %v14106_v42  ;;  %v1604_v41 = vld [vmem:[%s19811_s1 + $0x30a8] sm:$0xff]  ;;  %v14168_v42 = vcombine.low %v1591_v29, %v1595_v30 }
 0x2eb   :  { %10119 = vmatprep.subr.bf16.mxu0 %v14113_v43  ;;  %10678 = vmatprep.subr.bf16.mxu1 %v14115_v44  ;;  %v14170_v43 = vcombine.low %v1592_v32, %v1596_v33  ;;  %v14177_v44 = vcombine.high %v1599_v38, %v1603_v39  ;;  %v14179_v45 = vcombine.high %v1600_v40, %v1604_v41  ;;  %v89_v33 = vld [vmem:[%s19811_s1 + $0x150] sm:$0xff] }
 0x2ee   :  { %10120 = vmatpush1.bf16.msra.mxu0 %v14112_v49  ;;  %10679 = vmatpush1.bf16.msra.mxu1 %v14114_v50  ;;  %v1608_v49 = vld [vmem:[%s19811_s1 + $0x30c8] sm:$0xff] }
 0x2ef   :  { %10121 = vmatprep.subr.bf16.mxu0 %v14121_v51  ;;  %10680 = vmatprep.subr.bf16.mxu1 %v14123_v52  ;;  %v1612_v50 = vld [vmem:[%s19811_s1 + $0x30e8] sm:$0xff]  ;;  %v14176_v51 = vcombine.low %v1599_v38, %v1603_v39  ;;  %v14178_v52 = vcombine.low %v1600_v40, %v1604_v41  ;;  %v97_v41 = vld [vmem:[%s19811_s1 + $0x190] sm:$0xff] }
 0x2f0   :  { %v14187_v54 = vcombine.high %v1608_v49, %v1612_v50 }
 0x2f2   :  { %10122 = vmatpush1.bf16.msra.mxu0 %v14120_v57  ;;  %10681 = vmatpush1.bf16.msra.mxu1 %v14122_v58  ;;  %v50_v57 = vld [vmem:[%s19811_s1 + $0x18] sm:$0xff] }
 0x2f3   :  { %10123 = vmatprep.subr.bf16.mxu0 %v14129_v59  ;;  %10682 = vmatprep.subr.bf16.mxu1 %v14131_v60  ;;  %v54_v58 = vld [vmem:[%s19811_s1 + $0x38] sm:$0xff]  ;;  %v14184_v59 = vcombine.low %v1607_v46, %v1611_v47  ;;  %v14186_v60 = vcombine.low %v1608_v49, %v1612_v50  ;;  %v105_v50 = vld [vmem:[%s19811_s1 + $0x1d0] sm:$0xff] }
 0x2f4   :  { %v12631_v62 = vcombine.high %v50_v57, %v54_v58  ;;  %v12630_v5 = vcombine.low %v50_v57, %v54_v58  ;;  %v113_v58 = vld [vmem:[%s19811_s1 + $0x210] sm:$0xff] }
 0x2f6   :  { %10124 = vmatpush1.bf16.msra.mxu0 %v14128_v1  ;;  %10683 = vmatpush1.bf16.msra.mxu1 %v14130_v2  ;;  %v14597_v1 = vld [vmem:[%s19812_s0 + $0x60] ss:$100 sps:$4 sm:$0xff]   ;;  %v58_v2 = vld [vmem:[%s19811_s1 + $0x58] sm:$0xff] }
 0x2f7   :  { %10125 = vmatprep.subr.bf16.mxu0 %v14137_v3  ;;  %10684 = vmatprep.subr.bf16.mxu1 %v14139_v4  ;;  %v62_v3 = vld [vmem:[%s19811_s1 + $0x78] sm:$0xff]  ;;  %v12628_v4 = vcombine.low %v49_v55, %v53_v56 }
 0x2f8   :  { %v12639_v7 = vcombine.high %v58_v2, %v62_v3  ;;  %v12638_v13 = vcombine.low %v58_v2, %v62_v3  ;;  %v121_v2 = vld [vmem:[%s19811_s1 + $0x250] sm:$0xff] }
 0x2f9   :  { %v125_v3 = vld [vmem:[%s19811_s1 + $0x270] sm:$0xff] }
 0x2fa   :  { %10126 = vmatpush1.bf16.msra.mxu0 %v14136_v9  ;;  %10685 = vmatpush1.bf16.msra.mxu1 %v14138_v10  ;;  %v69_v9 = vld [vmem:[%s19811_s1 + $0xb0] sm:$0xff]  ;;  %v66_v10 = vld [vmem:[%s19811_s1 + $0x98] sm:$0xff] }
 0x2fb   :  { %10127 = vmatprep.subr.bf16.mxu0 %v14145_v11  ;;  %10686 = vmatprep.subr.bf16.mxu1 %v14147_v12  ;;  %v70_v11 = vld [vmem:[%s19811_s1 + $0xb8] sm:$0xff]  ;;  %v12636_v12 = vcombine.low %v57_v63, %v61_v0  ;;  %v12645_v14 = vcombine.high %v65_v8, %v69_v9  ;;  %v12644_v21 = vcombine.low %v65_v8, %v69_v9 }
 0x2fc   :  { %v12647_v15 = vcombine.high %v66_v10, %v70_v11  ;;  %v12646_v22 = vcombine.low %v66_v10, %v70_v11  ;;  %v12701_v8 = vcombine.high %v121_v2, %v125_v3  ;;  %v129_v10 = vld [vmem:[%s19811_s1 + $0x290] sm:$0xff] }
 0x2fd   :  { %v133_v11 = vld [vmem:[%s19811_s1 + $0x2b0] sm:$0xff] }
 0x2fe   :  { %10128 = vmatpush1.bf16.msra.mxu0 %v14144_v17  ;;  %10687 = vmatpush1.bf16.msra.mxu1 %v14146_v18  ;;  %v77_v17 = vld [vmem:[%s19811_s1 + $0xf0] sm:$0xff]  ;;  %v14662_v18 = vld [vmem:[%s19812_s0 + $0x4] ss:$100 sps:$4 sm:$0xff]  }
 0x2ff   :  { %10129 = vmatprep.subr.bf16.mxu0 %v14153_v19  ;;  %10688 = vmatprep.subr.bf16.mxu1 %v14155_v20  ;;  %v74_v19 = vld [vmem:[%s19811_s1 + $0xd8] sm:$0xff]  ;;  %v12653_v23 = vcombine.high %v73_v16, %v77_v17  ;;  %v12652_v29 = vcombine.low %v73_v16, %v77_v17  ;;  %v12709_v16 = vcombine.high %v129_v10, %v133_v11 }
 0x300   :  { %v78_v20 = vld [vmem:[%s19811_s1 + $0xf8] sm:$0xff] }
 0x301   :  { %v12655_v24 = vcombine.high %v74_v19, %v78_v20  ;;  %v12654_v30 = vcombine.low %v74_v19, %v78_v20  ;;  %v141_v19 = vld [vmem:[%s19811_s1 + $0x2f0] sm:$0xff]  ;;  %v138_v20 = vld [vmem:[%s19811_s1 + $0x2d8] sm:$0xff] }
 0x302   :  { %10130 = vmatpush1.bf16.msra.mxu0 %v14152_v25  ;;  %10689 = vmatpush1.bf16.msra.mxu1 %v14154_v26  ;;  %v81_v25 = vld [vmem:[%s19811_s1 + $0x110] sm:$0xff] }
 0x303   :  { %10142 = vmatprep.subr.bf16.mxu0 %v14161_v27  ;;  %10701 = vmatprep.subr.bf16.mxu1 %v14163_v28  ;;  %v85_v26 = vld [vmem:[%s19811_s1 + $0x130] sm:$0xff]  ;;  %v82_v27 = vld [vmem:[%s19811_s1 + $0x118] sm:$0xff] }
 0x304   :  { %v86_v28 = vld [vmem:[%s19811_s1 + $0x138] sm:$0xff] }
 0x305   :  { %10132 = vmatmul.mubr.bf16.vlgmr.msra.gmra.mrb[0].mxu0 %v14596_v31  ;;  %10691 = vmatmul.mubr.bf16.vlgmr.msra.gmra.mrb[0].mxu1 %v14596_v31  ;;  %v12661_v31 = vcombine.high %v81_v25, %v85_v26  ;;  %v12663_v32 = vcombine.high %v82_v27, %v86_v28  ;;  %v12662_v38 = vcombine.low %v82_v27, %v86_v28  ;;  %v149_v27 = vld [vmem:[%s19811_s1 + $0x330] sm:$0xff]  ;;  %v146_v28 = vld [vmem:[%s19811_s1 + $0x318] sm:$0xff] }
 0x306   :  { %10143 = vmatpush1.bf16.msra.mxu0 %v14160_v34  ;;  %10702 = vmatpush1.bf16.msra.mxu1 %v14162_v35  ;;  %v93_v34 = vld [vmem:[%s19811_s1 + $0x170] sm:$0xff]  ;;  %v90_v35 = vld [vmem:[%s19811_s1 + $0x158] sm:$0xff] }
 0x307   :  { %10144 = vmatprep.subr.bf16.mxu0 %v14169_v36  ;;  %10703 = vmatprep.subr.bf16.mxu1 %v14171_v37  ;;  %v94_v36 = vld [vmem:[%s19811_s1 + $0x178] sm:$0xff]  ;;  %v12660_v37 = vcombine.low %v81_v25, %v85_v26  ;;  %v12669_v39 = vcombine.high %v89_v33, %v93_v34  ;;  %v145_v26 = vld [vmem:[%s19811_s1 + $0x310] sm:$0xff] }
 0x308   :  { %10174 = vmatprep.mubr.bf16.mxu0 %v14688_v48  ;;  %10733 = vmatprep.mubr.bf16.mxu1 %v14688_v48  ;;  %v12671_v40 = vcombine.high %v90_v35, %v94_v36  ;;  %v12670_v46 = vcombine.low %v90_v35, %v94_v36  ;;  %v157_v35 = vld [vmem:[%s19811_s1 + $0x370] sm:$0xff]  ;;  %v154_v36 = vld [vmem:[%s19811_s1 + $0x358] sm:$0xff] }
 0x30a   :  { %10145 = vmatpush1.bf16.msra.mxu0 %v14168_v42  ;;  %10704 = vmatpush1.bf16.msra.mxu1 %v14170_v43  ;;  %v101_v42 = vld [vmem:[%s19811_s1 + $0x1b0] sm:$0xff]  ;;  %v98_v43 = vld [vmem:[%s19811_s1 + $0x198] sm:$0xff] }
 0x30b   :  { %10146 = vmatprep.subr.bf16.mxu0 %v14177_v44  ;;  %10705 = vmatprep.subr.bf16.mxu1 %v14179_v45  ;;  %v102_v44 = vld [vmem:[%s19811_s1 + $0x1b8] sm:$0xff]  ;;  %v12668_v45 = vcombine.low %v89_v33, %v93_v34  ;;  %v12677_v47 = vcombine.high %v97_v41, %v101_v42  ;;  %v153_v34 = vld [vmem:[%s19811_s1 + $0x350] sm:$0xff] }
 0x30c   :  { %v12679_v49 = vcombine.high %v98_v43, %v102_v44  ;;  %v12678_v55 = vcombine.low %v98_v43, %v102_v44  ;;  %v165_v43 = vld [vmem:[%s19811_s1 + $0x3b0] sm:$0xff]  ;;  %v162_v44 = vld [vmem:[%s19811_s1 + $0x398] sm:$0xff] }
 0x30e   :  { %10147 = vmatpush1.bf16.msra.mxu0 %v14176_v51  ;;  %10706 = vmatpush1.bf16.msra.mxu1 %v14178_v52  ;;  %v109_v51 = vld [vmem:[%s19811_s1 + $0x1f0] sm:$0xff]  ;;  %v106_v52 = vld [vmem:[%s19811_s1 + $0x1d8] sm:$0xff] }
 0x30f   :  { %10148 = vmatprep.subr.bf16.mxu0 %v14185_v53  ;;  %10707 = vmatprep.subr.bf16.mxu1 %v14187_v54  ;;  %v110_v53 = vld [vmem:[%s19811_s1 + $0x1f8] sm:$0xff]  ;;  %v12676_v54 = vcombine.low %v97_v41, %v101_v42  ;;  %v12685_v56 = vcombine.high %v105_v50, %v109_v51  ;;  %v161_v42 = vld [vmem:[%s19811_s1 + $0x390] sm:$0xff] }
 0x310   :  { %v12687_v57 = vcombine.high %v106_v52, %v110_v53  ;;  %v12686_v63 = vcombine.low %v106_v52, %v110_v53  ;;  %v173_v52 = vld [vmem:[%s19811_s1 + $0x3f0] sm:$0xff]  ;;  %v170_v53 = vld [vmem:[%s19811_s1 + $0x3d8] sm:$0xff] }
 0x312   :  { %10149 = vmatpush1.bf16.msra.mxu0 %v14184_v59  ;;  %10708 = vmatpush1.bf16.msra.mxu1 %v14186_v60  ;;  %v117_v59 = vld [vmem:[%s19811_s1 + $0x230] sm:$0xff]  ;;  %v114_v60 = vld [vmem:[%s19811_s1 + $0x218] sm:$0xff] }
 0x313   :  { %10744 = vmatprep.subr.bf16.mxu0 %v12629_v61  ;;  %11303 = vmatprep.subr.bf16.mxu1 %v12631_v62  ;;  %v118_v61 = vld [vmem:[%s19811_s1 + $0x238] sm:$0xff]  ;;  %v12684_v62 = vcombine.low %v105_v50, %v109_v51  ;;  %v12693_v0 = vcombine.high %v113_v58, %v117_v59  ;;  %v169_v51 = vld [vmem:[%s19811_s1 + $0x3d0] sm:$0xff] }
 0x315   :  { %14192 = vmatmul.mubr.msk.bf16.vlgmr.msra.gmra.mrb[0].mxu0 %vm9622_vm0, %v14597_v1  ;;  %14193 = vmatmul.mubr.msk.bf16.vlgmr.msra.gmra.mrb[0].mxu1 %vm9622_vm0, %v14597_v1  ;;  %v12695_v1 = vcombine.high %v114_v60, %v118_v61 }
 0x316   :  { %10745 = vmatpush1.bf16.msra.mxu0 %v12628_v4  ;;  %11304 = vmatpush1.bf16.msra.mxu1 %v12630_v5  ;;  %v122_v4 = vld [vmem:[%s19811_s1 + $0x258] sm:$0xff] }
 0x317   :  { %10746 = vmatprep.subr.bf16.mxu0 %v12637_v6  ;;  %11305 = vmatprep.subr.bf16.mxu1 %v12639_v7  ;;  %v126_v5 = vld [vmem:[%s19811_s1 + $0x278] sm:$0xff]  ;;  %v12692_v6 = vcombine.low %v113_v58, %v117_v59  ;;  %v12694_v7 = vcombine.low %v114_v60, %v118_v61  ;;  %v177_v59 = vld [vmem:[%s19811_s1 + $0x410] sm:$0xff] }
 0x318   :  { %10776 = vmatprep.mubr.bf16.mxu0 %v14662_v18  ;;  %11335 = vmatprep.mubr.bf16.mxu1 %v14662_v18  ;;  %v12703_v9 = vcombine.high %v122_v4, %v126_v5  ;;  %v137_v18 = vld [vmem:[%s19811_s1 + $0x2d0] sm:$0xff]  ;;  %v178_v61 = vld [vmem:[%s19811_s1 + $0x418] sm:$0xff] }
 0x319   :  { %v181_v60 = vld [vmem:[%s19811_s1 + $0x430] sm:$0xff] }
 0x31a   :  { %10747 = vmatpush1.bf16.msra.mxu0 %v12636_v12  ;;  %11306 = vmatpush1.bf16.msra.mxu1 %v12638_v13  ;;  %v130_v12 = vld [vmem:[%s19811_s1 + $0x298] sm:$0xff] }
 0x31b   :  { %10748 = vmatprep.subr.bf16.mxu0 %v12645_v14  ;;  %11307 = vmatprep.subr.bf16.mxu1 %v12647_v15  ;;  %v134_v13 = vld [vmem:[%s19811_s1 + $0x2b8] sm:$0xff]  ;;  %v12700_v14 = vcombine.low %v121_v2, %v125_v3  ;;  %v12702_v15 = vcombine.low %v122_v4, %v126_v5  ;;  %v185_v3 = vld [vmem:[%s19811_s1 + $0x450] sm:$0xff] }
 0x31c   :  { %v12711_v17 = vcombine.high %v130_v12, %v134_v13  ;;  %v189_v4 = vld [vmem:[%s19811_s1 + $0x470] sm:$0xff]  ;;  %v186_v5 = vld [vmem:[%s19811_s1 + $0x458] sm:$0xff] }
 0x31e   :  { %10749 = vmatpush1.bf16.msra.mxu0 %v12644_v21  ;;  %11308 = vmatpush1.bf16.msra.mxu1 %v12646_v22  ;;  %v142_v21 = vld [vmem:[%s19811_s1 + $0x2f8] sm:$0xff]  ;;  %v12708_v22 = vcombine.low %v129_v10, %v133_v11  ;;  %v193_v11 = vld [vmem:[%s19811_s1 + $0x490] sm:$0xff] }
 0x31f   :  { %10750 = vmatprep.subr.bf16.mxu0 %v12653_v23  ;;  %11309 = vmatprep.subr.bf16.mxu1 %v12655_v24  ;;  %v12710_v23 = vcombine.low %v130_v12, %v134_v13  ;;  %v12717_v24 = vcombine.high %v137_v18, %v141_v19  ;;  %v12719_v25 = vcombine.high %v138_v20, %v142_v21  ;;  %v197_v12 = vld [vmem:[%s19811_s1 + $0x4b0] sm:$0xff]  ;;  %v14663_v13 = vld [vmem:[%s19812_s0] ss:$100 sps:$4 sm:$0xff]  }
 0x322   :  { %10751 = vmatpush1.bf16.msra.mxu0 %v12652_v29  ;;  %11310 = vmatpush1.bf16.msra.mxu1 %v12654_v30  ;;  %v150_v29 = vld [vmem:[%s19811_s1 + $0x338] sm:$0xff]  ;;  %v12716_v30 = vcombine.low %v137_v18, %v141_v19  ;;  %v12773_v18 = vcombine.high %v193_v11, %v197_v12 }
 0x323   :  { %10752 = vmatprep.subr.bf16.mxu0 %v12661_v31  ;;  %11311 = vmatprep.subr.bf16.mxu1 %v12663_v32  ;;  %v12718_v31 = vcombine.low %v138_v20, %v142_v21  ;;  %v12725_v32 = vcombine.high %v145_v26, %v149_v27  ;;  %v12727_v33 = vcombine.high %v146_v28, %v150_v29  ;;  %v201_v20 = vld [vmem:[%s19811_s1 + $0x4d0] sm:$0xff] }
 0x324   :  { %v205_v21 = vld [vmem:[%s19811_s1 + $0x4f0] sm:$0xff] }
 0x326   :  { %10753 = vmatpush1.bf16.msra.mxu0 %v12660_v37  ;;  %11312 = vmatpush1.bf16.msra.mxu1 %v12662_v38  ;;  %v158_v37 = vld [vmem:[%s19811_s1 + $0x378] sm:$0xff]  ;;  %v12724_v38 = vcombine.low %v145_v26, %v149_v27  ;;  %v12781_v27 = vcombine.high %v201_v20, %v205_v21 }
 0x327   :  { %10754 = vmatprep.subr.bf16.mxu0 %v12669_v39  ;;  %11313 = vmatprep.subr.bf16.mxu1 %v12671_v40  ;;  %v12726_v39 = vcombine.low %v146_v28, %v150_v29  ;;  %v12733_v40 = vcombine.high %v153_v34, %v157_v35  ;;  %v12735_v41 = vcombine.high %v154_v36, %v158_v37  ;;  %v209_v29 = vld [vmem:[%s19811_s1 + $0x510] sm:$0xff] }
 0x32a   :  { %10755 = vmatpush1.bf16.msra.mxu0 %v12668_v45  ;;  %11314 = vmatpush1.bf16.msra.mxu1 %v12670_v46  ;;  %v166_v45 = vld [vmem:[%s19811_s1 + $0x3b8] sm:$0xff]  ;;  %v12732_v46 = vcombine.low %v153_v34, %v157_v35 }
 0x32b   :  { %10756 = vmatprep.subr.bf16.mxu0 %v12677_v47  ;;  %11315 = vmatprep.subr.bf16.mxu1 %v12679_v49  ;;  %v12734_v47 = vcombine.low %v154_v36, %v158_v37  ;;  %v12741_v49 = vcombine.high %v161_v42, %v165_v43  ;;  %v12743_v50 = vcombine.high %v162_v44, %v166_v45  ;;  %v217_v37 = vld [vmem:[%s19811_s1 + $0x550] sm:$0xff] }
 0x32e   :  { %10757 = vmatpush1.bf16.msra.mxu0 %v12676_v54  ;;  %11316 = vmatpush1.bf16.msra.mxu1 %v12678_v55  ;;  %v174_v54 = vld [vmem:[%s19811_s1 + $0x3f8] sm:$0xff]  ;;  %v12740_v55 = vcombine.low %v161_v42, %v165_v43 }
 0x32f   :  { %10758 = vmatprep.subr.bf16.mxu0 %v12685_v56  ;;  %11317 = vmatprep.subr.bf16.mxu1 %v12687_v57  ;;  %v12742_v56 = vcombine.low %v162_v44, %v166_v45  ;;  %v12749_v57 = vcombine.high %v169_v51, %v173_v52  ;;  %v12751_v58 = vcombine.high %v170_v53, %v174_v54  ;;  %v225_v45 = vld [vmem:[%s19811_s1 + $0x590] sm:$0xff] }
 0x332   :  { %10759 = vmatpush1.bf16.msra.mxu0 %v12684_v62  ;;  %11318 = vmatpush1.bf16.msra.mxu1 %v12686_v63  ;;  %v182_v62 = vld [vmem:[%s19811_s1 + $0x438] sm:$0xff]  ;;  %v12748_v63 = vcombine.low %v169_v51, %v173_v52 }
 0x333   :  { %10760 = vmatprep.subr.bf16.mxu0 %v12693_v0  ;;  %11319 = vmatprep.subr.bf16.mxu1 %v12695_v1  ;;  %v12750_v0 = vcombine.low %v170_v53, %v174_v54  ;;  %v12757_v1 = vcombine.high %v177_v59, %v181_v60  ;;  %v12759_v2 = vcombine.high %v178_v61, %v182_v62  ;;  %v233_v54 = vld [vmem:[%s19811_s1 + $0x5d0] sm:$0xff] }
 0x336   :  { %10761 = vmatpush1.bf16.msra.mxu0 %v12692_v6  ;;  %11320 = vmatpush1.bf16.msra.mxu1 %v12694_v7  ;;  %v190_v6 = vld [vmem:[%s19811_s1 + $0x478] sm:$0xff]  ;;  %v12756_v7 = vcombine.low %v177_v59, %v181_v60 }
 0x337   :  { %10762 = vmatprep.subr.bf16.mxu0 %v12701_v8  ;;  %11321 = vmatprep.subr.bf16.mxu1 %v12703_v9  ;;  %v12758_v8 = vcombine.low %v178_v61, %v182_v62  ;;  %v12765_v9 = vcombine.high %v185_v3, %v189_v4  ;;  %v12767_v10 = vcombine.high %v186_v5, %v190_v6  ;;  %v241_v62 = vld [vmem:[%s19811_s1 + $0x610] sm:$0xff] }
 0x33a   :  { %10763 = vmatpush1.bf16.msra.mxu0 %v12700_v14  ;;  %11322 = vmatpush1.bf16.msra.mxu1 %v12702_v15  ;;  %v194_v14 = vld [vmem:[%s19811_s1 + $0x498] sm:$0xff] }
 0x33b   :  { %10764 = vmatprep.subr.bf16.mxu0 %v12709_v16  ;;  %11323 = vmatprep.subr.bf16.mxu1 %v12711_v17  ;;  %v198_v15 = vld [vmem:[%s19811_s1 + $0x4b8] sm:$0xff]  ;;  %v12764_v16 = vcombine.low %v185_v3, %v189_v4  ;;  %v12766_v17 = vcombine.low %v186_v5, %v190_v6  ;;  %v249_v6 = vld [vmem:[%s19811_s1 + $0x650] sm:$0xff] }
 0x33c   :  { %v12775_v19 = vcombine.high %v194_v14, %v198_v15  ;;  %v12774_v26 = vcombine.low %v194_v14, %v198_v15  ;;  %v257_v14 = vld [vmem:[%s19811_s1 + $0x690] sm:$0xff] }
 0x33d   :  { %v261_v15 = vld [vmem:[%s19811_s1 + $0x6b0] sm:$0xff] }
 0x33e   :  { %10765 = vmatpush1.bf16.msra.mxu0 %v12708_v22  ;;  %11324 = vmatpush1.bf16.msra.mxu1 %v12710_v23  ;;  %v14664_v22 = vld [vmem:[%s19812_s0 + $0xc] ss:$100 sps:$4 sm:$0xff]   ;;  %v202_v23 = vld [vmem:[%s19811_s1 + $0x4d8] sm:$0xff] }
 0x33f   :  { %10766 = vmatprep.subr.bf16.mxu0 %v12717_v24  ;;  %11325 = vmatprep.subr.bf16.mxu1 %v12719_v25  ;;  %v206_v24 = vld [vmem:[%s19811_s1 + $0x4f8] sm:$0xff]  ;;  %v12772_v25 = vcombine.low %v193_v11, %v197_v12 }
 0x340   :  { %v12783_v28 = vcombine.high %v202_v23, %v206_v24  ;;  %v12782_v34 = vcombine.low %v202_v23, %v206_v24  ;;  %v269_v23 = vld [vmem:[%s19811_s1 + $0x6f0] sm:$0xff]  ;;  %v266_v24 = vld [vmem:[%s19811_s1 + $0x6d8] sm:$0xff] }
 0x342   :  { %10767 = vmatpush1.bf16.msra.mxu0 %v12716_v30  ;;  %11326 = vmatpush1.bf16.msra.mxu1 %v12718_v31  ;;  %v213_v30 = vld [vmem:[%s19811_s1 + $0x530] sm:$0xff]  ;;  %v210_v31 = vld [vmem:[%s19811_s1 + $0x518] sm:$0xff] }
 0x343   :  { %10768 = vmatprep.subr.bf16.mxu0 %v12725_v32  ;;  %11327 = vmatprep.subr.bf16.mxu1 %v12727_v33  ;;  %v214_v32 = vld [vmem:[%s19811_s1 + $0x538] sm:$0xff]  ;;  %v12780_v33 = vcombine.low %v201_v20, %v205_v21  ;;  %v12789_v35 = vcombine.high %v209_v29, %v213_v30  ;;  %v12837_v20 = vcombine.high %v257_v14, %v261_v15 }
 0x344   :  { %v12791_v36 = vcombine.high %v210_v31, %v214_v32  ;;  %v12790_v42 = vcombine.low %v210_v31, %v214_v32  ;;  %v277_v31 = vld [vmem:[%s19811_s1 + $0x730] sm:$0xff]  ;;  %v274_v32 = vld [vmem:[%s19811_s1 + $0x718] sm:$0xff] }
 0x346   :  { %10769 = vmatpush1.bf16.msra.mxu0 %v12724_v38  ;;  %11328 = vmatpush1.bf16.msra.mxu1 %v12726_v39  ;;  %v221_v38 = vld [vmem:[%s19811_s1 + $0x570] sm:$0xff]  ;;  %v218_v39 = vld [vmem:[%s19811_s1 + $0x558] sm:$0xff] }
 0x347   :  { %10770 = vmatprep.subr.bf16.mxu0 %v12733_v40  ;;  %11329 = vmatprep.subr.bf16.mxu1 %v12735_v41  ;;  %v222_v40 = vld [vmem:[%s19811_s1 + $0x578] sm:$0xff]  ;;  %v12788_v41 = vcombine.low %v209_v29, %v213_v30  ;;  %v12797_v43 = vcombine.high %v217_v37, %v221_v38  ;;  %v273_v30 = vld [vmem:[%s19811_s1 + $0x710] sm:$0xff] }
 0x348   :  { %v12799_v44 = vcombine.high %v218_v39, %v222_v40  ;;  %v12798_v51 = vcombine.low %v218_v39, %v222_v40  ;;  %v285_v39 = vld [vmem:[%s19811_s1 + $0x770] sm:$0xff]  ;;  %v282_v40 = vld [vmem:[%s19811_s1 + $0x758] sm:$0xff] }
 0x34a   :  { %10771 = vmatpush1.bf16.msra.mxu0 %v12732_v46  ;;  %11330 = vmatpush1.bf16.msra.mxu1 %v12734_v47  ;;  %v229_v46 = vld [vmem:[%s19811_s1 + $0x5b0] sm:$0xff]  ;;  %v226_v47 = vld [vmem:[%s19811_s1 + $0x598] sm:$0xff] }
 0x34b   :  { %10772 = vmatprep.subr.bf16.mxu0 %v12741_v49  ;;  %11331 = vmatprep.subr.bf16.mxu1 %v12743_v50  ;;  %v230_v49 = vld [vmem:[%s19811_s1 + $0x5b8] sm:$0xff]  ;;  %v12796_v50 = vcombine.low %v217_v37, %v221_v38  ;;  %v12805_v52 = vcombine.high %v225_v45, %v229_v46  ;;  %v281_v38 = vld [vmem:[%s19811_s1 + $0x750] sm:$0xff] }
 0x34c   :  { %v12807_v53 = vcombine.high %v226_v47, %v230_v49  ;;  %v12806_v59 = vcombine.low %v226_v47, %v230_v49  ;;  %v293_v47 = vld [vmem:[%s19811_s1 + $0x7b0] sm:$0xff]  ;;  %v290_v49 = vld [vmem:[%s19811_s1 + $0x798] sm:$0xff] }
 0x34e   :  { %10773 = vmatpush1.bf16.msra.mxu0 %v12740_v55  ;;  %11332 = vmatpush1.bf16.msra.mxu1 %v12742_v56  ;;  %v237_v55 = vld [vmem:[%s19811_s1 + $0x5f0] sm:$0xff]  ;;  %v234_v56 = vld [vmem:[%s19811_s1 + $0x5d8] sm:$0xff] }
 0x34f   :  { %10774 = vmatprep.subr.bf16.mxu0 %v12749_v57  ;;  %11333 = vmatprep.subr.bf16.mxu1 %v12751_v58  ;;  %v238_v57 = vld [vmem:[%s19811_s1 + $0x5f8] sm:$0xff]  ;;  %v12804_v58 = vcombine.low %v225_v45, %v229_v46  ;;  %v12813_v60 = vcombine.high %v233_v54, %v237_v55  ;;  %v289_v46 = vld [vmem:[%s19811_s1 + $0x790] sm:$0xff] }
 0x350   :  { %v12815_v61 = vcombine.high %v234_v56, %v238_v57  ;;  %v12814_v3 = vcombine.low %v234_v56, %v238_v57  ;;  %v301_v56 = vld [vmem:[%s19811_s1 + $0x7f0] sm:$0xff]  ;;  %v298_v57 = vld [vmem:[%s19811_s1 + $0x7d8] sm:$0xff] }
 0x352   :  { %10775 = vmatpush1.bf16.msra.mxu0 %v12748_v63  ;;  %11334 = vmatpush1.bf16.msra.mxu1 %v12750_v0  ;;  %v245_v63 = vld [vmem:[%s19811_s1 + $0x630] sm:$0xff]  ;;  %v242_v0 = vld [vmem:[%s19811_s1 + $0x618] sm:$0xff] }
 0x353   :  { %10787 = vmatprep.subr.bf16.mxu0 %v12757_v1  ;;  %11346 = vmatprep.subr.bf16.mxu1 %v12759_v2  ;;  %v246_v1 = vld [vmem:[%s19811_s1 + $0x638] sm:$0xff]  ;;  %v12812_v2 = vcombine.low %v233_v54, %v237_v55  ;;  %v12821_v4 = vcombine.high %v241_v62, %v245_v63  ;;  %v297_v55 = vld [vmem:[%s19811_s1 + $0x7d0] sm:$0xff] }
 0x354   :  { %v12823_v5 = vcombine.high %v242_v0, %v246_v1  ;;  %v12822_v11 = vcombine.low %v242_v0, %v246_v1  ;;  %v309_v0 = vld [vmem:[%s19811_s1 + $0x830] sm:$0xff]  ;;  %v306_v1 = vld [vmem:[%s19811_s1 + $0x818] sm:$0xff] }
 0x355   :  { %10777 = vmatmul.mubr.bf16.vlgmr.msra.gmra.mrb[4].mxu0 %v14663_v13  ;;  %11336 = vmatmul.mubr.bf16.vlgmr.msra.gmra.mrb[4].mxu1 %v14663_v13 }
 0x356   :  { %10788 = vmatpush1.bf16.msra.mxu0 %v12756_v7  ;;  %11347 = vmatpush1.bf16.msra.mxu1 %v12758_v8  ;;  %v253_v7 = vld [vmem:[%s19811_s1 + $0x670] sm:$0xff]  ;;  %v250_v8 = vld [vmem:[%s19811_s1 + $0x658] sm:$0xff] }
 0x357   :  { %10789 = vmatprep.subr.bf16.mxu0 %v12765_v9  ;;  %11348 = vmatprep.subr.bf16.mxu1 %v12767_v10  ;;  %v254_v9 = vld [vmem:[%s19811_s1 + $0x678] sm:$0xff]  ;;  %v12820_v10 = vcombine.low %v241_v62, %v245_v63  ;;  %v12829_v12 = vcombine.high %v249_v6, %v253_v7  ;;  %v305_v63 = vld [vmem:[%s19811_s1 + $0x810] sm:$0xff] }
 0x358   :  { %10819 = vmatprep.mubr.bf16.mxu0 %v14664_v22  ;;  %11378 = vmatprep.mubr.bf16.mxu1 %v14664_v22  ;;  %v12831_v13 = vcombine.high %v250_v8, %v254_v9  ;;  %v265_v22 = vld [vmem:[%s19811_s1 + $0x6d0] sm:$0xff] }
 0x35a   :  { %10790 = vmatpush1.bf16.msra.mxu0 %v12764_v16  ;;  %11349 = vmatpush1.bf16.msra.mxu1 %v12766_v17  ;;  %v258_v16 = vld [vmem:[%s19811_s1 + $0x698] sm:$0xff] }
 0x35b   :  { %10791 = vmatprep.subr.bf16.mxu0 %v12773_v18  ;;  %11350 = vmatprep.subr.bf16.mxu1 %v12775_v19  ;;  %v262_v17 = vld [vmem:[%s19811_s1 + $0x6b8] sm:$0xff]  ;;  %v12828_v18 = vcombine.low %v249_v6, %v253_v7  ;;  %v12830_v19 = vcombine.low %v250_v8, %v254_v9  ;;  %v313_v7 = vld [vmem:[%s19811_s1 + $0x850] sm:$0xff] }
 0x35c   :  { %v12839_v21 = vcombine.high %v258_v16, %v262_v17  ;;  %v317_v8 = vld [vmem:[%s19811_s1 + $0x870] sm:$0xff]  ;;  %v314_v9 = vld [vmem:[%s19811_s1 + $0x858] sm:$0xff] }
 0x35e   :  { %10792 = vmatpush1.bf16.msra.mxu0 %v12772_v25  ;;  %11351 = vmatpush1.bf16.msra.mxu1 %v12774_v26  ;;  %v270_v25 = vld [vmem:[%s19811_s1 + $0x6f8] sm:$0xff]  ;;  %v12836_v26 = vcombine.low %v257_v14, %v261_v15  ;;  %v321_v15 = vld [vmem:[%s19811_s1 + $0x890] sm:$0xff] }
 0x35f   :  { %10793 = vmatprep.subr.bf16.mxu0 %v12781_v27  ;;  %11352 = vmatprep.subr.bf16.mxu1 %v12783_v28  ;;  %v12838_v27 = vcombine.low %v258_v16, %v262_v17  ;;  %v12845_v28 = vcombine.high %v265_v22, %v269_v23  ;;  %v12847_v29 = vcombine.high %v266_v24, %v270_v25  ;;  %v325_v16 = vld [vmem:[%s19811_s1 + $0x8b0] sm:$0xff]  ;;  %v14665_v17 = vld [vmem:[%s19812_s0 + $0x8] ss:$100 sps:$4 sm:$0xff]  }
 0x362   :  { %10794 = vmatpush1.bf16.msra.mxu0 %v12780_v33  ;;  %11353 = vmatpush1.bf16.msra.mxu1 %v12782_v34  ;;  %v278_v33 = vld [vmem:[%s19811_s1 + $0x738] sm:$0xff]  ;;  %v12844_v34 = vcombine.low %v265_v22, %v269_v23  ;;  %v12901_v22 = vcombine.high %v321_v15, %v325_v16 }
 0x363   :  { %10795 = vmatprep.subr.bf16.mxu0 %v12789_v35  ;;  %11354 = vmatprep.subr.bf16.mxu1 %v12791_v36  ;;  %v12846_v35 = vcombine.low %v266_v24, %v270_v25  ;;  %v12853_v36 = vcombine.high %v273_v30, %v277_v31  ;;  %v12855_v37 = vcombine.high %v274_v32, %v278_v33  ;;  %v329_v24 = vld [vmem:[%s19811_s1 + $0x8d0] sm:$0xff] }
 0x364   :  { %v333_v25 = vld [vmem:[%s19811_s1 + $0x8f0] sm:$0xff] }
 0x366   :  { %10796 = vmatpush1.bf16.msra.mxu0 %v12788_v41  ;;  %11355 = vmatpush1.bf16.msra.mxu1 %v12790_v42  ;;  %v286_v41 = vld [vmem:[%s19811_s1 + $0x778] sm:$0xff]  ;;  %v12852_v42 = vcombine.low %v273_v30, %v277_v31  ;;  %v12909_v31 = vcombine.high %v329_v24, %v333_v25 }
 0x367   :  { %10797 = vmatprep.subr.bf16.mxu0 %v12797_v43  ;;  %11356 = vmatprep.subr.bf16.mxu1 %v12799_v44  ;;  %v12854_v43 = vcombine.low %v274_v32, %v278_v33  ;;  %v12861_v44 = vcombine.high %v281_v38, %v285_v39  ;;  %v12863_v45 = vcombine.high %v282_v40, %v286_v41  ;;  %v337_v33 = vld [vmem:[%s19811_s1 + $0x910] sm:$0xff] }
 0x36a   :  { %10798 = vmatpush1.bf16.msra.mxu0 %v12796_v50  ;;  %11357 = vmatpush1.bf16.msra.mxu1 %v12798_v51  ;;  %v294_v50 = vld [vmem:[%s19811_s1 + $0x7b8] sm:$0xff]  ;;  %v12860_v51 = vcombine.low %v281_v38, %v285_v39 }
 0x36b   :  { %10799 = vmatprep.subr.bf16.mxu0 %v12805_v52  ;;  %11358 = vmatprep.subr.bf16.mxu1 %v12807_v53  ;;  %v12862_v52 = vcombine.low %v282_v40, %v286_v41  ;;  %v12869_v53 = vcombine.high %v289_v46, %v293_v47  ;;  %v12871_v54 = vcombine.high %v290_v49, %v294_v50  ;;  %v345_v41 = vld [vmem:[%s19811_s1 + $0x950] sm:$0xff] }
 0x36e   :  { %10800 = vmatpush1.bf16.msra.mxu0 %v12804_v58  ;;  %11359 = vmatpush1.bf16.msra.mxu1 %v12806_v59  ;;  %v302_v58 = vld [vmem:[%s19811_s1 + $0x7f8] sm:$0xff]  ;;  %v12868_v59 = vcombine.low %v289_v46, %v293_v47 }
 0x36f   :  { %10801 = vmatprep.subr.bf16.mxu0 %v12813_v60  ;;  %11360 = vmatprep.subr.bf16.mxu1 %v12815_v61  ;;  %v12870_v60 = vcombine.low %v290_v49, %v294_v50  ;;  %v12877_v61 = vcombine.high %v297_v55, %v301_v56  ;;  %v12879_v62 = vcombine.high %v298_v57, %v302_v58  ;;  %v353_v50 = vld [vmem:[%s19811_s1 + $0x990] sm:$0xff] }
 0x372   :  { %10802 = vmatpush1.bf16.msra.mxu0 %v12812_v2  ;;  %11361 = vmatpush1.bf16.msra.mxu1 %v12814_v3  ;;  %v310_v2 = vld [vmem:[%s19811_s1 + $0x838] sm:$0xff]  ;;  %v12876_v3 = vcombine.low %v297_v55, %v301_v56 }
 0x373   :  { %10803 = vmatprep.subr.bf16.mxu0 %v12821_v4  ;;  %11362 = vmatprep.subr.bf16.mxu1 %v12823_v5  ;;  %v12878_v4 = vcombine.low %v298_v57, %v302_v58  ;;  %v12885_v5 = vcombine.high %v305_v63, %v309_v0  ;;  %v12887_v6 = vcombine.high %v306_v1, %v310_v2  ;;  %v361_v58 = vld [vmem:[%s19811_s1 + $0x9d0] sm:$0xff] }
 0x376   :  { %10804 = vmatpush1.bf16.msra.mxu0 %v12820_v10  ;;  %11363 = vmatpush1.bf16.msra.mxu1 %v12822_v11  ;;  %v318_v10 = vld [vmem:[%s19811_s1 + $0x878] sm:$0xff]  ;;  %v12884_v11 = vcombine.low %v305_v63, %v309_v0 }
 0x377   :  { %10805 = vmatprep.subr.bf16.mxu0 %v12829_v12  ;;  %11364 = vmatprep.subr.bf16.mxu1 %v12831_v13  ;;  %v12886_v12 = vcombine.low %v306_v1, %v310_v2  ;;  %v12893_v13 = vcombine.high %v313_v7, %v317_v8  ;;  %v12895_v14 = vcombine.high %v314_v9, %v318_v10  ;;  %v369_v2 = vld [vmem:[%s19811_s1 + $0xa10] sm:$0xff] }
 0x37a   :  { %10806 = vmatpush1.bf16.msra.mxu0 %v12828_v18  ;;  %11365 = vmatpush1.bf16.msra.mxu1 %v12830_v19  ;;  %v322_v18 = vld [vmem:[%s19811_s1 + $0x898] sm:$0xff] }
 0x37b   :  { %10807 = vmatprep.subr.bf16.mxu0 %v12837_v20  ;;  %11366 = vmatprep.subr.bf16.mxu1 %v12839_v21  ;;  %v326_v19 = vld [vmem:[%s19811_s1 + $0x8b8] sm:$0xff]  ;;  %v12892_v20 = vcombine.low %v313_v7, %v317_v8  ;;  %v12894_v21 = vcombine.low %v314_v9, %v318_v10  ;;  %v377_v10 = vld [vmem:[%s19811_s1 + $0xa50] sm:$0xff] }
 0x37c   :  { %v12903_v23 = vcombine.high %v322_v18, %v326_v19  ;;  %v12902_v30 = vcombine.low %v322_v18, %v326_v19  ;;  %v385_v18 = vld [vmem:[%s19811_s1 + $0xa90] sm:$0xff] }
 0x37d   :  { %v389_v19 = vld [vmem:[%s19811_s1 + $0xab0] sm:$0xff] }
 0x37e   :  { %10808 = vmatpush1.bf16.msra.mxu0 %v12836_v26  ;;  %11367 = vmatpush1.bf16.msra.mxu1 %v12838_v27  ;;  %v14666_v26 = vld [vmem:[%s19812_s0 + $0x14] ss:$100 sps:$4 sm:$0xff]  }
 0x37f   :  { %10809 = vmatprep.subr.bf16.mxu0 %v12845_v28  ;;  %11368 = vmatprep.subr.bf16.mxu1 %v12847_v29  ;;  %v330_v27 = vld [vmem:[%s19811_s1 + $0x8d8] sm:$0xff]  ;;  %v12900_v29 = vcombine.low %v321_v15, %v325_v16 }
 0x380   :  { %v334_v28 = vld [vmem:[%s19811_s1 + $0x8f8] sm:$0xff] }
 0x381   :  { %v12911_v32 = vcombine.high %v330_v27, %v334_v28  ;;  %v12910_v38 = vcombine.low %v330_v27, %v334_v28  ;;  %v397_v27 = vld [vmem:[%s19811_s1 + $0xaf0] sm:$0xff]  ;;  %v394_v28 = vld [vmem:[%s19811_s1 + $0xad8] sm:$0xff] }
 0x382   :  { %10810 = vmatpush1.bf16.msra.mxu0 %v12844_v34  ;;  %11369 = vmatpush1.bf16.msra.mxu1 %v12846_v35  ;;  %v341_v34 = vld [vmem:[%s19811_s1 + $0x930] sm:$0xff]  ;;  %v338_v35 = vld [vmem:[%s19811_s1 + $0x918] sm:$0xff] }
 0x383   :  { %10811 = vmatprep.subr.bf16.mxu0 %v12853_v36  ;;  %11370 = vmatprep.subr.bf16.mxu1 %v12855_v37  ;;  %v342_v36 = vld [vmem:[%s19811_s1 + $0x938] sm:$0xff]  ;;  %v12908_v37 = vcombine.low %v329_v24, %v333_v25  ;;  %v12917_v39 = vcombine.high %v337_v33, %v341_v34  ;;  %v12965_v24 = vcombine.high %v385_v18, %v389_v19 }
 0x384   :  { %v12919_v40 = vcombine.high %v338_v35, %v342_v36  ;;  %v12918_v46 = vcombine.low %v338_v35, %v342_v36  ;;  %v405_v35 = vld [vmem:[%s19811_s1 + $0xb30] sm:$0xff]  ;;  %v402_v36 = vld [vmem:[%s19811_s1 + $0xb18] sm:$0xff] }
 0x386   :  { %10812 = vmatpush1.bf16.msra.mxu0 %v12852_v42  ;;  %11371 = vmatpush1.bf16.msra.mxu1 %v12854_v43  ;;  %v349_v42 = vld [vmem:[%s19811_s1 + $0x970] sm:$0xff]  ;;  %v346_v43 = vld [vmem:[%s19811_s1 + $0x958] sm:$0xff] }
 0x387   :  { %10813 = vmatprep.subr.bf16.mxu0 %v12861_v44  ;;  %11372 = vmatprep.subr.bf16.mxu1 %v12863_v45  ;;  %v350_v44 = vld [vmem:[%s19811_s1 + $0x978] sm:$0xff]  ;;  %v12916_v45 = vcombine.low %v337_v33, %v341_v34  ;;  %v12925_v47 = vcombine.high %v345_v41, %v349_v42  ;;  %v401_v34 = vld [vmem:[%s19811_s1 + $0xb10] sm:$0xff] }
 0x388   :  { %v12927_v49 = vcombine.high %v346_v43, %v350_v44  ;;  %v12926_v55 = vcombine.low %v346_v43, %v350_v44  ;;  %v413_v43 = vld [vmem:[%s19811_s1 + $0xb70] sm:$0xff]  ;;  %v410_v44 = vld [vmem:[%s19811_s1 + $0xb58] sm:$0xff] }
 0x38a   :  { %10814 = vmatpush1.bf16.msra.mxu0 %v12860_v51  ;;  %11373 = vmatpush1.bf16.msra.mxu1 %v12862_v52  ;;  %v357_v51 = vld [vmem:[%s19811_s1 + $0x9b0] sm:$0xff]  ;;  %v354_v52 = vld [vmem:[%s19811_s1 + $0x998] sm:$0xff] }
 0x38b   :  { %10815 = vmatprep.subr.bf16.mxu0 %v12869_v53  ;;  %11374 = vmatprep.subr.bf16.mxu1 %v12871_v54  ;;  %v358_v53 = vld [vmem:[%s19811_s1 + $0x9b8] sm:$0xff]  ;;  %v12924_v54 = vcombine.low %v345_v41, %v349_v42  ;;  %v12933_v56 = vcombine.high %v353_v50, %v357_v51  ;;  %v409_v42 = vld [vmem:[%s19811_s1 + $0xb50] sm:$0xff] }
 0x38c   :  { %v12935_v57 = vcombine.high %v354_v52, %v358_v53  ;;  %v12934_v63 = vcombine.low %v354_v52, %v358_v53  ;;  %v421_v52 = vld [vmem:[%s19811_s1 + $0xbb0] sm:$0xff]  ;;  %v418_v53 = vld [vmem:[%s19811_s1 + $0xb98] sm:$0xff] }
 0x38e   :  { %10816 = vmatpush1.bf16.msra.mxu0 %v12868_v59  ;;  %11375 = vmatpush1.bf16.msra.mxu1 %v12870_v60  ;;  %v365_v59 = vld [vmem:[%s19811_s1 + $0x9f0] sm:$0xff]  ;;  %v362_v60 = vld [vmem:[%s19811_s1 + $0x9d8] sm:$0xff] }
 0x38f   :  { %10817 = vmatprep.subr.bf16.mxu0 %v12877_v61  ;;  %11376 = vmatprep.subr.bf16.mxu1 %v12879_v62  ;;  %v366_v61 = vld [vmem:[%s19811_s1 + $0x9f8] sm:$0xff]  ;;  %v12932_v62 = vcombine.low %v353_v50, %v357_v51  ;;  %v12941_v0 = vcombine.high %v361_v58, %v365_v59  ;;  %v417_v51 = vld [vmem:[%s19811_s1 + $0xb90] sm:$0xff] }
 0x390   :  { %v12943_v1 = vcombine.high %v362_v60, %v366_v61  ;;  %v12942_v7 = vcombine.low %v362_v60, %v366_v61  ;;  %v429_v60 = vld [vmem:[%s19811_s1 + $0xbf0] sm:$0xff]  ;;  %v426_v61 = vld [vmem:[%s19811_s1 + $0xbd8] sm:$0xff] }
 0x392   :  { %10818 = vmatpush1.bf16.msra.mxu0 %v12876_v3  ;;  %11377 = vmatpush1.bf16.msra.mxu1 %v12878_v4  ;;  %v373_v3 = vld [vmem:[%s19811_s1 + $0xa30] sm:$0xff]  ;;  %v370_v4 = vld [vmem:[%s19811_s1 + $0xa18] sm:$0xff] }
 0x393   :  { %10830 = vmatprep.subr.bf16.mxu0 %v12885_v5  ;;  %11389 = vmatprep.subr.bf16.mxu1 %v12887_v6  ;;  %v374_v5 = vld [vmem:[%s19811_s1 + $0xa38] sm:$0xff]  ;;  %v12940_v6 = vcombine.low %v361_v58, %v365_v59  ;;  %v12949_v8 = vcombine.high %v369_v2, %v373_v3  ;;  %v425_v59 = vld [vmem:[%s19811_s1 + $0xbd0] sm:$0xff] }
 0x394   :  { %v12951_v9 = vcombine.high %v370_v4, %v374_v5  ;;  %v12950_v15 = vcombine.low %v370_v4, %v374_v5  ;;  %v437_v4 = vld [vmem:[%s19811_s1 + $0xc30] sm:$0xff]  ;;  %v434_v5 = vld [vmem:[%s19811_s1 + $0xc18] sm:$0xff] }
 0x395   :  { %10820 = vmatmul.mubr.bf16.vlgmr.msra.gmra.mrb[4].mxu0 %v14665_v17  ;;  %11379 = vmatmul.mubr.bf16.vlgmr.msra.gmra.mrb[4].mxu1 %v14665_v17 }
 0x396   :  { %10831 = vmatpush1.bf16.msra.mxu0 %v12884_v11  ;;  %11390 = vmatpush1.bf16.msra.mxu1 %v12886_v12  ;;  %v381_v11 = vld [vmem:[%s19811_s1 + $0xa70] sm:$0xff]  ;;  %v378_v12 = vld [vmem:[%s19811_s1 + $0xa58] sm:$0xff] }
 0x397   :  { %10832 = vmatprep.subr.bf16.mxu0 %v12893_v13  ;;  %11391 = vmatprep.subr.bf16.mxu1 %v12895_v14  ;;  %v382_v13 = vld [vmem:[%s19811_s1 + $0xa78] sm:$0xff]  ;;  %v12948_v14 = vcombine.low %v369_v2, %v373_v3  ;;  %v12957_v16 = vcombine.high %v377_v10, %v381_v11  ;;  %v433_v3 = vld [vmem:[%s19811_s1 + $0xc10] sm:$0xff] }
 0x398   :  { %10862 = vmatprep.mubr.bf16.mxu0 %v14666_v26  ;;  %11421 = vmatprep.mubr.bf16.mxu1 %v14666_v26  ;;  %v12959_v17 = vcombine.high %v378_v12, %v382_v13  ;;  %v393_v26 = vld [vmem:[%s19811_s1 + $0xad0] sm:$0xff] }
 0x39a   :  { %10833 = vmatpush1.bf16.msra.mxu0 %v12892_v20  ;;  %11392 = vmatpush1.bf16.msra.mxu1 %v12894_v21  ;;  %v386_v20 = vld [vmem:[%s19811_s1 + $0xa98] sm:$0xff] }
 0x39b   :  { %10834 = vmatprep.subr.bf16.mxu0 %v12901_v22  ;;  %11393 = vmatprep.subr.bf16.mxu1 %v12903_v23  ;;  %v390_v21 = vld [vmem:[%s19811_s1 + $0xab8] sm:$0xff]  ;;  %v12956_v22 = vcombine.low %v377_v10, %v381_v11  ;;  %v12958_v23 = vcombine.low %v378_v12, %v382_v13  ;;  %v441_v11 = vld [vmem:[%s19811_s1 + $0xc50] sm:$0xff] }
 0x39c   :  { %v12967_v25 = vcombine.high %v386_v20, %v390_v21  ;;  %v445_v12 = vld [vmem:[%s19811_s1 + $0xc70] sm:$0xff]  ;;  %v442_v13 = vld [vmem:[%s19811_s1 + $0xc58] sm:$0xff] }
 0x39e   :  { %10835 = vmatpush1.bf16.msra.mxu0 %v12900_v29  ;;  %11394 = vmatpush1.bf16.msra.mxu1 %v12902_v30  ;;  %v398_v29 = vld [vmem:[%s19811_s1 + $0xaf8] sm:$0xff]  ;;  %v12964_v30 = vcombine.low %v385_v18, %v389_v19  ;;  %v449_v19 = vld [vmem:[%s19811_s1 + $0xc90] sm:$0xff] }
 0x39f   :  { %10836 = vmatprep.subr.bf16.mxu0 %v12909_v31  ;;  %11395 = vmatprep.subr.bf16.mxu1 %v12911_v32  ;;  %v12966_v31 = vcombine.low %v386_v20, %v390_v21  ;;  %v12973_v32 = vcombine.high %v393_v26, %v397_v27  ;;  %v12975_v33 = vcombine.high %v394_v28, %v398_v29  ;;  %v453_v20 = vld [vmem:[%s19811_s1 + $0xcb0] sm:$0xff] }
 0x3a0   :  { %v14667_v21 = vld [vmem:[%s19812_s0 + $0x10] ss:$100 sps:$4 sm:$0xff]  }
 0x3a2   :  { %10837 = vmatpush1.bf16.msra.mxu0 %v12908_v37  ;;  %11396 = vmatpush1.bf16.msra.mxu1 %v12910_v38  ;;  %v406_v37 = vld [vmem:[%s19811_s1 + $0xb38] sm:$0xff]  ;;  %v12972_v38 = vcombine.low %v393_v26, %v397_v27  ;;  %v13029_v26 = vcombine.high %v449_v19, %v453_v20 }
 0x3a3   :  { %10838 = vmatprep.subr.bf16.mxu0 %v12917_v39  ;;  %11397 = vmatprep.subr.bf16.mxu1 %v12919_v40  ;;  %v12974_v39 = vcombine.low %v394_v28, %v398_v29  ;;  %v12981_v40 = vcombine.high %v401_v34, %v405_v35  ;;  %v12983_v41 = vcombine.high %v402_v36, %v406_v37  ;;  %v457_v28 = vld [vmem:[%s19811_s1 + $0xcd0] sm:$0xff] }
 0x3a4   :  { %v461_v29 = vld [vmem:[%s19811_s1 + $0xcf0] sm:$0xff] }
 0x3a6   :  { %10839 = vmatpush1.bf16.msra.mxu0 %v12916_v45  ;;  %11398 = vmatpush1.bf16.msra.mxu1 %v12918_v46  ;;  %v414_v45 = vld [vmem:[%s19811_s1 + $0xb78] sm:$0xff]  ;;  %v12980_v46 = vcombine.low %v401_v34, %v405_v35  ;;  %v13028_v34 = vcombine.low %v449_v19, %v453_v20 }
 0x3a7   :  { %10840 = vmatprep.subr.bf16.mxu0 %v12925_v47  ;;  %11399 = vmatprep.subr.bf16.mxu1 %v12927_v49  ;;  %v12982_v47 = vcombine.low %v402_v36, %v406_v37  ;;  %v12989_v49 = vcombine.high %v409_v42, %v413_v43  ;;  %v12991_v50 = vcombine.high %v410_v44, %v414_v45 }
 0x3a8   :  { %v13037_v36 = vcombine.high %v457_v28, %v461_v29 }
 0x3aa   :  { %10841 = vmatpush1.bf16.msra.mxu0 %v12924_v54  ;;  %11400 = vmatpush1.bf16.msra.mxu1 %v12926_v55  ;;  %v422_v54 = vld [vmem:[%s19811_s1 + $0xbb8] sm:$0xff]  ;;  %v12988_v55 = vcombine.low %v409_v42, %v413_v43  ;;  %v13036_v43 = vcombine.low %v457_v28, %v461_v29 }
 0x3ab   :  { %10842 = vmatprep.subr.bf16.mxu0 %v12933_v56  ;;  %11401 = vmatprep.subr.bf16.mxu1 %v12935_v57  ;;  %v12990_v56 = vcombine.low %v410_v44, %v414_v45  ;;  %v12997_v57 = vcombine.high %v417_v51, %v421_v52  ;;  %v12999_v58 = vcombine.high %v418_v53, %v422_v54 }
 0x3ae   :  { %10843 = vmatpush1.bf16.msra.mxu0 %v12932_v62  ;;  %11402 = vmatpush1.bf16.msra.mxu1 %v12934_v63  ;;  %v430_v62 = vld [vmem:[%s19811_s1 + $0xbf8] sm:$0xff]  ;;  %v12996_v63 = vcombine.low %v417_v51, %v421_v52 }
 0x3af   :  { %10844 = vmatprep.subr.bf16.mxu0 %v12941_v0  ;;  %11403 = vmatprep.subr.bf16.mxu1 %v12943_v1  ;;  %v12998_v0 = vcombine.low %v418_v53, %v422_v54  ;;  %v13005_v1 = vcombine.high %v425_v59, %v429_v60  ;;  %v13007_v2 = vcombine.high %v426_v61, %v430_v62  ;;  %v474_v51 = vld [vmem:[%s19811_s1 + $0xd58] sm:$0xff]  ;;  %v1615_v54 = vld [vmem:[%s19813_s2] sm:$0xff] }
 0x3b0   :  { %v478_v52 = vld [vmem:[%s19811_s1 + $0xd78] sm:$0xff] }
 0x3b2   :  { %10845 = vmatpush1.bf16.msra.mxu0 %v12940_v6  ;;  %11404 = vmatpush1.bf16.msra.mxu1 %v12942_v7  ;;  %v438_v6 = vld [vmem:[%s19811_s1 + $0xc38] sm:$0xff]  ;;  %v13004_v7 = vcombine.low %v425_v59, %v429_v60  ;;  %v13055_v60 = vcombine.high %v474_v51, %v478_v52 }
 0x3b3   :  { %10846 = vmatprep.subr.bf16.mxu0 %v12949_v8  ;;  %11405 = vmatprep.subr.bf16.mxu1 %v12951_v9  ;;  %v13006_v8 = vcombine.low %v426_v61, %v430_v62  ;;  %v13013_v9 = vcombine.high %v433_v3, %v437_v4  ;;  %v13015_v10 = vcombine.high %v434_v5, %v438_v6  ;;  %v481_v61 = vld [vmem:[%s19811_s1 + $0xd90] sm:$0xff] }
 0x3b4   :  { %v485_v62 = vld [vmem:[%s19811_s1 + $0xdb0] sm:$0xff] }
 0x3b6   :  { %10847 = vmatpush1.bf16.msra.mxu0 %v12948_v14  ;;  %11406 = vmatpush1.bf16.msra.mxu1 %v12950_v15  ;;  %v446_v14 = vld [vmem:[%s19811_s1 + $0xc78] sm:$0xff]  ;;  %v13012_v15 = vcombine.low %v433_v3, %v437_v4 }
 0x3b7   :  { %10848 = vmatprep.subr.bf16.mxu0 %v12957_v16  ;;  %11407 = vmatprep.subr.bf16.mxu1 %v12959_v17  ;;  %v13014_v16 = vcombine.low %v434_v5, %v438_v6  ;;  %v13021_v17 = vcombine.high %v441_v11, %v445_v12  ;;  %v13023_v18 = vcombine.high %v442_v13, %v446_v14 }
 0x3b8   :  { %v13054_v6 = vcombine.low %v474_v51, %v478_v52 }
 0x3ba   :  { %10849 = vmatpush1.bf16.msra.mxu0 %v12956_v22  ;;  %11408 = vmatpush1.bf16.msra.mxu1 %v12958_v23  ;;  %v450_v22 = vld [vmem:[%s19811_s1 + $0xc98] sm:$0xff] }
 0x3bb   :  { %10850 = vmatprep.subr.bf16.mxu0 %v12965_v24  ;;  %11409 = vmatprep.subr.bf16.mxu1 %v12967_v25  ;;  %v454_v23 = vld [vmem:[%s19811_s1 + $0xcb8] sm:$0xff]  ;;  %v13020_v24 = vcombine.low %v441_v11, %v445_v12  ;;  %v13022_v25 = vcombine.low %v442_v13, %v446_v14  ;;  %v493_v11 = vld [vmem:[%s19811_s1 + $0xdf0] sm:$0xff] }
 0x3bc   :  { %v13031_v27 = vcombine.high %v450_v22, %v454_v23  ;;  %v13030_v35 = vcombine.low %v450_v22, %v454_v23 }
 0x3be   :  { %10851 = vmatpush1.bf16.msra.mxu0 %v12964_v30  ;;  %11410 = vmatpush1.bf16.msra.mxu1 %v12966_v31  ;;  %v14668_v30 = vld [vmem:[%s19812_s0 + $0x1c] ss:$100 sps:$4 sm:$0xff]  }
 0x3bf   :  { %10852 = vmatprep.subr.bf16.mxu0 %v12973_v32  ;;  %11411 = vmatprep.subr.bf16.mxu1 %v12975_v33  ;;  %v458_v31 = vld [vmem:[%s19811_s1 + $0xcd8] sm:$0xff]  ;;  %v1617_v33 = vlaneseq }
 0x3c0   :  { %v462_v32 = vld [vmem:[%s19811_s1 + $0xcf8] sm:$0xff] }
 0x3c1   :  { %v13039_v37 = vcombine.high %v458_v31, %v462_v32  ;;  %v17808_v42 = vshrl.u32 %v1617_v33, 7  ;;  %v13038_v44 = vcombine.low %v458_v31, %v462_v32  ;;  %v497_v33 = vld [vmem:[%s19811_s1 + $0xe10] sm:$0xff] }
 0x3c2   :  { %10853 = vmatpush1.bf16.msra.mxu0 %v12972_v38  ;;  %11412 = vmatpush1.bf16.msra.mxu1 %v12974_v39  ;;  %v465_v38 = vld [vmem:[%s19811_s1 + $0xd10] sm:$0xff] }
 0x3c3   :  { %10854 = vmatprep.subr.bf16.mxu0 %v12981_v40  ;;  %11413 = vmatprep.subr.bf16.mxu1 %v12983_v41  ;;  %v469_v39 = vld [vmem:[%s19811_s1 + $0xd30] sm:$0xff]  ;;  %v466_v40 = vld [vmem:[%s19811_s1 + $0xd18] sm:$0xff] }
 0x3c4   :  { %v470_v41 = vld [vmem:[%s19811_s1 + $0xd38] sm:$0xff]  ;;  %v13045_v45 = vcombine.high %v465_v38, %v469_v39  ;;  %v13044_v53 = vcombine.low %v465_v38, %v469_v39 }
 0x3c5   :  { %v498_v39 = vld [vmem:[%s19811_s1 + $0xe18] sm:$0xff] }
 0x3c6   :  { %10855 = vmatpush1.bf16.msra.mxu0 %v12980_v46  ;;  %11414 = vmatpush1.bf16.msra.mxu1 %v12982_v47  ;;  %v13047_v46 = vcombine.high %v466_v40, %v470_v41  ;;  %v473_v47 = vld [vmem:[%s19811_s1 + $0xd50] sm:$0xff] }
 0x3c7   :  { %10856 = vmatprep.subr.bf16.mxu0 %v12989_v49  ;;  %11415 = vmatprep.subr.bf16.mxu1 %v12991_v50  ;;  %v477_v49 = vld [vmem:[%s19811_s1 + $0xd70] sm:$0xff]  ;;  %v1619_v50 = vsub.s32 0, %v17808_v42 }
 0x3c8   :  { %v13053_v59 = vcombine.high %v473_v47, %v477_v49  ;;  %v13052_v4 = vcombine.low %v473_v47, %v477_v49 }
 0x3ca   :  { %10857 = vmatpush1.bf16.msra.mxu0 %v12988_v55  ;;  %11416 = vmatpush1.bf16.msra.mxu1 %v12990_v56  ;;  %v1627_v55 = vsub.s32 2, %v17808_v42  ;;  %v1623_v56 = vsub.s32 1, %v17808_v42 }
 0x3cb   :  { %10858 = vmatprep.subr.bf16.mxu0 %v12997_v57  ;;  %11417 = vmatprep.subr.bf16.mxu1 %v12999_v58  ;;  %v13046_v57 = vcombine.low %v466_v40, %v470_v41  ;;  %v1631_v58 = vsub.s32 3, %v17808_v42  ;;  %v502_v40 = vld [vmem:[%s19811_s1 + $0xe38] sm:$0xff] }
 0x3cc   :  { %v1624_v3 = vrot.slane %v1615_v54, %v1623_v56 }
 0x3cd   :  { %v1632_v5 = vrot.slane %v1615_v54, %v1631_v58  ;;  %v510_v58 = vld [vmem:[%s19811_s1 + $0xe78] sm:$0xff] }
 0x3ce   :  { %10859 = vmatpush1.bf16.msra.mxu0 %v12996_v63  ;;  %11418 = vmatpush1.bf16.msra.mxu1 %v12998_v0  ;;  %v1620_v63 = vrot.slane %v1615_v54, %v1619_v50  ;;  %v482_v0 = vld [vmem:[%s19811_s1 + $0xd98] sm:$0xff] }
 0x3cf   :  { %10860 = vmatprep.subr.bf16.mxu0 %v13005_v1  ;;  %11419 = vmatprep.subr.bf16.mxu1 %v13007_v2  ;;  %v486_v1 = vld [vmem:[%s19811_s1 + $0xdb8] sm:$0xff]  ;;  %v1628_v2 = vrot.slane %v1615_v54, %v1627_v55  ;;  %v505_v54 = vld [vmem:[%s19811_s1 + $0xe50] sm:$0xff] }
 0x3d0   :  { %v13062_v22 = vcombine.low %v482_v0, %v486_v1  ;;  %v509_v55 = vld [vmem:[%s19811_s1 + $0xe70] sm:$0xff] }
 0x3d2   :  { %10861 = vmatpush1.bf16.msra.mxu0 %v13004_v7  ;;  %11420 = vmatpush1.bf16.msra.mxu1 %v13006_v8  ;;  %v13061_v7 = vcombine.high %v481_v61, %v485_v62 }
 0x3d3   :  { %10873 = vmatprep.subr.bf16.mxu0 %v13013_v9  ;;  %11432 = vmatprep.subr.bf16.mxu1 %v13015_v10  ;;  %v13063_v9 = vcombine.high %v482_v0, %v486_v1  ;;  %v489_v10 = vld [vmem:[%s19811_s1 + $0xdd0] sm:$0xff]  ;;  %v514_v1 = vld [vmem:[%s19811_s1 + $0xe98] sm:$0xff] }
 0x3d4   :  { %v13068_v31 = vcombine.low %v489_v10, %v493_v11  ;;  %v517_v0 = vld [vmem:[%s19811_s1 + $0xeb0] sm:$0xff] }
 0x3d5   :  { %10863 = vmatmul.mubr.bf16.vlgmr.msra.gmra.mrb[4].mxu0 %v14667_v21  ;;  %11422 = vmatmul.mubr.bf16.vlgmr.msra.gmra.mrb[4].mxu1 %v14667_v21  ;;  %v13060_v21 = vcombine.low %v481_v61, %v485_v62  ;;  %v13085_v61 = vcombine.high %v505_v54, %v509_v55 }
 0x3d6   :  { %10874 = vmatpush1.bf16.msra.mxu0 %v13012_v15  ;;  %11433 = vmatpush1.bf16.msra.mxu1 %v13014_v16  ;;  %v490_v15 = vld [vmem:[%s19811_s1 + $0xdd8] sm:$0xff] }
 0x3d7   :  { %10875 = vmatprep.subr.bf16.mxu0 %v13021_v17  ;;  %11434 = vmatprep.subr.bf16.mxu1 %v13023_v18  ;;  %v494_v16 = vld [vmem:[%s19811_s1 + $0xdf8] sm:$0xff] }
 0x3d8   :  { %10905 = vmatprep.mubr.bf16.mxu0 %v14668_v30  ;;  %11464 = vmatprep.mubr.bf16.mxu1 %v14668_v30  ;;  %v13071_v32 = vcombine.high %v490_v15, %v494_v16  ;;  %v13070_v38 = vcombine.low %v490_v15, %v494_v16  ;;  %v529_v15 = vld [vmem:[%s19811_s1 + $0xf10] sm:$0xff] }
 0x3d9   :  { %v533_v16 = vld [vmem:[%s19811_s1 + $0xf30] sm:$0xff] }
 0x3da   :  { %10876 = vmatpush1.bf16.msra.mxu0 %v13020_v24  ;;  %11435 = vmatpush1.bf16.msra.mxu1 %v13022_v25 }
 0x3db   :  { %10877 = vmatprep.subr.bf16.mxu0 %v13029_v26  ;;  %11436 = vmatprep.subr.bf16.mxu1 %v13031_v27  ;;  %v13069_v27 = vcombine.high %v489_v10, %v493_v11  ;;  %v526_v10 = vld [vmem:[%s19811_s1 + $0xef8] sm:$0xff] }
 0x3de   :  { %10878 = vmatpush1.bf16.msra.mxu0 %v13028_v34  ;;  %11437 = vmatpush1.bf16.msra.mxu1 %v13030_v35  ;;  %v501_v34 = vld [vmem:[%s19811_s1 + $0xe30] sm:$0xff] }
 0x3df   :  { %10879 = vmatprep.subr.bf16.mxu0 %v13037_v36  ;;  %11438 = vmatprep.subr.bf16.mxu1 %v13039_v37  ;;  %v13077_v50 = vcombine.high %v497_v33, %v501_v34 }
 0x3e2   :  { %10880 = vmatpush1.bf16.msra.mxu0 %v13036_v43  ;;  %11439 = vmatpush1.bf16.msra.mxu1 %v13038_v44 }
 0x3e3   :  { %10881 = vmatprep.subr.bf16.mxu0 %v13045_v45  ;;  %11440 = vmatprep.subr.bf16.mxu1 %v13047_v46 }
 0x3e6   :  { %10882 = vmatpush1.bf16.msra.mxu0 %v13044_v53  ;;  %11441 = vmatpush1.bf16.msra.mxu1 %v13046_v57  ;;  %v13079_v53 = vcombine.high %v498_v39, %v502_v40  ;;  %v506_v57 = vld [vmem:[%s19811_s1 + $0xe58] sm:$0xff] }
 0x3e7   :  { %10883 = vmatprep.subr.bf16.mxu0 %v13053_v59  ;;  %11442 = vmatprep.subr.bf16.mxu1 %v13055_v60  ;;  %v13076_v59 = vcombine.low %v497_v33, %v501_v34  ;;  %v13078_v60 = vcombine.low %v498_v39, %v502_v40  ;;  %v13087_v62 = vcombine.high %v506_v57, %v510_v58  ;;  %v546_v33 = vld [vmem:[%s19811_s1 + $0xf98] sm:$0xff]  ;;  %v553_v39 = vld [vmem:[%s19811_s1 + $0xfd0] sm:$0xff] }
 0x3e8   :  { %v10176_v8 = vpop.f32.mrb[0].mxu0  ;;  %v10735_v13 = vpop.f32.mrb[0].mxu1  ;;  %v550_v34 = vld [vmem:[%s19811_s1 + $0xfb8] sm:$0xff]  ;;  %v557_v40 = vld [vmem:[%s19811_s1 + $0xff0] sm:$0xff] }
 0x3e9   :  { %v14349_v12 = vadd.f32 %v10176_v8, %v1620_v63  ;;  %v10178_v14 = vpop.f32.mrb[1].mxu0  ;;  %v14353_v17 = vadd.f32 %v10735_v13, %v1628_v2  ;;  %v10737_v19 = vpop.f32.mrb[1].mxu1  ;;  %v525_v8 = vld [vmem:[%s19811_s1 + $0xef0] sm:$0xff] }
 0x3ea   :  { %v14350_v18 = vadd.f32 %v10178_v14, %v1624_v3  ;;  %v10180_v20 = vpop.f32.mrb[2].mxu0  ;;  %10884 = vmatpush1.bf16.msra.mxu0 %v13052_v4  ;;  %v14354_v23 = vadd.f32 %v10737_v19, %v1632_v5  ;;  %v10739_v25 = vpop.f32.mrb[2].mxu1  ;;  %11443 = vmatpush1.bf16.msra.mxu1 %v13054_v6  ;;  %v13086_v4 = vcombine.low %v506_v57, %v510_v58 }
 0x3eb   :  { %v14351_v24 = vadd.f32 %v10180_v20, %v1620_v63  ;;  %v10182_v26 = vpop.f32.mrb[3].mxu0  ;;  %10885 = vmatprep.subr.bf16.mxu0 %v13061_v7  ;;  %v14355_v28 = vadd.f32 %v10739_v25, %v1628_v2  ;;  %v10741_v30 = vpop.f32.mrb[3].mxu1  ;;  %11444 = vmatprep.subr.bf16.mxu1 %v13063_v9  ;;  %v11862_v35 = vmax.f32 %v14349_v12, 0.0  ;;  %v11864_v41 = vmax.f32 %v14353_v17, 0.0  ;;  %v513_v63 = vld [vmem:[%s19811_s1 + $0xe90] sm:$0xff]  ;;  %v518_v2 = vld [vmem:[%s19811_s1 + $0xeb8] sm:$0xff] }
 0x3ec   :  { %v14352_v29 = vadd.f32 %v10182_v26, %v1624_v3  ;;  %v14356_v37 = vadd.f32 %v10741_v30, %v1632_v5  ;;  %v11863_v43 = vmax.f32 %v14350_v18, 0.0  ;;  %v11865_v46 = vmax.f32 %v14354_v23, 0.0  ;;  %v521_v7 = vld [vmem:[%s19811_s1 + $0xed0] sm:$0xff]  ;;  %v522_v9 = vld [vmem:[%s19811_s1 + $0xed8] sm:$0xff] }
 0x3ed   :  { %v11870_v36 = vmax.f32 %v14351_v24, 0.0  ;;  %v11872_v44 = vmax.f32 %v14355_v28, 0.0  ;;  %v13084_v3 = vcombine.low %v505_v54, %v509_v55  ;;  %v13093_v5 = vcombine.high %v513_v63, %v517_v0  ;;  %v530_v17 = vld [vmem:[%s19811_s1 + $0xf18] sm:$0xff]  ;;  %v537_v23 = vld [vmem:[%s19811_s1 + $0xf50] sm:$0xff] }
 0x3ee   :  { %v11871_v45 = vmax.f32 %v14352_v29, 0.0  ;;  %10886 = vmatpush1.bf16.msra.mxu0 %v13060_v21  ;;  %v11873_v49 = vmax.f32 %v14356_v37, 0.0  ;;  %11445 = vmatpush1.bf16.msra.mxu1 %v13062_v22  ;;  %v13095_v6 = vcombine.high %v514_v1, %v518_v2  ;;  %v13092_v11 = vcombine.low %v513_v63, %v517_v0  ;;  %v534_v18 = vld [vmem:[%s19811_s1 + $0xf38] sm:$0xff]  ;;  %v541_v24 = vld [vmem:[%s19811_s1 + $0xf70] sm:$0xff] }
 0x3ef   :  { %v17865_v47 = vpack.c.bf16 %v11870_v36, %v11862_v35  ;;  %10887 = vmatprep.subr.bf16.mxu0 %v13069_v27  ;;  %v17867_v51 = vpack.c.bf16 %v11872_v44, %v11864_v41  ;;  %11446 = vmatprep.subr.bf16.mxu1 %v13071_v32  ;;  %v13094_v12 = vcombine.low %v514_v1, %v518_v2  ;;  %v538_v25 = vld [vmem:[%s19811_s1 + $0xf58] sm:$0xff]  ;;  %v549_v32 = vld [vmem:[%s19811_s1 + $0xfb0] sm:$0xff] }
 0x3f0   :  { %v17869_v52 = vpack.c.bf16 %v11871_v45, %v11863_v43  ;;  %v17877_v56 = vpack.c.bf16 %v11873_v49, %v11865_v46  ;;  %v13101_v13 = vcombine.high %v521_v7, %v525_v8  ;;  %v13103_v14 = vcombine.high %v522_v9, %v526_v10  ;;  %v542_v26 = vld [vmem:[%s19811_s1 + $0xf78] sm:$0xff] }
 0x3f1   :  { %v13100_v19 = vcombine.low %v521_v7, %v525_v8  ;;  %v13102_v20 = vcombine.low %v522_v9, %v526_v10  ;;  %v13109_v21 = vcombine.high %v529_v15, %v533_v16  ;;  %v13111_v22 = vcombine.high %v530_v17, %v534_v18  ;;  %v554_v41 = vld [vmem:[%s19811_s1 + $0xfd8] sm:$0xff] }
 0x3f2   :  { %10888 = vmatpush1.bf16.msra.mxu0 %v13068_v31  ;;  %11447 = vmatpush1.bf16.msra.mxu1 %v13070_v38  ;;  %v13108_v27 = vcombine.low %v529_v15, %v533_v16  ;;  %v13110_v28 = vcombine.low %v530_v17, %v534_v18  ;;  %v13117_v29 = vcombine.high %v537_v23, %v541_v24  ;;  %v545_v31 = vld [vmem:[%s19811_s1 + $0xf90] sm:$0xff]  ;;  %v558_v43 = vld [vmem:[%s19811_s1 + $0xff8] sm:$0xff]  ;;  %v14670_v16 = vld [vmem:[%s19812_s0 + $0x24] ss:$100 sps:$4 sm:$0xff]  }
 0x3f3   :  { %10889 = vmatprep.subr.bf16.mxu0 %v13077_v50  ;;  %11448 = vmatprep.subr.bf16.mxu1 %v13079_v53  ;;  %v13119_v30 = vcombine.high %v538_v25, %v542_v26  ;;  %v13116_v35 = vcombine.low %v537_v23, %v541_v24  ;;  %v13118_v36 = vcombine.low %v538_v25, %v542_v26  ;;  %v561_v50 = vld [vmem:[%s19811_s1 + $0x1010] sm:$0xff]  ;;  %v562_v54 = vld [vmem:[%s19811_s1 + $0x1018] sm:$0xff] }
 0x3f4   :  { %v13125_v37 = vcombine.high %v545_v31, %v549_v32  ;;  %v13127_v38 = vcombine.high %v546_v33, %v550_v34  ;;  %v13124_v44 = vcombine.low %v545_v31, %v549_v32  ;;  %v13126_v45 = vcombine.low %v546_v33, %v550_v34  ;;  %v565_v53 = vld [vmem:[%s19811_s1 + $0x1030] sm:$0xff]  ;;  %v566_v55 = vld [vmem:[%s19811_s1 + $0x1038] sm:$0xff] }
 0x3f5   :  { %v13133_v46 = vcombine.high %v553_v39, %v557_v40  ;;  %v13135_v49 = vcombine.high %v554_v41, %v558_v43  ;;  %v13132_v57 = vcombine.low %v553_v39, %v557_v40  ;;  %v13134_v58 = vcombine.low %v554_v41, %v558_v43  ;;  %v570_v63 = vld [vmem:[%s19811_s1 + $0x1058] sm:$0xff]  ;;  %v589_v15 = vld [vmem:[%s19811_s1 + $0x10f0] sm:$0xff] }
 0x3f6   :  { %10890 = vmatpush1.bf16.msra.mxu0 %v13076_v59  ;;  %11449 = vmatpush1.bf16.msra.mxu1 %v13078_v60  ;;  %v13141_v59 = vcombine.high %v561_v50, %v565_v53  ;;  %v13143_v60 = vcombine.high %v562_v54, %v566_v55  ;;  %v574_v0 = vld [vmem:[%s19811_s1 + $0x1078] sm:$0xff]  ;;  %v13140_v1 = vcombine.low %v561_v50, %v565_v53  ;;  %v593_v23 = vld [vmem:[%s19811_s1 + $0x1110] sm:$0xff] }
 0x3f7   :  { %10891 = vmatprep.subr.bf16.mxu0 %v13085_v61  ;;  %11450 = vmatprep.subr.bf16.mxu1 %v13087_v62  ;;  %v569_v61 = vld [vmem:[%s19811_s1 + $0x1050] sm:$0xff]  ;;  %v13142_v2 = vcombine.low %v562_v54, %v566_v55  ;;  %v14669_v7 = vld [vmem:[%s19812_s0 + $0x18] ss:$100 sps:$4 sm:$0xff]  }
 0x3f8   :  { %v573_v62 = vld [vmem:[%s19811_s1 + $0x1070] sm:$0xff]  ;;  %v578_v8 = vld [vmem:[%s19811_s1 + $0x1098] sm:$0xff] }
 0x3f9   :  { %v582_v9 = vld [vmem:[%s19811_s1 + $0x10b8] sm:$0xff]  ;;  %v13148_v10 = vcombine.low %v569_v61, %v573_v62  ;;  %v597_v24 = vld [vmem:[%s19811_s1 + $0x1130] sm:$0xff] }
 0x3fa   :  { %10892 = vmatpush1.bf16.msra.mxu0 %v13084_v3  ;;  %11451 = vmatpush1.bf16.msra.mxu1 %v13086_v4  ;;  %v13149_v3 = vcombine.high %v569_v61, %v573_v62  ;;  %v13151_v4 = vcombine.high %v570_v63, %v574_v0  ;;  %v586_v17 = vld [vmem:[%s19811_s1 + $0x10d8] sm:$0xff]  ;;  %v601_v31 = vld [vmem:[%s19811_s1 + $0x1150] sm:$0xff] }
 0x3fb   :  { %10893 = vmatprep.subr.bf16.mxu0 %v13093_v5  ;;  %11452 = vmatprep.subr.bf16.mxu1 %v13095_v6  ;;  %v577_v5 = vld [vmem:[%s19811_s1 + $0x1090] sm:$0xff]  ;;  %v590_v18 = vld [vmem:[%s19811_s1 + $0x10f8] sm:$0xff] }
 0x3fc   :  { %v581_v6 = vld [vmem:[%s19811_s1 + $0x10b0] sm:$0xff]  ;;  %v594_v25 = vld [vmem:[%s19811_s1 + $0x1118] sm:$0xff] }
 0x3fd   :  { %v598_v26 = vld [vmem:[%s19811_s1 + $0x1138] sm:$0xff]  ;;  %v605_v32 = vld [vmem:[%s19811_s1 + $0x1170] sm:$0xff] }
 0x3fe   :  { %10894 = vmatpush1.bf16.msra.mxu0 %v13092_v11  ;;  %11453 = vmatpush1.bf16.msra.mxu1 %v13094_v12  ;;  %v13150_v11 = vcombine.low %v570_v63, %v574_v0  ;;  %v13157_v12 = vcombine.high %v577_v5, %v581_v6  ;;  %v602_v33 = vld [vmem:[%s19811_s1 + $0x1158] sm:$0xff]  ;;  %v609_v39 = vld [vmem:[%s19811_s1 + $0x1190] sm:$0xff] }
 0x3ff   :  { %10895 = vmatprep.subr.bf16.mxu0 %v13101_v13  ;;  %11454 = vmatprep.subr.bf16.mxu1 %v13103_v14  ;;  %v13159_v13 = vcombine.high %v578_v8, %v582_v9  ;;  %v585_v14 = vld [vmem:[%s19811_s1 + $0x10d0] sm:$0xff]  ;;  %v606_v34 = vld [vmem:[%s19811_s1 + $0x1178] sm:$0xff] }
 0x400   :  { %v613_v40 = vld [vmem:[%s19811_s1 + $0x11b0] sm:$0xff]  ;;  %v610_v41 = vld [vmem:[%s19811_s1 + $0x1198] sm:$0xff] }
 0x401   :  { %v614_v43 = vld [vmem:[%s19811_s1 + $0x11b8] sm:$0xff]  ;;  %v617_v50 = vld [vmem:[%s19811_s1 + $0x11d0] sm:$0xff] }
 0x402   :  { %10896 = vmatpush1.bf16.msra.mxu0 %v13100_v19  ;;  %11455 = vmatpush1.bf16.msra.mxu1 %v13102_v20  ;;  %v13156_v19 = vcombine.low %v577_v5, %v581_v6  ;;  %v13158_v20 = vcombine.low %v578_v8, %v582_v9  ;;  %v621_v53 = vld [vmem:[%s19811_s1 + $0x11f0] sm:$0xff]  ;;  %v618_v54 = vld [vmem:[%s19811_s1 + $0x11d8] sm:$0xff] }
 0x403   :  { %10897 = vmatprep.subr.bf16.mxu0 %v13109_v21  ;;  %11456 = vmatprep.subr.bf16.mxu1 %v13111_v22  ;;  %v13165_v21 = vcombine.high %v585_v14, %v589_v15  ;;  %v13167_v22 = vcombine.high %v586_v17, %v590_v18  ;;  %v622_v55 = vld [vmem:[%s19811_s1 + $0x11f8] sm:$0xff]  ;;  %v625_v61 = vld [vmem:[%s19811_s1 + $0x1210] sm:$0xff] }
 0x404   :  { %v629_v62 = vld [vmem:[%s19811_s1 + $0x1230] sm:$0xff]  ;;  %v626_v63 = vld [vmem:[%s19811_s1 + $0x1218] sm:$0xff] }
 0x405   :  { %v630_v0 = vld [vmem:[%s19811_s1 + $0x1238] sm:$0xff]  ;;  %v633_v5 = vld [vmem:[%s19811_s1 + $0x1250] sm:$0xff]  ;;  %v13204_v9 = vcombine.low %v625_v61, %v629_v62 }
 0x406   :  { %10898 = vmatpush1.bf16.msra.mxu0 %v13108_v27  ;;  %11457 = vmatpush1.bf16.msra.mxu1 %v13110_v28  ;;  %v13164_v27 = vcombine.low %v585_v14, %v589_v15  ;;  %v13166_v28 = vcombine.low %v586_v17, %v590_v18  ;;  %v637_v6 = vld [vmem:[%s19811_s1 + $0x1270] sm:$0xff]  ;;  %v638_v8 = vld [vmem:[%s19811_s1 + $0x1278] sm:$0xff] }
 0x407   :  { %10899 = vmatprep.subr.bf16.mxu0 %v13117_v29  ;;  %11458 = vmatprep.subr.bf16.mxu1 %v13119_v30  ;;  %v13173_v29 = vcombine.high %v593_v23, %v597_v24  ;;  %v13175_v30 = vcombine.high %v594_v25, %v598_v26  ;;  %v645_v14 = vld [vmem:[%s19811_s1 + $0x12b0] sm:$0xff]  ;;  %v642_v15 = vld [vmem:[%s19811_s1 + $0x1298] sm:$0xff]  ;;  %v13212_v17 = vcombine.low %v633_v5, %v637_v6 }
 0x40a   :  { %10900 = vmatpush1.bf16.msra.mxu0 %v13116_v35  ;;  %11459 = vmatpush1.bf16.msra.mxu1 %v13118_v36  ;;  %v13172_v35 = vcombine.low %v593_v23, %v597_v24  ;;  %v13174_v36 = vcombine.low %v594_v25, %v598_v26  ;;  %v650_v23 = vld [vmem:[%s19811_s1 + $0x12d8] sm:$0xff] }
 0x40b   :  { %10901 = vmatprep.subr.bf16.mxu0 %v13125_v37  ;;  %11460 = vmatprep.subr.bf16.mxu1 %v13127_v38  ;;  %v13181_v37 = vcombine.high %v601_v31, %v605_v32  ;;  %v13183_v38 = vcombine.high %v602_v33, %v606_v34  ;;  %v654_v24 = vld [vmem:[%s19811_s1 + $0x12f8] sm:$0xff] }
 0x40e   :  { %10902 = vmatpush1.bf16.msra.mxu0 %v13124_v44  ;;  %11461 = vmatpush1.bf16.msra.mxu1 %v13126_v45  ;;  %v13180_v44 = vcombine.low %v601_v31, %v605_v32  ;;  %v13182_v45 = vcombine.low %v602_v33, %v606_v34  ;;  %v658_v31 = vld [vmem:[%s19811_s1 + $0x1318] sm:$0xff]  ;;  %v13230_v34 = vcombine.low %v650_v23, %v654_v24 }
 0x40f   :  { %10903 = vmatprep.subr.bf16.mxu0 %v13133_v46  ;;  %11462 = vmatprep.subr.bf16.mxu1 %v13135_v49  ;;  %v13189_v46 = vcombine.high %v609_v39, %v613_v40  ;;  %v13191_v49 = vcombine.high %v610_v41, %v614_v43  ;;  %v662_v32 = vld [vmem:[%s19811_s1 + $0x1338] sm:$0xff] }
 0x412   :  { %10904 = vmatpush1.bf16.msra.mxu0 %v13132_v57  ;;  %11463 = vmatpush1.bf16.msra.mxu1 %v13134_v58  ;;  %v13188_v57 = vcombine.low %v609_v39, %v613_v40  ;;  %v13190_v58 = vcombine.low %v610_v41, %v614_v43  ;;  %v666_v39 = vld [vmem:[%s19811_s1 + $0x1358] sm:$0xff]  ;;  %v13238_v43 = vcombine.low %v658_v31, %v662_v32 }
 0x413   :  { %10916 = vmatprep.subr.bf16.mxu0 %v13141_v59  ;;  %11475 = vmatprep.subr.bf16.mxu1 %v13143_v60  ;;  %v13197_v59 = vcombine.high %v617_v50, %v621_v53  ;;  %v13199_v60 = vcombine.high %v618_v54, %v622_v55  ;;  %v670_v40 = vld [vmem:[%s19811_s1 + $0x1378] sm:$0xff] }
 0x415   :  { %10906 = vmatmul.mubr.bf16.vlgmr.msra.gmra.mrb[4].mxu0 %v14669_v7  ;;  %11465 = vmatmul.mubr.bf16.vlgmr.msra.gmra.mrb[4].mxu1 %v14669_v7  ;;  %v634_v7 = vld [vmem:[%s19811_s1 + $0x1258] sm:$0xff] }
 0x416   :  { %10917 = vmatpush1.bf16.msra.mxu0 %v13140_v1  ;;  %11476 = vmatpush1.bf16.msra.mxu1 %v13142_v2  ;;  %v13196_v1 = vcombine.low %v617_v50, %v621_v53  ;;  %v13198_v2 = vcombine.low %v618_v54, %v622_v55  ;;  %v13214_v18 = vcombine.low %v634_v7, %v638_v8  ;;  %v674_v50 = vld [vmem:[%s19811_s1 + $0x1398] sm:$0xff] }
 0x417   :  { %10918 = vmatprep.subr.bf16.mxu0 %v13149_v3  ;;  %11477 = vmatprep.subr.bf16.mxu1 %v13151_v4  ;;  %v13205_v3 = vcombine.high %v625_v61, %v629_v62  ;;  %v13207_v4 = vcombine.high %v626_v63, %v630_v0  ;;  %v678_v53 = vld [vmem:[%s19811_s1 + $0x13b8] sm:$0xff]  ;;  %v13246_v55 = vcombine.low %v666_v39, %v670_v40 }
 0x418   :  { %10948 = vmatprep.mubr.bf16.mxu0 %v14670_v16  ;;  %11507 = vmatprep.mubr.bf16.mxu1 %v14670_v16  ;;  %v646_v16 = vld [vmem:[%s19811_s1 + $0x12b8] sm:$0xff] }
 0x419   :  { %v13222_v26 = vcombine.low %v642_v15, %v646_v16  ;;  %v682_v61 = vld [vmem:[%s19811_s1 + $0x13d8] sm:$0xff] }
 0x41a   :  { %10919 = vmatpush1.bf16.msra.mxu0 %v13148_v10  ;;  %11478 = vmatpush1.bf16.msra.mxu1 %v13150_v11  ;;  %v13206_v10 = vcombine.low %v626_v63, %v630_v0  ;;  %v13213_v11 = vcombine.high %v633_v5, %v637_v6  ;;  %v686_v62 = vld [vmem:[%s19811_s1 + $0x13f8] sm:$0xff]  ;;  %v13254_v0 = vcombine.low %v674_v50, %v678_v53 }
 0x41b   :  { %10920 = vmatprep.subr.bf16.mxu0 %v13157_v12  ;;  %11479 = vmatprep.subr.bf16.mxu1 %v13159_v13  ;;  %v13215_v12 = vcombine.high %v634_v7, %v638_v8  ;;  %v641_v13 = vld [vmem:[%s19811_s1 + $0x1290] sm:$0xff]  ;;  %v690_v5 = vld [vmem:[%s19811_s1 + $0x1418] sm:$0xff]  ;;  %v13262_v8 = vcombine.low %v682_v61, %v686_v62 }
 0x41c   :  { %v13220_v25 = vcombine.low %v641_v13, %v645_v14  ;;  %v694_v6 = vld [vmem:[%s19811_s1 + $0x1438] sm:$0xff] }
 0x41e   :  { %10921 = vmatpush1.bf16.msra.mxu0 %v13156_v19  ;;  %11480 = vmatpush1.bf16.msra.mxu1 %v13158_v20  ;;  %v13221_v19 = vcombine.high %v641_v13, %v645_v14  ;;  %v13223_v20 = vcombine.high %v642_v15, %v646_v16  ;;  %v698_v13 = vld [vmem:[%s19811_s1 + $0x1458] sm:$0xff]  ;;  %v13270_v16 = vcombine.low %v690_v5, %v694_v6 }
 0x41f   :  { %10922 = vmatprep.subr.bf16.mxu0 %v13165_v21  ;;  %11481 = vmatprep.subr.bf16.mxu1 %v13167_v22  ;;  %v649_v21 = vld [vmem:[%s19811_s1 + $0x12d0] sm:$0xff]  ;;  %v702_v14 = vld [vmem:[%s19811_s1 + $0x1478] sm:$0xff] }
 0x420   :  { %v653_v22 = vld [vmem:[%s19811_s1 + $0x12f0] sm:$0xff] }
 0x421   :  { %v13228_v33 = vcombine.low %v649_v21, %v653_v22 }
 0x422   :  { %10923 = vmatpush1.bf16.msra.mxu0 %v13164_v27  ;;  %11482 = vmatpush1.bf16.msra.mxu1 %v13166_v28  ;;  %v13229_v27 = vcombine.high %v649_v21, %v653_v22  ;;  %v13231_v28 = vcombine.high %v650_v23, %v654_v24  ;;  %v14671_v21 = vld [vmem:[%s19812_s0 + $0x20] ss:$100 sps:$4 sm:$0xff]   ;;  %v706_v22 = vld [vmem:[%s19811_s1 + $0x1498] sm:$0xff] }
 0x423   :  { %10924 = vmatprep.subr.bf16.mxu0 %v13173_v29  ;;  %11483 = vmatprep.subr.bf16.mxu1 %v13175_v30  ;;  %v657_v29 = vld [vmem:[%s19811_s1 + $0x1310] sm:$0xff]  ;;  %v710_v23 = vld [vmem:[%s19811_s1 + $0x14b8] sm:$0xff] }
 0x424   :  { %v661_v30 = vld [vmem:[%s19811_s1 + $0x1330] sm:$0xff] }
 0x425   :  { %v13236_v41 = vcombine.low %v657_v29, %v661_v30 }
 0x426   :  { %10925 = vmatpush1.bf16.msra.mxu0 %v13172_v35  ;;  %11484 = vmatpush1.bf16.msra.mxu1 %v13174_v36  ;;  %v13237_v35 = vcombine.high %v657_v29, %v661_v30  ;;  %v13239_v36 = vcombine.high %v658_v31, %v662_v32  ;;  %v717_v29 = vld [vmem:[%s19811_s1 + $0x14f0] sm:$0xff]  ;;  %v714_v31 = vld [vmem:[%s19811_s1 + $0x14d8] sm:$0xff] }
 0x427   :  { %10926 = vmatprep.subr.bf16.mxu0 %v13181_v37  ;;  %11485 = vmatprep.subr.bf16.mxu1 %v13183_v38  ;;  %v665_v37 = vld [vmem:[%s19811_s1 + $0x1350] sm:$0xff]  ;;  %v718_v32 = vld [vmem:[%s19811_s1 + $0x14f8] sm:$0xff] }
 0x428   :  { %v669_v38 = vld [vmem:[%s19811_s1 + $0x1370] sm:$0xff] }
 0x429   :  { %v13244_v54 = vcombine.low %v665_v37, %v669_v38  ;;  %v14672_v30 = vld [vmem:[%s19812_s0 + $0x2c] ss:$100 sps:$4 sm:$0xff]  }
 0x42a   :  { %10927 = vmatpush1.bf16.msra.mxu0 %v13180_v44  ;;  %11486 = vmatpush1.bf16.msra.mxu1 %v13182_v45  ;;  %v13245_v44 = vcombine.high %v665_v37, %v669_v38  ;;  %v13247_v45 = vcombine.high %v666_v39, %v670_v40  ;;  %v721_v37 = vld [vmem:[%s19811_s1 + $0x1510] sm:$0xff]  ;;  %v722_v39 = vld [vmem:[%s19811_s1 + $0x1518] sm:$0xff] }
 0x42b   :  { %10928 = vmatprep.subr.bf16.mxu0 %v13189_v46  ;;  %11487 = vmatprep.subr.bf16.mxu1 %v13191_v49  ;;  %v673_v46 = vld [vmem:[%s19811_s1 + $0x1390] sm:$0xff]  ;;  %v726_v40 = vld [vmem:[%s19811_s1 + $0x1538] sm:$0xff] }
 0x42c   :  { %v677_v49 = vld [vmem:[%s19811_s1 + $0x13b0] sm:$0xff] }
 0x42d   :  { %v13252_v63 = vcombine.low %v673_v46, %v677_v49  ;;  %v725_v38 = vld [vmem:[%s19811_s1 + $0x1530] sm:$0xff] }
 0x42e   :  { %10929 = vmatpush1.bf16.msra.mxu0 %v13188_v57  ;;  %11488 = vmatpush1.bf16.msra.mxu1 %v13190_v58  ;;  %v13253_v57 = vcombine.high %v673_v46, %v677_v49  ;;  %v13255_v58 = vcombine.high %v674_v50, %v678_v53  ;;  %v729_v46 = vld [vmem:[%s19811_s1 + $0x1550] sm:$0xff]  ;;  %v730_v50 = vld [vmem:[%s19811_s1 + $0x1558] sm:$0xff] }
 0x42f   :  { %10930 = vmatprep.subr.bf16.mxu0 %v13197_v59  ;;  %11489 = vmatprep.subr.bf16.mxu1 %v13199_v60  ;;  %v681_v59 = vld [vmem:[%s19811_s1 + $0x13d0] sm:$0xff]  ;;  %v734_v53 = vld [vmem:[%s19811_s1 + $0x1578] sm:$0xff] }
 0x430   :  { %v685_v60 = vld [vmem:[%s19811_s1 + $0x13f0] sm:$0xff] }
 0x431   :  { %v13260_v7 = vcombine.low %v681_v59, %v685_v60  ;;  %v733_v49 = vld [vmem:[%s19811_s1 + $0x1570] sm:$0xff] }
 0x432   :  { %10931 = vmatpush1.bf16.msra.mxu0 %v13196_v1  ;;  %11490 = vmatpush1.bf16.msra.mxu1 %v13198_v2  ;;  %v13261_v1 = vcombine.high %v681_v59, %v685_v60  ;;  %v13263_v2 = vcombine.high %v682_v61, %v686_v62  ;;  %v737_v59 = vld [vmem:[%s19811_s1 + $0x1590] sm:$0xff]  ;;  %v738_v61 = vld [vmem:[%s19811_s1 + $0x1598] sm:$0xff] }
 0x433   :  { %10932 = vmatprep.subr.bf16.mxu0 %v13205_v3  ;;  %11491 = vmatprep.subr.bf16.mxu1 %v13207_v4  ;;  %v689_v3 = vld [vmem:[%s19811_s1 + $0x1410] sm:$0xff]  ;;  %v742_v62 = vld [vmem:[%s19811_s1 + $0x15b8] sm:$0xff] }
 0x434   :  { %v693_v4 = vld [vmem:[%s19811_s1 + $0x1430] sm:$0xff] }
 0x435   :  { %v13268_v15 = vcombine.low %v689_v3, %v693_v4  ;;  %v741_v60 = vld [vmem:[%s19811_s1 + $0x15b0] sm:$0xff] }
 0x436   :  { %10933 = vmatpush1.bf16.msra.mxu0 %v13204_v9  ;;  %11492 = vmatpush1.bf16.msra.mxu1 %v13206_v10  ;;  %v13269_v9 = vcombine.high %v689_v3, %v693_v4  ;;  %v13271_v10 = vcombine.high %v690_v5, %v694_v6  ;;  %v745_v3 = vld [vmem:[%s19811_s1 + $0x15d0] sm:$0xff]  ;;  %v746_v5 = vld [vmem:[%s19811_s1 + $0x15d8] sm:$0xff] }
 0x437   :  { %10934 = vmatprep.subr.bf16.mxu0 %v13213_v11  ;;  %11493 = vmatprep.subr.bf16.mxu1 %v13215_v12  ;;  %v697_v11 = vld [vmem:[%s19811_s1 + $0x1450] sm:$0xff]  ;;  %v750_v6 = vld [vmem:[%s19811_s1 + $0x15f8] sm:$0xff] }
 0x438   :  { %v701_v12 = vld [vmem:[%s19811_s1 + $0x1470] sm:$0xff] }
 0x439   :  { %v13276_v24 = vcombine.low %v697_v11, %v701_v12  ;;  %v749_v4 = vld [vmem:[%s19811_s1 + $0x15f0] sm:$0xff] }
 0x43a   :  { %10935 = vmatpush1.bf16.msra.mxu0 %v13212_v17  ;;  %11494 = vmatpush1.bf16.msra.mxu1 %v13214_v18  ;;  %v13277_v17 = vcombine.high %v697_v11, %v701_v12  ;;  %v13279_v18 = vcombine.high %v698_v13, %v702_v14  ;;  %v753_v11 = vld [vmem:[%s19811_s1 + $0x1610] sm:$0xff] }
 0x43b   :  { %10936 = vmatprep.subr.bf16.mxu0 %v13221_v19  ;;  %11495 = vmatprep.subr.bf16.mxu1 %v13223_v20  ;;  %v705_v19 = vld [vmem:[%s19811_s1 + $0x1490] sm:$0xff] }
 0x43c   :  { %v709_v20 = vld [vmem:[%s19811_s1 + $0x14b0] sm:$0xff] }
 0x43d   :  { %v757_v12 = vld [vmem:[%s19811_s1 + $0x1630] sm:$0xff] }
 0x43e   :  { %10937 = vmatpush1.bf16.msra.mxu0 %v13220_v25  ;;  %11496 = vmatpush1.bf16.msra.mxu1 %v13222_v26  ;;  %v13278_v25 = vcombine.low %v698_v13, %v702_v14  ;;  %v13285_v26 = vcombine.high %v705_v19, %v709_v20  ;;  %v754_v13 = vld [vmem:[%s19811_s1 + $0x1618] sm:$0xff] }
 0x43f   :  { %10938 = vmatprep.subr.bf16.mxu0 %v13229_v27  ;;  %11497 = vmatprep.subr.bf16.mxu1 %v13231_v28  ;;  %v13287_v27 = vcombine.high %v706_v22, %v710_v23  ;;  %v713_v28 = vld [vmem:[%s19811_s1 + $0x14d0] sm:$0xff]  ;;  %v758_v14 = vld [vmem:[%s19811_s1 + $0x1638] sm:$0xff] }
 0x442   :  { %10939 = vmatpush1.bf16.msra.mxu0 %v13228_v33  ;;  %11498 = vmatpush1.bf16.msra.mxu1 %v13230_v34  ;;  %v13284_v33 = vcombine.low %v705_v19, %v709_v20  ;;  %v13286_v34 = vcombine.low %v706_v22, %v710_v23  ;;  %v761_v19 = vld [vmem:[%s19811_s1 + $0x1650] sm:$0xff]  ;;  %v766_v22 = vld [vmem:[%s19811_s1 + $0x1678] sm:$0xff]  ;;  %v13332_v23 = vcombine.low %v753_v11, %v757_v12 }
 0x443   :  { %10940 = vmatprep.subr.bf16.mxu0 %v13237_v35  ;;  %11499 = vmatprep.subr.bf16.mxu1 %v13239_v36  ;;  %v13293_v35 = vcombine.high %v713_v28, %v717_v29  ;;  %v13295_v36 = vcombine.high %v714_v31, %v718_v32  ;;  %v765_v20 = vld [vmem:[%s19811_s1 + $0x1670] sm:$0xff] }
 0x446   :  { %10941 = vmatpush1.bf16.msra.mxu0 %v13236_v41  ;;  %11500 = vmatpush1.bf16.msra.mxu1 %v13238_v43  ;;  %v13292_v41 = vcombine.low %v713_v28, %v717_v29  ;;  %v13294_v43 = vcombine.low %v714_v31, %v718_v32  ;;  %v773_v28 = vld [vmem:[%s19811_s1 + $0x16b0] sm:$0xff]  ;;  %v770_v29 = vld [vmem:[%s19811_s1 + $0x1698] sm:$0xff]  ;;  %v13340_v31 = vcombine.low %v761_v19, %v765_v20 }
 0x447   :  { %10942 = vmatprep.subr.bf16.mxu0 %v13245_v44  ;;  %11501 = vmatprep.subr.bf16.mxu1 %v13247_v45  ;;  %v13301_v44 = vcombine.high %v721_v37, %v725_v38  ;;  %v13303_v45 = vcombine.high %v722_v39, %v726_v40 }
 0x44a   :  { %10943 = vmatpush1.bf16.msra.mxu0 %v13244_v54  ;;  %11502 = vmatpush1.bf16.msra.mxu1 %v13246_v55  ;;  %v13300_v54 = vcombine.low %v721_v37, %v725_v38  ;;  %v13302_v55 = vcombine.low %v722_v39, %v726_v40  ;;  %v778_v37 = vld [vmem:[%s19811_s1 + $0x16d8] sm:$0xff] }
 0x44b   :  { %10944 = vmatprep.subr.bf16.mxu0 %v13253_v57  ;;  %11503 = vmatprep.subr.bf16.mxu1 %v13255_v58  ;;  %v13309_v57 = vcombine.high %v729_v46, %v733_v49  ;;  %v13311_v58 = vcombine.high %v730_v50, %v734_v53  ;;  %v782_v38 = vld [vmem:[%s19811_s1 + $0x16f8] sm:$0xff] }
 0x44e   :  { %10945 = vmatpush1.bf16.msra.mxu0 %v13252_v63  ;;  %11504 = vmatpush1.bf16.msra.mxu1 %v13254_v0  ;;  %v13308_v63 = vcombine.low %v729_v46, %v733_v49  ;;  %v13310_v0 = vcombine.low %v730_v50, %v734_v53  ;;  %v786_v46 = vld [vmem:[%s19811_s1 + $0x1718] sm:$0xff]  ;;  %v13358_v53 = vcombine.low %v778_v37, %v782_v38 }
 0x44f   :  { %10946 = vmatprep.subr.bf16.mxu0 %v13261_v1  ;;  %11505 = vmatprep.subr.bf16.mxu1 %v13263_v2  ;;  %v13317_v1 = vcombine.high %v737_v59, %v741_v60  ;;  %v13319_v2 = vcombine.high %v738_v61, %v742_v62  ;;  %v790_v49 = vld [vmem:[%s19811_s1 + $0x1738] sm:$0xff] }
 0x452   :  { %10947 = vmatpush1.bf16.msra.mxu0 %v13260_v7  ;;  %11506 = vmatpush1.bf16.msra.mxu1 %v13262_v8  ;;  %v13316_v7 = vcombine.low %v737_v59, %v741_v60  ;;  %v13318_v8 = vcombine.low %v738_v61, %v742_v62  ;;  %v794_v59 = vld [vmem:[%s19811_s1 + $0x1758] sm:$0xff]  ;;  %v13366_v62 = vcombine.low %v786_v46, %v790_v49 }
 0x453   :  { %10959 = vmatprep.subr.bf16.mxu0 %v13269_v9  ;;  %11518 = vmatprep.subr.bf16.mxu1 %v13271_v10  ;;  %v13325_v9 = vcombine.high %v745_v3, %v749_v4  ;;  %v13327_v10 = vcombine.high %v746_v5, %v750_v6  ;;  %v798_v60 = vld [vmem:[%s19811_s1 + $0x1778] sm:$0xff] }
 0x455   :  { %10949 = vmatmul.mubr.bf16.vlgmr.msra.gmra.mrb[4].mxu0 %v14671_v21  ;;  %11508 = vmatmul.mubr.bf16.vlgmr.msra.gmra.mrb[4].mxu1 %v14671_v21  ;;  %v762_v21 = vld [vmem:[%s19811_s1 + $0x1658] sm:$0xff] }
 0x456   :  { %10960 = vmatpush1.bf16.msra.mxu0 %v13268_v15  ;;  %11519 = vmatpush1.bf16.msra.mxu1 %v13270_v16  ;;  %v13324_v15 = vcombine.low %v745_v3, %v749_v4  ;;  %v13326_v16 = vcombine.low %v746_v5, %v750_v6  ;;  %v13342_v32 = vcombine.low %v762_v21, %v766_v22  ;;  %v802_v3 = vld [vmem:[%s19811_s1 + $0x1798] sm:$0xff] }
 0x457   :  { %10961 = vmatprep.subr.bf16.mxu0 %v13277_v17  ;;  %11520 = vmatprep.subr.bf16.mxu1 %v13279_v18  ;;  %v13333_v17 = vcombine.high %v753_v11, %v757_v12  ;;  %v13335_v18 = vcombine.high %v754_v13, %v758_v14  ;;  %v806_v4 = vld [vmem:[%s19811_s1 + $0x17b8] sm:$0xff]  ;;  %v13374_v6 = vcombine.low %v794_v59, %v798_v60 }
 0x458   :  { %10991 = vmatprep.mubr.bf16.mxu0 %v14672_v30  ;;  %11550 = vmatprep.mubr.bf16.mxu1 %v14672_v30  ;;  %v774_v30 = vld [vmem:[%s19811_s1 + $0x16b8] sm:$0xff] }
 0x459   :  { %v13350_v40 = vcombine.low %v770_v29, %v774_v30  ;;  %v810_v11 = vld [vmem:[%s19811_s1 + $0x17d8] sm:$0xff] }
 0x45a   :  { %10962 = vmatpush1.bf16.msra.mxu0 %v13276_v24  ;;  %11521 = vmatpush1.bf16.msra.mxu1 %v13278_v25  ;;  %v13334_v24 = vcombine.low %v754_v13, %v758_v14  ;;  %v13341_v25 = vcombine.high %v761_v19, %v765_v20  ;;  %v814_v12 = vld [vmem:[%s19811_s1 + $0x17f8] sm:$0xff]  ;;  %v13382_v14 = vcombine.low %v802_v3, %v806_v4 }
 0x45b   :  { %10963 = vmatprep.subr.bf16.mxu0 %v13285_v26  ;;  %11522 = vmatprep.subr.bf16.mxu1 %v13287_v27  ;;  %v13343_v26 = vcombine.high %v762_v21, %v766_v22  ;;  %v769_v27 = vld [vmem:[%s19811_s1 + $0x1690] sm:$0xff]  ;;  %v818_v19 = vld [vmem:[%s19811_s1 + $0x1818] sm:$0xff]  ;;  %v13390_v22 = vcombine.low %v810_v11, %v814_v12 }
 0x45c   :  { %v13348_v39 = vcombine.low %v769_v27, %v773_v28  ;;  %v822_v20 = vld [vmem:[%s19811_s1 + $0x1838] sm:$0xff] }
 0x45e   :  { %10964 = vmatpush1.bf16.msra.mxu0 %v13284_v33  ;;  %11523 = vmatpush1.bf16.msra.mxu1 %v13286_v34  ;;  %v13349_v33 = vcombine.high %v769_v27, %v773_v28  ;;  %v13351_v34 = vcombine.high %v770_v29, %v774_v30  ;;  %v826_v27 = vld [vmem:[%s19811_s1 + $0x1858] sm:$0xff]  ;;  %v13398_v30 = vcombine.low %v818_v19, %v822_v20 }
 0x45f   :  { %10965 = vmatprep.subr.bf16.mxu0 %v13293_v35  ;;  %11524 = vmatprep.subr.bf16.mxu1 %v13295_v36  ;;  %v777_v35 = vld [vmem:[%s19811_s1 + $0x16d0] sm:$0xff]  ;;  %v830_v28 = vld [vmem:[%s19811_s1 + $0x1878] sm:$0xff] }
 0x460   :  { %v781_v36 = vld [vmem:[%s19811_s1 + $0x16f0] sm:$0xff] }
 0x461   :  { %v13356_v50 = vcombine.low %v777_v35, %v781_v36 }
 0x462   :  { %10966 = vmatpush1.bf16.msra.mxu0 %v13292_v41  ;;  %11525 = vmatpush1.bf16.msra.mxu1 %v13294_v43  ;;  %v13357_v41 = vcombine.high %v777_v35, %v781_v36  ;;  %v13359_v43 = vcombine.high %v778_v37, %v782_v38  ;;  %v14673_v35 = vld [vmem:[%s19812_s0 + $0x28] ss:$100 sps:$4 sm:$0xff]   ;;  %v834_v36 = vld [vmem:[%s19811_s1 + $0x1898] sm:$0xff] }
 0x463   :  { %10967 = vmatprep.subr.bf16.mxu0 %v13301_v44  ;;  %11526 = vmatprep.subr.bf16.mxu1 %v13303_v45  ;;  %v785_v44 = vld [vmem:[%s19811_s1 + $0x1710] sm:$0xff]  ;;  %v838_v37 = vld [vmem:[%s19811_s1 + $0x18b8] sm:$0xff] }
 0x464   :  { %v789_v45 = vld [vmem:[%s19811_s1 + $0x1730] sm:$0xff] }
 0x465   :  { %v13364_v61 = vcombine.low %v785_v44, %v789_v45 }
 0x466   :  { %10968 = vmatpush1.bf16.msra.mxu0 %v13300_v54  ;;  %11527 = vmatpush1.bf16.msra.mxu1 %v13302_v55  ;;  %v13365_v54 = vcombine.high %v785_v44, %v789_v45  ;;  %v13367_v55 = vcombine.high %v786_v46, %v790_v49  ;;  %v845_v44 = vld [vmem:[%s19811_s1 + $0x18f0] sm:$0xff]  ;;  %v842_v46 = vld [vmem:[%s19811_s1 + $0x18d8] sm:$0xff] }
 0x467   :  { %10969 = vmatprep.subr.bf16.mxu0 %v13309_v57  ;;  %11528 = vmatprep.subr.bf16.mxu1 %v13311_v58  ;;  %v793_v57 = vld [vmem:[%s19811_s1 + $0x1750] sm:$0xff]  ;;  %v846_v49 = vld [vmem:[%s19811_s1 + $0x18f8] sm:$0xff] }
 0x468   :  { %v797_v58 = vld [vmem:[%s19811_s1 + $0x1770] sm:$0xff] }
 0x469   :  { %v13372_v5 = vcombine.low %v793_v57, %v797_v58  ;;  %v14674_v45 = vld [vmem:[%s19812_s0 + $0x34] ss:$100 sps:$4 sm:$0xff]  }
 0x46a   :  { %10970 = vmatpush1.bf16.msra.mxu0 %v13308_v63  ;;  %11529 = vmatpush1.bf16.msra.mxu1 %v13310_v0  ;;  %v13373_v63 = vcombine.high %v793_v57, %v797_v58  ;;  %v13375_v0 = vcombine.high %v794_v59, %v798_v60  ;;  %v849_v57 = vld [vmem:[%s19811_s1 + $0x1910] sm:$0xff]  ;;  %v850_v59 = vld [vmem:[%s19811_s1 + $0x1918] sm:$0xff] }
 0x46b   :  { %10971 = vmatprep.subr.bf16.mxu0 %v13317_v1  ;;  %11530 = vmatprep.subr.bf16.mxu1 %v13319_v2  ;;  %v801_v1 = vld [vmem:[%s19811_s1 + $0x1790] sm:$0xff]  ;;  %v854_v60 = vld [vmem:[%s19811_s1 + $0x1938] sm:$0xff] }
 0x46c   :  { %v805_v2 = vld [vmem:[%s19811_s1 + $0x17b0] sm:$0xff] }
 0x46d   :  { %v13380_v13 = vcombine.low %v801_v1, %v805_v2  ;;  %v853_v58 = vld [vmem:[%s19811_s1 + $0x1930] sm:$0xff] }
 0x46e   :  { %10972 = vmatpush1.bf16.msra.mxu0 %v13316_v7  ;;  %11531 = vmatpush1.bf16.msra.mxu1 %v13318_v8  ;;  %v13381_v7 = vcombine.high %v801_v1, %v805_v2  ;;  %v13383_v8 = vcombine.high %v802_v3, %v806_v4  ;;  %v857_v1 = vld [vmem:[%s19811_s1 + $0x1950] sm:$0xff]  ;;  %v858_v3 = vld [vmem:[%s19811_s1 + $0x1958] sm:$0xff] }
 0x46f   :  { %10973 = vmatprep.subr.bf16.mxu0 %v13325_v9  ;;  %11532 = vmatprep.subr.bf16.mxu1 %v13327_v10  ;;  %v809_v9 = vld [vmem:[%s19811_s1 + $0x17d0] sm:$0xff]  ;;  %v862_v4 = vld [vmem:[%s19811_s1 + $0x1978] sm:$0xff] }
 0x470   :  { %v813_v10 = vld [vmem:[%s19811_s1 + $0x17f0] sm:$0xff] }
 0x471   :  { %v13388_v21 = vcombine.low %v809_v9, %v813_v10  ;;  %v861_v2 = vld [vmem:[%s19811_s1 + $0x1970] sm:$0xff] }
 0x472   :  { %10974 = vmatpush1.bf16.msra.mxu0 %v13324_v15  ;;  %11533 = vmatpush1.bf16.msra.mxu1 %v13326_v16  ;;  %v13389_v15 = vcombine.high %v809_v9, %v813_v10  ;;  %v13391_v16 = vcombine.high %v810_v11, %v814_v12  ;;  %v865_v9 = vld [vmem:[%s19811_s1 + $0x1990] sm:$0xff]  ;;  %v866_v11 = vld [vmem:[%s19811_s1 + $0x1998] sm:$0xff] }
 0x473   :  { %10975 = vmatprep.subr.bf16.mxu0 %v13333_v17  ;;  %11534 = vmatprep.subr.bf16.mxu1 %v13335_v18  ;;  %v817_v17 = vld [vmem:[%s19811_s1 + $0x1810] sm:$0xff]  ;;  %v870_v12 = vld [vmem:[%s19811_s1 + $0x19b8] sm:$0xff] }
 0x474   :  { %v821_v18 = vld [vmem:[%s19811_s1 + $0x1830] sm:$0xff] }
 0x475   :  { %v13396_v29 = vcombine.low %v817_v17, %v821_v18  ;;  %v869_v10 = vld [vmem:[%s19811_s1 + $0x19b0] sm:$0xff] }
 0x476   :  { %10976 = vmatpush1.bf16.msra.mxu0 %v13332_v23  ;;  %11535 = vmatpush1.bf16.msra.mxu1 %v13334_v24  ;;  %v13397_v23 = vcombine.high %v817_v17, %v821_v18  ;;  %v13399_v24 = vcombine.high %v818_v19, %v822_v20  ;;  %v873_v17 = vld [vmem:[%s19811_s1 + $0x19d0] sm:$0xff]  ;;  %v874_v19 = vld [vmem:[%s19811_s1 + $0x19d8] sm:$0xff] }
 0x477   :  { %10977 = vmatprep.subr.bf16.mxu0 %v13341_v25  ;;  %11536 = vmatprep.subr.bf16.mxu1 %v13343_v26  ;;  %v825_v25 = vld [vmem:[%s19811_s1 + $0x1850] sm:$0xff]  ;;  %v878_v20 = vld [vmem:[%s19811_s1 + $0x19f8] sm:$0xff] }
 0x478   :  { %v829_v26 = vld [vmem:[%s19811_s1 + $0x1870] sm:$0xff] }
 0x479   :  { %v13404_v38 = vcombine.low %v825_v25, %v829_v26  ;;  %v877_v18 = vld [vmem:[%s19811_s1 + $0x19f0] sm:$0xff] }
 0x47a   :  { %10978 = vmatpush1.bf16.msra.mxu0 %v13340_v31  ;;  %11537 = vmatpush1.bf16.msra.mxu1 %v13342_v32  ;;  %v13405_v31 = vcombine.high %v825_v25, %v829_v26  ;;  %v13407_v32 = vcombine.high %v826_v27, %v830_v28  ;;  %v881_v25 = vld [vmem:[%s19811_s1 + $0x1a10] sm:$0xff] }
 0x47b   :  { %10979 = vmatprep.subr.bf16.mxu0 %v13349_v33  ;;  %11538 = vmatprep.subr.bf16.mxu1 %v13351_v34  ;;  %v833_v33 = vld [vmem:[%s19811_s1 + $0x1890] sm:$0xff] }
 0x47c   :  { %v837_v34 = vld [vmem:[%s19811_s1 + $0x18b0] sm:$0xff] }
 0x47d   :  { %v885_v26 = vld [vmem:[%s19811_s1 + $0x1a30] sm:$0xff] }
 0x47e   :  { %10980 = vmatpush1.bf16.msra.mxu0 %v13348_v39  ;;  %11539 = vmatpush1.bf16.msra.mxu1 %v13350_v40  ;;  %v13406_v39 = vcombine.low %v826_v27, %v830_v28  ;;  %v13413_v40 = vcombine.high %v833_v33, %v837_v34  ;;  %v882_v27 = vld [vmem:[%s19811_s1 + $0x1a18] sm:$0xff] }
 0x47f   :  { %10981 = vmatprep.subr.bf16.mxu0 %v13357_v41  ;;  %11540 = vmatprep.subr.bf16.mxu1 %v13359_v43  ;;  %v13415_v41 = vcombine.high %v834_v36, %v838_v37  ;;  %v841_v43 = vld [vmem:[%s19811_s1 + $0x18d0] sm:$0xff]  ;;  %v886_v28 = vld [vmem:[%s19811_s1 + $0x1a38] sm:$0xff] }
 0x482   :  { %10982 = vmatpush1.bf16.msra.mxu0 %v13356_v50  ;;  %11541 = vmatpush1.bf16.msra.mxu1 %v13358_v53  ;;  %v13412_v50 = vcombine.low %v833_v33, %v837_v34  ;;  %v13414_v53 = vcombine.low %v834_v36, %v838_v37  ;;  %v889_v33 = vld [vmem:[%s19811_s1 + $0x1a50] sm:$0xff]  ;;  %v894_v36 = vld [vmem:[%s19811_s1 + $0x1a78] sm:$0xff]  ;;  %v13460_v37 = vcombine.low %v881_v25, %v885_v26 }
 0x483   :  { %10983 = vmatprep.subr.bf16.mxu0 %v13365_v54  ;;  %11542 = vmatprep.subr.bf16.mxu1 %v13367_v55  ;;  %v13421_v54 = vcombine.high %v841_v43, %v845_v44  ;;  %v13423_v55 = vcombine.high %v842_v46, %v846_v49  ;;  %v893_v34 = vld [vmem:[%s19811_s1 + $0x1a70] sm:$0xff] }
 0x486   :  { %10984 = vmatpush1.bf16.msra.mxu0 %v13364_v61  ;;  %11543 = vmatpush1.bf16.msra.mxu1 %v13366_v62  ;;  %v13420_v61 = vcombine.low %v841_v43, %v845_v44  ;;  %v13422_v62 = vcombine.low %v842_v46, %v846_v49  ;;  %v901_v43 = vld [vmem:[%s19811_s1 + $0x1ab0] sm:$0xff]  ;;  %v898_v44 = vld [vmem:[%s19811_s1 + $0x1a98] sm:$0xff]  ;;  %v13468_v46 = vcombine.low %v889_v33, %v893_v34 }
 0x487   :  { %10985 = vmatprep.subr.bf16.mxu0 %v13373_v63  ;;  %11544 = vmatprep.subr.bf16.mxu1 %v13375_v0  ;;  %v13429_v63 = vcombine.high %v849_v57, %v853_v58  ;;  %v13431_v0 = vcombine.high %v850_v59, %v854_v60 }
 0x48a   :  { %10986 = vmatpush1.bf16.msra.mxu0 %v13372_v5  ;;  %11545 = vmatpush1.bf16.msra.mxu1 %v13374_v6  ;;  %v13428_v5 = vcombine.low %v849_v57, %v853_v58  ;;  %v13430_v6 = vcombine.low %v850_v59, %v854_v60  ;;  %v906_v57 = vld [vmem:[%s19811_s1 + $0x1ad8] sm:$0xff] }
 0x48b   :  { %10987 = vmatprep.subr.bf16.mxu0 %v13381_v7  ;;  %11546 = vmatprep.subr.bf16.mxu1 %v13383_v8  ;;  %v13437_v7 = vcombine.high %v857_v1, %v861_v2  ;;  %v13439_v8 = vcombine.high %v858_v3, %v862_v4  ;;  %v910_v58 = vld [vmem:[%s19811_s1 + $0x1af8] sm:$0xff] }
 0x48e   :  { %10988 = vmatpush1.bf16.msra.mxu0 %v13380_v13  ;;  %11547 = vmatpush1.bf16.msra.mxu1 %v13382_v14  ;;  %v13436_v13 = vcombine.low %v857_v1, %v861_v2  ;;  %v13438_v14 = vcombine.low %v858_v3, %v862_v4  ;;  %v914_v1 = vld [vmem:[%s19811_s1 + $0x1b18] sm:$0xff]  ;;  %v13486_v4 = vcombine.low %v906_v57, %v910_v58 }
 0x48f   :  { %10989 = vmatprep.subr.bf16.mxu0 %v13389_v15  ;;  %11548 = vmatprep.subr.bf16.mxu1 %v13391_v16  ;;  %v13445_v15 = vcombine.high %v865_v9, %v869_v10  ;;  %v13447_v16 = vcombine.high %v866_v11, %v870_v12  ;;  %v918_v2 = vld [vmem:[%s19811_s1 + $0x1b38] sm:$0xff] }
 0x492   :  { %10990 = vmatpush1.bf16.msra.mxu0 %v13388_v21  ;;  %11549 = vmatpush1.bf16.msra.mxu1 %v13390_v22  ;;  %v13444_v21 = vcombine.low %v865_v9, %v869_v10  ;;  %v13446_v22 = vcombine.low %v866_v11, %v870_v12  ;;  %v922_v9 = vld [vmem:[%s19811_s1 + $0x1b58] sm:$0xff]  ;;  %v13494_v12 = vcombine.low %v914_v1, %v918_v2 }
 0x493   :  { %11002 = vmatprep.subr.bf16.mxu0 %v13397_v23  ;;  %11561 = vmatprep.subr.bf16.mxu1 %v13399_v24  ;;  %v13453_v23 = vcombine.high %v873_v17, %v877_v18  ;;  %v13455_v24 = vcombine.high %v874_v19, %v878_v20  ;;  %v926_v10 = vld [vmem:[%s19811_s1 + $0x1b78] sm:$0xff] }
 0x495   :  { %10992 = vmatmul.mubr.bf16.vlgmr.msra.gmra.mrb[4].mxu0 %v14673_v35  ;;  %11551 = vmatmul.mubr.bf16.vlgmr.msra.gmra.mrb[4].mxu1 %v14673_v35  ;;  %v890_v35 = vld [vmem:[%s19811_s1 + $0x1a58] sm:$0xff] }
 0x496   :  { %11003 = vmatpush1.bf16.msra.mxu0 %v13396_v29  ;;  %11562 = vmatpush1.bf16.msra.mxu1 %v13398_v30  ;;  %v13452_v29 = vcombine.low %v873_v17, %v877_v18  ;;  %v13454_v30 = vcombine.low %v874_v19, %v878_v20  ;;  %v13470_v49 = vcombine.low %v890_v35, %v894_v36  ;;  %v930_v17 = vld [vmem:[%s19811_s1 + $0x1b98] sm:$0xff] }
 0x497   :  { %11004 = vmatprep.subr.bf16.mxu0 %v13405_v31  ;;  %11563 = vmatprep.subr.bf16.mxu1 %v13407_v32  ;;  %v13461_v31 = vcombine.high %v881_v25, %v885_v26  ;;  %v13463_v32 = vcombine.high %v882_v27, %v886_v28  ;;  %v934_v18 = vld [vmem:[%s19811_s1 + $0x1bb8] sm:$0xff]  ;;  %v13502_v20 = vcombine.low %v922_v9, %v926_v10 }
 0x498   :  { %11034 = vmatprep.mubr.bf16.mxu0 %v14674_v45  ;;  %11593 = vmatprep.mubr.bf16.mxu1 %v14674_v45  ;;  %v902_v45 = vld [vmem:[%s19811_s1 + $0x1ab8] sm:$0xff] }
 0x499   :  { %v13478_v60 = vcombine.low %v898_v44, %v902_v45  ;;  %v938_v25 = vld [vmem:[%s19811_s1 + $0x1bd8] sm:$0xff] }
 0x49a   :  { %11005 = vmatpush1.bf16.msra.mxu0 %v13404_v38  ;;  %11564 = vmatpush1.bf16.msra.mxu1 %v13406_v39  ;;  %v13462_v38 = vcombine.low %v882_v27, %v886_v28  ;;  %v13469_v39 = vcombine.high %v889_v33, %v893_v34  ;;  %v942_v26 = vld [vmem:[%s19811_s1 + $0x1bf8] sm:$0xff]  ;;  %v13510_v28 = vcombine.low %v930_v17, %v934_v18 }
 0x49b   :  { %11006 = vmatprep.subr.bf16.mxu0 %v13413_v40  ;;  %11565 = vmatprep.subr.bf16.mxu1 %v13415_v41  ;;  %v13471_v40 = vcombine.high %v890_v35, %v894_v36  ;;  %v897_v41 = vld [vmem:[%s19811_s1 + $0x1a90] sm:$0xff]  ;;  %v946_v33 = vld [vmem:[%s19811_s1 + $0x1c18] sm:$0xff]  ;;  %v13518_v36 = vcombine.low %v938_v25, %v942_v26 }
 0x49c   :  { %v13476_v59 = vcombine.low %v897_v41, %v901_v43  ;;  %v950_v34 = vld [vmem:[%s19811_s1 + $0x1c38] sm:$0xff] }
 0x49e   :  { %11007 = vmatpush1.bf16.msra.mxu0 %v13412_v50  ;;  %11566 = vmatpush1.bf16.msra.mxu1 %v13414_v53  ;;  %v13477_v50 = vcombine.high %v897_v41, %v901_v43  ;;  %v13479_v53 = vcombine.high %v898_v44, %v902_v45  ;;  %v954_v41 = vld [vmem:[%s19811_s1 + $0x1c58] sm:$0xff]  ;;  %v13526_v45 = vcombine.low %v946_v33, %v950_v34 }
 0x49f   :  { %11008 = vmatprep.subr.bf16.mxu0 %v13421_v54  ;;  %11567 = vmatprep.subr.bf16.mxu1 %v13423_v55  ;;  %v905_v54 = vld [vmem:[%s19811_s1 + $0x1ad0] sm:$0xff]  ;;  %v958_v43 = vld [vmem:[%s19811_s1 + $0x1c78] sm:$0xff] }
 0x4a0   :  { %v909_v55 = vld [vmem:[%s19811_s1 + $0x1af0] sm:$0xff] }
 0x4a1   :  { %v13484_v3 = vcombine.low %v905_v54, %v909_v55 }
 0x4a2   :  { %11009 = vmatpush1.bf16.msra.mxu0 %v13420_v61  ;;  %11568 = vmatpush1.bf16.msra.mxu1 %v13422_v62  ;;  %v13485_v61 = vcombine.high %v905_v54, %v909_v55  ;;  %v13487_v62 = vcombine.high %v906_v57, %v910_v58  ;;  %v14675_v54 = vld [vmem:[%s19812_s0 + $0x30] ss:$100 sps:$4 sm:$0xff]   ;;  %v962_v55 = vld [vmem:[%s19811_s1 + $0x1c98] sm:$0xff] }
 0x4a3   :  { %11010 = vmatprep.subr.bf16.mxu0 %v13429_v63  ;;  %11569 = vmatprep.subr.bf16.mxu1 %v13431_v0  ;;  %v913_v63 = vld [vmem:[%s19811_s1 + $0x1b10] sm:$0xff]  ;;  %v966_v57 = vld [vmem:[%s19811_s1 + $0x1cb8] sm:$0xff] }
 0x4a4   :  { %v917_v0 = vld [vmem:[%s19811_s1 + $0x1b30] sm:$0xff] }
 0x4a5   :  { %v13492_v11 = vcombine.low %v913_v63, %v917_v0 }
 0x4a6   :  { %11011 = vmatpush1.bf16.msra.mxu0 %v13428_v5  ;;  %11570 = vmatpush1.bf16.msra.mxu1 %v13430_v6  ;;  %v13493_v5 = vcombine.high %v913_v63, %v917_v0  ;;  %v13495_v6 = vcombine.high %v914_v1, %v918_v2  ;;  %v973_v63 = vld [vmem:[%s19811_s1 + $0x1cf0] sm:$0xff]  ;;  %v14676_v0 = vld [vmem:[%s19812_s0 + $0x3c] ss:$100 sps:$4 sm:$0xff]  }
 0x4a7   :  { %11012 = vmatprep.subr.bf16.mxu0 %v13437_v7  ;;  %11571 = vmatprep.subr.bf16.mxu1 %v13439_v8  ;;  %v921_v7 = vld [vmem:[%s19811_s1 + $0x1b50] sm:$0xff]  ;;  %v970_v1 = vld [vmem:[%s19811_s1 + $0x1cd8] sm:$0xff] }
 0x4a8   :  { %v925_v8 = vld [vmem:[%s19811_s1 + $0x1b70] sm:$0xff]  ;;  %v974_v2 = vld [vmem:[%s19811_s1 + $0x1cf8] sm:$0xff] }
 0x4a9   :  { %v13500_v19 = vcombine.low %v921_v7, %v925_v8 }
 0x4aa   :  { %11013 = vmatpush1.bf16.msra.mxu0 %v13436_v13  ;;  %11572 = vmatpush1.bf16.msra.mxu1 %v13438_v14  ;;  %v13501_v13 = vcombine.high %v921_v7, %v925_v8  ;;  %v13503_v14 = vcombine.high %v922_v9, %v926_v10  ;;  %v977_v7 = vld [vmem:[%s19811_s1 + $0x1d10] sm:$0xff]  ;;  %v978_v9 = vld [vmem:[%s19811_s1 + $0x1d18] sm:$0xff] }
 0x4ab   :  { %11014 = vmatprep.subr.bf16.mxu0 %v13445_v15  ;;  %11573 = vmatprep.subr.bf16.mxu1 %v13447_v16  ;;  %v929_v15 = vld [vmem:[%s19811_s1 + $0x1b90] sm:$0xff]  ;;  %v982_v10 = vld [vmem:[%s19811_s1 + $0x1d38] sm:$0xff] }
 0x4ac   :  { %v933_v16 = vld [vmem:[%s19811_s1 + $0x1bb0] sm:$0xff] }
 0x4ad   :  { %v13508_v27 = vcombine.low %v929_v15, %v933_v16  ;;  %v981_v8 = vld [vmem:[%s19811_s1 + $0x1d30] sm:$0xff] }
 0x4ae   :  { %11015 = vmatpush1.bf16.msra.mxu0 %v13444_v21  ;;  %11574 = vmatpush1.bf16.msra.mxu1 %v13446_v22  ;;  %v13509_v21 = vcombine.high %v929_v15, %v933_v16  ;;  %v13511_v22 = vcombine.high %v930_v17, %v934_v18  ;;  %v985_v15 = vld [vmem:[%s19811_s1 + $0x1d50] sm:$0xff]  ;;  %v986_v17 = vld [vmem:[%s19811_s1 + $0x1d58] sm:$0xff] }
 0x4af   :  { %11016 = vmatprep.subr.bf16.mxu0 %v13453_v23  ;;  %11575 = vmatprep.subr.bf16.mxu1 %v13455_v24  ;;  %v937_v23 = vld [vmem:[%s19811_s1 + $0x1bd0] sm:$0xff]  ;;  %v990_v18 = vld [vmem:[%s19811_s1 + $0x1d78] sm:$0xff] }
 0x4b0   :  { %v941_v24 = vld [vmem:[%s19811_s1 + $0x1bf0] sm:$0xff] }
 0x4b1   :  { %v13516_v35 = vcombine.low %v937_v23, %v941_v24  ;;  %v989_v16 = vld [vmem:[%s19811_s1 + $0x1d70] sm:$0xff] }
 0x4b2   :  { %11017 = vmatpush1.bf16.msra.mxu0 %v13452_v29  ;;  %11576 = vmatpush1.bf16.msra.mxu1 %v13454_v30  ;;  %v13517_v29 = vcombine.high %v937_v23, %v941_v24  ;;  %v13519_v30 = vcombine.high %v938_v25, %v942_v26  ;;  %v993_v23 = vld [vmem:[%s19811_s1 + $0x1d90] sm:$0xff]  ;;  %v994_v25 = vld [vmem:[%s19811_s1 + $0x1d98] sm:$0xff] }
 0x4b3   :  { %11018 = vmatprep.subr.bf16.mxu0 %v13461_v31  ;;  %11577 = vmatprep.subr.bf16.mxu1 %v13463_v32  ;;  %v945_v31 = vld [vmem:[%s19811_s1 + $0x1c10] sm:$0xff]  ;;  %v998_v26 = vld [vmem:[%s19811_s1 + $0x1db8] sm:$0xff] }
 0x4b4   :  { %v949_v32 = vld [vmem:[%s19811_s1 + $0x1c30] sm:$0xff] }
 0x4b5   :  { %v13524_v44 = vcombine.low %v945_v31, %v949_v32  ;;  %v997_v24 = vld [vmem:[%s19811_s1 + $0x1db0] sm:$0xff] }
 0x4b6   :  { %11019 = vmatpush1.bf16.msra.mxu0 %v13460_v37  ;;  %11578 = vmatpush1.bf16.msra.mxu1 %v13462_v38  ;;  %v13525_v37 = vcombine.high %v945_v31, %v949_v32  ;;  %v13527_v38 = vcombine.high %v946_v33, %v950_v34  ;;  %v1001_v31 = vld [vmem:[%s19811_s1 + $0x1dd0] sm:$0xff]  ;;  %v1002_v33 = vld [vmem:[%s19811_s1 + $0x1dd8] sm:$0xff] }
 0x4b7   :  { %11020 = vmatprep.subr.bf16.mxu0 %v13469_v39  ;;  %11579 = vmatprep.subr.bf16.mxu1 %v13471_v40  ;;  %v953_v39 = vld [vmem:[%s19811_s1 + $0x1c50] sm:$0xff]  ;;  %v1006_v34 = vld [vmem:[%s19811_s1 + $0x1df8] sm:$0xff] }
 0x4b8   :  { %v957_v40 = vld [vmem:[%s19811_s1 + $0x1c70] sm:$0xff] }
 0x4b9   :  { %v13532_v58 = vcombine.low %v953_v39, %v957_v40  ;;  %v1005_v32 = vld [vmem:[%s19811_s1 + $0x1df0] sm:$0xff] }
 0x4ba   :  { %11021 = vmatpush1.bf16.msra.mxu0 %v13468_v46  ;;  %11580 = vmatpush1.bf16.msra.mxu1 %v13470_v49  ;;  %v13533_v46 = vcombine.high %v953_v39, %v957_v40  ;;  %v13535_v49 = vcombine.high %v954_v41, %v958_v43  ;;  %v1009_v39 = vld [vmem:[%s19811_s1 + $0x1e10] sm:$0xff] }
 0x4bb   :  { %11022 = vmatprep.subr.bf16.mxu0 %v13477_v50  ;;  %11581 = vmatprep.subr.bf16.mxu1 %v13479_v53  ;;  %v961_v50 = vld [vmem:[%s19811_s1 + $0x1c90] sm:$0xff] }
 0x4bc   :  { %v965_v53 = vld [vmem:[%s19811_s1 + $0x1cb0] sm:$0xff] }
 0x4bd   :  { %v1013_v40 = vld [vmem:[%s19811_s1 + $0x1e30] sm:$0xff] }
 0x4be   :  { %11023 = vmatpush1.bf16.msra.mxu0 %v13476_v59  ;;  %11582 = vmatpush1.bf16.msra.mxu1 %v13478_v60  ;;  %v13534_v59 = vcombine.low %v954_v41, %v958_v43  ;;  %v13541_v60 = vcombine.high %v961_v50, %v965_v53  ;;  %v1010_v41 = vld [vmem:[%s19811_s1 + $0x1e18] sm:$0xff] }
 0x4bf   :  { %11024 = vmatprep.subr.bf16.mxu0 %v13485_v61  ;;  %11583 = vmatprep.subr.bf16.mxu1 %v13487_v62  ;;  %v13543_v61 = vcombine.high %v962_v55, %v966_v57  ;;  %v969_v62 = vld [vmem:[%s19811_s1 + $0x1cd0] sm:$0xff]  ;;  %v1014_v43 = vld [vmem:[%s19811_s1 + $0x1e38] sm:$0xff] }
 0x4c2   :  { %11025 = vmatpush1.bf16.msra.mxu0 %v13484_v3  ;;  %11584 = vmatpush1.bf16.msra.mxu1 %v13486_v4  ;;  %v13540_v3 = vcombine.low %v961_v50, %v965_v53  ;;  %v13542_v4 = vcombine.low %v962_v55, %v966_v57  ;;  %v1017_v50 = vld [vmem:[%s19811_s1 + $0x1e50] sm:$0xff]  ;;  %v1022_v55 = vld [vmem:[%s19811_s1 + $0x1e78] sm:$0xff]  ;;  %v13588_v57 = vcombine.low %v1009_v39, %v1013_v40 }
 0x4c3   :  { %11026 = vmatprep.subr.bf16.mxu0 %v13493_v5  ;;  %11585 = vmatprep.subr.bf16.mxu1 %v13495_v6  ;;  %v13549_v5 = vcombine.high %v969_v62, %v973_v63  ;;  %v13551_v6 = vcombine.high %v970_v1, %v974_v2  ;;  %v1021_v53 = vld [vmem:[%s19811_s1 + $0x1e70] sm:$0xff] }
 0x4c6   :  { %11027 = vmatpush1.bf16.msra.mxu0 %v13492_v11  ;;  %11586 = vmatpush1.bf16.msra.mxu1 %v13494_v12  ;;  %v13548_v11 = vcombine.low %v969_v62, %v973_v63  ;;  %v13550_v12 = vcombine.low %v970_v1, %v974_v2  ;;  %v1029_v62 = vld [vmem:[%s19811_s1 + $0x1eb0] sm:$0xff]  ;;  %v1026_v63 = vld [vmem:[%s19811_s1 + $0x1e98] sm:$0xff]  ;;  %v13596_v1 = vcombine.low %v1017_v50, %v1021_v53 }
 0x4c7   :  { %11028 = vmatprep.subr.bf16.mxu0 %v13501_v13  ;;  %11587 = vmatprep.subr.bf16.mxu1 %v13503_v14  ;;  %v13557_v13 = vcombine.high %v977_v7, %v981_v8  ;;  %v13559_v14 = vcombine.high %v978_v9, %v982_v10 }
 0x4ca   :  { %11029 = vmatpush1.bf16.msra.mxu0 %v13500_v19  ;;  %11588 = vmatpush1.bf16.msra.mxu1 %v13502_v20  ;;  %v13556_v19 = vcombine.low %v977_v7, %v981_v8  ;;  %v13558_v20 = vcombine.low %v978_v9, %v982_v10  ;;  %v1034_v7 = vld [vmem:[%s19811_s1 + $0x1ed8] sm:$0xff] }
 0x4cb   :  { %11030 = vmatprep.subr.bf16.mxu0 %v13509_v21  ;;  %11589 = vmatprep.subr.bf16.mxu1 %v13511_v22  ;;  %v13565_v21 = vcombine.high %v985_v15, %v989_v16  ;;  %v13567_v22 = vcombine.high %v986_v17, %v990_v18  ;;  %v1038_v8 = vld [vmem:[%s19811_s1 + $0x1ef8] sm:$0xff] }
 0x4ce   :  { %11031 = vmatpush1.bf16.msra.mxu0 %v13508_v27  ;;  %11590 = vmatpush1.bf16.msra.mxu1 %v13510_v28  ;;  %v13564_v27 = vcombine.low %v985_v15, %v989_v16  ;;  %v13566_v28 = vcombine.low %v986_v17, %v990_v18  ;;  %v1042_v15 = vld [vmem:[%s19811_s1 + $0x1f18] sm:$0xff]  ;;  %v13614_v18 = vcombine.low %v1034_v7, %v1038_v8 }
 0x4cf   :  { %11032 = vmatprep.subr.bf16.mxu0 %v13517_v29  ;;  %11591 = vmatprep.subr.bf16.mxu1 %v13519_v30  ;;  %v13573_v29 = vcombine.high %v993_v23, %v997_v24  ;;  %v13575_v30 = vcombine.high %v994_v25, %v998_v26  ;;  %v1046_v16 = vld [vmem:[%s19811_s1 + $0x1f38] sm:$0xff] }
 0x4d2   :  { %11033 = vmatpush1.bf16.msra.mxu0 %v13516_v35  ;;  %11592 = vmatpush1.bf16.msra.mxu1 %v13518_v36  ;;  %v13572_v35 = vcombine.low %v993_v23, %v997_v24  ;;  %v13574_v36 = vcombine.low %v994_v25, %v998_v26  ;;  %v1050_v23 = vld [vmem:[%s19811_s1 + $0x1f58] sm:$0xff]  ;;  %v13622_v26 = vcombine.low %v1042_v15, %v1046_v16 }
 0x4d3   :  { %11045 = vmatprep.subr.bf16.mxu0 %v13525_v37  ;;  %11604 = vmatprep.subr.bf16.mxu1 %v13527_v38  ;;  %v13581_v37 = vcombine.high %v1001_v31, %v1005_v32  ;;  %v13583_v38 = vcombine.high %v1002_v33, %v1006_v34  ;;  %v1054_v24 = vld [vmem:[%s19811_s1 + $0x1f78] sm:$0xff] }
 0x4d5   :  { %11035 = vmatmul.mubr.bf16.vlgmr.msra.gmra.mrb[4].mxu0 %v14675_v54  ;;  %11594 = vmatmul.mubr.bf16.vlgmr.msra.gmra.mrb[4].mxu1 %v14675_v54  ;;  %v1018_v54 = vld [vmem:[%s19811_s1 + $0x1e58] sm:$0xff] }
 0x4d6   :  { %11046 = vmatpush1.bf16.msra.mxu0 %v13524_v44  ;;  %11605 = vmatpush1.bf16.msra.mxu1 %v13526_v45  ;;  %v13580_v44 = vcombine.low %v1001_v31, %v1005_v32  ;;  %v13582_v45 = vcombine.low %v1002_v33, %v1006_v34  ;;  %v13598_v2 = vcombine.low %v1018_v54, %v1022_v55  ;;  %v1058_v31 = vld [vmem:[%s19811_s1 + $0x1f98] sm:$0xff] }
 0x4d7   :  { %11047 = vmatprep.subr.bf16.mxu0 %v13533_v46  ;;  %11606 = vmatprep.subr.bf16.mxu1 %v13535_v49  ;;  %v13589_v46 = vcombine.high %v1009_v39, %v1013_v40  ;;  %v13591_v49 = vcombine.high %v1010_v41, %v1014_v43  ;;  %v1062_v32 = vld [vmem:[%s19811_s1 + $0x1fb8] sm:$0xff]  ;;  %v13630_v34 = vcombine.low %v1050_v23, %v1054_v24 }
 0x4d8   :  { %11077 = vmatprep.mubr.bf16.mxu0 %v14676_v0  ;;  %11636 = vmatprep.mubr.bf16.mxu1 %v14676_v0  ;;  %v1030_v0 = vld [vmem:[%s19811_s1 + $0x1eb8] sm:$0xff] }
 0x4d9   :  { %v13606_v10 = vcombine.low %v1026_v63, %v1030_v0  ;;  %v1066_v39 = vld [vmem:[%s19811_s1 + $0x1fd8] sm:$0xff] }
 0x4da   :  { %11048 = vmatpush1.bf16.msra.mxu0 %v13532_v58  ;;  %11607 = vmatpush1.bf16.msra.mxu1 %v13534_v59  ;;  %v13590_v58 = vcombine.low %v1010_v41, %v1014_v43  ;;  %v13597_v59 = vcombine.high %v1017_v50, %v1021_v53  ;;  %v1070_v40 = vld [vmem:[%s19811_s1 + $0x1ff8] sm:$0xff]  ;;  %v13638_v43 = vcombine.low %v1058_v31, %v1062_v32 }
 0x4db   :  { %11049 = vmatprep.subr.bf16.mxu0 %v13541_v60  ;;  %11608 = vmatprep.subr.bf16.mxu1 %v13543_v61  ;;  %v13599_v60 = vcombine.high %v1018_v54, %v1022_v55  ;;  %v1025_v61 = vld [vmem:[%s19811_s1 + $0x1e90] sm:$0xff]  ;;  %v1074_v50 = vld [vmem:[%s19811_s1 + $0x2018] sm:$0xff]  ;;  %v13646_v55 = vcombine.low %v1066_v39, %v1070_v40 }
 0x4dc   :  { %v13604_v9 = vcombine.low %v1025_v61, %v1029_v62  ;;  %v1078_v53 = vld [vmem:[%s19811_s1 + $0x2038] sm:$0xff] }
 0x4de   :  { %11050 = vmatpush1.bf16.msra.mxu0 %v13540_v3  ;;  %11609 = vmatpush1.bf16.msra.mxu1 %v13542_v4  ;;  %v13605_v3 = vcombine.high %v1025_v61, %v1029_v62  ;;  %v13607_v4 = vcombine.high %v1026_v63, %v1030_v0  ;;  %v1082_v61 = vld [vmem:[%s19811_s1 + $0x2058] sm:$0xff]  ;;  %v13654_v0 = vcombine.low %v1074_v50, %v1078_v53 }
 0x4df   :  { %11051 = vmatprep.subr.bf16.mxu0 %v13549_v5  ;;  %11610 = vmatprep.subr.bf16.mxu1 %v13551_v6  ;;  %v1033_v5 = vld [vmem:[%s19811_s1 + $0x1ed0] sm:$0xff]  ;;  %v1086_v62 = vld [vmem:[%s19811_s1 + $0x2078] sm:$0xff] }
 0x4e0   :  { %v1037_v6 = vld [vmem:[%s19811_s1 + $0x1ef0] sm:$0xff] }
 0x4e1   :  { %v13612_v17 = vcombine.low %v1033_v5, %v1037_v6 }
 0x4e2   :  { %11052 = vmatpush1.bf16.msra.mxu0 %v13548_v11  ;;  %11611 = vmatpush1.bf16.msra.mxu1 %v13550_v12  ;;  %v13613_v11 = vcombine.high %v1033_v5, %v1037_v6  ;;  %v13615_v12 = vcombine.high %v1034_v7, %v1038_v8  ;;  %v14677_v5 = vld [vmem:[%s19812_s0 + $0x38] ss:$100 sps:$4 sm:$0xff]  }
 0x4e3   :  { %11053 = vmatprep.subr.bf16.mxu0 %v13557_v13  ;;  %11612 = vmatprep.subr.bf16.mxu1 %v13559_v14  ;;  %v1041_v13 = vld [vmem:[%s19811_s1 + $0x1f10] sm:$0xff]  ;;  %v1090_v6 = vld [vmem:[%s19811_s1 + $0x2098] sm:$0xff] }
 0x4e4   :  { %v1045_v14 = vld [vmem:[%s19811_s1 + $0x1f30] sm:$0xff]  ;;  %v1094_v7 = vld [vmem:[%s19811_s1 + $0x20b8] sm:$0xff] }
 0x4e5   :  { %v13620_v25 = vcombine.low %v1041_v13, %v1045_v14 }
 0x4e6   :  { %11054 = vmatpush1.bf16.msra.mxu0 %v13556_v19  ;;  %11613 = vmatpush1.bf16.msra.mxu1 %v13558_v20  ;;  %v13621_v19 = vcombine.high %v1041_v13, %v1045_v14  ;;  %v13623_v20 = vcombine.high %v1042_v15, %v1046_v16  ;;  %v1101_v13 = vld [vmem:[%s19811_s1 + $0x20f0] sm:$0xff]  ;;  %v14678_v14 = vld [vmem:[%s19812_s0 + $0x44] ss:$100 sps:$4 sm:$0xff]   ;;  %v1098_v15 = vld [vmem:[%s19811_s1 + $0x20d8] sm:$0xff] }
 0x4e7   :  { %11055 = vmatprep.subr.bf16.mxu0 %v13565_v21  ;;  %11614 = vmatprep.subr.bf16.mxu1 %v13567_v22  ;;  %v1049_v21 = vld [vmem:[%s19811_s1 + $0x1f50] sm:$0xff]  ;;  %v1102_v16 = vld [vmem:[%s19811_s1 + $0x20f8] sm:$0xff] }
 0x4e8   :  { %v1053_v22 = vld [vmem:[%s19811_s1 + $0x1f70] sm:$0xff] }
 0x4e9   :  { %v13628_v33 = vcombine.low %v1049_v21, %v1053_v22 }
 0x4ea   :  { %11056 = vmatpush1.bf16.msra.mxu0 %v13564_v27  ;;  %11615 = vmatpush1.bf16.msra.mxu1 %v13566_v28  ;;  %v13629_v27 = vcombine.high %v1049_v21, %v1053_v22  ;;  %v13631_v28 = vcombine.high %v1050_v23, %v1054_v24  ;;  %v1105_v21 = vld [vmem:[%s19811_s1 + $0x2110] sm:$0xff]  ;;  %v1106_v23 = vld [vmem:[%s19811_s1 + $0x2118] sm:$0xff] }
 0x4eb   :  { %11057 = vmatprep.subr.bf16.mxu0 %v13573_v29  ;;  %11616 = vmatprep.subr.bf16.mxu1 %v13575_v30  ;;  %v1057_v29 = vld [vmem:[%s19811_s1 + $0x1f90] sm:$0xff]  ;;  %v1110_v24 = vld [vmem:[%s19811_s1 + $0x2138] sm:$0xff] }
 0x4ec   :  { %v1061_v30 = vld [vmem:[%s19811_s1 + $0x1fb0] sm:$0xff] }
 0x4ed   :  { %v13636_v41 = vcombine.low %v1057_v29, %v1061_v30  ;;  %v1109_v22 = vld [vmem:[%s19811_s1 + $0x2130] sm:$0xff] }
 0x4ee   :  { %11058 = vmatpush1.bf16.msra.mxu0 %v13572_v35  ;;  %11617 = vmatpush1.bf16.msra.mxu1 %v13574_v36  ;;  %v13637_v35 = vcombine.high %v1057_v29, %v1061_v30  ;;  %v13639_v36 = vcombine.high %v1058_v31, %v1062_v32  ;;  %v1113_v29 = vld [vmem:[%s19811_s1 + $0x2150] sm:$0xff]  ;;  %v1114_v31 = vld [vmem:[%s19811_s1 + $0x2158] sm:$0xff] }
 0x4ef   :  { %11059 = vmatprep.subr.bf16.mxu0 %v13581_v37  ;;  %11618 = vmatprep.subr.bf16.mxu1 %v13583_v38  ;;  %v1065_v37 = vld [vmem:[%s19811_s1 + $0x1fd0] sm:$0xff]  ;;  %v1118_v32 = vld [vmem:[%s19811_s1 + $0x2178] sm:$0xff] }
 0x4f0   :  { %v1069_v38 = vld [vmem:[%s19811_s1 + $0x1ff0] sm:$0xff] }
 0x4f1   :  { %v13644_v54 = vcombine.low %v1065_v37, %v1069_v38  ;;  %v1117_v30 = vld [vmem:[%s19811_s1 + $0x2170] sm:$0xff] }
 0x4f2   :  { %11060 = vmatpush1.bf16.msra.mxu0 %v13580_v44  ;;  %11619 = vmatpush1.bf16.msra.mxu1 %v13582_v45  ;;  %v13645_v44 = vcombine.high %v1065_v37, %v1069_v38  ;;  %v13647_v45 = vcombine.high %v1066_v39, %v1070_v40  ;;  %v1121_v37 = vld [vmem:[%s19811_s1 + $0x2190] sm:$0xff]  ;;  %v1122_v39 = vld [vmem:[%s19811_s1 + $0x2198] sm:$0xff] }
 0x4f3   :  { %11061 = vmatprep.subr.bf16.mxu0 %v13589_v46  ;;  %11620 = vmatprep.subr.bf16.mxu1 %v13591_v49  ;;  %v1073_v46 = vld [vmem:[%s19811_s1 + $0x2010] sm:$0xff]  ;;  %v1126_v40 = vld [vmem:[%s19811_s1 + $0x21b8] sm:$0xff] }
 0x4f4   :  { %v1077_v49 = vld [vmem:[%s19811_s1 + $0x2030] sm:$0xff] }
 0x4f5   :  { %v13652_v63 = vcombine.low %v1073_v46, %v1077_v49  ;;  %v1125_v38 = vld [vmem:[%s19811_s1 + $0x21b0] sm:$0xff] }
 0x4f6   :  { %11062 = vmatpush1.bf16.msra.mxu0 %v13588_v57  ;;  %11621 = vmatpush1.bf16.msra.mxu1 %v13590_v58  ;;  %v13653_v57 = vcombine.high %v1073_v46, %v1077_v49  ;;  %v13655_v58 = vcombine.high %v1074_v50, %v1078_v53  ;;  %v1129_v46 = vld [vmem:[%s19811_s1 + $0x21d0] sm:$0xff]  ;;  %v1130_v50 = vld [vmem:[%s19811_s1 + $0x21d8] sm:$0xff] }
 0x4f7   :  { %11063 = vmatprep.subr.bf16.mxu0 %v13597_v59  ;;  %11622 = vmatprep.subr.bf16.mxu1 %v13599_v60  ;;  %v1081_v59 = vld [vmem:[%s19811_s1 + $0x2050] sm:$0xff]  ;;  %v1134_v53 = vld [vmem:[%s19811_s1 + $0x21f8] sm:$0xff] }
 0x4f8   :  { %v1085_v60 = vld [vmem:[%s19811_s1 + $0x2070] sm:$0xff] }
 0x4f9   :  { %v13660_v8 = vcombine.low %v1081_v59, %v1085_v60  ;;  %v1133_v49 = vld [vmem:[%s19811_s1 + $0x21f0] sm:$0xff] }
 0x4fa   :  { %11064 = vmatpush1.bf16.msra.mxu0 %v13596_v1  ;;  %11623 = vmatpush1.bf16.msra.mxu1 %v13598_v2  ;;  %v13661_v1 = vcombine.high %v1081_v59, %v1085_v60  ;;  %v13663_v2 = vcombine.high %v1082_v61, %v1086_v62  ;;  %v1137_v59 = vld [vmem:[%s19811_s1 + $0x2210] sm:$0xff] }
 0x4fb   :  { %11065 = vmatprep.subr.bf16.mxu0 %v13605_v3  ;;  %11624 = vmatprep.subr.bf16.mxu1 %v13607_v4  ;;  %v1089_v3 = vld [vmem:[%s19811_s1 + $0x2090] sm:$0xff] }
 0x4fc   :  { %v1093_v4 = vld [vmem:[%s19811_s1 + $0x20b0] sm:$0xff] }
 0x4fd   :  { %v1141_v60 = vld [vmem:[%s19811_s1 + $0x2230] sm:$0xff] }
 0x4fe   :  { %11066 = vmatpush1.bf16.msra.mxu0 %v13604_v9  ;;  %11625 = vmatpush1.bf16.msra.mxu1 %v13606_v10  ;;  %v13662_v9 = vcombine.low %v1082_v61, %v1086_v62  ;;  %v13669_v10 = vcombine.high %v1089_v3, %v1093_v4  ;;  %v1138_v61 = vld [vmem:[%s19811_s1 + $0x2218] sm:$0xff] }
 0x4ff   :  { %11067 = vmatprep.subr.bf16.mxu0 %v13613_v11  ;;  %11626 = vmatprep.subr.bf16.mxu1 %v13615_v12  ;;  %v13671_v11 = vcombine.high %v1090_v6, %v1094_v7  ;;  %v1097_v12 = vld [vmem:[%s19811_s1 + $0x20d0] sm:$0xff]  ;;  %v1142_v62 = vld [vmem:[%s19811_s1 + $0x2238] sm:$0xff] }
 0x502   :  { %11068 = vmatpush1.bf16.msra.mxu0 %v13612_v17  ;;  %11627 = vmatpush1.bf16.msra.mxu1 %v13614_v18  ;;  %v13668_v17 = vcombine.low %v1089_v3, %v1093_v4  ;;  %v13670_v18 = vcombine.low %v1090_v6, %v1094_v7  ;;  %v1145_v3 = vld [vmem:[%s19811_s1 + $0x2250] sm:$0xff]  ;;  %v1150_v6 = vld [vmem:[%s19811_s1 + $0x2278] sm:$0xff]  ;;  %v13716_v7 = vcombine.low %v1137_v59, %v1141_v60 }
 0x503   :  { %11069 = vmatprep.subr.bf16.mxu0 %v13621_v19  ;;  %11628 = vmatprep.subr.bf16.mxu1 %v13623_v20  ;;  %v13677_v19 = vcombine.high %v1097_v12, %v1101_v13  ;;  %v13679_v20 = vcombine.high %v1098_v15, %v1102_v16  ;;  %v1149_v4 = vld [vmem:[%s19811_s1 + $0x2270] sm:$0xff] }
 0x506   :  { %11070 = vmatpush1.bf16.msra.mxu0 %v13620_v25  ;;  %11629 = vmatpush1.bf16.msra.mxu1 %v13622_v26  ;;  %v13676_v25 = vcombine.low %v1097_v12, %v1101_v13  ;;  %v13678_v26 = vcombine.low %v1098_v15, %v1102_v16  ;;  %v1157_v12 = vld [vmem:[%s19811_s1 + $0x22b0] sm:$0xff]  ;;  %v1154_v13 = vld [vmem:[%s19811_s1 + $0x2298] sm:$0xff]  ;;  %v13724_v15 = vcombine.low %v1145_v3, %v1149_v4 }
 0x507   :  { %11071 = vmatprep.subr.bf16.mxu0 %v13629_v27  ;;  %11630 = vmatprep.subr.bf16.mxu1 %v13631_v28  ;;  %v13685_v27 = vcombine.high %v1105_v21, %v1109_v22  ;;  %v13687_v28 = vcombine.high %v1106_v23, %v1110_v24 }
 0x50a   :  { %11072 = vmatpush1.bf16.msra.mxu0 %v13628_v33  ;;  %11631 = vmatpush1.bf16.msra.mxu1 %v13630_v34  ;;  %v13684_v33 = vcombine.low %v1105_v21, %v1109_v22  ;;  %v13686_v34 = vcombine.low %v1106_v23, %v1110_v24  ;;  %v1162_v21 = vld [vmem:[%s19811_s1 + $0x22d8] sm:$0xff] }
 0x50b   :  { %11073 = vmatprep.subr.bf16.mxu0 %v13637_v35  ;;  %11632 = vmatprep.subr.bf16.mxu1 %v13639_v36  ;;  %v13693_v35 = vcombine.high %v1113_v29, %v1117_v30  ;;  %v13695_v36 = vcombine.high %v1114_v31, %v1118_v32  ;;  %v1166_v22 = vld [vmem:[%s19811_s1 + $0x22f8] sm:$0xff] }
 0x50e   :  { %11074 = vmatpush1.bf16.msra.mxu0 %v13636_v41  ;;  %11633 = vmatpush1.bf16.msra.mxu1 %v13638_v43  ;;  %v13692_v41 = vcombine.low %v1113_v29, %v1117_v30  ;;  %v13694_v43 = vcombine.low %v1114_v31, %v1118_v32  ;;  %v1170_v29 = vld [vmem:[%s19811_s1 + $0x2318] sm:$0xff]  ;;  %v13742_v32 = vcombine.low %v1162_v21, %v1166_v22 }
 0x50f   :  { %11075 = vmatprep.subr.bf16.mxu0 %v13645_v44  ;;  %11634 = vmatprep.subr.bf16.mxu1 %v13647_v45  ;;  %v13701_v44 = vcombine.high %v1121_v37, %v1125_v38  ;;  %v13703_v45 = vcombine.high %v1122_v39, %v1126_v40  ;;  %v1174_v30 = vld [vmem:[%s19811_s1 + $0x2338] sm:$0xff] }
 0x512   :  { %11076 = vmatpush1.bf16.msra.mxu0 %v13644_v54  ;;  %11635 = vmatpush1.bf16.msra.mxu1 %v13646_v55  ;;  %v13700_v54 = vcombine.low %v1121_v37, %v1125_v38  ;;  %v13702_v55 = vcombine.low %v1122_v39, %v1126_v40  ;;  %v1178_v37 = vld [vmem:[%s19811_s1 + $0x2358] sm:$0xff]  ;;  %v13750_v40 = vcombine.low %v1170_v29, %v1174_v30 }
 0x513   :  { %11088 = vmatprep.subr.bf16.mxu0 %v13653_v57  ;;  %11647 = vmatprep.subr.bf16.mxu1 %v13655_v58  ;;  %v13709_v57 = vcombine.high %v1129_v46, %v1133_v49  ;;  %v13711_v58 = vcombine.high %v1130_v50, %v1134_v53  ;;  %v1182_v38 = vld [vmem:[%s19811_s1 + $0x2378] sm:$0xff] }
 0x515   :  { %11078 = vmatmul.mubr.bf16.vlgmr.msra.gmra.mrb[4].mxu0 %v14677_v5  ;;  %11637 = vmatmul.mubr.bf16.vlgmr.msra.gmra.mrb[4].mxu1 %v14677_v5  ;;  %v1146_v5 = vld [vmem:[%s19811_s1 + $0x2258] sm:$0xff] }
 0x516   :  { %11089 = vmatpush1.bf16.msra.mxu0 %v13652_v63  ;;  %11648 = vmatpush1.bf16.msra.mxu1 %v13654_v0  ;;  %v13708_v63 = vcombine.low %v1129_v46, %v1133_v49  ;;  %v13710_v0 = vcombine.low %v1130_v50, %v1134_v53  ;;  %v13726_v16 = vcombine.low %v1146_v5, %v1150_v6  ;;  %v1186_v46 = vld [vmem:[%s19811_s1 + $0x2398] sm:$0xff] }
 0x517   :  { %11090 = vmatprep.subr.bf16.mxu0 %v13661_v1  ;;  %11649 = vmatprep.subr.bf16.mxu1 %v13663_v2  ;;  %v13717_v1 = vcombine.high %v1137_v59, %v1141_v60  ;;  %v13719_v2 = vcombine.high %v1138_v61, %v1142_v62  ;;  %v1190_v49 = vld [vmem:[%s19811_s1 + $0x23b8] sm:$0xff]  ;;  %v13758_v53 = vcombine.low %v1178_v37, %v1182_v38 }
 0x518   :  { %11120 = vmatprep.mubr.bf16.mxu0 %v14678_v14  ;;  %11679 = vmatprep.mubr.bf16.mxu1 %v14678_v14  ;;  %v1158_v14 = vld [vmem:[%s19811_s1 + $0x22b8] sm:$0xff] }
 0x519   :  { %v13734_v24 = vcombine.low %v1154_v13, %v1158_v14  ;;  %v1194_v59 = vld [vmem:[%s19811_s1 + $0x23d8] sm:$0xff] }
 0x51a   :  { %11091 = vmatpush1.bf16.msra.mxu0 %v13660_v8  ;;  %11650 = vmatpush1.bf16.msra.mxu1 %v13662_v9  ;;  %v13718_v8 = vcombine.low %v1138_v61, %v1142_v62  ;;  %v13725_v9 = vcombine.high %v1145_v3, %v1149_v4  ;;  %v1198_v60 = vld [vmem:[%s19811_s1 + $0x23f8] sm:$0xff]  ;;  %v13766_v62 = vcombine.low %v1186_v46, %v1190_v49 }
 0x51b   :  { %11092 = vmatprep.subr.bf16.mxu0 %v13669_v10  ;;  %11651 = vmatprep.subr.bf16.mxu1 %v13671_v11  ;;  %v13727_v10 = vcombine.high %v1146_v5, %v1150_v6  ;;  %v1153_v11 = vld [vmem:[%s19811_s1 + $0x2290] sm:$0xff]  ;;  %v1202_v3 = vld [vmem:[%s19811_s1 + $0x2418] sm:$0xff]  ;;  %v13774_v6 = vcombine.low %v1194_v59, %v1198_v60 }
 0x51c   :  { %v13732_v23 = vcombine.low %v1153_v11, %v1157_v12  ;;  %v1206_v4 = vld [vmem:[%s19811_s1 + $0x2438] sm:$0xff] }
 0x51e   :  { %11093 = vmatpush1.bf16.msra.mxu0 %v13668_v17  ;;  %11652 = vmatpush1.bf16.msra.mxu1 %v13670_v18  ;;  %v13733_v17 = vcombine.high %v1153_v11, %v1157_v12  ;;  %v13735_v18 = vcombine.high %v1154_v13, %v1158_v14  ;;  %v1210_v11 = vld [vmem:[%s19811_s1 + $0x2458] sm:$0xff]  ;;  %v13782_v14 = vcombine.low %v1202_v3, %v1206_v4 }
 0x51f   :  { %11094 = vmatprep.subr.bf16.mxu0 %v13677_v19  ;;  %11653 = vmatprep.subr.bf16.mxu1 %v13679_v20  ;;  %v1161_v19 = vld [vmem:[%s19811_s1 + $0x22d0] sm:$0xff]  ;;  %v1214_v12 = vld [vmem:[%s19811_s1 + $0x2478] sm:$0xff] }
 0x520   :  { %v1165_v20 = vld [vmem:[%s19811_s1 + $0x22f0] sm:$0xff] }
 0x521   :  { %v13740_v31 = vcombine.low %v1161_v19, %v1165_v20 }
 0x522   :  { %11095 = vmatpush1.bf16.msra.mxu0 %v13676_v25  ;;  %11654 = vmatpush1.bf16.msra.mxu1 %v13678_v26  ;;  %v13741_v25 = vcombine.high %v1161_v19, %v1165_v20  ;;  %v13743_v26 = vcombine.high %v1162_v21, %v1166_v22  ;;  %v14679_v19 = vld [vmem:[%s19812_s0 + $0x40] ss:$100 sps:$4 sm:$0xff]   ;;  %v1218_v20 = vld [vmem:[%s19811_s1 + $0x2498] sm:$0xff] }
 0x523   :  { %11096 = vmatprep.subr.bf16.mxu0 %v13685_v27  ;;  %11655 = vmatprep.subr.bf16.mxu1 %v13687_v28  ;;  %v1169_v27 = vld [vmem:[%s19811_s1 + $0x2310] sm:$0xff]  ;;  %v1222_v21 = vld [vmem:[%s19811_s1 + $0x24b8] sm:$0xff] }
 0x524   :  { %v1173_v28 = vld [vmem:[%s19811_s1 + $0x2330] sm:$0xff] }
 0x525   :  { %v13748_v39 = vcombine.low %v1169_v27, %v1173_v28 }
 0x526   :  { %11097 = vmatpush1.bf16.msra.mxu0 %v13684_v33  ;;  %11656 = vmatpush1.bf16.msra.mxu1 %v13686_v34  ;;  %v13749_v33 = vcombine.high %v1169_v27, %v1173_v28  ;;  %v13751_v34 = vcombine.high %v1170_v29, %v1174_v30  ;;  %v1229_v27 = vld [vmem:[%s19811_s1 + $0x24f0] sm:$0xff]  ;;  %v1226_v29 = vld [vmem:[%s19811_s1 + $0x24d8] sm:$0xff] }
 0x527   :  { %11098 = vmatprep.subr.bf16.mxu0 %v13693_v35  ;;  %11657 = vmatprep.subr.bf16.mxu1 %v13695_v36  ;;  %v1177_v35 = vld [vmem:[%s19811_s1 + $0x2350] sm:$0xff]  ;;  %v1230_v30 = vld [vmem:[%s19811_s1 + $0x24f8] sm:$0xff] }
 0x528   :  { %v1181_v36 = vld [vmem:[%s19811_s1 + $0x2370] sm:$0xff] }
 0x529   :  { %v13756_v50 = vcombine.low %v1177_v35, %v1181_v36  ;;  %v14680_v28 = vld [vmem:[%s19812_s0 + $0x4c] ss:$100 sps:$4 sm:$0xff]  }
 0x52a   :  { %11099 = vmatpush1.bf16.msra.mxu0 %v13692_v41  ;;  %11658 = vmatpush1.bf16.msra.mxu1 %v13694_v43  ;;  %v13757_v41 = vcombine.high %v1177_v35, %v1181_v36  ;;  %v13759_v43 = vcombine.high %v1178_v37, %v1182_v38  ;;  %v1233_v35 = vld [vmem:[%s19811_s1 + $0x2510] sm:$0xff]  ;;  %v1234_v37 = vld [vmem:[%s19811_s1 + $0x2518] sm:$0xff] }
 0x52b   :  { %11100 = vmatprep.subr.bf16.mxu0 %v13701_v44  ;;  %11659 = vmatprep.subr.bf16.mxu1 %v13703_v45  ;;  %v1185_v44 = vld [vmem:[%s19811_s1 + $0x2390] sm:$0xff]  ;;  %v1238_v38 = vld [vmem:[%s19811_s1 + $0x2538] sm:$0xff] }
 0x52c   :  { %v1189_v45 = vld [vmem:[%s19811_s1 + $0x23b0] sm:$0xff] }
 0x52d   :  { %v13764_v61 = vcombine.low %v1185_v44, %v1189_v45  ;;  %v1237_v36 = vld [vmem:[%s19811_s1 + $0x2530] sm:$0xff] }
 0x52e   :  { %11101 = vmatpush1.bf16.msra.mxu0 %v13700_v54  ;;  %11660 = vmatpush1.bf16.msra.mxu1 %v13702_v55  ;;  %v13765_v54 = vcombine.high %v1185_v44, %v1189_v45  ;;  %v13767_v55 = vcombine.high %v1186_v46, %v1190_v49  ;;  %v1241_v44 = vld [vmem:[%s19811_s1 + $0x2550] sm:$0xff]  ;;  %v1242_v46 = vld [vmem:[%s19811_s1 + $0x2558] sm:$0xff] }
 0x52f   :  { %11102 = vmatprep.subr.bf16.mxu0 %v13709_v57  ;;  %11661 = vmatprep.subr.bf16.mxu1 %v13711_v58  ;;  %v1193_v57 = vld [vmem:[%s19811_s1 + $0x23d0] sm:$0xff]  ;;  %v1246_v49 = vld [vmem:[%s19811_s1 + $0x2578] sm:$0xff] }
 0x530   :  { %v1197_v58 = vld [vmem:[%s19811_s1 + $0x23f0] sm:$0xff] }
 0x531   :  { %v13772_v5 = vcombine.low %v1193_v57, %v1197_v58  ;;  %v1245_v45 = vld [vmem:[%s19811_s1 + $0x2570] sm:$0xff] }
 0x532   :  { %11103 = vmatpush1.bf16.msra.mxu0 %v13708_v63  ;;  %11662 = vmatpush1.bf16.msra.mxu1 %v13710_v0  ;;  %v13773_v63 = vcombine.high %v1193_v57, %v1197_v58  ;;  %v13775_v0 = vcombine.high %v1194_v59, %v1198_v60  ;;  %v1249_v57 = vld [vmem:[%s19811_s1 + $0x2590] sm:$0xff]  ;;  %v1250_v59 = vld [vmem:[%s19811_s1 + $0x2598] sm:$0xff] }
 0x533   :  { %11104 = vmatprep.subr.bf16.mxu0 %v13717_v1  ;;  %11663 = vmatprep.subr.bf16.mxu1 %v13719_v2  ;;  %v1201_v1 = vld [vmem:[%s19811_s1 + $0x2410] sm:$0xff]  ;;  %v1254_v60 = vld [vmem:[%s19811_s1 + $0x25b8] sm:$0xff] }
 0x534   :  { %v1205_v2 = vld [vmem:[%s19811_s1 + $0x2430] sm:$0xff] }
 0x535   :  { %v13780_v13 = vcombine.low %v1201_v1, %v1205_v2  ;;  %v1253_v58 = vld [vmem:[%s19811_s1 + $0x25b0] sm:$0xff] }
 0x536   :  { %11105 = vmatpush1.bf16.msra.mxu0 %v13716_v7  ;;  %11664 = vmatpush1.bf16.msra.mxu1 %v13718_v8  ;;  %v13781_v7 = vcombine.high %v1201_v1, %v1205_v2  ;;  %v13783_v8 = vcombine.high %v1202_v3, %v1206_v4  ;;  %v1257_v1 = vld [vmem:[%s19811_s1 + $0x25d0] sm:$0xff]  ;;  %v1258_v3 = vld [vmem:[%s19811_s1 + $0x25d8] sm:$0xff] }
 0x537   :  { %11106 = vmatprep.subr.bf16.mxu0 %v13725_v9  ;;  %11665 = vmatprep.subr.bf16.mxu1 %v13727_v10  ;;  %v1209_v9 = vld [vmem:[%s19811_s1 + $0x2450] sm:$0xff]  ;;  %v1262_v4 = vld [vmem:[%s19811_s1 + $0x25f8] sm:$0xff] }
 0x538   :  { %v1213_v10 = vld [vmem:[%s19811_s1 + $0x2470] sm:$0xff] }
 0x539   :  { %v13788_v22 = vcombine.low %v1209_v9, %v1213_v10  ;;  %v1261_v2 = vld [vmem:[%s19811_s1 + $0x25f0] sm:$0xff] }
 0x53a   :  { %11107 = vmatpush1.bf16.msra.mxu0 %v13724_v15  ;;  %11666 = vmatpush1.bf16.msra.mxu1 %v13726_v16  ;;  %v13789_v15 = vcombine.high %v1209_v9, %v1213_v10  ;;  %v13791_v16 = vcombine.high %v1210_v11, %v1214_v12  ;;  %v1265_v9 = vld [vmem:[%s19811_s1 + $0x2610] sm:$0xff] }
 0x53b   :  { %11108 = vmatprep.subr.bf16.mxu0 %v13733_v17  ;;  %11667 = vmatprep.subr.bf16.mxu1 %v13735_v18  ;;  %v1217_v17 = vld [vmem:[%s19811_s1 + $0x2490] sm:$0xff] }
 0x53c   :  { %v1221_v18 = vld [vmem:[%s19811_s1 + $0x24b0] sm:$0xff] }
 0x53d   :  { %v1269_v10 = vld [vmem:[%s19811_s1 + $0x2630] sm:$0xff] }
 0x53e   :  { %11109 = vmatpush1.bf16.msra.mxu0 %v13732_v23  ;;  %11668 = vmatpush1.bf16.msra.mxu1 %v13734_v24  ;;  %v13790_v23 = vcombine.low %v1210_v11, %v1214_v12  ;;  %v13797_v24 = vcombine.high %v1217_v17, %v1221_v18  ;;  %v1266_v11 = vld [vmem:[%s19811_s1 + $0x2618] sm:$0xff] }
 0x53f   :  { %11110 = vmatprep.subr.bf16.mxu0 %v13741_v25  ;;  %11669 = vmatprep.subr.bf16.mxu1 %v13743_v26  ;;  %v13799_v25 = vcombine.high %v1218_v20, %v1222_v21  ;;  %v1225_v26 = vld [vmem:[%s19811_s1 + $0x24d0] sm:$0xff]  ;;  %v1270_v12 = vld [vmem:[%s19811_s1 + $0x2638] sm:$0xff] }
 0x542   :  { %11111 = vmatpush1.bf16.msra.mxu0 %v13740_v31  ;;  %11670 = vmatpush1.bf16.msra.mxu1 %v13742_v32  ;;  %v13796_v31 = vcombine.low %v1217_v17, %v1221_v18  ;;  %v13798_v32 = vcombine.low %v1218_v20, %v1222_v21  ;;  %v1273_v17 = vld [vmem:[%s19811_s1 + $0x2650] sm:$0xff]  ;;  %v1278_v20 = vld [vmem:[%s19811_s1 + $0x2678] sm:$0xff]  ;;  %v13844_v21 = vcombine.low %v1265_v9, %v1269_v10 }
 0x543   :  { %11112 = vmatprep.subr.bf16.mxu0 %v13749_v33  ;;  %11671 = vmatprep.subr.bf16.mxu1 %v13751_v34  ;;  %v13805_v33 = vcombine.high %v1225_v26, %v1229_v27  ;;  %v13807_v34 = vcombine.high %v1226_v29, %v1230_v30  ;;  %v1277_v18 = vld [vmem:[%s19811_s1 + $0x2670] sm:$0xff] }
 0x546   :  { %11113 = vmatpush1.bf16.msra.mxu0 %v13748_v39  ;;  %11672 = vmatpush1.bf16.msra.mxu1 %v13750_v40  ;;  %v13804_v39 = vcombine.low %v1225_v26, %v1229_v27  ;;  %v13806_v40 = vcombine.low %v1226_v29, %v1230_v30  ;;  %v1285_v26 = vld [vmem:[%s19811_s1 + $0x26b0] sm:$0xff]  ;;  %v1282_v27 = vld [vmem:[%s19811_s1 + $0x2698] sm:$0xff]  ;;  %v13852_v29 = vcombine.low %v1273_v17, %v1277_v18 }
 0x547   :  { %11114 = vmatprep.subr.bf16.mxu0 %v13757_v41  ;;  %11673 = vmatprep.subr.bf16.mxu1 %v13759_v43  ;;  %v13813_v41 = vcombine.high %v1233_v35, %v1237_v36  ;;  %v13815_v43 = vcombine.high %v1234_v37, %v1238_v38 }
 0x54a   :  { %11115 = vmatpush1.bf16.msra.mxu0 %v13756_v50  ;;  %11674 = vmatpush1.bf16.msra.mxu1 %v13758_v53  ;;  %v13812_v50 = vcombine.low %v1233_v35, %v1237_v36  ;;  %v13814_v53 = vcombine.low %v1234_v37, %v1238_v38  ;;  %v1290_v35 = vld [vmem:[%s19811_s1 + $0x26d8] sm:$0xff] }
 0x54b   :  { %11116 = vmatprep.subr.bf16.mxu0 %v13765_v54  ;;  %11675 = vmatprep.subr.bf16.mxu1 %v13767_v55  ;;  %v13821_v54 = vcombine.high %v1241_v44, %v1245_v45  ;;  %v13823_v55 = vcombine.high %v1242_v46, %v1246_v49  ;;  %v1294_v36 = vld [vmem:[%s19811_s1 + $0x26f8] sm:$0xff] }
 0x54e   :  { %11117 = vmatpush1.bf16.msra.mxu0 %v13764_v61  ;;  %11676 = vmatpush1.bf16.msra.mxu1 %v13766_v62  ;;  %v13820_v61 = vcombine.low %v1241_v44, %v1245_v45  ;;  %v13822_v62 = vcombine.low %v1242_v46, %v1246_v49  ;;  %v1298_v44 = vld [vmem:[%s19811_s1 + $0x2718] sm:$0xff]  ;;  %v13870_v49 = vcombine.low %v1290_v35, %v1294_v36 }
 0x54f   :  { %11118 = vmatprep.subr.bf16.mxu0 %v13773_v63  ;;  %11677 = vmatprep.subr.bf16.mxu1 %v13775_v0  ;;  %v13829_v63 = vcombine.high %v1249_v57, %v1253_v58  ;;  %v13831_v0 = vcombine.high %v1250_v59, %v1254_v60  ;;  %v1302_v45 = vld [vmem:[%s19811_s1 + $0x2738] sm:$0xff] }
 0x552   :  { %11119 = vmatpush1.bf16.msra.mxu0 %v13772_v5  ;;  %11678 = vmatpush1.bf16.msra.mxu1 %v13774_v6  ;;  %v13828_v5 = vcombine.low %v1249_v57, %v1253_v58  ;;  %v13830_v6 = vcombine.low %v1250_v59, %v1254_v60  ;;  %v1306_v57 = vld [vmem:[%s19811_s1 + $0x2758] sm:$0xff]  ;;  %v13878_v60 = vcombine.low %v1298_v44, %v1302_v45 }
 0x553   :  { %11131 = vmatprep.subr.bf16.mxu0 %v13781_v7  ;;  %11690 = vmatprep.subr.bf16.mxu1 %v13783_v8  ;;  %v13837_v7 = vcombine.high %v1257_v1, %v1261_v2  ;;  %v13839_v8 = vcombine.high %v1258_v3, %v1262_v4  ;;  %v1310_v58 = vld [vmem:[%s19811_s1 + $0x2778] sm:$0xff] }
 0x555   :  { %11121 = vmatmul.mubr.bf16.vlgmr.msra.gmra.mrb[4].mxu0 %v14679_v19  ;;  %11680 = vmatmul.mubr.bf16.vlgmr.msra.gmra.mrb[4].mxu1 %v14679_v19  ;;  %v1274_v19 = vld [vmem:[%s19811_s1 + $0x2658] sm:$0xff] }
 0x556   :  { %11132 = vmatpush1.bf16.msra.mxu0 %v13780_v13  ;;  %11691 = vmatpush1.bf16.msra.mxu1 %v13782_v14  ;;  %v13836_v13 = vcombine.low %v1257_v1, %v1261_v2  ;;  %v13838_v14 = vcombine.low %v1258_v3, %v1262_v4  ;;  %v13854_v30 = vcombine.low %v1274_v19, %v1278_v20  ;;  %v1314_v1 = vld [vmem:[%s19811_s1 + $0x2798] sm:$0xff] }
 0x557   :  { %11133 = vmatprep.subr.bf16.mxu0 %v13789_v15  ;;  %11692 = vmatprep.subr.bf16.mxu1 %v13791_v16  ;;  %v13845_v15 = vcombine.high %v1265_v9, %v1269_v10  ;;  %v13847_v16 = vcombine.high %v1266_v11, %v1270_v12  ;;  %v1318_v2 = vld [vmem:[%s19811_s1 + $0x27b8] sm:$0xff]  ;;  %v13886_v4 = vcombine.low %v1306_v57, %v1310_v58 }
 0x558   :  { %11163 = vmatprep.mubr.bf16.mxu0 %v14680_v28  ;;  %11722 = vmatprep.mubr.bf16.mxu1 %v14680_v28  ;;  %v1286_v28 = vld [vmem:[%s19811_s1 + $0x26b8] sm:$0xff] }
 0x559   :  { %v13862_v38 = vcombine.low %v1282_v27, %v1286_v28  ;;  %v1322_v9 = vld [vmem:[%s19811_s1 + $0x27d8] sm:$0xff] }
 0x55a   :  { %11134 = vmatpush1.bf16.msra.mxu0 %v13788_v22  ;;  %11693 = vmatpush1.bf16.msra.mxu1 %v13790_v23  ;;  %v13846_v22 = vcombine.low %v1266_v11, %v1270_v12  ;;  %v13853_v23 = vcombine.high %v1273_v17, %v1277_v18  ;;  %v1326_v10 = vld [vmem:[%s19811_s1 + $0x27f8] sm:$0xff]  ;;  %v13894_v12 = vcombine.low %v1314_v1, %v1318_v2 }
 0x55b   :  { %11135 = vmatprep.subr.bf16.mxu0 %v13797_v24  ;;  %11694 = vmatprep.subr.bf16.mxu1 %v13799_v25  ;;  %v13855_v24 = vcombine.high %v1274_v19, %v1278_v20  ;;  %v1281_v25 = vld [vmem:[%s19811_s1 + $0x2690] sm:$0xff]  ;;  %v1330_v17 = vld [vmem:[%s19811_s1 + $0x2818] sm:$0xff]  ;;  %v13902_v20 = vcombine.low %v1322_v9, %v1326_v10 }
 0x55c   :  { %v13860_v37 = vcombine.low %v1281_v25, %v1285_v26  ;;  %v1334_v18 = vld [vmem:[%s19811_s1 + $0x2838] sm:$0xff] }
 0x55e   :  { %11136 = vmatpush1.bf16.msra.mxu0 %v13796_v31  ;;  %11695 = vmatpush1.bf16.msra.mxu1 %v13798_v32  ;;  %v13861_v31 = vcombine.high %v1281_v25, %v1285_v26  ;;  %v13863_v32 = vcombine.high %v1282_v27, %v1286_v28  ;;  %v1338_v25 = vld [vmem:[%s19811_s1 + $0x2858] sm:$0xff]  ;;  %v13910_v28 = vcombine.low %v1330_v17, %v1334_v18 }
 0x55f   :  { %11137 = vmatprep.subr.bf16.mxu0 %v13805_v33  ;;  %11696 = vmatprep.subr.bf16.mxu1 %v13807_v34  ;;  %v1289_v33 = vld [vmem:[%s19811_s1 + $0x26d0] sm:$0xff]  ;;  %v1342_v26 = vld [vmem:[%s19811_s1 + $0x2878] sm:$0xff] }
 0x560   :  { %v1293_v34 = vld [vmem:[%s19811_s1 + $0x26f0] sm:$0xff] }
 0x561   :  { %v13868_v46 = vcombine.low %v1289_v33, %v1293_v34 }
 0x562   :  { %11138 = vmatpush1.bf16.msra.mxu0 %v13804_v39  ;;  %11697 = vmatpush1.bf16.msra.mxu1 %v13806_v40  ;;  %v13869_v39 = vcombine.high %v1289_v33, %v1293_v34  ;;  %v13871_v40 = vcombine.high %v1290_v35, %v1294_v36  ;;  %v14681_v33 = vld [vmem:[%s19812_s0 + $0x48] ss:$100 sps:$4 sm:$0xff]   ;;  %v1346_v34 = vld [vmem:[%s19811_s1 + $0x2898] sm:$0xff] }
 0x563   :  { %11139 = vmatprep.subr.bf16.mxu0 %v13813_v41  ;;  %11698 = vmatprep.subr.bf16.mxu1 %v13815_v43  ;;  %v1297_v41 = vld [vmem:[%s19811_s1 + $0x2710] sm:$0xff]  ;;  %v1350_v35 = vld [vmem:[%s19811_s1 + $0x28b8] sm:$0xff] }
 0x564   :  { %v1301_v43 = vld [vmem:[%s19811_s1 + $0x2730] sm:$0xff] }
 0x565   :  { %v13876_v59 = vcombine.low %v1297_v41, %v1301_v43 }
 0x566   :  { %11140 = vmatpush1.bf16.msra.mxu0 %v13812_v50  ;;  %11699 = vmatpush1.bf16.msra.mxu1 %v13814_v53  ;;  %v13877_v50 = vcombine.high %v1297_v41, %v1301_v43  ;;  %v13879_v53 = vcombine.high %v1298_v44, %v1302_v45  ;;  %v1357_v41 = vld [vmem:[%s19811_s1 + $0x28f0] sm:$0xff]  ;;  %v1354_v44 = vld [vmem:[%s19811_s1 + $0x28d8] sm:$0xff] }
 0x567   :  { %11141 = vmatprep.subr.bf16.mxu0 %v13821_v54  ;;  %11700 = vmatprep.subr.bf16.mxu1 %v13823_v55  ;;  %v1305_v54 = vld [vmem:[%s19811_s1 + $0x2750] sm:$0xff]  ;;  %v1358_v45 = vld [vmem:[%s19811_s1 + $0x28f8] sm:$0xff] }
 0x568   :  { %v1309_v55 = vld [vmem:[%s19811_s1 + $0x2770] sm:$0xff] }
 0x569   :  { %v13884_v3 = vcombine.low %v1305_v54, %v1309_v55  ;;  %v14682_v43 = vld [vmem:[%s19812_s0 + $0x54] ss:$100 sps:$4 sm:$0xff]  }
 0x56a   :  { %11142 = vmatpush1.bf16.msra.mxu0 %v13820_v61  ;;  %11701 = vmatpush1.bf16.msra.mxu1 %v13822_v62  ;;  %v13885_v61 = vcombine.high %v1305_v54, %v1309_v55  ;;  %v13887_v62 = vcombine.high %v1306_v57, %v1310_v58  ;;  %v1361_v54 = vld [vmem:[%s19811_s1 + $0x2910] sm:$0xff]  ;;  %v1362_v57 = vld [vmem:[%s19811_s1 + $0x2918] sm:$0xff] }
 0x56b   :  { %11143 = vmatprep.subr.bf16.mxu0 %v13829_v63  ;;  %11702 = vmatprep.subr.bf16.mxu1 %v13831_v0  ;;  %v1313_v63 = vld [vmem:[%s19811_s1 + $0x2790] sm:$0xff]  ;;  %v1366_v58 = vld [vmem:[%s19811_s1 + $0x2938] sm:$0xff] }
 0x56c   :  { %v1317_v0 = vld [vmem:[%s19811_s1 + $0x27b0] sm:$0xff] }
 0x56d   :  { %v13892_v11 = vcombine.low %v1313_v63, %v1317_v0  ;;  %v1365_v55 = vld [vmem:[%s19811_s1 + $0x2930] sm:$0xff] }
 0x56e   :  { %11144 = vmatpush1.bf16.msra.mxu0 %v13828_v5  ;;  %11703 = vmatpush1.bf16.msra.mxu1 %v13830_v6  ;;  %v13893_v5 = vcombine.high %v1313_v63, %v1317_v0  ;;  %v13895_v6 = vcombine.high %v1314_v1, %v1318_v2  ;;  %v1369_v63 = vld [vmem:[%s19811_s1 + $0x2950] sm:$0xff]  ;;  %v1370_v1 = vld [vmem:[%s19811_s1 + $0x2958] sm:$0xff] }
 0x56f   :  { %11145 = vmatprep.subr.bf16.mxu0 %v13837_v7  ;;  %11704 = vmatprep.subr.bf16.mxu1 %v13839_v8  ;;  %v1321_v7 = vld [vmem:[%s19811_s1 + $0x27d0] sm:$0xff]  ;;  %v1374_v2 = vld [vmem:[%s19811_s1 + $0x2978] sm:$0xff] }
 0x570   :  { %v1325_v8 = vld [vmem:[%s19811_s1 + $0x27f0] sm:$0xff] }
 0x571   :  { %v13900_v19 = vcombine.low %v1321_v7, %v1325_v8  ;;  %v1373_v0 = vld [vmem:[%s19811_s1 + $0x2970] sm:$0xff] }
 0x572   :  { %11146 = vmatpush1.bf16.msra.mxu0 %v13836_v13  ;;  %11705 = vmatpush1.bf16.msra.mxu1 %v13838_v14  ;;  %v13901_v13 = vcombine.high %v1321_v7, %v1325_v8  ;;  %v13903_v14 = vcombine.high %v1322_v9, %v1326_v10  ;;  %v1381_v7 = vld [vmem:[%s19811_s1 + $0x29b0] sm:$0xff]  ;;  %v13951_v8 = vcombine.high %v1370_v1, %v1374_v2  ;;  %v1378_v9 = vld [vmem:[%s19811_s1 + $0x2998] sm:$0xff] }
 0x573   :  { %11147 = vmatprep.subr.bf16.mxu0 %v13845_v15  ;;  %11706 = vmatprep.subr.bf16.mxu1 %v13847_v16  ;;  %v1329_v15 = vld [vmem:[%s19811_s1 + $0x2810] sm:$0xff]  ;;  %v1382_v10 = vld [vmem:[%s19811_s1 + $0x29b8] sm:$0xff] }
 0x574   :  { %v1333_v16 = vld [vmem:[%s19811_s1 + $0x2830] sm:$0xff] }
 0x575   :  { %v13908_v27 = vcombine.low %v1329_v15, %v1333_v16 }
 0x576   :  { %11148 = vmatpush1.bf16.msra.mxu0 %v13844_v21  ;;  %11707 = vmatpush1.bf16.msra.mxu1 %v13846_v22  ;;  %v13909_v21 = vcombine.high %v1329_v15, %v1333_v16  ;;  %v13911_v22 = vcombine.high %v1330_v17, %v1334_v18  ;;  %v1389_v15 = vld [vmem:[%s19811_s1 + $0x29f0] sm:$0xff]  ;;  %v13959_v16 = vcombine.high %v1378_v9, %v1382_v10  ;;  %v1386_v17 = vld [vmem:[%s19811_s1 + $0x29d8] sm:$0xff] }
 0x577   :  { %11149 = vmatprep.subr.bf16.mxu0 %v13853_v23  ;;  %11708 = vmatprep.subr.bf16.mxu1 %v13855_v24  ;;  %v1337_v23 = vld [vmem:[%s19811_s1 + $0x2850] sm:$0xff]  ;;  %v1390_v18 = vld [vmem:[%s19811_s1 + $0x29f8] sm:$0xff] }
 0x578   :  { %v1341_v24 = vld [vmem:[%s19811_s1 + $0x2870] sm:$0xff] }
 0x579   :  { %v13916_v36 = vcombine.low %v1337_v23, %v1341_v24 }
 0x57a   :  { %11150 = vmatpush1.bf16.msra.mxu0 %v13852_v29  ;;  %11709 = vmatpush1.bf16.msra.mxu1 %v13854_v30  ;;  %v13917_v29 = vcombine.high %v1337_v23, %v1341_v24  ;;  %v13919_v30 = vcombine.high %v1338_v25, %v1342_v26  ;;  %v1397_v23 = vld [vmem:[%s19811_s1 + $0x2a30] sm:$0xff]  ;;  %v13967_v24 = vcombine.high %v1386_v17, %v1390_v18 }
 0x57b   :  { %11151 = vmatprep.subr.bf16.mxu0 %v13861_v31  ;;  %11710 = vmatprep.subr.bf16.mxu1 %v13863_v32  ;;  %v1345_v31 = vld [vmem:[%s19811_s1 + $0x2890] sm:$0xff] }
 0x57c   :  { %v1349_v32 = vld [vmem:[%s19811_s1 + $0x28b0] sm:$0xff] }
 0x57e   :  { %11152 = vmatpush1.bf16.msra.mxu0 %v13860_v37  ;;  %11711 = vmatpush1.bf16.msra.mxu1 %v13862_v38  ;;  %v13918_v37 = vcombine.low %v1338_v25, %v1342_v26  ;;  %v13925_v38 = vcombine.high %v1345_v31, %v1349_v32  ;;  %v1394_v25 = vld [vmem:[%s19811_s1 + $0x2a18] sm:$0xff] }
 0x57f   :  { %11153 = vmatprep.subr.bf16.mxu0 %v13869_v39  ;;  %11712 = vmatprep.subr.bf16.mxu1 %v13871_v40  ;;  %v13927_v39 = vcombine.high %v1346_v34, %v1350_v35  ;;  %v1353_v40 = vld [vmem:[%s19811_s1 + $0x28d0] sm:$0xff]  ;;  %v1398_v26 = vld [vmem:[%s19811_s1 + $0x2a38] sm:$0xff] }
 0x582   :  { %11154 = vmatpush1.bf16.msra.mxu0 %v13868_v46  ;;  %11713 = vmatpush1.bf16.msra.mxu1 %v13870_v49  ;;  %v13924_v46 = vcombine.low %v1345_v31, %v1349_v32  ;;  %v13926_v49 = vcombine.low %v1346_v34, %v1350_v35  ;;  %v1405_v31 = vld [vmem:[%s19811_s1 + $0x2a70] sm:$0xff]  ;;  %v13975_v32 = vcombine.high %v1394_v25, %v1398_v26  ;;  %v1406_v34 = vld [vmem:[%s19811_s1 + $0x2a78] sm:$0xff] }
 0x583   :  { %11155 = vmatprep.subr.bf16.mxu0 %v13877_v50  ;;  %11714 = vmatprep.subr.bf16.mxu1 %v13879_v53  ;;  %v13933_v50 = vcombine.high %v1353_v40, %v1357_v41  ;;  %v13935_v53 = vcombine.high %v1354_v44, %v1358_v45 }
 0x586   :  { %11156 = vmatpush1.bf16.msra.mxu0 %v13876_v59  ;;  %11715 = vmatpush1.bf16.msra.mxu1 %v13878_v60  ;;  %v13932_v59 = vcombine.low %v1353_v40, %v1357_v41  ;;  %v13934_v60 = vcombine.low %v1354_v44, %v1358_v45  ;;  %v1410_v41 = vld [vmem:[%s19811_s1 + $0x2a98] sm:$0xff]  ;;  %v1417_v45 = vld [vmem:[%s19811_s1 + $0x2ad0] sm:$0xff] }
 0x587   :  { %11157 = vmatprep.subr.bf16.mxu0 %v13885_v61  ;;  %11716 = vmatprep.subr.bf16.mxu1 %v13887_v62  ;;  %v13941_v61 = vcombine.high %v1361_v54, %v1365_v55  ;;  %v13943_v62 = vcombine.high %v1362_v57, %v1366_v58 }
 0x58a   :  { %11158 = vmatpush1.bf16.msra.mxu0 %v13884_v3  ;;  %11717 = vmatpush1.bf16.msra.mxu1 %v13886_v4  ;;  %v13940_v3 = vcombine.low %v1361_v54, %v1365_v55  ;;  %v13942_v4 = vcombine.low %v1362_v57, %v1366_v58  ;;  %v1418_v54 = vld [vmem:[%s19811_s1 + $0x2ad8] sm:$0xff]  ;;  %v1425_v58 = vld [vmem:[%s19811_s1 + $0x2b10] sm:$0xff] }
 0x58b   :  { %11159 = vmatprep.subr.bf16.mxu0 %v13893_v5  ;;  %11718 = vmatprep.subr.bf16.mxu1 %v13895_v6  ;;  %v13949_v5 = vcombine.high %v1369_v63, %v1373_v0  ;;  %v1377_v6 = vld [vmem:[%s19811_s1 + $0x2990] sm:$0xff]  ;;  %v1422_v55 = vld [vmem:[%s19811_s1 + $0x2af8] sm:$0xff] }
 0x58e   :  { %11160 = vmatpush1.bf16.msra.mxu0 %v13892_v11  ;;  %11719 = vmatpush1.bf16.msra.mxu1 %v13894_v12  ;;  %v13948_v11 = vcombine.low %v1369_v63, %v1373_v0  ;;  %v1385_v12 = vld [vmem:[%s19811_s1 + $0x29d0] sm:$0xff]  ;;  %v1426_v63 = vld [vmem:[%s19811_s1 + $0x2b18] sm:$0xff] }
 0x58f   :  { %11161 = vmatprep.subr.bf16.mxu0 %v13901_v13  ;;  %11720 = vmatprep.subr.bf16.mxu1 %v13903_v14  ;;  %v13950_v13 = vcombine.low %v1370_v1, %v1374_v2  ;;  %v13957_v14 = vcombine.high %v1377_v6, %v1381_v7  ;;  %v1430_v0 = vld [vmem:[%s19811_s1 + $0x2b38] sm:$0xff]  ;;  %v1433_v2 = vld [vmem:[%s19811_s1 + $0x2b50] sm:$0xff] }
 0x592   :  { %11162 = vmatpush1.bf16.msra.mxu0 %v13900_v19  ;;  %11721 = vmatpush1.bf16.msra.mxu1 %v13902_v20  ;;  %v13956_v19 = vcombine.low %v1377_v6, %v1381_v7  ;;  %v1393_v20 = vld [vmem:[%s19811_s1 + $0x2a10] sm:$0xff]  ;;  %v14007_v6 = vcombine.high %v1426_v63, %v1430_v0  ;;  %v1434_v7 = vld [vmem:[%s19811_s1 + $0x2b58] sm:$0xff] }
 0x593   :  { %11174 = vmatprep.subr.bf16.mxu0 %v13909_v21  ;;  %11733 = vmatprep.subr.bf16.mxu1 %v13911_v22  ;;  %v13958_v21 = vcombine.low %v1378_v9, %v1382_v10  ;;  %v13965_v22 = vcombine.high %v1385_v12, %v1389_v15  ;;  %v13972_v35 = vcombine.low %v1393_v20, %v1397_v23  ;;  %v1441_v10 = vld [vmem:[%s19811_s1 + $0x2b90] sm:$0xff] }
 0x595   :  { %11164 = vmatmul.mubr.bf16.vlgmr.msra.gmra.mrb[4].mxu0 %v14681_v33  ;;  %11723 = vmatmul.mubr.bf16.vlgmr.msra.gmra.mrb[4].mxu1 %v14681_v33  ;;  %v1402_v33 = vld [vmem:[%s19811_s1 + $0x2a58] sm:$0xff] }
 0x596   :  { %11175 = vmatpush1.bf16.msra.mxu0 %v13908_v27  ;;  %11734 = vmatpush1.bf16.msra.mxu1 %v13910_v28  ;;  %v13964_v27 = vcombine.low %v1385_v12, %v1389_v15  ;;  %v1401_v28 = vld [vmem:[%s19811_s1 + $0x2a50] sm:$0xff]  ;;  %v13983_v40 = vcombine.high %v1402_v33, %v1406_v34  ;;  %v14006_v12 = vcombine.low %v1426_v63, %v1430_v0  ;;  %v1446_v15 = vld [vmem:[%s19811_s1 + $0x2bb8] sm:$0xff] }
 0x597   :  { %11176 = vmatprep.subr.bf16.mxu0 %v13917_v29  ;;  %11735 = vmatprep.subr.bf16.mxu1 %v13919_v30  ;;  %v13966_v29 = vcombine.low %v1386_v17, %v1390_v18  ;;  %v13973_v30 = vcombine.high %v1393_v20, %v1397_v23  ;;  %v13980_v44 = vcombine.low %v1401_v28, %v1405_v31  ;;  %v1449_v18 = vld [vmem:[%s19811_s1 + $0x2bd0] sm:$0xff]  ;;  %v1450_v23 = vld [vmem:[%s19811_s1 + $0x2bd8] sm:$0xff] }
 0x598   :  { %11206 = vmatprep.mubr.bf16.mxu0 %v14682_v43  ;;  %11765 = vmatprep.mubr.bf16.mxu1 %v14682_v43  ;;  %v1414_v43 = vld [vmem:[%s19811_s1 + $0x2ab8] sm:$0xff] }
 0x599   :  { %v14684_v63 = vld [vmem:[%s19812_s0 + $0x5c] ss:$100 sps:$4 sm:$0xff]  }
 0x59a   :  { %11177 = vmatpush1.bf16.msra.mxu0 %v13916_v36  ;;  %11736 = vmatpush1.bf16.msra.mxu1 %v13918_v37  ;;  %v1409_v36 = vld [vmem:[%s19811_s1 + $0x2a90] sm:$0xff]  ;;  %v13974_v37 = vcombine.low %v1394_v25, %v1398_v26  ;;  %v1486_v0 = vld [vmem:[%s19811_s1 + $0x2cf8] sm:$0xff] }
 0x59b   :  { %11178 = vmatprep.subr.bf16.mxu0 %v13925_v38  ;;  %11737 = vmatprep.subr.bf16.mxu1 %v13927_v39  ;;  %v13981_v38 = vcombine.high %v1401_v28, %v1405_v31  ;;  %v1413_v39 = vld [vmem:[%s19811_s1 + $0x2ab0] sm:$0xff]  ;;  %v1458_v31 = vld [vmem:[%s19811_s1 + $0x2c18] sm:$0xff] }
 0x59c   :  { %v13988_v57 = vcombine.low %v1409_v36, %v1413_v39  ;;  %v1457_v26 = vld [vmem:[%s19811_s1 + $0x2c10] sm:$0xff] }
 0x59e   :  { %11179 = vmatpush1.bf16.msra.mxu0 %v13924_v46  ;;  %11738 = vmatpush1.bf16.msra.mxu1 %v13926_v49  ;;  %v13982_v46 = vcombine.low %v1402_v33, %v1406_v34  ;;  %v13989_v49 = vcombine.high %v1409_v36, %v1413_v39  ;;  %v1465_v34 = vld [vmem:[%s19811_s1 + $0x2c50] sm:$0xff]  ;;  %v1466_v39 = vld [vmem:[%s19811_s1 + $0x2c58] sm:$0xff] }
 0x59f   :  { %11180 = vmatprep.subr.bf16.mxu0 %v13933_v50  ;;  %11739 = vmatprep.subr.bf16.mxu1 %v13935_v53  ;;  %v1421_v50 = vld [vmem:[%s19811_s1 + $0x2af0] sm:$0xff]  ;;  %v13991_v53 = vcombine.high %v1410_v41, %v1414_v43 }
 0x5a0   :  { %v13996_v1 = vcombine.low %v1417_v45, %v1421_v50 }
 0x5a2   :  { %11181 = vmatpush1.bf16.msra.mxu0 %v13932_v59  ;;  %11740 = vmatpush1.bf16.msra.mxu1 %v13934_v60  ;;  %v13990_v59 = vcombine.low %v1410_v41, %v1414_v43  ;;  %v13997_v60 = vcombine.high %v1417_v45, %v1421_v50  ;;  %v1473_v43 = vld [vmem:[%s19811_s1 + $0x2c90] sm:$0xff]  ;;  %v1474_v50 = vld [vmem:[%s19811_s1 + $0x2c98] sm:$0xff] }
 0x5a3   :  { %11182 = vmatprep.subr.bf16.mxu0 %v13941_v61  ;;  %11741 = vmatprep.subr.bf16.mxu1 %v13943_v62  ;;  %v1429_v61 = vld [vmem:[%s19811_s1 + $0x2b30] sm:$0xff]  ;;  %v13999_v62 = vcombine.high %v1418_v54, %v1422_v55 }
 0x5a4   :  { %v14004_v9 = vcombine.low %v1425_v58, %v1429_v61 }
 0x5a6   :  { %11183 = vmatpush1.bf16.msra.mxu0 %v13940_v3  ;;  %11742 = vmatpush1.bf16.msra.mxu1 %v13942_v4  ;;  %v13998_v3 = vcombine.low %v1418_v54, %v1422_v55  ;;  %v14005_v4 = vcombine.high %v1425_v58, %v1429_v61  ;;  %v1478_v54 = vld [vmem:[%s19811_s1 + $0x2cb8] sm:$0xff] }
 0x5a7   :  { %11184 = vmatprep.subr.bf16.mxu0 %v13949_v5  ;;  %11743 = vmatprep.subr.bf16.mxu1 %v13951_v8  ;;  %v1437_v5 = vld [vmem:[%s19811_s1 + $0x2b70] sm:$0xff]  ;;  %v1438_v8 = vld [vmem:[%s19811_s1 + $0x2b78] sm:$0xff]  ;;  %v14055_v61 = vcombine.high %v1474_v50, %v1478_v54 }
 0x5a8   :  { %v14012_v17 = vcombine.low %v1433_v2, %v1437_v5 }
 0x5aa   :  { %11185 = vmatpush1.bf16.msra.mxu0 %v13948_v11  ;;  %11744 = vmatpush1.bf16.msra.mxu1 %v13950_v13  ;;  %v1445_v11 = vld [vmem:[%s19811_s1 + $0x2bb0] sm:$0xff]  ;;  %v14013_v13 = vcombine.high %v1433_v2, %v1437_v5 }
 0x5ab   :  { %11186 = vmatprep.subr.bf16.mxu0 %v13957_v14  ;;  %11745 = vmatprep.subr.bf16.mxu1 %v13959_v16  ;;  %v1442_v14 = vld [vmem:[%s19811_s1 + $0x2b98] sm:$0xff]  ;;  %v14015_v16 = vcombine.high %v1434_v7, %v1438_v8  ;;  %v14021_v20 = vcombine.high %v1441_v10, %v1445_v11  ;;  %v14020_v25 = vcombine.low %v1441_v10, %v1445_v11  ;;  %v1489_v2 = vld [vmem:[%s19811_s1 + $0x2d10] sm:$0xff] }
 0x5ac   :  { %v1497_v10 = vld [vmem:[%s19811_s1 + $0x2d50] sm:$0xff] }
 0x5ae   :  { %11187 = vmatpush1.bf16.msra.mxu0 %v13956_v19  ;;  %11746 = vmatpush1.bf16.msra.mxu1 %v13958_v21  ;;  %v14014_v19 = vcombine.low %v1434_v7, %v1438_v8  ;;  %v1453_v21 = vld [vmem:[%s19811_s1 + $0x2bf0] sm:$0xff]  ;;  %v1494_v7 = vld [vmem:[%s19811_s1 + $0x2d38] sm:$0xff] }
 0x5af   :  { %11188 = vmatprep.subr.bf16.mxu0 %v13965_v22  ;;  %11747 = vmatprep.subr.bf16.mxu1 %v13967_v24  ;;  %v14023_v22 = vcombine.high %v1442_v14, %v1446_v15  ;;  %v1454_v24 = vld [vmem:[%s19811_s1 + $0x2bf8] sm:$0xff]  ;;  %v14029_v28 = vcombine.high %v1449_v18, %v1453_v21  ;;  %v14028_v33 = vcombine.low %v1449_v18, %v1453_v21  ;;  %v1505_v21 = vld [vmem:[%s19811_s1 + $0x2d90] sm:$0xff] }
 0x5b2   :  { %11189 = vmatpush1.bf16.msra.mxu0 %v13964_v27  ;;  %11748 = vmatpush1.bf16.msra.mxu1 %v13966_v29  ;;  %v14022_v27 = vcombine.low %v1442_v14, %v1446_v15  ;;  %v1461_v29 = vld [vmem:[%s19811_s1 + $0x2c30] sm:$0xff]  ;;  %v1498_v15 = vld [vmem:[%s19811_s1 + $0x2d58] sm:$0xff] }
 0x5b3   :  { %11190 = vmatprep.subr.bf16.mxu0 %v13973_v30  ;;  %11749 = vmatprep.subr.bf16.mxu1 %v13975_v32  ;;  %v14031_v30 = vcombine.high %v1450_v23, %v1454_v24  ;;  %v1462_v32 = vld [vmem:[%s19811_s1 + $0x2c38] sm:$0xff]  ;;  %v14037_v36 = vcombine.high %v1457_v26, %v1461_v29  ;;  %v14036_v41 = vcombine.low %v1457_v26, %v1461_v29  ;;  %v1501_v14 = vld [vmem:[%s19811_s1 + $0x2d70] sm:$0xff] }
 0x5b4   :  { %v1513_v29 = vld [vmem:[%s19811_s1 + $0x2dd0] sm:$0xff] }
 0x5b6   :  { %11191 = vmatpush1.bf16.msra.mxu0 %v13972_v35  ;;  %11750 = vmatpush1.bf16.msra.mxu1 %v13974_v37  ;;  %v14030_v35 = vcombine.low %v1450_v23, %v1454_v24  ;;  %v1469_v37 = vld [vmem:[%s19811_s1 + $0x2c70] sm:$0xff]  ;;  %v1506_v23 = vld [vmem:[%s19811_s1 + $0x2d98] sm:$0xff] }
 0x5b7   :  { %11192 = vmatprep.subr.bf16.mxu0 %v13981_v38  ;;  %11751 = vmatprep.subr.bf16.mxu1 %v13983_v40  ;;  %v14039_v38 = vcombine.high %v1458_v31, %v1462_v32  ;;  %v1470_v40 = vld [vmem:[%s19811_s1 + $0x2c78] sm:$0xff]  ;;  %v14045_v45 = vcombine.high %v1465_v34, %v1469_v37  ;;  %v14044_v55 = vcombine.low %v1465_v34, %v1469_v37  ;;  %v1521_v37 = vld [vmem:[%s19811_s1 + $0x2e10] sm:$0xff] }
 0x5b8   :  { %v14046_v58 = vcombine.low %v1466_v39, %v1470_v40  ;;  %v1510_v24 = vld [vmem:[%s19811_s1 + $0x2db8] sm:$0xff] }
 0x5b9   :  { %v14086_v34 = vcombine.low %v1506_v23, %v1510_v24 }
 0x5ba   :  { %11193 = vmatpush1.bf16.msra.mxu0 %v13980_v44  ;;  %11752 = vmatpush1.bf16.msra.mxu1 %v13982_v46  ;;  %v14038_v44 = vcombine.low %v1458_v31, %v1462_v32  ;;  %v1477_v46 = vld [vmem:[%s19811_s1 + $0x2cb0] sm:$0xff]  ;;  %v1514_v31 = vld [vmem:[%s19811_s1 + $0x2dd8] sm:$0xff] }
 0x5bb   :  { %11194 = vmatprep.subr.bf16.mxu0 %v13989_v49  ;;  %11753 = vmatprep.subr.bf16.mxu1 %v13991_v53  ;;  %v14047_v49 = vcombine.high %v1466_v39, %v1470_v40  ;;  %v14683_v53 = vld [vmem:[%s19812_s0 + $0x50] ss:$100 sps:$4 sm:$0xff]   ;;  %v1518_v32 = vld [vmem:[%s19811_s1 + $0x2df8] sm:$0xff] }
 0x5bc   :  { %v1522_v39 = vld [vmem:[%s19811_s1 + $0x2e18] sm:$0xff] }
 0x5bd   :  { %v1526_v40 = vld [vmem:[%s19811_s1 + $0x2e38] sm:$0xff] }
 0x5be   :  { %11195 = vmatpush1.bf16.msra.mxu0 %v13988_v57  ;;  %11754 = vmatpush1.bf16.msra.mxu1 %v13990_v59  ;;  %v1481_v57 = vld [vmem:[%s19811_s1 + $0x2cd0] sm:$0xff]  ;;  %v14053_v59 = vcombine.high %v1473_v43, %v1477_v46 }
 0x5bf   :  { %11196 = vmatprep.subr.bf16.mxu0 %v13997_v60  ;;  %11755 = vmatprep.subr.bf16.mxu1 %v13999_v62  ;;  %v1485_v60 = vld [vmem:[%s19811_s1 + $0x2cf0] sm:$0xff]  ;;  %v1482_v62 = vld [vmem:[%s19811_s1 + $0x2cd8] sm:$0xff] }
 0x5c0   :  { %v14061_v5 = vcombine.high %v1481_v57, %v1485_v60  ;;  %v14063_v8 = vcombine.high %v1482_v62, %v1486_v0  ;;  %v14062_v11 = vcombine.low %v1482_v62, %v1486_v0  ;;  %v1542_v62 = vld [vmem:[%s19811_s1 + $0x2eb8] sm:$0xff] }
 0x5c2   :  { %11197 = vmatpush1.bf16.msra.mxu0 %v13996_v1  ;;  %11756 = vmatpush1.bf16.msra.mxu1 %v13998_v3  ;;  %v14052_v1 = vcombine.low %v1473_v43, %v1477_v46  ;;  %v1493_v3 = vld [vmem:[%s19811_s1 + $0x2d30] sm:$0xff]  ;;  %v14094_v43 = vcombine.low %v1514_v31, %v1518_v32 }
 0x5c3   :  { %11198 = vmatprep.subr.bf16.mxu0 %v14005_v4  ;;  %11757 = vmatprep.subr.bf16.mxu1 %v14007_v6  ;;  %v14054_v4 = vcombine.low %v1474_v50, %v1478_v54  ;;  %v1490_v6 = vld [vmem:[%s19811_s1 + $0x2d18] sm:$0xff]  ;;  %v1529_v46 = vld [vmem:[%s19811_s1 + $0x2e50] sm:$0xff] }
 0x5c4   :  { %v14070_v18 = vcombine.low %v1490_v6, %v1494_v7  ;;  %v1530_v50 = vld [vmem:[%s19811_s1 + $0x2e58] sm:$0xff] }
 0x5c6   :  { %11199 = vmatpush1.bf16.msra.mxu0 %v14004_v9  ;;  %11758 = vmatpush1.bf16.msra.mxu1 %v14006_v12  ;;  %v14060_v9 = vcombine.low %v1481_v57, %v1485_v60  ;;  %v14069_v12 = vcombine.high %v1489_v2, %v1493_v3  ;;  %v1541_v60 = vld [vmem:[%s19811_s1 + $0x2eb0] sm:$0xff] }
 0x5c7   :  { %11200 = vmatprep.subr.bf16.mxu0 %v14013_v13  ;;  %11759 = vmatprep.subr.bf16.mxu1 %v14015_v16  ;;  %v14071_v13 = vcombine.high %v1490_v6, %v1494_v7  ;;  %v1502_v16 = vld [vmem:[%s19811_s1 + $0x2d78] sm:$0xff] }
 0x5c8   :  { %v14078_v26 = vcombine.low %v1498_v15, %v1502_v16  ;;  %v1550_v6 = vld [vmem:[%s19811_s1 + $0x2ef8] sm:$0xff] }
 0x5ca   :  { %11201 = vmatpush1.bf16.msra.mxu0 %v14012_v17  ;;  %11760 = vmatpush1.bf16.msra.mxu1 %v14014_v19  ;;  %v14068_v17 = vcombine.low %v1489_v2, %v1493_v3  ;;  %v14077_v19 = vcombine.high %v1497_v10, %v1501_v14  ;;  %v1545_v3 = vld [vmem:[%s19811_s1 + $0x2ed0] sm:$0xff] }
 0x5cb   :  { %11202 = vmatprep.subr.bf16.mxu0 %v14021_v20  ;;  %11761 = vmatprep.subr.bf16.mxu1 %v14023_v22  ;;  %v14079_v20 = vcombine.high %v1498_v15, %v1502_v16  ;;  %v1509_v22 = vld [vmem:[%s19811_s1 + $0x2db0] sm:$0xff] }
 0x5ce   :  { %11203 = vmatpush1.bf16.msra.mxu0 %v14020_v25  ;;  %11762 = vmatpush1.bf16.msra.mxu1 %v14022_v27  ;;  %v14076_v25 = vcombine.low %v1497_v10, %v1501_v14  ;;  %v14085_v27 = vcombine.high %v1505_v21, %v1509_v22  ;;  %v1558_v14 = vld [vmem:[%s19811_s1 + $0x2f38] sm:$0xff] }
 0x5cf   :  { %11204 = vmatprep.subr.bf16.mxu0 %v14029_v28  ;;  %11763 = vmatprep.subr.bf16.mxu1 %v14031_v30  ;;  %v14087_v28 = vcombine.high %v1506_v23, %v1510_v24  ;;  %v1517_v30 = vld [vmem:[%s19811_s1 + $0x2df0] sm:$0xff] }
 0x5d2   :  { %11205 = vmatpush1.bf16.msra.mxu0 %v14028_v33  ;;  %11764 = vmatpush1.bf16.msra.mxu1 %v14030_v35  ;;  %v14084_v33 = vcombine.low %v1505_v21, %v1509_v22  ;;  %v14093_v35 = vcombine.high %v1513_v29, %v1517_v30  ;;  %v1562_v21 = vld [vmem:[%s19811_s1 + $0x2f58] sm:$0xff] }
 0x5d3   :  { %11217 = vmatprep.subr.bf16.mxu0 %v14037_v36  ;;  %11776 = vmatprep.subr.bf16.mxu1 %v14039_v38  ;;  %v14095_v36 = vcombine.high %v1514_v31, %v1518_v32  ;;  %v1525_v38 = vld [vmem:[%s19811_s1 + $0x2e30] sm:$0xff]  ;;  %v1566_v22 = vld [vmem:[%s19811_s1 + $0x2f78] sm:$0xff] }
 0x5d4   :  { %v14100_v54 = vcombine.low %v1521_v37, %v1525_v38  ;;  %v14142_v32 = vcombine.low %v1562_v21, %v1566_v22 }
 0x5d5   :  { %11207 = vmatmul.mubr.bf16.vlgmr.msra.gmra.mrb[4].mxu0 %v14683_v53  ;;  %11766 = vmatmul.mubr.bf16.vlgmr.msra.gmra.mrb[4].mxu1 %v14683_v53  ;;  %v1534_v53 = vld [vmem:[%s19811_s1 + $0x2e78] sm:$0xff] }
 0x5d6   :  { %11218 = vmatpush1.bf16.msra.mxu0 %v14036_v41  ;;  %11777 = vmatpush1.bf16.msra.mxu1 %v14038_v44  ;;  %v14092_v41 = vcombine.low %v1513_v29, %v1517_v30  ;;  %v14101_v44 = vcombine.high %v1521_v37, %v1525_v38  ;;  %v14110_v0 = vcombine.low %v1530_v50, %v1534_v53  ;;  %v1570_v29 = vld [vmem:[%s19811_s1 + $0x2f98] sm:$0xff] }
 0x5d7   :  { %11219 = vmatprep.subr.bf16.mxu0 %v14045_v45  ;;  %11778 = vmatprep.subr.bf16.mxu1 %v14047_v49  ;;  %v14103_v45 = vcombine.high %v1522_v39, %v1526_v40  ;;  %v1533_v49 = vld [vmem:[%s19811_s1 + $0x2e70] sm:$0xff]  ;;  %v1574_v30 = vld [vmem:[%s19811_s1 + $0x2fb8] sm:$0xff] }
 0x5d8   :  { %11249 = vmatprep.mubr.bf16.mxu0 %v14684_v63  ;;  %11808 = vmatprep.mubr.bf16.mxu1 %v14684_v63  ;;  %v14109_v57 = vcombine.high %v1529_v46, %v1533_v49  ;;  %v14108_v63 = vcombine.low %v1529_v46, %v1533_v49  ;;  %v1578_v37 = vld [vmem:[%s19811_s1 + $0x2fd8] sm:$0xff] }
 0x5d9   :  { %v1582_v38 = vld [vmem:[%s19811_s1 + $0x2ff8] sm:$0xff] }
 0x5da   :  { %11220 = vmatpush1.bf16.msra.mxu0 %v14044_v55  ;;  %11779 = vmatpush1.bf16.msra.mxu1 %v14046_v58  ;;  %v14102_v55 = vcombine.low %v1522_v39, %v1526_v40  ;;  %v14111_v58 = vcombine.high %v1530_v50, %v1534_v53  ;;  %v14150_v40 = vcombine.low %v1570_v29, %v1574_v30  ;;  %v1586_v46 = vld [vmem:[%s19811_s1 + $0x3018] sm:$0xff] }
 0x5db   :  { %11221 = vmatprep.subr.bf16.mxu0 %v14053_v59  ;;  %11780 = vmatprep.subr.bf16.mxu1 %v14055_v61  ;;  %v1537_v59 = vld [vmem:[%s19811_s1 + $0x2e90] sm:$0xff]  ;;  %v1538_v61 = vld [vmem:[%s19811_s1 + $0x2e98] sm:$0xff]  ;;  %v14158_v53 = vcombine.low %v1578_v37, %v1582_v38 }
 0x5dc   :  { %v14119_v2 = vcombine.high %v1538_v61, %v1542_v62  ;;  %v14116_v7 = vcombine.low %v1537_v59, %v1541_v60  ;;  %v1590_v49 = vld [vmem:[%s19811_s1 + $0x3038] sm:$0xff] }
 0x5de   :  { %11222 = vmatpush1.bf16.msra.mxu0 %v14052_v1  ;;  %11781 = vmatpush1.bf16.msra.mxu1 %v14054_v4  ;;  %v14117_v1 = vcombine.high %v1537_v59, %v1541_v60  ;;  %v1549_v4 = vld [vmem:[%s19811_s1 + $0x2ef0] sm:$0xff]  ;;  %v1594_v59 = vld [vmem:[%s19811_s1 + $0x3058] sm:$0xff] }
 0x5df   :  { %11223 = vmatprep.subr.bf16.mxu0 %v14061_v5  ;;  %11782 = vmatprep.subr.bf16.mxu1 %v14063_v8  ;;  %v1546_v5 = vld [vmem:[%s19811_s1 + $0x2ed8] sm:$0xff]  ;;  %v14118_v8 = vcombine.low %v1538_v61, %v1542_v62  ;;  %v14124_v15 = vcombine.low %v1545_v3, %v1549_v4  ;;  %v14166_v62 = vcombine.low %v1586_v46, %v1590_v49 }
 0x5e0   :  { %v14127_v10 = vcombine.high %v1546_v5, %v1550_v6  ;;  %v14126_v16 = vcombine.low %v1546_v5, %v1550_v6  ;;  %v1598_v60 = vld [vmem:[%s19811_s1 + $0x3078] sm:$0xff] }
 0x5e1   :  { %v1606_v5 = vld [vmem:[%s19811_s1 + $0x30b8] sm:$0xff] }
 0x5e2   :  { %11224 = vmatpush1.bf16.msra.mxu0 %v14060_v9  ;;  %11783 = vmatpush1.bf16.msra.mxu1 %v14062_v11  ;;  %v14125_v9 = vcombine.high %v1545_v3, %v1549_v4  ;;  %v1553_v11 = vld [vmem:[%s19811_s1 + $0x2f10] sm:$0xff]  ;;  %v14685_v3 = vld [vmem:[%s19812_s0 + $0x58] ss:$100 sps:$4 sm:$0xff]  }
 0x5e3   :  { %11225 = vmatprep.subr.bf16.mxu0 %v14069_v12  ;;  %11784 = vmatprep.subr.bf16.mxu1 %v14071_v13  ;;  %v1557_v12 = vld [vmem:[%s19811_s1 + $0x2f30] sm:$0xff]  ;;  %v1554_v13 = vld [vmem:[%s19811_s1 + $0x2f18] sm:$0xff] }
 0x5e4   :  { %v14132_v23 = vcombine.low %v1553_v11, %v1557_v12  ;;  %v14134_v24 = vcombine.low %v1554_v13, %v1558_v14  ;;  %v1602_v4 = vld [vmem:[%s19811_s1 + $0x3098] sm:$0xff] }
 0x5e6   :  { %11226 = vmatpush1.bf16.msra.mxu0 %v14068_v17  ;;  %11785 = vmatpush1.bf16.msra.mxu1 %v14070_v18  ;;  %v14133_v17 = vcombine.high %v1553_v11, %v1557_v12  ;;  %v14135_v18 = vcombine.high %v1554_v13, %v1558_v14  ;;  %v1613_v11 = vld [vmem:[%s19811_s1 + $0x30f0] sm:$0xff]  ;;  %v1610_v12 = vld [vmem:[%s19811_s1 + $0x30d8] sm:$0xff] }
 0x5e7   :  { %11227 = vmatprep.subr.bf16.mxu0 %v14077_v19  ;;  %11786 = vmatprep.subr.bf16.mxu1 %v14079_v20  ;;  %v1561_v19 = vld [vmem:[%s19811_s1 + $0x2f50] sm:$0xff]  ;;  %v1614_v13 = vld [vmem:[%s19811_s1 + $0x30f8] sm:$0xff] }
 0x5e8   :  { %v1565_v20 = vld [vmem:[%s19811_s1 + $0x2f70] sm:$0xff] }
 0x5e9   :  { %v14140_v31 = vcombine.low %v1561_v19, %v1565_v20 }
 0x5ea   :  { %11228 = vmatpush1.bf16.msra.mxu0 %v14076_v25  ;;  %11787 = vmatpush1.bf16.msra.mxu1 %v14078_v26  ;;  %v14141_v25 = vcombine.high %v1561_v19, %v1565_v20  ;;  %v14143_v26 = vcombine.high %v1562_v21, %v1566_v22  ;;  %v14190_v19 = vcombine.low %v1610_v12, %v1614_v13  ;;  %v14598_v20 = vld [vmem:[%s19814_s3 + $0x40] sm:$0xff]  }
 0x5eb   :  { %11229 = vmatprep.subr.bf16.mxu0 %v14085_v27  ;;  %11788 = vmatprep.subr.bf16.mxu1 %v14087_v28  ;;  %v1569_v27 = vld [vmem:[%s19811_s1 + $0x2f90] sm:$0xff]  ;;  %v14600_v21 = vld [vmem:[%s19814_s3] sm:$0xff]  }
 0x5ec   :  { %v1573_v28 = vld [vmem:[%s19811_s1 + $0x2fb0] sm:$0xff]  ;;  %v14601_v22 = vld [vmem:[%s19814_s3 + $0x80] sm:$0xff]  }
 0x5ed   :  { %v14148_v39 = vcombine.low %v1569_v27, %v1573_v28 }
 0x5ee   :  { %11230 = vmatpush1.bf16.msra.mxu0 %v14084_v33  ;;  %11789 = vmatpush1.bf16.msra.mxu1 %v14086_v34  ;;  %v14149_v33 = vcombine.high %v1569_v27, %v1573_v28  ;;  %v14151_v34 = vcombine.high %v1570_v29, %v1574_v30  ;;  %v14605_v27 = vld [vmem:[%s19814_s3 + $0x88] sm:$0xff]   ;;  %v14606_v28 = vld [vmem:[%s19814_s3 + $0x50] sm:$0xff]  }
 0x5ef   :  { %11231 = vmatprep.subr.bf16.mxu0 %v14093_v35  ;;  %11790 = vmatprep.subr.bf16.mxu1 %v14095_v36  ;;  %v1577_v35 = vld [vmem:[%s19811_s1 + $0x2fd0] sm:$0xff] }
 0x5f0   :  { %v1581_v36 = vld [vmem:[%s19811_s1 + $0x2ff0] sm:$0xff] }
 0x5f1   :  { %v14156_v50 = vcombine.low %v1577_v35, %v1581_v36  ;;  %v14607_v29 = vld [vmem:[%s19814_s3 + $0xd0] sm:$0xff]  }
 0x5f2   :  { %11232 = vmatpush1.bf16.msra.mxu0 %v14092_v41  ;;  %11791 = vmatpush1.bf16.msra.mxu1 %v14094_v43  ;;  %v14157_v41 = vcombine.high %v1577_v35, %v1581_v36  ;;  %v14159_v43 = vcombine.high %v1578_v37, %v1582_v38  ;;  %v14609_v30 = vld [vmem:[%s19814_s3 + $0x90] sm:$0xff]   ;;  %v14615_v35 = vld [vmem:[%s19814_s3 + $0xe0] sm:$0xff]   ;;  %v14618_v38 = vld [vmem:[%s19814_s3 + $0x68] sm:$0xff]  }
 0x5f3   :  { %11233 = vmatprep.subr.bf16.mxu0 %v14101_v44  ;;  %11792 = vmatprep.subr.bf16.mxu1 %v14103_v45  ;;  %v1585_v44 = vld [vmem:[%s19811_s1 + $0x3010] sm:$0xff]  ;;  %v14616_v36 = vld [vmem:[%s19814_s3 + $0x20] sm:$0xff]  }
 0x5f4   :  { %v1589_v45 = vld [vmem:[%s19811_s1 + $0x3030] sm:$0xff]  ;;  %v14617_v37 = vld [vmem:[%s19814_s3 + $0xa0] sm:$0xff]  }
 0x5f5   :  { %v14164_v61 = vcombine.low %v1585_v44, %v1589_v45 }
 0x5f6   :  { %11234 = vmatpush1.bf16.msra.mxu0 %v14100_v54  ;;  %11793 = vmatpush1.bf16.msra.mxu1 %v14102_v55  ;;  %v14165_v54 = vcombine.high %v1585_v44, %v1589_v45  ;;  %v14167_v55 = vcombine.high %v1586_v46, %v1590_v49  ;;  %v14623_v44 = vld [vmem:[%s19814_s3 + $0xf0] sm:$0xff]   ;;  %v14626_v49 = vld [vmem:[%s19814_s3 + $0x78] sm:$0xff]  }
 0x5f7   :  { %11235 = vmatprep.subr.bf16.mxu0 %v14109_v57  ;;  %11794 = vmatprep.subr.bf16.mxu1 %v14111_v58  ;;  %v1593_v57 = vld [vmem:[%s19811_s1 + $0x3050] sm:$0xff] }
 0x5f8   :  { %v1597_v58 = vld [vmem:[%s19811_s1 + $0x3070] sm:$0xff] }
 0x5f9   :  { %v14172_v6 = vcombine.low %v1593_v57, %v1597_v58  ;;  %v14624_v45 = vld [vmem:[%s19814_s3 + $0x30] sm:$0xff]  }
 0x5fa   :  { %11236 = vmatpush1.bf16.msra.mxu0 %v14108_v63  ;;  %11795 = vmatpush1.bf16.msra.mxu1 %v14110_v0  ;;  %v14173_v63 = vcombine.high %v1593_v57, %v1597_v58  ;;  %v14175_v0 = vcombine.high %v1594_v59, %v1598_v60  ;;  %v14625_v46 = vld [vmem:[%s19814_s3 + $0xb0] sm:$0xff]   ;;  %v14631_v57 = vld [vmem:[%s19814_s3 + $0x1c0] sm:$0xff]  }
 0x5fb   :  { %11237 = vmatprep.subr.bf16.mxu0 %v14117_v1  ;;  %11796 = vmatprep.subr.bf16.mxu1 %v14119_v2  ;;  %v1601_v1 = vld [vmem:[%s19811_s1 + $0x3090] sm:$0xff]  ;;  %v14632_v58 = vld [vmem:[%s19814_s3 + $0x100] sm:$0xff]  }
 0x5fc   :  { %v1605_v2 = vld [vmem:[%s19811_s1 + $0x30b0] sm:$0xff] }
 0x5fd   :  { %v14180_v14 = vcombine.low %v1601_v1, %v1605_v2 }
 0x5fe   :  { %11238 = vmatpush1.bf16.msra.mxu0 %v14116_v7  ;;  %11797 = vmatpush1.bf16.msra.mxu1 %v14118_v8  ;;  %v14174_v7 = vcombine.low %v1594_v59, %v1598_v60  ;;  %v14181_v8 = vcombine.high %v1601_v1, %v1605_v2  ;;  %v14633_v59 = vld [vmem:[%s19814_s3 + $0x180] sm:$0xff]   ;;  %v14634_v60 = vld [vmem:[%s19814_s3 + $0x148] sm:$0xff]   ;;  %v14641_v1 = vld [vmem:[%s19814_s3 + $0x190] sm:$0xff]  }
 0x5ff   :  { %11239 = vmatprep.subr.bf16.mxu0 %v14125_v9  ;;  %11798 = vmatprep.subr.bf16.mxu1 %v14127_v10  ;;  %v14183_v9 = vcombine.high %v1602_v4, %v1606_v5  ;;  %v1609_v10 = vld [vmem:[%s19811_s1 + $0x30d0] sm:$0xff]  ;;  %v14642_v2 = vld [vmem:[%s19814_s3 + $0x158] sm:$0xff]  }
 0x602   :  { %11240 = vmatpush1.bf16.msra.mxu0 %v14124_v15  ;;  %11799 = vmatpush1.bf16.msra.mxu1 %v14126_v16  ;;  %v14182_v15 = vcombine.low %v1602_v4, %v1606_v5  ;;  %v14189_v16 = vcombine.high %v1609_v10, %v1613_v11  ;;  %v14644_v4 = vld [vmem:[%s19814_s3 + $0x118] sm:$0xff]  }
 0x603   :  { %11241 = vmatprep.subr.bf16.mxu0 %v14133_v17  ;;  %11800 = vmatprep.subr.bf16.mxu1 %v14135_v18  ;;  %v14191_v17 = vcombine.high %v1610_v12, %v1614_v13  ;;  %v14188_v18 = vcombine.low %v1609_v10, %v1613_v11  ;;  %v14645_v5 = vld [vmem:[%s19814_s3 + $0x198] sm:$0xff]   ;;  %v14650_v10 = vld [vmem:[%s19814_s3 + $0x168] sm:$0xff]  }
 0x604   :  { %v14651_v11 = vld [vmem:[%s19814_s3 + $0x1e8] sm:$0xff]  }
 0x605   :  { %v14652_v12 = vld [vmem:[%s19814_s3 + $0x128] sm:$0xff]  }
 0x606   :  { %11242 = vmatpush1.bf16.msra.mxu0 %v14132_v23  ;;  %11801 = vmatpush1.bf16.msra.mxu1 %v14134_v24  ;;  %v14602_v23 = vld [vmem:[%s19814_s3 + $0x48] sm:$0xff]   ;;  %v14686_v24 = vld [vmem:[%s19812_s0 + $0x60] ss:$100 sps:$4 sm:$0xff]  }
 0x607   :  { %11243 = vmatprep.subr.bf16.mxu0 %v14141_v25  ;;  %11802 = vmatprep.subr.bf16.mxu1 %v14143_v26  ;;  %v14603_v25 = vld [vmem:[%s19814_s3 + $0xc8] sm:$0xff]  }
 0x608   :  { %v14604_v26 = vld [vmem:[%s19814_s3 + $0x8] sm:$0xff]  }
 0x609   :  { %v14653_v13 = vld [vmem:[%s19814_s3 + $0x1a8] sm:$0xff]  }
 0x60a   :  { %11244 = vmatpush1.bf16.msra.mxu0 %v14140_v31  ;;  %11803 = vmatpush1.bf16.msra.mxu1 %v14142_v32  ;;  %v14611_v31 = vld [vmem:[%s19814_s3 + $0xd8] sm:$0xff]  }
 0x60b   :  { %11245 = vmatprep.subr.bf16.mxu0 %v14149_v33  ;;  %11804 = vmatprep.subr.bf16.mxu1 %v14151_v34  ;;  %v14612_v32 = vld [vmem:[%s19814_s3 + $0x18] sm:$0xff]   ;;  %v14614_v34 = vld [vmem:[%s19814_s3 + $0x60] sm:$0xff]  }
 0x60c   :  { %v14613_v33 = vld [vmem:[%s19814_s3 + $0x98] sm:$0xff]  }
 0x60e   :  { %11246 = vmatpush1.bf16.msra.mxu0 %v14148_v39  ;;  %11805 = vmatpush1.bf16.msra.mxu1 %v14150_v40  ;;  %v14619_v39 = vld [vmem:[%s19814_s3 + $0xe8] sm:$0xff]  }
 0x60f   :  { %11247 = vmatprep.subr.bf16.mxu0 %v14157_v41  ;;  %11806 = vmatprep.subr.bf16.mxu1 %v14159_v43  ;;  %v14620_v40 = vld [vmem:[%s19814_s3 + $0x28] sm:$0xff]   ;;  %v14622_v43 = vld [vmem:[%s19814_s3 + $0x70] sm:$0xff]  }
 0x610   :  { %v14621_v41 = vld [vmem:[%s19814_s3 + $0xa8] sm:$0xff]  }
 0x612   :  { %11248 = vmatpush1.bf16.msra.mxu0 %v14156_v50  ;;  %11807 = vmatpush1.bf16.msra.mxu1 %v14158_v53  ;;  %v14627_v50 = vld [vmem:[%s19814_s3 + $0xf8] sm:$0xff]  }
 0x613   :  { %11260 = vmatprep.subr.bf16.mxu0 %v14165_v54  ;;  %11819 = vmatprep.subr.bf16.mxu1 %v14167_v55  ;;  %v14628_v53 = vld [vmem:[%s19814_s3 + $0x38] sm:$0xff]   ;;  %v14630_v55 = vld [vmem:[%s19814_s3 + $0x140] sm:$0xff]  }
 0x614   :  { %v14629_v54 = vld [vmem:[%s19814_s3 + $0xb8] sm:$0xff]  }
 0x615   :  { %11250 = vmatmul.mubr.bf16.vlgmr.msra.gmra.mrb[4].mxu0 %v14685_v3  ;;  %11809 = vmatmul.mubr.bf16.vlgmr.msra.gmra.mrb[4].mxu1 %v14685_v3  ;;  %v14643_v3 = vld [vmem:[%s19814_s3 + $0x1d8] sm:$0xff]  }
 0x616   :  { %11261 = vmatpush1.bf16.msra.mxu0 %v14164_v61  ;;  %11820 = vmatpush1.bf16.msra.mxu1 %v14166_v62  ;;  %v14635_v61 = vld [vmem:[%s19814_s3 + $0x1c8] sm:$0xff]  }
 0x617   :  { %11262 = vmatprep.subr.bf16.mxu0 %v14173_v63  ;;  %11821 = vmatprep.subr.bf16.mxu1 %v14175_v0  ;;  %v14636_v62 = vld [vmem:[%s19814_s3 + $0x108] sm:$0xff]   ;;  %v14638_v0 = vld [vmem:[%s19814_s3 + $0x150] sm:$0xff]  }
 0x618   :  { %11292 = vmatprep.mubr.bf16.mxu0 %v14688_v48  ;;  %11851 = vmatprep.mubr.bf16.mxu1 %v14688_v48  ;;  %v14599_v48 = vld [vmem:[%s19814_s3 + $0xc0] sm:$0xff]   ;;  %v14637_v63 = vld [vmem:[%s19814_s3 + $0x188] sm:$0xff]  }
 0x61a   :  { %11263 = vmatpush1.bf16.msra.mxu0 %v14172_v6  ;;  %11822 = vmatpush1.bf16.msra.mxu1 %v14174_v7  ;;  %v14646_v6 = vld [vmem:[%s19814_s3 + $0x160] sm:$0xff]  }
 0x61b   :  { %11264 = vmatprep.subr.bf16.mxu0 %v14181_v8  ;;  %11823 = vmatprep.subr.bf16.mxu1 %v14183_v9  ;;  %v14647_v7 = vld [vmem:[%s19814_s3 + $0x1e0] sm:$0xff]  }
 0x61c   :  { %v14648_v8 = vld [vmem:[%s19814_s3 + $0x120] sm:$0xff]  }
 0x61d   :  { %v14649_v9 = vld [vmem:[%s19814_s3 + $0x1a0] sm:$0xff]  }
 0x61e   :  { %11265 = vmatpush1.bf16.msra.mxu0 %v14180_v14  ;;  %11824 = vmatpush1.bf16.msra.mxu1 %v14182_v15  ;;  %v14654_v14 = vld [vmem:[%s19814_s3 + $0x170] sm:$0xff]  }
 0x61f   :  { %11266 = vmatprep.subr.bf16.mxu0 %v14189_v16  ;;  %11825 = vmatprep.subr.bf16.mxu1 %v14191_v17  ;;  %v14655_v15 = vld [vmem:[%s19814_s3 + $0x1f0] sm:$0xff]  }
 0x620   :  { %v14656_v16 = vld [vmem:[%s19814_s3 + $0x130] sm:$0xff]  }
 0x621   :  { %v14657_v17 = vld [vmem:[%s19814_s3 + $0x1b0] sm:$0xff]  }
 0x622   :  { %11267 = vmatpush1.bf16.msra.mxu0 %v14188_v18  ;;  %11826 = vmatpush1.bf16.msra.mxu1 %v14190_v19  ;;  %v14658_v18 = vld [vmem:[%s19814_s3 + $0x178] sm:$0xff]  }
 0x623   :  { %14261 = vmatprep.subr.bf16.mxu0 %v14598_v20  ;;  %14283 = vmatprep.subr.bf16.mxu1 %v14599_v48  ;;  %v14659_v19 = vld [vmem:[%s19814_s3 + $0x1f8] sm:$0xff]  }
 0x624   :  { %v14660_v20 = vld [vmem:[%s19814_s3 + $0x138] sm:$0xff]  }
 0x625   :  { %14194 = vmatmul.mubr.msk.bf16.vlgmr.msra.gmra.mrb[4].mxu0 %vm9622_vm0, %v14686_v24  ;;  %14195 = vmatmul.mubr.msk.bf16.vlgmr.msra.gmra.mrb[4].mxu1 %vm9622_vm0, %v14686_v24  ;;  %v14661_v48 = vld [vmem:[%s19814_s3 + $0x1b8] sm:$0xff]   ;;  %v1647_v24 = vsub.s32 7, %v17808_v42 }
 0x626   :  { %14262 = vmatpush3.bf16.msra.mxu0 %v14600_v21  ;;  %12437 = vmatprep.mubr.bf16.mxu0 %v17869_v52  ;;  %v14608_v52 = vld [vmem:[%s19814_s3 + $0x10] sm:$0xff]   ;;  %v1635_v21 = vsub.s32 4, %v17808_v42 }
 0x627   :  { %14284 = vmatpush3.bf16.msra.mxu1 %v14601_v22  ;;  %12478 = vmatprep.mubr.bf16.mxu1 %v17877_v56  ;;  %v14610_v56 = vld [vmem:[%s19814_s3 + $0x58] sm:$0xff]   ;;  %v1643_v22 = vsub.s32 6, %v17808_v42 }
 0x628   :  { %14263 = vmatprep.subr.bf16.mxu0 %v14602_v23  ;;  %14285 = vmatprep.subr.bf16.mxu1 %v14603_v25  ;;  %v1639_v23 = vsub.s32 5, %v17808_v42  ;;  %v14687_v25 = vld [vmem:[%s19813_s2] sm:$0xff] }
 0x62a   :  { %14264 = vmatpush3.bf16.msra.mxu0 %v14604_v26  ;;  %v1636_v26 = vrot.slane %v14687_v25, %v1635_v21 }
 0x62b   :  { %14286 = vmatpush3.bf16.msra.mxu1 %v14605_v27  ;;  %14265 = vmatprep.subr.bf16.mxu0 %v14606_v28  ;;  %v1644_v27 = vrot.slane %v14687_v25, %v1643_v22  ;;  %v1640_v28 = vrot.slane %v14687_v25, %v1639_v23 }
 0x62c   :  { %14287 = vmatprep.subr.bf16.mxu1 %v14607_v29  ;;  %v1648_v29 = vrot.slane %v14687_v25, %v1647_v24 }
 0x62e   :  { %14266 = vmatpush3.bf16.msra.mxu0 %v14608_v52 }
 0x62f   :  { %14288 = vmatpush3.bf16.msra.mxu1 %v14609_v30  ;;  %14267 = vmatprep.subr.bf16.mxu0 %v14610_v56 }
 0x630   :  { %14289 = vmatprep.subr.bf16.mxu1 %v14611_v31 }
 0x632   :  { %14268 = vmatpush3.bf16.msra.mxu0 %v14612_v32 }
 0x633   :  { %14290 = vmatpush3.bf16.msra.mxu1 %v14613_v33  ;;  %14269 = vmatprep.subr.bf16.mxu0 %v14614_v34 }
 0x634   :  { %14291 = vmatprep.subr.bf16.mxu1 %v14615_v35 }
 0x636   :  { %14270 = vmatpush3.bf16.msra.mxu0 %v14616_v36 }
 0x637   :  { %14292 = vmatpush3.bf16.msra.mxu1 %v14617_v37  ;;  %14271 = vmatprep.subr.bf16.mxu0 %v14618_v38 }
 0x638   :  { %14293 = vmatprep.subr.bf16.mxu1 %v14619_v39 }
 0x63a   :  { %14272 = vmatpush3.bf16.msra.mxu0 %v14620_v40 }
 0x63b   :  { %14294 = vmatpush3.bf16.msra.mxu1 %v14621_v41  ;;  %14273 = vmatprep.subr.bf16.mxu0 %v14622_v43 }
 0x63c   :  { %14295 = vmatprep.subr.bf16.mxu1 %v14623_v44 }
 0x63e   :  { %14274 = vmatpush3.bf16.msra.mxu0 %v14624_v45 }
 0x63f   :  { %14296 = vmatpush3.bf16.msra.mxu1 %v14625_v46  ;;  %14275 = vmatprep.subr.bf16.mxu0 %v14626_v49 }
 0x640   :  { %14297 = vmatprep.subr.bf16.mxu1 %v14627_v50 }
 0x642   :  { %14276 = vmatpush3.bf16.msra.mxu0 %v14628_v53 }
 0x643   :  { %14298 = vmatpush3.bf16.msra.mxu1 %v14629_v54  ;;  %14305 = vmatprep.subr.bf16.mxu0 %v14630_v55 }
 0x644   :  { %14327 = vmatprep.subr.bf16.mxu1 %v14631_v57 }
 0x645   :  { %12438 = vmatmul.mubr.bf16.vlgmr.msra.gmra.mrb[8].mxu0 %v17865_v47  ;;  %v14639_v47 = vld [vmem:[%s19814_s3 + $0x1d0] sm:$0xff]  }
 0x646   :  { %12479 = vmatmul.mubr.bf16.vlgmr.msra.gmra.mrb[8].mxu1 %v17867_v51  ;;  %14306 = vmatpush3.bf16.msra.mxu0 %v14632_v58  ;;  %v14640_v51 = vld [vmem:[%s19814_s3 + $0x110] sm:$0xff]  }
 0x647   :  { %14328 = vmatpush3.bf16.msra.mxu1 %v14633_v59  ;;  %14307 = vmatprep.subr.bf16.mxu0 %v14634_v60 }
 0x648   :  { %14329 = vmatprep.subr.bf16.mxu1 %v14635_v61 }
 0x64a   :  { %14308 = vmatpush3.bf16.msra.mxu0 %v14636_v62 }
 0x64b   :  { %14330 = vmatpush3.bf16.msra.mxu1 %v14637_v63  ;;  %14309 = vmatprep.subr.bf16.mxu0 %v14638_v0  ;;  %v14196_v63 = vld [vmem:[%s19815_s4] ss:$0 sm:$0xff] }
 0x64c   :  { %14331 = vmatprep.subr.bf16.mxu1 %v14639_v47 }
 0x64e   :  { %14310 = vmatpush3.bf16.msra.mxu0 %v14640_v51 }
 0x64f   :  { %14332 = vmatpush3.bf16.msra.mxu1 %v14641_v1  ;;  %14311 = vmatprep.subr.bf16.mxu0 %v14642_v2 }
 0x650   :  { %14333 = vmatprep.subr.bf16.mxu1 %v14643_v3 }
 0x652   :  { %14312 = vmatpush3.bf16.msra.mxu0 %v14644_v4 }
 0x653   :  { %14334 = vmatpush3.bf16.msra.mxu1 %v14645_v5  ;;  %14313 = vmatprep.subr.bf16.mxu0 %v14646_v6 }
 0x654   :  { %14335 = vmatprep.subr.bf16.mxu1 %v14647_v7 }
 0x656   :  { %14314 = vmatpush3.bf16.msra.mxu0 %v14648_v8 }
 0x657   :  { %14336 = vmatpush3.bf16.msra.mxu1 %v14649_v9  ;;  %14315 = vmatprep.subr.bf16.mxu0 %v14650_v10 }
 0x658   :  { %14337 = vmatprep.subr.bf16.mxu1 %v14651_v11 }
 0x65a   :  { %14316 = vmatpush3.bf16.msra.mxu0 %v14652_v12  ;;  %v14689_v12 = vmov 4  }
 0x65b   :  { %14338 = vmatpush3.bf16.msra.mxu1 %v14653_v13  ;;  %14317 = vmatprep.subr.bf16.mxu0 %v14654_v14 }
 0x65c   :  { %14339 = vmatprep.subr.bf16.mxu1 %v14655_v15  ;;  %14559 = vset.pattern.permute.xlu1 %v14689_v12 }
 0x65d   :  { %14560 = vset.pattern.permute.xlu0 %v14689_v12 }
 0x65e   :  { %14318 = vmatpush3.bf16.msra.mxu0 %v14656_v16 }
 0x65f   :  { %14340 = vmatpush3.bf16.msra.mxu1 %v14657_v17  ;;  %14319 = vmatprep.subr.bf16.mxu0 %v14658_v18 }
 0x660   :  { %14341 = vmatprep.subr.bf16.mxu1 %v14659_v19 }
 0x662   :  { %14320 = vmatpush3.bf16.msra.mxu0 %v14660_v20 }
 0x663   :  { %14342 = vmatpush3.bf16.msra.mxu1 %v14661_v48 }
 0x6f8   :  { %v11294_v52 = vpop.f32.mrb[4].mxu0  ;;  %v11853_v56 = vpop.f32.mrb[4].mxu1 }
 0x6f9   :  { %v14357_v30 = vadd.f32 %v11294_v52, %v1636_v26  ;;  %v11296_v31 = vpop.f32.mrb[5].mxu0  ;;  %v14361_v32 = vadd.f32 %v11853_v56, %v1644_v27  ;;  %v11855_v34 = vpop.f32.mrb[5].mxu1 }
 0x6fa   :  { %v14358_v33 = vadd.f32 %v11296_v31, %v1640_v28  ;;  %v11298_v35 = vpop.f32.mrb[6].mxu0  ;;  %v14362_v36 = vadd.f32 %v11855_v34, %v1648_v29  ;;  %v11857_v38 = vpop.f32.mrb[6].mxu1 }
 0x6fb   :  { %v14359_v37 = vadd.f32 %v11298_v35, %v1636_v26  ;;  %v11300_v42 = vpop.f32.mrb[7].mxu0  ;;  %v14363_v39 = vadd.f32 %v11857_v38, %v1644_v27  ;;  %v11859_v41 = vpop.f32.mrb[7].mxu1  ;;  %v11866_v43 = vmax.f32 %v14357_v30, 0.0  ;;  %v11868_v46 = vmax.f32 %v14361_v32, 0.0 }
 0x6fc   :  { %v14360_v40 = vadd.f32 %v11300_v42, %v1640_v28  ;;  %v14364_v45 = vadd.f32 %v11859_v41, %v1648_v29  ;;  %v11867_v49 = vmax.f32 %v14358_v33, 0.0  ;;  %v11869_v54 = vmax.f32 %v14362_v36, 0.0 }
 0x6fd   :  { %v11874_v44 = vmax.f32 %v14359_v37, 0.0  ;;  %v11876_v50 = vmax.f32 %v14363_v39, 0.0 }
 0x6fe   :  { %v11875_v53 = vmax.f32 %v14360_v40, 0.0  ;;  %v11877_v57 = vmax.f32 %v14364_v45, 0.0 }
 0x6ff   :  { %v11882_v55 = vpack.c.bf16 %v11874_v44, %v11866_v43  ;;  %v11884_v58 = vpack.c.bf16 %v11876_v50, %v11868_v46 }
 0x700   :  { %v11883_v59 = vpack.c.bf16 %v11875_v53, %v11867_v49  ;;  %v11885_v60 = vpack.c.bf16 %v11877_v57, %v11869_v54 }
 0x702   :  { %12519 = vmatprep.mubr.bf16.mxu0 %v11883_v59  ;;  %12560 = vmatprep.mubr.bf16.mxu1 %v11885_v60 }
 0x703   :  { %12520 = vmatmul.mubr.bf16.vlgmr.msra.gmra.mrb[12].mxu0 %v11882_v55  ;;  %12561 = vmatmul.mubr.bf16.vlgmr.msra.gmra.mrb[12].mxu1 %v11884_v58 }
 0x718   :  { %v14277_v61 = vpop.f32.mrb[8].mxu0 }
 0x719   :  { %v14299_v62 = vpop.f32.mrb[8].mxu1  ;;  %v14278_v0 = vpop.f32.mrb[9].mxu0 }
 0x71a   :  { %v14279_v47 = vadd.f32 %v14278_v0, %v14277_v61  ;;  %v14300_v51 = vpop.f32.mrb[9].mxu1  ;;  %v14280_v1 = vpop.f32.mrb[10].mxu0 }
 0x71b   :  { %v14301_v2 = vadd.f32 %v14300_v51, %v14299_v62  ;;  %v14302_v3 = vpop.f32.mrb[10].mxu1  ;;  %v14281_v4 = vpop.f32.mrb[11].mxu0 }
 0x71c   :  { %v12440_v5 = vadd.f32 %v14279_v47, %v14196_v63  ;;  %v14282_v6 = vadd.f32 %v14281_v4, %v14280_v1  ;;  %v14303_v7 = vpop.f32.mrb[11].mxu1 }
 0x71d   :  { %v14304_v8 = vadd.f32 %v14303_v7, %v14302_v3 }
 0x71e   :  { %v12481_v9 = vadd.f32 %v14301_v2, %v12440_v5  ;;  %v12443_v10 = vadd.f32 %v14282_v6, %v14196_v63 }
 0x720   :  { %v12484_v11 = vadd.f32 %v14304_v8, %v12443_v10 }
 0x7d6   :  { %v14321_v13 = vpop.f32.mrb[12].mxu0  ;;  %v14343_v14 = vpop.f32.mrb[12].mxu1 }
 0x7d7   :  { %v14322_v15 = vpop.f32.mrb[13].mxu0  ;;  %v14344_v17 = vpop.f32.mrb[13].mxu1 }
 0x7d8   :  { %v14323_v16 = vadd.f32 %v14322_v15, %v14321_v13  ;;  %v14324_v18 = vpop.f32.mrb[14].mxu0  ;;  %v14345_v19 = vadd.f32 %v14344_v17, %v14343_v14  ;;  %v14346_v20 = vpop.f32.mrb[14].mxu1 }
 0x7d9   :  { %v14325_v48 = vpop.f32.mrb[15].mxu0  ;;  %v14347_v23 = vpop.f32.mrb[15].mxu1 }
 0x7da   :  { %v12522_v21 = vadd.f32 %v14323_v16, %v12481_v9  ;;  %v14326_v22 = vadd.f32 %v14325_v48, %v14324_v18  ;;  %v14348_v24 = vadd.f32 %v14347_v23, %v14346_v20 }
 0x7dc   :  { %v12563_v25 = vadd.f32 %v14345_v19, %v12522_v21  ;;  %v12525_v26 = vadd.f32 %v14326_v22, %v12484_v11 }
 0x7de   :  { %v12566_v27 = vadd.f32 %v14348_v24, %v12525_v26  ;;  %12571 = vperm.xlu1 %14559, %v12563_v25   ;;  %v12582_v28 = vsel %vm12581_vm1, %v12563_v25, 0.0 }
 0x7df   :  { %12583 = vadd.xlane.f32.xlu0 %v12582_v28 }
 0x7e0   :  { %v12585_v29 = vsel %vm12581_vm1, %v12566_v27, 0.0 }
 0x7e2   :  { %12576 = vperm.xlu1 %14559, %v12566_v27  }
 0x7e3   :  { %12586 = vadd.xlane.f32.xlu0 %v12585_v29 }
 0x85d   :  { %v12572_v52 = vpop.permute.xlu1 %12571 }
 0x85e   :  { %v12579_v56 = vadd.f32 %v12572_v52, %v12563_v25 }
 0x861   :  { %v12577_v32 = vpop.permute.xlu1 %12576 }
 0x862   :  { %v12580_v35 = vadd.f32 %v12577_v32, %v12566_v27 }
 0x86c   :  { %v12584_v30 = vpop.xlane.xlu0 %12583 }
 0x86d   :  { %v12589_v31 = vmul.f32 0.25, %v12584_v30 }
 0x86f   :  { %v12591_v33 = vsub.f32 %v12579_v56, %v12589_v31 }
 0x870   :  { %v12587_v34 = vpop.xlane.xlu0 %12586 }
 0x871   :  { %12593 = vst [vmem:[%s19816_s5] sm:$0xff] %v12591_v33  ;;  %v12590_v36 = vmul.f32 0.25, %v12587_v34 }
 0x873   :  { %v12592_v37 = vsub.f32 %v12580_v35, %v12590_v36 }
 0x875   :  { %12594 = vst [vmem:[%s19816_s5 + $0x8] sm:$0xff] %v12592_v37 }

</bundles_post_ra>
